<compile_context>
chip_gen: v5e
topology: v5e:2x2
jax: 0.10.0
libtpu: 0.0.40
codegen_flags: <defaults>
</compile_context>

<pallas_src>
import functools

import jax
import jax.numpy as jnp
from jax import lax
from jax.experimental import pallas as pl
from jax.experimental.pallas import tpu as pltpu

EPS = 1e-12  # torch F.normalize default eps


def _ceil_to(n, m):
    return ((n + m - 1) // m) * m


def _row_normalize(h):
    # h: f32 [tm, H];  x / max(||x||, eps) == x * rsqrt(max(sum(x^2), eps^2))
    ssq = jnp.sum(h * h, axis=-1, keepdims=True)
    return h * lax.rsqrt(jnp.maximum(ssq, EPS * EPS))


# ---------------------------------------------------------------------------
# Kernels
# ---------------------------------------------------------------------------
def _gc_init_kernel(adj_ref, w_ref, x_ref):
    """Row tile of: normalize(relu(adj @ W), p=2, dim=1)."""
    h = jnp.dot(adj_ref[...], w_ref[...], preferred_element_type=jnp.float32)
    h = jnp.maximum(h, 0.0)
    x_ref[...] = _row_normalize(h).astype(x_ref.dtype)


def _gnn_layer_kernel(adj_ref, x_ref, w_ref, out_ref):
    """Row tile of normalize(relu(adj @ (x @ W))) computed as (adj_tile @ x) @ W."""
    ax = jnp.dot(adj_ref[...], x_ref[...], preferred_element_type=jnp.float32)
    h = jnp.dot(ax.astype(w_ref.dtype), w_ref[...], preferred_element_type=jnp.float32)
    h = jnp.maximum(h, 0.0)
    out_ref[...] = _row_normalize(h).astype(out_ref.dtype)


def _score_kernel(adj_ref, xfull_ref, xtile_ref, wstk_ref, wlast_ref,
                  w1_ref, b1_ref, w2_ref, b2_ref, w3_ref, b3_ref,
                  out_ref, *, num_inter):
    """Fused scoring: one adj row tile -> sum of all per-layer MLP scores."""
    cdt = w1_ref.dtype

    def mlp(h):
        # 3-layer scoring MLP; final H2->1 projection stays on the VPU (lane sum)
        # instead of a 1-column MXU matmul.
        h1 = jnp.dot(h.astype(cdt), w1_ref[...], preferred_element_type=jnp.float32)
        h1 = jnp.maximum(h1 + b1_ref[...], 0.0)
        # TODO(synk): F.dropout in the torch MLP is stochastic; identity (eval) here.
        h2 = jnp.dot(h1.astype(cdt), w2_ref[...], preferred_element_type=jnp.float32)
        h2 = jnp.maximum(h2 + b2_ref[...], 0.0)
        return jnp.sum(h2 * w3_ref[...].astype(jnp.float32), axis=-1, keepdims=True) \
            + b3_ref[...]

    # adj_tile @ x_final is computed ONCE and shared by every scored layer,
    # since adj @ (x @ W_l) == (adj @ x) @ W_l.
    ax = jnp.dot(adj_ref[...], xfull_ref[...], preferred_element_type=jnp.float32)

    # score(x_final)
    score = mlp(xtile_ref[...].astype(jnp.float32))
    # + score of each intermediate layer re-applied to x_final (as in the torch code)
    for l in range(num_inter):
        h = jnp.dot(ax.astype(cdt), wstk_ref[l], preferred_element_type=jnp.float32)
        h = _row_normalize(jnp.maximum(h, 0.0))
        score = score + mlp(h)
    # + score of gc_last (relu only, no normalize)
    h_last = jnp.maximum(
        jnp.dot(ax.astype(cdt), wlast_ref[...], preferred_element_type=jnp.float32), 0.0)
    score = score + mlp(h_last)

    out_ref[...] = score


# ---------------------------------------------------------------------------
# pallas_call wrappers (grid = (path, row-tile); both axes parallel)
# ---------------------------------------------------------------------------
def _gc_init_call(adj, w, *, tm, out_dtype):
    P, Np, _ = adj.shape
    H = w.shape[1]
    return pl.pallas_call(
        _gc_init_kernel,
        out_shape=jax.ShapeDtypeStruct((P, Np, H), out_dtype),
        grid=(P, Np // tm),
        in_specs=[
            pl.BlockSpec((None, tm, Np), lambda p, i: (p, i, 0)),   # adj row tile
            pl.BlockSpec((Np, H), lambda p, i: (0, 0)),             # full weight
        ],
        out_specs=pl.BlockSpec((None, tm, H), lambda p, i: (p, i, 0)),
        compiler_params=pltpu.CompilerParams(
            dimension_semantics=("parallel", "parallel")),
    )(adj, w)


def _gnn_layer_call(adj, x, w, *, tm, out_dtype):
    P, Np, _ = adj.shape
    H = w.shape[1]
    return pl.pallas_call(
        _gnn_layer_kernel,
        out_shape=jax.ShapeDtypeStruct((P, Np, H), out_dtype),
        grid=(P, Np // tm),
        in_specs=[
            pl.BlockSpec((None, tm, Np), lambda p, i: (p, i, 0)),   # adj row tile
            pl.BlockSpec((None, Np, H), lambda p, i: (p, 0, 0)),    # full x of path p
            pl.BlockSpec((H, H), lambda p, i: (0, 0)),              # layer weight
        ],
        out_specs=pl.BlockSpec((None, tm, H), lambda p, i: (p, i, 0)),
        compiler_params=pltpu.CompilerParams(
            dimension_semantics=("parallel", "parallel")),
    )(adj, x, w)


def _score_call(adj, x, w_stack, w_last, mlp_params, *, tm):
    P, Np, _ = adj.shape
    L, H, _ = w_stack.shape
    w1, b1, w2, b2, w3row, b3 = mlp_params
    H2 = w1.shape[1]
    return pl.pallas_call(
        functools.partial(_score_kernel, num_inter=L),
        out_shape=jax.ShapeDtypeStruct((P, Np, 1), jnp.float32),
        grid=(P, Np // tm),
        in_specs=[
            pl.BlockSpec((None, tm, Np), lambda p, i: (p, i, 0)),   # adj row tile
            pl.BlockSpec((None, Np, H), lambda p, i: (p, 0, 0)),    # full x_final (path p)
            pl.BlockSpec((None, tm, H), lambda p, i: (p, i, 0)),    # row tile of x_final
            pl.BlockSpec((L, H, H), lambda p, i: (0, 0, 0)),        # stacked intermediate W
            pl.BlockSpec((H, H), lambda p, i: (0, 0)),              # gc_last W
            pl.BlockSpec((H, H2), lambda p, i: (0, 0)),             # mlp w1
            pl.BlockSpec((1, H2), lambda p, i: (0, 0)),             # mlp b1
            pl.BlockSpec((H2, H2), lambda p, i: (0, 0)),            # mlp w2
            pl.BlockSpec((1, H2), lambda p, i: (0, 0)),             # mlp b2
            pl.BlockSpec((1, H2), lambda p, i: (0, 0)),             # mlp w3 (as a row)
            pl.BlockSpec((1, 1), lambda p, i: (0, 0)),              # mlp b3
        ],
        out_specs=pl.BlockSpec((None, tm, 1), lambda p, i: (p, i, 0)),
        compiler_params=pltpu.CompilerParams(
            dimension_semantics=("parallel", "parallel")),
    )(adj, x, x, w_stack, w_last, w1, b1, w2, b2, w3row, b3)


# ---------------------------------------------------------------------------
# GNN_Bet forward
# ---------------------------------------------------------------------------
def gnn_bet_forward(params, adj1, adj2, *, tm=128, compute_dtype=jnp.float32):
    N = adj1.shape[0]

    # Tile size / padding (handles N not divisible by tm; tiles stay 8-aligned).
    tm_eff = min(tm, _ceil_to(N, 8))
    Np = _ceil_to(N, tm_eff)
    pad = Np - N

    w_gc1 = params["gc1"].astype(compute_dtype)                    # [N, H]
    w_inter = [w.astype(compute_dtype) for w in params["inter"]]   # L x [H, H]
    w_last = params["gc_last"].astype(compute_dtype)               # [H, H]
    w1, b1, w2, b2, w3, b3 = params["mlp"]
    mlp_p = (w1.astype(compute_dtype),
             b1.reshape(1, -1).astype(jnp.float32),
             w2.astype(compute_dtype),
             b2.reshape(1, -1).astype(jnp.float32),
             w3.reshape(1, -1).astype(compute_dtype),              # [1, 2*H] row
             b3.reshape(1, 1).astype(jnp.float32))

    # Both graph paths batched on a leading axis -> one launch per stage.
    adj = jnp.stack([adj1, adj2]).astype(compute_dtype)            # [2, N, N]
    if pad:
        adj = jnp.pad(adj, ((0, 0), (0, pad), (0, pad)))
        w_gc1 = jnp.pad(w_gc1, ((0, pad), (0, 0)))

    # x = normalize(relu(gc1(adj)))
    x = _gc_init_call(adj, w_gc1, tm=tm_eff, out_dtype=compute_dtype)

    # intermediate layers (sequential: each needs the full previous x)
    for w in w_inter:
        x = _gnn_layer_call(adj, x, w, tm=tm_eff, out_dtype=compute_dtype)

    # Fused scoring: gc_last + per-layer re-application to x_final + all MLP scores,
    # accumulated in-kernel.  Note: per-step VMEM here is ~2*tm*Np*bytes (adj tile,
    # double buffered); for very large graphs add K-tiling / vmem_limit_bytes.
    scores = _score_call(adj, x, jnp.stack(w_inter), w_last, mlp_p, tm=tm_eff)
    scores = scores[:, :N, :]                                      # drop padded rows

    return scores[0] * scores[1]                                   # torch.mul(score1, score2)


# ---------------------------------------------------------------------------
# Pure-JAX reference (same inferred layer semantics) for a sanity check
# ---------------------------------------------------------------------------
def _reference_forward(params, adj1, adj2):
    hp = jax.lax.Precision.HIGHEST

    def normalize(x):
        n = jnp.sqrt(jnp.sum(x * x, axis=1, keepdims=True))
        return x / jnp.maximum(n, EPS)

    def mlp(x):
        w1, b1, w2, b2, w3, b3 = params["mlp"]
        h = jnp.maximum(jnp.dot(x, w1, precision=hp) + b1, 0.0)
        h = jnp.maximum(jnp.dot(h, w2, precision=hp) + b2, 0.0)
        return jnp.dot(h, w3, precision=hp) + b3

    def path(adj):
        x = normalize(jnp.maximum(jnp.dot(adj, params["gc1"], precision=hp), 0.0))
        for w in params["inter"]:
            x = normalize(jnp.maximum(
                jnp.dot(adj, jnp.dot(x, w, precision=hp), precision=hp), 0.0))
        x_last = jnp.maximum(
            jnp.dot(adj, jnp.dot(x, params["gc_last"], precision=hp), precision=hp), 0.0)
        scores = [mlp(normalize(jnp.maximum(
            jnp.dot(adj, jnp.dot(x, w, precision=hp), precision=hp), 0.0)))
            for w in params["inter"]]
        scores.insert(0, mlp(x))
        scores.append(mlp(x_last))
        return sum(scores)

    return path(adj1) * path(adj2)


# ---------------------------------------------------------------------------
# Deterministic parameter init (shapes implied by the module's __init__)
# ---------------------------------------------------------------------------
def init_params(key, n_nodes, nhid, num_intermediate_layers=4):
    def uniform(k, shape, fan_in):
        bound = 1.0 / jnp.sqrt(jnp.float32(fan_in))
        return jax.random.uniform(k, shape, jnp.float32, -bound, bound)

    keys = jax.random.split(key, 3 + num_intermediate_layers + 6)
    params = {
        "gc1": uniform(keys[0], (n_nodes, nhid), n_nodes),              # ninput == N
        "inter": [uniform(keys[1 + l], (nhid, nhid), nhid)
                  for l in range(num_intermediate_layers)],
        "gc_last": uniform(keys[1 + num_intermediate_layers], (nhid, nhid), nhid),
        "mlp": (
            uniform(keys[-6], (nhid, 2 * nhid), nhid),          # w1
            uniform(keys[-5], (1, 2 * nhid), nhid),             # b1
            uniform(keys[-4], (2 * nhid, 2 * nhid), 2 * nhid),  # w2
            uniform(keys[-3], (1, 2 * nhid), 2 * nhid),         # b2
            uniform(keys[-2], (2 * nhid, 1), 2 * nhid),         # w3
            uniform(keys[-1], (1, 1), 2 * nhid),                # b3
        ),
    }
    return params


if __name__ == "__main__":
    N = 128      # number of nodes (== ninput)
    NHID = 32
    NUM_INTERMEDIATE = 4

    key = jax.random.PRNGKey(0)
    k_params, k_a1, k_a2 = jax.random.split(key, 3)

    params = init_params(k_params, N, NHID, NUM_INTERMEDIATE)

    # dense, row-normalized random "adjacency" matrices
    a1 = jax.random.uniform(k_a1, (N, N), jnp.float32)
    a2 = jax.random.uniform(k_a2, (N, N), jnp.float32)
    adj1 = a1 / jnp.sum(a1, axis=1, keepdims=True)
    adj2 = a2 / jnp.sum(a2, axis=1, keepdims=True)

    fwd = jax.jit(gnn_bet_forward)
    out = jax.block_until_ready(fwd(params, adj1, adj2))

    assert out.shape == (N, 1) and out.dtype == jnp.float32
    assert bool(jnp.all(jnp.isfinite(out)))

    ref = _reference_forward(params, adj1, adj2)
    err = jnp.max(jnp.abs(out - ref)) / (jnp.max(jnp.abs(ref)) + 1e-8)
    assert float(err) < 5e-2, f"kernel/reference mismatch, rel err={float(err)}"

    print("KERNEL_OK")
</pallas_src>

<mosaic_0001>
module attributes {stable_mosaic.version = 11 : i64} {
  func.func @_gc_init_kernel(%arg0: i32, %arg1: i32, %arg2: memref<1x128x128xf32, #tpu.memory_space<vmem>>, %arg3: memref<128x32xf32, #tpu.memory_space<vmem>>, %arg4: memref<1x128x32xf32, #tpu.memory_space<vmem>>) attributes {dimension_semantics = [#tpu.dimension_semantics<parallel>, #tpu.dimension_semantics<parallel>], iteration_bounds = array<i64: 2, 1>, scalar_prefetch = 0 : i64, scratch_operands = 0 : i64, tpu.core_type = #tpu.core_type<tc>, window_params = [{transform_indices = @transform_0, window_bounds = array<i64: 1, 128, 128>}, {pipeline_mode = #tpu.pipeline_mode<synchronous>, transform_indices = @transform_1, window_bounds = array<i64: 128, 32>}, {transform_indices = @transform_2, window_bounds = array<i64: 1, 128, 32>}]} {
    %c0 = arith.constant 0 : index
    %c0_0 = arith.constant 0 : index
    %c0_1 = arith.constant 0 : index
    %0 = vector.load %arg2[%c0, %c0_0, %c0_1] : memref<1x128x128xf32, #tpu.memory_space<vmem>>, vector<1x128x128xf32>
    %1 = vector.shape_cast %0 : vector<1x128x128xf32> to vector<128x128xf32>
    %c0_2 = arith.constant 0 : index
    %c0_3 = arith.constant 0 : index
    %2 = vector.load %arg3[%c0_2, %c0_3] : memref<128x32xf32, #tpu.memory_space<vmem>>, vector<128x32xf32>
    %cst = arith.constant dense<0.000000e+00> : vector<128x32xf32>
    %3 = tpu.matmul %1, %2, %cst {dimension_numbers = #tpu.dot_dimension_numbers<[1], [0], [0], [1], [0, 0, 1, 1], [], []>} : vector<128x128xf32>, vector<128x32xf32>, vector<128x32xf32> -> vector<128x32xf32>
    %cst_4 = arith.constant 0.000000e+00 : f32
    %4 = vector.broadcast %cst_4 : f32 to vector<128x32xf32>
    %5 = arith.maximumf %3, %4 : vector<128x32xf32>
    %6 = arith.mulf %5, %5 : vector<128x32xf32>
    %cst_5 = arith.constant dense<0.000000e+00> : vector<128xf32>
    %7 = vector.multi_reduction <add>, %6, %cst_5 [1] : vector<128x32xf32> to vector<128xf32>
    %8 = vector.shape_cast %7 : vector<128xf32> to vector<128x1xf32>
    %cst_6 = arith.constant 1.000000e-24 : f32
    %9 = vector.broadcast %cst_6 : f32 to vector<128x1xf32>
    %10 = arith.maximumf %8, %9 : vector<128x1xf32>
    %11 = math.rsqrt %10 : vector<128x1xf32>
    %12 = vector.broadcast %11 : vector<128x1xf32> to vector<128x32xf32>
    %13 = arith.mulf %5, %12 : vector<128x32xf32>
    %c0_7 = arith.constant 0 : index
    %c0_8 = arith.constant 0 : index
    %c0_9 = arith.constant 0 : index
    %14 = vector.load %arg4[%c0_7, %c0_8, %c0_9] : memref<1x128x32xf32, #tpu.memory_space<vmem>>, vector<1x128x32xf32>
    %15 = vector.shape_cast %14 : vector<1x128x32xf32> to vector<128x32xf32>
    %16 = vector.shape_cast %13 : vector<128x32xf32> to vector<1x128x32xf32>
    tpu.vector_store %arg4[%c0_7, %c0_8, %c0_9], %16 {strides = array<i32>} : memref<1x128x32xf32, #tpu.memory_space<vmem>>, vector<1x128x32xf32>,
    return
  }
  func.func @transform_0(%arg0: i32, %arg1: i32) -> (i32, i32, i32) {
    %c0_i32 = arith.constant 0 : i32
    %c0_i32_0 = arith.constant 0 : i32
    return %arg0, %arg1, %c0_i32 : i32, i32, i32
  }
  func.func @transform_1(%arg0: i32, %arg1: i32) -> (i32, i32) {
    %c0_i32 = arith.constant 0 : i32
    %c0_i32_0 = arith.constant 0 : i32
    %c0_i32_1 = arith.constant 0 : i32
    return %c0_i32, %c0_i32_0 : i32, i32
  }
  func.func @transform_2(%arg0: i32, %arg1: i32) -> (i32, i32, i32) {
    %c0_i32 = arith.constant 0 : i32
    %c0_i32_0 = arith.constant 0 : i32
    return %arg0, %arg1, %c0_i32 : i32, i32, i32
  }
}

module attributes {stable_mosaic.version = 11 : i64} {
  func.func @_gnn_layer_kernel(%arg0: i32, %arg1: i32, %arg2: memref<1x128x128xf32, #tpu.memory_space<vmem>>, %arg3: memref<1x128x32xf32, #tpu.memory_space<vmem>>, %arg4: memref<32x32xf32, #tpu.memory_space<vmem>>, %arg5: memref<1x128x32xf32, #tpu.memory_space<vmem>>) attributes {dimension_semantics = [#tpu.dimension_semantics<parallel>, #tpu.dimension_semantics<parallel>], iteration_bounds = array<i64: 2, 1>, scalar_prefetch = 0 : i64, scratch_operands = 0 : i64, tpu.core_type = #tpu.core_type<tc>, window_params = [{transform_indices = @transform_0, window_bounds = array<i64: 1, 128, 128>}, {transform_indices = @transform_1, window_bounds = array<i64: 1, 128, 32>}, {pipeline_mode = #tpu.pipeline_mode<synchronous>, transform_indices = @transform_2, window_bounds = array<i64: 32, 32>}, {transform_indices = @transform_3, window_bounds = array<i64: 1, 128, 32>}]} {
    %c0 = arith.constant 0 : index
    %c0_0 = arith.constant 0 : index
    %c0_1 = arith.constant 0 : index
    %0 = vector.load %arg2[%c0, %c0_0, %c0_1] : memref<1x128x128xf32, #tpu.memory_space<vmem>>, vector<1x128x128xf32>
    %1 = vector.shape_cast %0 : vector<1x128x128xf32> to vector<128x128xf32>
    %c0_2 = arith.constant 0 : index
    %c0_3 = arith.constant 0 : index
    %c0_4 = arith.constant 0 : index
    %2 = vector.load %arg3[%c0_2, %c0_3, %c0_4] : memref<1x128x32xf32, #tpu.memory_space<vmem>>, vector<1x128x32xf32>
    %3 = vector.shape_cast %2 : vector<1x128x32xf32> to vector<128x32xf32>
    %cst = arith.constant dense<0.000000e+00> : vector<128x32xf32>
    %4 = tpu.matmul %1, %3, %cst {dimension_numbers = #tpu.dot_dimension_numbers<[1], [0], [0], [1], [0, 0, 1, 1], [], []>} : vector<128x128xf32>, vector<128x32xf32>, vector<128x32xf32> -> vector<128x32xf32>
    %c0_5 = arith.constant 0 : index
    %c0_6 = arith.constant 0 : index
    %5 = vector.load %arg4[%c0_5, %c0_6] : memref<32x32xf32, #tpu.memory_space<vmem>>, vector<32x32xf32>
    %cst_7 = arith.constant dense<0.000000e+00> : vector<128x32xf32>
    %6 = tpu.matmul %4, %5, %cst_7 {dimension_numbers = #tpu.dot_dimension_numbers<[1], [0], [0], [1], [0, 0, 1, 1], [], []>} : vector<128x32xf32>, vector<32x32xf32>, vector<128x32xf32> -> vector<128x32xf32>
    %cst_8 = arith.constant 0.000000e+00 : f32
    %7 = vector.broadcast %cst_8 : f32 to vector<128x32xf32>
    %8 = arith.maximumf %6, %7 : vector<128x32xf32>
    %9 = arith.mulf %8, %8 : vector<128x32xf32>
    %cst_9 = arith.constant dense<0.000000e+00> : vector<128xf32>
    %10 = vector.multi_reduction <add>, %9, %cst_9 [1] : vector<128x32xf32> to vector<128xf32>
    %11 = vector.shape_cast %10 : vector<128xf32> to vector<128x1xf32>
    %cst_10 = arith.constant 1.000000e-24 : f32
    %12 = vector.broadcast %cst_10 : f32 to vector<128x1xf32>
    %13 = arith.maximumf %11, %12 : vector<128x1xf32>
    %14 = math.rsqrt %13 : vector<128x1xf32>
    %15 = vector.broadcast %14 : vector<128x1xf32> to vector<128x32xf32>
    %16 = arith.mulf %8, %15 : vector<128x32xf32>
    %c0_11 = arith.constant 0 : index
    %c0_12 = arith.constant 0 : index
    %c0_13 = arith.constant 0 : index
    %17 = vector.load %arg5[%c0_11, %c0_12, %c0_13] : memref<1x128x32xf32, #tpu.memory_space<vmem>>, vector<1x128x32xf32>
    %18 = vector.shape_cast %17 : vector<1x128x32xf32> to vector<128x32xf32>
    %19 = vector.shape_cast %16 : vector<128x32xf32> to vector<1x128x32xf32>
    tpu.vector_store %arg5[%c0_11, %c0_12, %c0_13], %19 {strides = array<i32>} : memref<1x128x32xf32, #tpu.memory_space<vmem>>, vector<1x128x32xf32>,
    return
  }
  func.func @transform_0(%arg0: i32, %arg1: i32) -> (i32, i32, i32) {
    %c0_i32 = arith.constant 0 : i32
    %c0_i32_0 = arith.constant 0 : i32
    return %arg0, %arg1, %c0_i32 : i32, i32, i32
  }
  func.func @transform_1(%arg0: i32, %arg1: i32) -> (i32, i32, i32) {
    %c0_i32 = arith.constant 0 : i32
    %c0_i32_0 = arith.constant 0 : i32
    %c0_i32_1 = arith.constant 0 : i32
    return %arg0, %c0_i32, %c0_i32_0 : i32, i32, i32
  }
  func.func @transform_2(%arg0: i32, %arg1: i32) -> (i32, i32) {
    %c0_i32 = arith.constant 0 : i32
    %c0_i32_0 = arith.constant 0 : i32
    %c0_i32_1 = arith.constant 0 : i32
    return %c0_i32, %c0_i32_0 : i32, i32
  }
  func.func @transform_3(%arg0: i32, %arg1: i32) -> (i32, i32, i32) {
    %c0_i32 = arith.constant 0 : i32
    %c0_i32_0 = arith.constant 0 : i32
    return %arg0, %arg1, %c0_i32 : i32, i32, i32
  }
}

module attributes {stable_mosaic.version = 11 : i64} {
  func.func @_score_kernel(%arg0: i32, %arg1: i32, %arg2: memref<1x128x128xf32, #tpu.memory_space<vmem>>, %arg3: memref<1x128x32xf32, #tpu.memory_space<vmem>>, %arg4: memref<1x128x32xf32, #tpu.memory_space<vmem>>, %arg5: memref<4x32x32xf32, #tpu.memory_space<vmem>>, %arg6: memref<32x32xf32, #tpu.memory_space<vmem>>, %arg7: memref<32x64xf32, #tpu.memory_space<vmem>>, %arg8: memref<1x64xf32, #tpu.memory_space<vmem>>, %arg9: memref<64x64xf32, #tpu.memory_space<vmem>>, %arg10: memref<1x64xf32, #tpu.memory_space<vmem>>, %arg11: memref<1x64xf32, #tpu.memory_space<vmem>>, %arg12: memref<1x1xf32, #tpu.memory_space<vmem>>, %arg13: memref<1x128x1xf32, #tpu.memory_space<vmem>>) attributes {dimension_semantics = [#tpu.dimension_semantics<parallel>, #tpu.dimension_semantics<parallel>], iteration_bounds = array<i64: 2, 1>, scalar_prefetch = 0 : i64, scratch_operands = 0 : i64, tpu.core_type = #tpu.core_type<tc>, window_params = [{transform_indices = @transform_0, window_bounds = array<i64: 1, 128, 128>}, {transform_indices = @transform_1, window_bounds = array<i64: 1, 128, 32>}, {transform_indices = @transform_2, window_bounds = array<i64: 1, 128, 32>}, {pipeline_mode = #tpu.pipeline_mode<synchronous>, transform_indices = @transform_3, window_bounds = array<i64: 4, 32, 32>}, {pipeline_mode = #tpu.pipeline_mode<synchronous>, transform_indices = @transform_4, window_bounds = array<i64: 32, 32>}, {pipeline_mode = #tpu.pipeline_mode<synchronous>, transform_indices = @transform_5, window_bounds = array<i64: 32, 64>}, {pipeline_mode = #tpu.pipeline_mode<synchronous>, transform_indices = @transform_6, window_bounds = array<i64: 1, 64>}, {pipeline_mode = #tpu.pipeline_mode<synchronous>, transform_indices = @transform_7, window_bounds = array<i64: 64, 64>}, {pipeline_mode = #tpu.pipeline_mode<synchronous>, transform_indices = @transform_8, window_bounds = array<i64: 1, 64>}, {pipeline_mode = #tpu.pipeline_mode<synchronous>, transform_indices = @transform_9, window_bounds = array<i64: 1, 64>}, {pipeline_mode = #tpu.pipeline_mode<synchronous>, transform_indices = @transform_10, window_bounds = array<i64: 1, 1>}, {transform_indices = @transform_11, window_bounds = array<i64: 1, 128, 1>}]} {
    %c0 = arith.constant 0 : index
    %c0_0 = arith.constant 0 : index
    %c0_1 = arith.constant 0 : index
    %0 = vector.load %arg2[%c0, %c0_0, %c0_1] : memref<1x128x128xf32, #tpu.memory_space<vmem>>, vector<1x128x128xf32>
    %1 = vector.shape_cast %0 : vector<1x128x128xf32> to vector<128x128xf32>
    %c0_2 = arith.constant 0 : index
    %c0_3 = arith.constant 0 : index
    %c0_4 = arith.constant 0 : index
    %2 = vector.load %arg3[%c0_2, %c0_3, %c0_4] : memref<1x128x32xf32, #tpu.memory_space<vmem>>, vector<1x128x32xf32>
    %3 = vector.shape_cast %2 : vector<1x128x32xf32> to vector<128x32xf32>
    %cst = arith.constant dense<0.000000e+00> : vector<128x32xf32>
    %4 = tpu.matmul %1, %3, %cst {dimension_numbers = #tpu.dot_dimension_numbers<[1], [0], [0], [1], [0, 0, 1, 1], [], []>} : vector<128x128xf32>, vector<128x32xf32>, vector<128x32xf32> -> vector<128x32xf32>
    %c0_5 = arith.constant 0 : index
    %c0_6 = arith.constant 0 : index
    %c0_7 = arith.constant 0 : index
    %5 = vector.load %arg4[%c0_5, %c0_6, %c0_7] : memref<1x128x32xf32, #tpu.memory_space<vmem>>, vector<1x128x32xf32>
    %6 = vector.shape_cast %5 : vector<1x128x32xf32> to vector<128x32xf32>
    %c0_8 = arith.constant 0 : index
    %c0_9 = arith.constant 0 : index
    %7 = vector.load %arg7[%c0_8, %c0_9] : memref<32x64xf32, #tpu.memory_space<vmem>>, vector<32x64xf32>
    %cst_10 = arith.constant dense<0.000000e+00> : vector<128x64xf32>
    %8 = tpu.matmul %6, %7, %cst_10 {dimension_numbers = #tpu.dot_dimension_numbers<[1], [0], [0], [1], [0, 0, 1, 1], [], []>} : vector<128x32xf32>, vector<32x64xf32>, vector<128x64xf32> -> vector<128x64xf32>
    %c0_11 = arith.constant 0 : index
    %c0_12 = arith.constant 0 : index
    %9 = vector.load %arg8[%c0_11, %c0_12] : memref<1x64xf32, #tpu.memory_space<vmem>>, vector<1x64xf32>
    %10 = vector.broadcast %9 : vector<1x64xf32> to vector<128x64xf32>
    %11 = arith.addf %8, %10 : vector<128x64xf32>
    %cst_13 = arith.constant 0.000000e+00 : f32
    %12 = vector.broadcast %cst_13 : f32 to vector<128x64xf32>
    %13 = arith.maximumf %11, %12 : vector<128x64xf32>
    %c0_14 = arith.constant 0 : index
    %c0_15 = arith.constant 0 : index
    %14 = vector.load %arg9[%c0_14, %c0_15] : memref<64x64xf32, #tpu.memory_space<vmem>>, vector<64x64xf32>
    %cst_16 = arith.constant dense<0.000000e+00> : vector<128x64xf32>
    %15 = tpu.matmul %13, %14, %cst_16 {dimension_numbers = #tpu.dot_dimension_numbers<[1], [0], [0], [1], [0, 0, 1, 1], [], []>} : vector<128x64xf32>, vector<64x64xf32>, vector<128x64xf32> -> vector<128x64xf32>
    %c0_17 = arith.constant 0 : index
    %c0_18 = arith.constant 0 : index
    %16 = vector.load %arg10[%c0_17, %c0_18] : memref<1x64xf32, #tpu.memory_space<vmem>>, vector<1x64xf32>
    %17 = vector.broadcast %16 : vector<1x64xf32> to vector<128x64xf32>
    %18 = arith.addf %15, %17 : vector<128x64xf32>
    %cst_19 = arith.constant 0.000000e+00 : f32
    %19 = vector.broadcast %cst_19 : f32 to vector<128x64xf32>
    %20 = arith.maximumf %18, %19 : vector<128x64xf32>
    %c0_20 = arith.constant 0 : index
    %c0_21 = arith.constant 0 : index
    %21 = vector.load %arg11[%c0_20, %c0_21] : memref<1x64xf32, #tpu.memory_space<vmem>>, vector<1x64xf32>
    %22 = vector.broadcast %21 : vector<1x64xf32> to vector<128x64xf32>
    %23 = arith.mulf %20, %22 : vector<128x64xf32>
    %cst_22 = arith.constant dense<0.000000e+00> : vector<128xf32>
    %24 = vector.multi_reduction <add>, %23, %cst_22 [1] : vector<128x64xf32> to vector<128xf32>
    %25 = vector.shape_cast %24 : vector<128xf32> to vector<128x1xf32>
    %c0_23 = arith.constant 0 : index
    %c0_24 = arith.constant 0 : index
    %26 = vector.load %arg12[%c0_23, %c0_24] : memref<1x1xf32, #tpu.memory_space<vmem>>, vector<1x1xf32>
    %27 = vector.broadcast %26 : vector<1x1xf32> to vector<128x1xf32>
    %28 = arith.addf %25, %27 : vector<128x1xf32>
    %c0_25 = arith.constant 0 : index
    %c0_26 = arith.constant 0 : index
    %c0_27 = arith.constant 0 : index
    %29 = vector.load %arg5[%c0_25, %c0_26, %c0_27] : memref<4x32x32xf32, #tpu.memory_space<vmem>>, vector<1x32x32xf32>
    %30 = vector.shape_cast %29 : vector<1x32x32xf32> to vector<32x32xf32>
    %cst_28 = arith.constant dense<0.000000e+00> : vector<128x32xf32>
    %31 = tpu.matmul %4, %30, %cst_28 {dimension_numbers = #tpu.dot_dimension_numbers<[1], [0], [0], [1], [0, 0, 1, 1], [], []>} : vector<128x32xf32>, vector<32x32xf32>, vector<128x32xf32> -> vector<128x32xf32>
    %cst_29 = arith.constant 0.000000e+00 : f32
    %32 = vector.broadcast %cst_29 : f32 to vector<128x32xf32>
    %33 = arith.maximumf %31, %32 : vector<128x32xf32>
    %34 = arith.mulf %33, %33 : vector<128x32xf32>
    %cst_30 = arith.constant dense<0.000000e+00> : vector<128xf32>
    %35 = vector.multi_reduction <add>, %34, %cst_30 [1] : vector<128x32xf32> to vector<128xf32>
    %36 = vector.shape_cast %35 : vector<128xf32> to vector<128x1xf32>
    %cst_31 = arith.constant 1.000000e-24 : f32
    %37 = vector.broadcast %cst_31 : f32 to vector<128x1xf32>
    %38 = arith.maximumf %36, %37 : vector<128x1xf32>
    %39 = math.rsqrt %38 : vector<128x1xf32>
    %40 = vector.broadcast %39 : vector<128x1xf32> to vector<128x32xf32>
    %41 = arith.mulf %33, %40 : vector<128x32xf32>
    %c0_32 = arith.constant 0 : index
    %c0_33 = arith.constant 0 : index
    %42 = vector.load %arg7[%c0_32, %c0_33] : memref<32x64xf32, #tpu.memory_space<vmem>>, vector<32x64xf32>
    %cst_34 = arith.constant dense<0.000000e+00> : vector<128x64xf32>
    %43 = tpu.matmul %41, %42, %cst_34 {dimension_numbers = #tpu.dot_dimension_numbers<[1], [0], [0], [1], [0, 0, 1, 1], [], []>} : vector<128x32xf32>, vector<32x64xf32>, vector<128x64xf32> -> vector<128x64xf32>
    %c0_35 = arith.constant 0 : index
    %c0_36 = arith.constant 0 : index
    %44 = vector.load %arg8[%c0_35, %c0_36] : memref<1x64xf32, #tpu.memory_space<vmem>>, vector<1x64xf32>
    %45 = vector.broadcast %44 : vector<1x64xf32> to vector<128x64xf32>
    %46 = arith.addf %43, %45 : vector<128x64xf32>
    %cst_37 = arith.constant 0.000000e+00 : f32
    %47 = vector.broadcast %cst_37 : f32 to vector<128x64xf32>
    %48 = arith.maximumf %46, %47 : vector<128x64xf32>
    %c0_38 = arith.constant 0 : index
    %c0_39 = arith.constant 0 : index
    %49 = vector.load %arg9[%c0_38, %c0_39] : memref<64x64xf32, #tpu.memory_space<vmem>>, vector<64x64xf32>
    %cst_40 = arith.constant dense<0.000000e+00> : vector<128x64xf32>
    %50 = tpu.matmul %48, %49, %cst_40 {dimension_numbers = #tpu.dot_dimension_numbers<[1], [0], [0], [1], [0, 0, 1, 1], [], []>} : vector<128x64xf32>, vector<64x64xf32>, vector<128x64xf32> -> vector<128x64xf32>
    %c0_41 = arith.constant 0 : index
    %c0_42 = arith.constant 0 : index
    %51 = vector.load %arg10[%c0_41, %c0_42] : memref<1x64xf32, #tpu.memory_space<vmem>>, vector<1x64xf32>
    %52 = vector.broadcast %51 : vector<1x64xf32> to vector<128x64xf32>
    %53 = arith.addf %50, %52 : vector<128x64xf32>
    %cst_43 = arith.constant 0.000000e+00 : f32
    %54 = vector.broadcast %cst_43 : f32 to vector<128x64xf32>
    %55 = arith.maximumf %53, %54 : vector<128x64xf32>
    %c0_44 = arith.constant 0 : index
    %c0_45 = arith.constant 0 : index
    %56 = vector.load %arg11[%c0_44, %c0_45] : memref<1x64xf32, #tpu.memory_space<vmem>>, vector<1x64xf32>
    %57 = vector.broadcast %56 : vector<1x64xf32> to vector<128x64xf32>
    %58 = arith.mulf %55, %57 : vector<128x64xf32>
    %cst_46 = arith.constant dense<0.000000e+00> : vector<128xf32>
    %59 = vector.multi_reduction <add>, %58, %cst_46 [1] : vector<128x64xf32> to vector<128xf32>
    %60 = vector.shape_cast %59 : vector<128xf32> to vector<128x1xf32>
    %c0_47 = arith.constant 0 : index
    %c0_48 = arith.constant 0 : index
    %61 = vector.load %arg12[%c0_47, %c0_48] : memref<1x1xf32, #tpu.memory_space<vmem>>, vector<1x1xf32>
    %62 = vector.broadcast %61 : vector<1x1xf32> to vector<128x1xf32>
    %63 = arith.addf %60, %62 : vector<128x1xf32>
    %64 = arith.addf %28, %63 : vector<128x1xf32>
    %c1 = arith.constant 1 : index
    %c0_49 = arith.constant 0 : index
    %c0_50 = arith.constant 0 : index
    %65 = vector.load %arg5[%c1, %c0_49, %c0_50] : memref<4x32x32xf32, #tpu.memory_space<vmem>>, vector<1x32x32xf32>
    %66 = vector.shape_cast %65 : vector<1x32x32xf32> to vector<32x32xf32>
    %cst_51 = arith.constant dense<0.000000e+00> : vector<128x32xf32>
    %67 = tpu.matmul %4, %66, %cst_51 {dimension_numbers = #tpu.dot_dimension_numbers<[1], [0], [0], [1], [0, 0, 1, 1], [], []>} : vector<128x32xf32>, vector<32x32xf32>, vector<128x32xf32> -> vector<128x32xf32>
    %cst_52 = arith.constant 0.000000e+00 : f32
    %68 = vector.broadcast %cst_52 : f32 to vector<128x32xf32>
    %69 = arith.maximumf %67, %68 : vector<128x32xf32>
    %70 = arith.mulf %69, %69 : vector<128x32xf32>
    %cst_53 = arith.constant dense<0.000000e+00> : vector<128xf32>
    %71 = vector.multi_reduction <add>, %70, %cst_53 [1] : vector<128x32xf32> to vector<128xf32>
    %72 = vector.shape_cast %71 : vector<128xf32> to vector<128x1xf32>
    %cst_54 = arith.constant 1.000000e-24 : f32
    %73 = vector.broadcast %cst_54 : f32 to vector<128x1xf32>
    %74 = arith.maximumf %72, %73 : vector<128x1xf32>
    %75 = math.rsqrt %74 : vector<128x1xf32>
    %76 = vector.broadcast %75 : vector<128x1xf32> to vector<128x32xf32>
    %77 = arith.mulf %69, %76 : vector<128x32xf32>
    %c0_55 = arith.constant 0 : index
    %c0_56 = arith.constant 0 : index
    %78 = vector.load %arg7[%c0_55, %c0_56] : memref<32x64xf32, #tpu.memory_space<vmem>>, vector<32x64xf32>
    %cst_57 = arith.constant dense<0.000000e+00> : vector<128x64xf32>
    %79 = tpu.matmul %77, %78, %cst_57 {dimension_numbers = #tpu.dot_dimension_numbers<[1], [0], [0], [1], [0, 0, 1, 1], [], []>} : vector<128x32xf32>, vector<32x64xf32>, vector<128x64xf32> -> vector<128x64xf32>
    %c0_58 = arith.constant 0 : index
    %c0_59 = arith.constant 0 : index
    %80 = vector.load %arg8[%c0_58, %c0_59] : memref<1x64xf32, #tpu.memory_space<vmem>>, vector<1x64xf32>
    %81 = vector.broadcast %80 : vector<1x64xf32> to vector<128x64xf32>
    %82 = arith.addf %79, %81 : vector<128x64xf32>
    %cst_60 = arith.constant 0.000000e+00 : f32
    %83 = vector.broadcast %cst_60 : f32 to vector<128x64xf32>
    %84 = arith.maximumf %82, %83 : vector<128x64xf32>
    %c0_61 = arith.constant 0 : index
    %c0_62 = arith.constant 0 : index
    %85 = vector.load %arg9[%c0_61, %c0_62] : memref<64x64xf32, #tpu.memory_space<vmem>>, vector<64x64xf32>
    %cst_63 = arith.constant dense<0.000000e+00> : vector<128x64xf32>
    %86 = tpu.matmul %84, %85, %cst_63 {dimension_numbers = #tpu.dot_dimension_numbers<[1], [0], [0], [1], [0, 0, 1, 1], [], []>} : vector<128x64xf32>, vector<64x64xf32>, vector<128x64xf32> -> vector<128x64xf32>
    %c0_64 = arith.constant 0 : index
    %c0_65 = arith.constant 0 : index
    %87 = vector.load %arg10[%c0_64, %c0_65] : memref<1x64xf32, #tpu.memory_space<vmem>>, vector<1x64xf32>
    %88 = vector.broadcast %87 : vector<1x64xf32> to vector<128x64xf32>
    %89 = arith.addf %86, %88 : vector<128x64xf32>
    %cst_66 = arith.constant 0.000000e+00 : f32
    %90 = vector.broadcast %cst_66 : f32 to vector<128x64xf32>
    %91 = arith.maximumf %89, %90 : vector<128x64xf32>
    %c0_67 = arith.constant 0 : index
    %c0_68 = arith.constant 0 : index
    %92 = vector.load %arg11[%c0_67, %c0_68] : memref<1x64xf32, #tpu.memory_space<vmem>>, vector<1x64xf32>
    %93 = vector.broadcast %92 : vector<1x64xf32> to vector<128x64xf32>
    %94 = arith.mulf %91, %93 : vector<128x64xf32>
    %cst_69 = arith.constant dense<0.000000e+00> : vector<128xf32>
    %95 = vector.multi_reduction <add>, %94, %cst_69 [1] : vector<128x64xf32> to vector<128xf32>
    %96 = vector.shape_cast %95 : vector<128xf32> to vector<128x1xf32>
    %c0_70 = arith.constant 0 : index
    %c0_71 = arith.constant 0 : index
    %97 = vector.load %arg12[%c0_70, %c0_71] : memref<1x1xf32, #tpu.memory_space<vmem>>, vector<1x1xf32>
    %98 = vector.broadcast %97 : vector<1x1xf32> to vector<128x1xf32>
    %99 = arith.addf %96, %98 : vector<128x1xf32>
    %100 = arith.addf %64, %99 : vector<128x1xf32>
    %c2 = arith.constant 2 : index
    %c0_72 = arith.constant 0 : index
    %c0_73 = arith.constant 0 : index
    %101 = vector.load %arg5[%c2, %c0_72, %c0_73] : memref<4x32x32xf32, #tpu.memory_space<vmem>>, vector<1x32x32xf32>
    %102 = vector.shape_cast %101 : vector<1x32x32xf32> to vector<32x32xf32>
    %cst_74 = arith.constant dense<0.000000e+00> : vector<128x32xf32>
    %103 = tpu.matmul %4, %102, %cst_74 {dimension_numbers = #tpu.dot_dimension_numbers<[1], [0], [0], [1], [0, 0, 1, 1], [], []>} : vector<128x32xf32>, vector<32x32xf32>, vector<128x32xf32> -> vector<128x32xf32>
    %cst_75 = arith.constant 0.000000e+00 : f32
    %104 = vector.broadcast %cst_75 : f32 to vector<128x32xf32>
    %105 = arith.maximumf %103, %104 : vector<128x32xf32>
    %106 = arith.mulf %105, %105 : vector<128x32xf32>
    %cst_76 = arith.constant dense<0.000000e+00> : vector<128xf32>
    %107 = vector.multi_reduction <add>, %106, %cst_76 [1] : vector<128x32xf32> to vector<128xf32>
    %108 = vector.shape_cast %107 : vector<128xf32> to vector<128x1xf32>
    %cst_77 = arith.constant 1.000000e-24 : f32
    %109 = vector.broadcast %cst_77 : f32 to vector<128x1xf32>
    %110 = arith.maximumf %108, %109 : vector<128x1xf32>
    %111 = math.rsqrt %110 : vector<128x1xf32>
    %112 = vector.broadcast %111 : vector<128x1xf32> to vector<128x32xf32>
    %113 = arith.mulf %105, %112 : vector<128x32xf32>
    %c0_78 = arith.constant 0 : index
    %c0_79 = arith.constant 0 : index
    %114 = vector.load %arg7[%c0_78, %c0_79] : memref<32x64xf32, #tpu.memory_space<vmem>>, vector<32x64xf32>
    %cst_80 = arith.constant dense<0.000000e+00> : vector<128x64xf32>
    %115 = tpu.matmul %113, %114, %cst_80 {dimension_numbers = #tpu.dot_dimension_numbers<[1], [0], [0], [1], [0, 0, 1, 1], [], []>} : vector<128x32xf32>, vector<32x64xf32>, vector<128x64xf32> -> vector<128x64xf32>
    %c0_81 = arith.constant 0 : index
    %c0_82 = arith.constant 0 : index
    %116 = vector.load %arg8[%c0_81, %c0_82] : memref<1x64xf32, #tpu.memory_space<vmem>>, vector<1x64xf32>
    %117 = vector.broadcast %116 : vector<1x64xf32> to vector<128x64xf32>
    %118 = arith.addf %115, %117 : vector<128x64xf32>
    %cst_83 = arith.constant 0.000000e+00 : f32
    %119 = vector.broadcast %cst_83 : f32 to vector<128x64xf32>
    %120 = arith.maximumf %118, %119 : vector<128x64xf32>
    %c0_84 = arith.constant 0 : index
    %c0_85 = arith.constant 0 : index
    %121 = vector.load %arg9[%c0_84, %c0_85] : memref<64x64xf32, #tpu.memory_space<vmem>>, vector<64x64xf32>
    %cst_86 = arith.constant dense<0.000000e+00> : vector<128x64xf32>
    %122 = tpu.matmul %120, %121, %cst_86 {dimension_numbers = #tpu.dot_dimension_numbers<[1], [0], [0], [1], [0, 0, 1, 1], [], []>} : vector<128x64xf32>, vector<64x64xf32>, vector<128x64xf32> -> vector<128x64xf32>
    %c0_87 = arith.constant 0 : index
    %c0_88 = arith.constant 0 : index
    %123 = vector.load %arg10[%c0_87, %c0_88] : memref<1x64xf32, #tpu.memory_space<vmem>>, vector<1x64xf32>
    %124 = vector.broadcast %123 : vector<1x64xf32> to vector<128x64xf32>
    %125 = arith.addf %122, %124 : vector<128x64xf32>
    %cst_89 = arith.constant 0.000000e+00 : f32
    %126 = vector.broadcast %cst_89 : f32 to vector<128x64xf32>
    %127 = arith.maximumf %125, %126 : vector<128x64xf32>
    %c0_90 = arith.constant 0 : index
    %c0_91 = arith.constant 0 : index
    %128 = vector.load %arg11[%c0_90, %c0_91] : memref<1x64xf32, #tpu.memory_space<vmem>>, vector<1x64xf32>
    %129 = vector.broadcast %128 : vector<1x64xf32> to vector<128x64xf32>
    %130 = arith.mulf %127, %129 : vector<128x64xf32>
    %cst_92 = arith.constant dense<0.000000e+00> : vector<128xf32>
    %131 = vector.multi_reduction <add>, %130, %cst_92 [1] : vector<128x64xf32> to vector<128xf32>
    %132 = vector.shape_cast %131 : vector<128xf32> to vector<128x1xf32>
    %c0_93 = arith.constant 0 : index
    %c0_94 = arith.constant 0 : index
    %133 = vector.load %arg12[%c0_93, %c0_94] : memref<1x1xf32, #tpu.memory_space<vmem>>, vector<1x1xf32>
    %134 = vector.broadcast %133 : vector<1x1xf32> to vector<128x1xf32>
    %135 = arith.addf %132, %134 : vector<128x1xf32>
    %136 = arith.addf %100, %135 : vector<128x1xf32>
    %c3 = arith.constant 3 : index
    %c0_95 = arith.constant 0 : index
    %c0_96 = arith.constant 0 : index
    %137 = vector.load %arg5[%c3, %c0_95, %c0_96] : memref<4x32x32xf32, #tpu.memory_space<vmem>>, vector<1x32x32xf32>
    %138 = vector.shape_cast %137 : vector<1x32x32xf32> to vector<32x32xf32>
    %cst_97 = arith.constant dense<0.000000e+00> : vector<128x32xf32>
    %139 = tpu.matmul %4, %138, %cst_97 {dimension_numbers = #tpu.dot_dimension_numbers<[1], [0], [0], [1], [0, 0, 1, 1], [], []>} : vector<128x32xf32>, vector<32x32xf32>, vector<128x32xf32> -> vector<128x32xf32>
    %cst_98 = arith.constant 0.000000e+00 : f32
    %140 = vector.broadcast %cst_98 : f32 to vector<128x32xf32>
    %141 = arith.maximumf %139, %140 : vector<128x32xf32>
    %142 = arith.mulf %141, %141 : vector<128x32xf32>
    %cst_99 = arith.constant dense<0.000000e+00> : vector<128xf32>
    %143 = vector.multi_reduction <add>, %142, %cst_99 [1] : vector<128x32xf32> to vector<128xf32>
    %144 = vector.shape_cast %143 : vector<128xf32> to vector<128x1xf32>
    %cst_100 = arith.constant 1.000000e-24 : f32
    %145 = vector.broadcast %cst_100 : f32 to vector<128x1xf32>
    %146 = arith.maximumf %144, %145 : vector<128x1xf32>
    %147 = math.rsqrt %146 : vector<128x1xf32>
    %148 = vector.broadcast %147 : vector<128x1xf32> to vector<128x32xf32>
    %149 = arith.mulf %141, %148 : vector<128x32xf32>
    %c0_101 = arith.constant 0 : index
    %c0_102 = arith.constant 0 : index
    %150 = vector.load %arg7[%c0_101, %c0_102] : memref<32x64xf32, #tpu.memory_space<vmem>>, vector<32x64xf32>
    %cst_103 = arith.constant dense<0.000000e+00> : vector<128x64xf32>
    %151 = tpu.matmul %149, %150, %cst_103 {dimension_numbers = #tpu.dot_dimension_numbers<[1], [0], [0], [1], [0, 0, 1, 1], [], []>} : vector<128x32xf32>, vector<32x64xf32>, vector<128x64xf32> -> vector<128x64xf32>
    %c0_104 = arith.constant 0 : index
    %c0_105 = arith.constant 0 : index
    %152 = vector.load %arg8[%c0_104, %c0_105] : memref<1x64xf32, #tpu.memory_space<vmem>>, vector<1x64xf32>
    %153 = vector.broadcast %152 : vector<1x64xf32> to vector<128x64xf32>
    %154 = arith.addf %151, %153 : vector<128x64xf32>
    %cst_106 = arith.constant 0.000000e+00 : f32
    %155 = vector.broadcast %cst_106 : f32 to vector<128x64xf32>
    %156 = arith.maximumf %154, %155 : vector<128x64xf32>
    %c0_107 = arith.constant 0 : index
    %c0_108 = arith.constant 0 : index
    %157 = vector.load %arg9[%c0_107, %c0_108] : memref<64x64xf32, #tpu.memory_space<vmem>>, vector<64x64xf32>
    %cst_109 = arith.constant dense<0.000000e+00> : vector<128x64xf32>
    %158 = tpu.matmul %156, %157, %cst_109 {dimension_numbers = #tpu.dot_dimension_numbers<[1], [0], [0], [1], [0, 0, 1, 1], [], []>} : vector<128x64xf32>, vector<64x64xf32>, vector<128x64xf32> -> vector<128x64xf32>
    %c0_110 = arith.constant 0 : index
    %c0_111 = arith.constant 0 : index
    %159 = vector.load %arg10[%c0_110, %c0_111] : memref<1x64xf32, #tpu.memory_space<vmem>>, vector<1x64xf32>
    %160 = vector.broadcast %159 : vector<1x64xf32> to vector<128x64xf32>
    %161 = arith.addf %158, %160 : vector<128x64xf32>
    %cst_112 = arith.constant 0.000000e+00 : f32
    %162 = vector.broadcast %cst_112 : f32 to vector<128x64xf32>
    %163 = arith.maximumf %161, %162 : vector<128x64xf32>
    %c0_113 = arith.constant 0 : index
    %c0_114 = arith.constant 0 : index
    %164 = vector.load %arg11[%c0_113, %c0_114] : memref<1x64xf32, #tpu.memory_space<vmem>>, vector<1x64xf32>
    %165 = vector.broadcast %164 : vector<1x64xf32> to vector<128x64xf32>
    %166 = arith.mulf %163, %165 : vector<128x64xf32>
    %cst_115 = arith.constant dense<0.000000e+00> : vector<128xf32>
    %167 = vector.multi_reduction <add>, %166, %cst_115 [1] : vector<128x64xf32> to vector<128xf32>
    %168 = vector.shape_cast %167 : vector<128xf32> to vector<128x1xf32>
    %c0_116 = arith.constant 0 : index
    %c0_117 = arith.constant 0 : index
    %169 = vector.load %arg12[%c0_116, %c0_117] : memref<1x1xf32, #tpu.memory_space<vmem>>, vector<1x1xf32>
    %170 = vector.broadcast %169 : vector<1x1xf32> to vector<128x1xf32>
    %171 = arith.addf %168, %170 : vector<128x1xf32>
    %172 = arith.addf %136, %171 : vector<128x1xf32>
    %c0_118 = arith.constant 0 : index
    %c0_119 = arith.constant 0 : index
    %173 = vector.load %arg6[%c0_118, %c0_119] : memref<32x32xf32, #tpu.memory_space<vmem>>, vector<32x32xf32>
    %cst_120 = arith.constant dense<0.000000e+00> : vector<128x32xf32>
    %174 = tpu.matmul %4, %173, %cst_120 {dimension_numbers = #tpu.dot_dimension_numbers<[1], [0], [0], [1], [0, 0, 1, 1], [], []>} : vector<128x32xf32>, vector<32x32xf32>, vector<128x32xf32> -> vector<128x32xf32>
    %cst_121 = arith.constant 0.000000e+00 : f32
    %175 = vector.broadcast %cst_121 : f32 to vector<128x32xf32>
    %176 = arith.maximumf %174, %175 : vector<128x32xf32>
    %c0_122 = arith.constant 0 : index
    %c0_123 = arith.constant 0 : index
    %177 = vector.load %arg7[%c0_122, %c0_123] : memref<32x64xf32, #tpu.memory_space<vmem>>, vector<32x64xf32>
    %cst_124 = arith.constant dense<0.000000e+00> : vector<128x64xf32>
    %178 = tpu.matmul %176, %177, %cst_124 {dimension_numbers = #tpu.dot_dimension_numbers<[1], [0], [0], [1], [0, 0, 1, 1], [], []>} : vector<128x32xf32>, vector<32x64xf32>, vector<128x64xf32> -> vector<128x64xf32>
    %c0_125 = arith.constant 0 : index
    %c0_126 = arith.constant 0 : index
    %179 = vector.load %arg8[%c0_125, %c0_126] : memref<1x64xf32, #tpu.memory_space<vmem>>, vector<1x64xf32>
    %180 = vector.broadcast %179 : vector<1x64xf32> to vector<128x64xf32>
    %181 = arith.addf %178, %180 : vector<128x64xf32>
    %cst_127 = arith.constant 0.000000e+00 : f32
    %182 = vector.broadcast %cst_127 : f32 to vector<128x64xf32>
    %183 = arith.maximumf %181, %182 : vector<128x64xf32>
    %c0_128 = arith.constant 0 : index
    %c0_129 = arith.constant 0 : index
    %184 = vector.load %arg9[%c0_128, %c0_129] : memref<64x64xf32, #tpu.memory_space<vmem>>, vector<64x64xf32>
    %cst_130 = arith.constant dense<0.000000e+00> : vector<128x64xf32>
    %185 = tpu.matmul %183, %184, %cst_130 {dimension_numbers = #tpu.dot_dimension_numbers<[1], [0], [0], [1], [0, 0, 1, 1], [], []>} : vector<128x64xf32>, vector<64x64xf32>, vector<128x64xf32> -> vector<128x64xf32>
    %c0_131 = arith.constant 0 : index
    %c0_132 = arith.constant 0 : index
    %186 = vector.load %arg10[%c0_131, %c0_132] : memref<1x64xf32, #tpu.memory_space<vmem>>, vector<1x64xf32>
    %187 = vector.broadcast %186 : vector<1x64xf32> to vector<128x64xf32>
    %188 = arith.addf %185, %187 : vector<128x64xf32>
    %cst_133 = arith.constant 0.000000e+00 : f32
    %189 = vector.broadcast %cst_133 : f32 to vector<128x64xf32>
    %190 = arith.maximumf %188, %189 : vector<128x64xf32>
    %c0_134 = arith.constant 0 : index
    %c0_135 = arith.constant 0 : index
    %191 = vector.load %arg11[%c0_134, %c0_135] : memref<1x64xf32, #tpu.memory_space<vmem>>, vector<1x64xf32>
    %192 = vector.broadcast %191 : vector<1x64xf32> to vector<128x64xf32>
    %193 = arith.mulf %190, %192 : vector<128x64xf32>
    %cst_136 = arith.constant dense<0.000000e+00> : vector<128xf32>
    %194 = vector.multi_reduction <add>, %193, %cst_136 [1] : vector<128x64xf32> to vector<128xf32>
    %195 = vector.shape_cast %194 : vector<128xf32> to vector<128x1xf32>
    %c0_137 = arith.constant 0 : index
    %c0_138 = arith.constant 0 : index
    %196 = vector.load %arg12[%c0_137, %c0_138] : memref<1x1xf32, #tpu.memory_space<vmem>>, vector<1x1xf32>
    %197 = vector.broadcast %196 : vector<1x1xf32> to vector<128x1xf32>
    %198 = arith.addf %195, %197 : vector<128x1xf32>
    %199 = arith.addf %172, %198 : vector<128x1xf32>
    %c0_139 = arith.constant 0 : index
    %c0_140 = arith.constant 0 : index
    %c0_141 = arith.constant 0 : index
    %200 = vector.load %arg13[%c0_139, %c0_140, %c0_141] : memref<1x128x1xf32, #tpu.memory_space<vmem>>, vector<1x128x1xf32>
    %201 = vector.shape_cast %200 : vector<1x128x1xf32> to vector<128x1xf32>
    %202 = vector.shape_cast %199 : vector<128x1xf32> to vector<1x128x1xf32>
    tpu.vector_store %arg13[%c0_139, %c0_140, %c0_141], %202 {strides = array<i32>} : memref<1x128x1xf32, #tpu.memory_space<vmem>>, vector<1x128x1xf32>,
    return
  }
  func.func @transform_0(%arg0: i32, %arg1: i32) -> (i32, i32, i32) {
    %c0_i32 = arith.constant 0 : i32
    %c0_i32_0 = arith.constant 0 : i32
    return %arg0, %arg1, %c0_i32 : i32, i32, i32
  }
  func.func @transform_1(%arg0: i32, %arg1: i32) -> (i32, i32, i32) {
    %c0_i32 = arith.constant 0 : i32
    %c0_i32_0 = arith.constant 0 : i32
    %c0_i32_1 = arith.constant 0 : i32
    return %arg0, %c0_i32, %c0_i32_0 : i32, i32, i32
  }
  func.func @transform_2(%arg0: i32, %arg1: i32) -> (i32, i32, i32) {
    %c0_i32 = arith.constant 0 : i32
    %c0_i32_0 = arith.constant 0 : i32
    return %arg0, %arg1, %c0_i32 : i32, i32, i32
  }
  func.func @transform_3(%arg0: i32, %arg1: i32) -> (i32, i32, i32) {
    %c0_i32 = arith.constant 0 : i32
    %c0_i32_0 = arith.constant 0 : i32
    %c0_i32_1 = arith.constant 0 : i32
    %c0_i32_2 = arith.constant 0 : i32
    return %c0_i32, %c0_i32_0, %c0_i32_1 : i32, i32, i32
  }
  func.func @transform_4(%arg0: i32, %arg1: i32) -> (i32, i32) {
    %c0_i32 = arith.constant 0 : i32
    %c0_i32_0 = arith.constant 0 : i32
    %c0_i32_1 = arith.constant 0 : i32
    return %c0_i32, %c0_i32_0 : i32, i32
  }
  func.func @transform_5(%arg0: i32, %arg1: i32) -> (i32, i32) {
    %c0_i32 = arith.constant 0 : i32
    %c0_i32_0 = arith.constant 0 : i32
    %c0_i32_1 = arith.constant 0 : i32
    return %c0_i32, %c0_i32_0 : i32, i32
  }
  func.func @transform_6(%arg0: i32, %arg1: i32) -> (i32, i32) {
    %c0_i32 = arith.constant 0 : i32
    %c0_i32_0 = arith.constant 0 : i32
    %c0_i32_1 = arith.constant 0 : i32
    return %c0_i32, %c0_i32_0 : i32, i32
  }
  func.func @transform_7(%arg0: i32, %arg1: i32) -> (i32, i32) {
    %c0_i32 = arith.constant 0 : i32
    %c0_i32_0 = arith.constant 0 : i32
    %c0_i32_1 = arith.constant 0 : i32
    return %c0_i32, %c0_i32_0 : i32, i32
  }
  func.func @transform_8(%arg0: i32, %arg1: i32) -> (i32, i32) {
    %c0_i32 = arith.constant 0 : i32
    %c0_i32_0 = arith.constant 0 : i32
    %c0_i32_1 = arith.constant 0 : i32
    return %c0_i32, %c0_i32_0 : i32, i32
  }
  func.func @transform_9(%arg0: i32, %arg1: i32) -> (i32, i32) {
    %c0_i32 = arith.constant 0 : i32
    %c0_i32_0 = arith.constant 0 : i32
    %c0_i32_1 = arith.constant 0 : i32
    return %c0_i32, %c0_i32_0 : i32, i32
  }
  func.func @transform_10(%arg0: i32, %arg1: i32) -> (i32, i32) {
    %c0_i32 = arith.constant 0 : i32
    %c0_i32_0 = arith.constant 0 : i32
    %c0_i32_1 = arith.constant 0 : i32
    return %c0_i32, %c0_i32_0 : i32, i32
  }
  func.func @transform_11(%arg0: i32, %arg1: i32) -> (i32, i32, i32) {
    %c0_i32 = arith.constant 0 : i32
    %c0_i32_0 = arith.constant 0 : i32
    return %arg0, %arg1, %c0_i32 : i32, i32, i32
  }
}

</mosaic_0001>

<bundles_post_ra>
// kernel: gnn_bet_forward.6
= control target key start
LH: loop header
LB: loop body
LE: loop exit
PB: predicated region body
PF: predicated region fallthrough
CT: control target
= control target key end

     0   :  { %s812_s9 = smov 0   ;;  %s814_s10 = smov 0   ;;  %s1143_s0 = inlined_call_operand.vmem [shape: f32[2,128,128], index: 0, kind: input, shape index: {}]   ;;  %s1144_s1 = inlined_call_operand.vmem [shape: f32[128,32], index: 1, kind: input, shape index: {}]   ;;  %s1145_s2 = inlined_call_operand.vmem [shape: f32[2,128,32], index: 2, kind: output, shape index: {}]  }
   0x1   :  { %s816_s11 = smov 0  }
   0x2 LB: > { %s24_s12 = sadd.s32 1, %s791_s10  ;;  %p660_p0 = scmp.ge.s32.totalorder %s795_s11, 1  ;;  %s795_s11 = sphi %s816_s11, %s12_s11   ;;  %s791_s10 = sphi %s814_s10, %s1149_s10   ;;  %s787_s9 = sphi %s812_s9, %s1148_s9  }
   0x3   : > { %p26_p1 = scmp.ge.s32.totalorder %s24_s12, 2  ;;  %p133_p2 = scmp.lt.s32.totalorder %s795_s11, 3 }
   0x5   : > { %s1151_s12 = smov (%p26_p1, %s24_s12), 0  ;;  %p134_p3 = pnand %p660_p0, %p133_p2 }
   0x6   : > { %p164_p4 = scmp.lt.s32.totalorder (!%p134_p3), %s787_s9, 1 }
   0x7   : > { %137 = sbr.rel (%p134_p3) target bundleno = 362 (0x16a), region = 28 }
   0xc   : > { %v214_v0 = vld [vmem:[%s1144_s1 + $0x78] sm:$0xff]  ;;  %v213_v1 = vld [vmem:[%s1144_s1 + $0x70] sm:$0xff]  ;;  %v212_v2 = vld [vmem:[%s1144_s1 + $0x68] sm:$0xff]  ;;  %s1153_s9 = smov (!%p164_p4, %s787_s9), 1  ;;  %vm312_vm0 = vcmask 261120  }
   0xd   : > { %215 = vmatpush.msra.mxu0 %v214_v0  ;;  %669 = vmatpush.msra.mxu1 %v214_v0  ;;  %v211_v3 = vld [vmem:[%s1144_s1 + $0x60] sm:$0xff]  ;;  %v210_v4 = vld [vmem:[%s1144_s1 + $0x58] sm:$0xff]  ;;  %v209_v5 = vld [vmem:[%s1144_s1 + $0x50] sm:$0xff]  ;;  %s667_s15 = sshll.u32 %s1153_s9, 7 }
   0xe   : > { %670 = vmatpush.msra.mxu2 %v214_v0  ;;  %671 = vmatpush.msra.mxu3 %v214_v0  ;;  %v208_v6 = vld [vmem:[%s1144_s1 + $0x48] sm:$0xff]  ;;  %v207_v7 = vld [vmem:[%s1144_s1 + $0x40] sm:$0xff]  ;;  %v206_v8 = vld [vmem:[%s1144_s1 + $0x38] sm:$0xff]  ;;  %s887_s22 = scalar_lea.vmem %s1143_s0, %s667_s15  ;;  %s1007_s27 = scalar_lea.vmem %s1145_s2, %s667_s15 }
   0xf   : > { %216 = vmatpush.msra.mxu0 %v213_v1  ;;  %672 = vmatpush.msra.mxu1 %v213_v1  ;;  %v205_v9 = vld [vmem:[%s1144_s1 + $0x30] sm:$0xff]  ;;  %v204_v10 = vld [vmem:[%s1144_s1 + $0x28] sm:$0xff]  ;;  %v203_v11 = vld [vmem:[%s1144_s1 + $0x20] sm:$0xff] }
  0x10   : > { %673 = vmatpush.msra.mxu2 %v213_v1  ;;  %674 = vmatpush.msra.mxu3 %v213_v1  ;;  %v202_v12 = vld [vmem:[%s1144_s1 + $0x18] sm:$0xff]  ;;  %v201_v13 = vld [vmem:[%s1144_s1 + $0x10] sm:$0xff]  ;;  %v200_v14 = vld [vmem:[%s1144_s1 + $0x8] sm:$0xff] }
  0x11   : > { %217 = vmatpush.msra.mxu0 %v212_v2  ;;  %675 = vmatpush.msra.mxu1 %v212_v2  ;;  %v199_v15 = vld [vmem:[%s1144_s1] sm:$0xff]  ;;  %v184_v20 = vld [vmem:[%s887_s22 + $0x8] sm:$0xff]  ;;  %v185_v24 = vld [vmem:[%s887_s22 + $0x10] sm:$0xff] }
  0x12   : > { %676 = vmatpush.msra.mxu2 %v212_v2  ;;  %677 = vmatpush.msra.mxu3 %v212_v2  ;;  %v183_v16 = vld [vmem:[%s887_s22] sm:$0xff]  ;;  %v192_v21 = vld [vmem:[%s887_s22 + $0x48] sm:$0xff]  ;;  %v193_v25 = vld [vmem:[%s887_s22 + $0x50] sm:$0xff] }
  0x13   : > { %218 = vmatpush.msra.mxu0 %v211_v3  ;;  %678 = vmatpush.msra.mxu1 %v211_v3  ;;  %v187_v17 = vld [vmem:[%s887_s22 + $0x20] sm:$0xff]  ;;  %v188_v22 = vld [vmem:[%s887_s22 + $0x28] sm:$0xff]  ;;  %v189_v26 = vld [vmem:[%s887_s22 + $0x30] sm:$0xff] }
  0x14   : > { %679 = vmatpush.msra.mxu2 %v211_v3  ;;  %680 = vmatpush.msra.mxu3 %v211_v3  ;;  %v191_v18 = vld [vmem:[%s887_s22 + $0x40] sm:$0xff]  ;;  %v196_v23 = vld [vmem:[%s887_s22 + $0x68] sm:$0xff]  ;;  %v197_v27 = vld [vmem:[%s887_s22 + $0x70] sm:$0xff] }
  0x15   : > { %219 = vmatpush.msra.mxu0 %v210_v4  ;;  %681 = vmatpush.msra.mxu1 %v210_v4  ;;  %v195_v19 = vld [vmem:[%s887_s22 + $0x60] sm:$0xff]  ;;  %v186_v28 = vld [vmem:[%s887_s22 + $0x18] sm:$0xff] }
  0x16   : > { %682 = vmatpush.msra.mxu2 %v210_v4  ;;  %683 = vmatpush.msra.mxu3 %v210_v4  ;;  %v194_v29 = vld [vmem:[%s887_s22 + $0x58] sm:$0xff] }
  0x17   : > { %220 = vmatpush.msra.mxu0 %v209_v5  ;;  %684 = vmatpush.msra.mxu1 %v209_v5  ;;  %v190_v30 = vld [vmem:[%s887_s22 + $0x38] sm:$0xff] }
  0x18   : > { %685 = vmatpush.msra.mxu2 %v209_v5  ;;  %686 = vmatpush.msra.mxu3 %v209_v5  ;;  %v198_v31 = vld [vmem:[%s887_s22 + $0x78] sm:$0xff] }
  0x19   : > { %221 = vmatpush.msra.mxu0 %v208_v6  ;;  %687 = vmatpush.msra.mxu1 %v208_v6 }
  0x1a   : > { %688 = vmatpush.msra.mxu2 %v208_v6  ;;  %689 = vmatpush.msra.mxu3 %v208_v6 }
  0x1b   : > { %222 = vmatpush.msra.mxu0 %v207_v7  ;;  %690 = vmatpush.msra.mxu1 %v207_v7 }
  0x1c   : > { %691 = vmatpush.msra.mxu2 %v207_v7  ;;  %692 = vmatpush.msra.mxu3 %v207_v7 }
  0x1d   : > { %223 = vmatpush.msra.mxu0 %v206_v8  ;;  %693 = vmatpush.msra.mxu1 %v206_v8 }
  0x1e   : > { %694 = vmatpush.msra.mxu2 %v206_v8  ;;  %695 = vmatpush.msra.mxu3 %v206_v8 }
  0x1f   : > { %224 = vmatpush.msra.mxu0 %v205_v9  ;;  %696 = vmatpush.msra.mxu1 %v205_v9 }
  0x20   : > { %697 = vmatpush.msra.mxu2 %v205_v9  ;;  %698 = vmatpush.msra.mxu3 %v205_v9 }
  0x21   : > { %225 = vmatpush.msra.mxu0 %v204_v10  ;;  %699 = vmatpush.msra.mxu1 %v204_v10 }
  0x22   : > { %700 = vmatpush.msra.mxu2 %v204_v10  ;;  %701 = vmatpush.msra.mxu3 %v204_v10 }
  0x23   : > { %226 = vmatpush.msra.mxu0 %v203_v11  ;;  %702 = vmatpush.msra.mxu1 %v203_v11 }
  0x24   : > { %703 = vmatpush.msra.mxu2 %v203_v11  ;;  %704 = vmatpush.msra.mxu3 %v203_v11 }
  0x25   : > { %227 = vmatpush.msra.mxu0 %v202_v12  ;;  %705 = vmatpush.msra.mxu1 %v202_v12 }
  0x26   : > { %706 = vmatpush.msra.mxu2 %v202_v12  ;;  %707 = vmatpush.msra.mxu3 %v202_v12 }
  0x27   : > { %228 = vmatpush.msra.mxu0 %v201_v13  ;;  %708 = vmatpush.msra.mxu1 %v201_v13 }
  0x28   : > { %709 = vmatpush.msra.mxu2 %v201_v13  ;;  %710 = vmatpush.msra.mxu3 %v201_v13 }
  0x29   : > { %229 = vmatpush.msra.mxu0 %v200_v14  ;;  %711 = vmatpush.msra.mxu1 %v200_v14 }
  0x2a   : > { %712 = vmatpush.msra.mxu2 %v200_v14  ;;  %713 = vmatpush.msra.mxu3 %v200_v14 }
  0x2b   : > { %230 = vmatpush.msra.mxu0 %v199_v15  ;;  %714 = vmatpush.msra.mxu1 %v199_v15 }
  0x2c   : > { %715 = vmatpush.msra.mxu2 %v199_v15  ;;  %231 = vmatmul.f32.vlgmr.msra.gmra.mxu0 %v183_v16 }
  0x2d   : > { %243 = vmatmul.f32.vlgmr.msra.gmra.mxu1 %v187_v17  ;;  %255 = vmatmul.f32.vlgmr.msra.gmra.mxu2 %v191_v18 }
  0x2e   : > { %716 = vmatpush.msra.mxu3 %v199_v15 }
  0x2f   : > { %267 = vmatmul.f32.vlgmr.msra.gmra.mxu3 %v195_v19 }
  0x34   : > { %234 = vmatmul.f32.gmra.mxu0 %v184_v20 }
  0x35   : > { %258 = vmatmul.f32.gmra.mxu2 %v192_v21  ;;  %246 = vmatmul.f32.gmra.mxu1 %v188_v22 }
  0x37   : > { %270 = vmatmul.f32.gmra.mxu3 %v196_v23 }
  0x3c   : > { %237 = vmatmul.f32.gmra.mxu0 %v185_v24 }
  0x3d   : > { %261 = vmatmul.f32.gmra.mxu2 %v193_v25  ;;  %249 = vmatmul.f32.gmra.mxu1 %v189_v26 }
  0x3f   : > { %273 = vmatmul.f32.gmra.mxu3 %v197_v27 }
  0x44   : > { %240 = vmatmul.f32.gmra.mxu0 %v186_v28 }
  0x45   : > { %264 = vmatmul.f32.gmra.mxu2 %v194_v29  ;;  %252 = vmatmul.f32.gmra.mxu1 %v190_v30 }
  0x47   : > { %276 = vmatmul.f32.gmra.mxu3 %v198_v31 }
  0xa9   : > { %v232_v32 = vpop.f32.mrf.mxu0 }
  0xaa   : > { %v908_v33 = vmax.f32 %v232_v32, 0.0  ;;  %v244_v34 = vpop.f32.mrf.mxu1 }
  0xab   : > { %v910_v35 = vmax.f32 %v244_v34, 0.0 }
  0xac   : > { %v296_v36 = vmul.f32 %v908_v33, %v908_v33 }
  0xad   : > { %v300_v37 = vmul.f32 %v910_v35, %v910_v35 }
  0xae   : > { %v313_v38 = vsel %vm312_vm0, %v296_v36, 0.0 }
  0xaf   : > { %v325_v39 = vsel %vm312_vm0, %v300_v37, 0.0  ;;  %314 = vadd.xlane.f32.xlu0 %v313_v38 }
  0xb0   : > { %v256_v40 = vpop.f32.mrf.mxu2  ;;  %326 = vadd.xlane.f32.xlu2 %v325_v39 }
  0xb1   : > { %v918_v41 = vmax.f32 %v256_v40, 0.0  ;;  %v235_v42 = vpop.f32.mrf.mxu0 }
  0xb2   : > { %v268_v43 = vpop.f32.mrf.mxu3  ;;  %v247_v44 = vpop.f32.mrf.mxu1  ;;  %v929_v50 = vmax.f32 %v235_v42, 0.0 }
  0xb3   : > { %v920_v45 = vmax.f32 %v268_v43, 0.0  ;;  %v304_v46 = vmul.f32 %v918_v41, %v918_v41  ;;  %v927_v49 = vmax.f32 %v247_v44, 0.0 }
  0xb4   : > { %v297_v57 = vmul.f32 %v929_v50, %v929_v50 }
  0xb5   : > { %v337_v47 = vsel %vm312_vm0, %v304_v46, 0.0  ;;  %v308_v48 = vmul.f32 %v920_v45, %v920_v45  ;;  %v301_v54 = vmul.f32 %v927_v49, %v927_v49 }
  0xb6   : > { %v316_v62 = vsel %vm312_vm0, %v297_v57, 0.0 }
  0xb7   : > { %v349_v51 = vsel %vm312_vm0, %v308_v48, 0.0  ;;  %v328_v59 = vsel %vm312_vm0, %v301_v54, 0.0 }
  0xb8   : > { %v259_v52 = vpop.f32.mrf.mxu2  ;;  %338 = vadd.xlane.f32.xlu2 %v337_v47  ;;  %350 = vadd.xlane.f32.xlu0 %v349_v51 }
  0xb9   : > { %v238_v53 = vpop.f32.mrf.mxu0  ;;  %v942_v61 = vmax.f32 %v259_v52, 0.0 }
  0xba   : > { %v934_v55 = vmax.f32 %v238_v53, 0.0  ;;  %v271_v56 = vpop.f32.mrf.mxu3  ;;  %v250_v63 = vpop.f32.mrf.mxu1 }
  0xbb   : > { %v305_v4 = vmul.f32 %v942_v61, %v942_v61  ;;  %v954_v8 = vmax.f32 %v250_v63, 0.0  ;;  %v983_v29 = vmax.f32 %v271_v56, 0.0 }
  0xbc   : > { %v298_v58 = vmul.f32 %v934_v55, %v934_v55 }
  0xbd   : > { %v340_v9 = vsel %vm312_vm0, %v305_v4, 0.0  ;;  %v302_v13 = vmul.f32 %v954_v8, %v954_v8  ;;  %v309_v30 = vmul.f32 %v983_v29, %v983_v29 }
  0xbe   : > { %v319_v60 = vsel %vm312_vm0, %v298_v58, 0.0 }
  0xbf   : > { %320 = vadd.xlane.f32.xlu1 %v319_v60  ;;  %v331_v21 = vsel %vm312_vm0, %v302_v13, 0.0  ;;  %v352_v31 = vsel %vm312_vm0, %v309_v30, 0.0 }
  0xc0   : > { %v262_v0 = vpop.f32.mrf.mxu2  ;;  %329 = vadd.xlane.f32.xlu2 %v328_v59  ;;  %317 = vadd.xlane.f32.xlu0 %v316_v62 }
  0xc1   : > { %v945_v1 = vmax.f32 %v262_v0, 0.0  ;;  %v241_v2 = vpop.f32.mrf.mxu0 }
  0xc2   : > { %v274_v3 = vpop.f32.mrf.mxu3  ;;  %v951_v6 = vmax.f32 %v241_v2, 0.0  ;;  %v253_v14 = vpop.f32.mrf.mxu1 }
  0xc3   : > { %v306_v5 = vmul.f32 %v945_v1, %v945_v1  ;;  %v965_v17 = vmax.f32 %v274_v3, 0.0  ;;  %v968_v19 = vmax.f32 %v253_v14, 0.0 }
  0xc4   : > { %v299_v11 = vmul.f32 %v951_v6, %v951_v6 }
  0xc5   : > { %v343_v7 = vsel %vm312_vm0, %v306_v5, 0.0  ;;  %v310_v23 = vmul.f32 %v965_v17, %v965_v17  ;;  %v303_v24 = vmul.f32 %v968_v19, %v968_v19 }
  0xc6   : > { %v322_v18 = vsel %vm312_vm0, %v299_v11, 0.0 }
  0xc7   : > { %344 = vadd.xlane.f32.xlu1 %v343_v7  ;;  %v355_v26 = vsel %vm312_vm0, %v310_v23, 0.0  ;;  %v334_v27 = vsel %vm312_vm0, %v303_v24, 0.0 }
  0xc8   : > { %v265_v10 = vpop.f32.mrf.mxu2  ;;  %341 = vadd.xlane.f32.xlu0 %v340_v9 }
  0xc9   : > { %v959_v12 = vmax.f32 %v265_v10, 0.0 }
  0xca   : > { %v277_v15 = vpop.f32.mrf.mxu3 }
  0xcb   : > { %v307_v16 = vmul.f32 %v959_v12, %v959_v12  ;;  %v972_v22 = vmax.f32 %v277_v15, 0.0 }
  0xcd   : > { %v346_v20 = vsel %vm312_vm0, %v307_v16, 0.0  ;;  %v311_v25 = vmul.f32 %v972_v22, %v972_v22 }
  0xce   : > { %347 = vadd.xlane.f32.xlu2 %v346_v20 }
  0xcf   : > { %323 = vadd.xlane.f32.xlu1 %v322_v18  ;;  %v358_v28 = vsel %vm312_vm0, %v311_v25, 0.0 }
  0xd0   : > { %332 = vadd.xlane.f32.xlu0 %v331_v21 }
  0xd6   : > { %356 = vadd.xlane.f32.xlu2 %v355_v26 }
  0xd7   : > { %335 = vadd.xlane.f32.xlu1 %v334_v27 }
  0xd8   : > { %359 = vadd.xlane.f32.xlu0 %v358_v28 }
  0xdf   : > { %353 = vadd.xlane.f32.xlu1 %v352_v31 }
 0x122   : > { %v315_v32 = vpop.xlane.xlu0 %314 }
 0x123   : > { %v327_v34 = vpop.xlane.xlu2 %326  ;;  %v361_v36 = vmax.f32 %v315_v32, 1e-24 }
 0x124   : > { %v365_v37 = vmax.f32 %v327_v34, 1e-24 }
 0x125   : > { %741 = vrsqrt.f32 %v361_v36  ;;  %vm383_vm5 = vweird.f32 %v361_v36 }
 0x126   : > { %743 = vrsqrt.f32 %v365_v37  ;;  %vm423_vm1 = vweird.f32 %v365_v37 }
 0x12b   : > { %v742_v38 = vpop.eup %741  ;;  %v339_v39 = vpop.xlane.xlu2 %338 }
 0x12c   : > { %v351_v40 = vpop.xlane.xlu0 %350  ;;  %v744_v42 = vpop.eup %743  ;;  %v378_v43 = vmul.f32 %v742_v38, %v361_v36  ;;  %v369_v44 = vmax.f32 %v339_v39, 1e-24  ;;  %vm384_vm3 = vweird.f32 %v742_v38 }
 0x12d   : > { %v988_v46 = vmax.f32 %v351_v40, 1e-24  ;;  %v418_v47 = vmul.f32 %v744_v42, %v365_v37  ;;  %vm424_vm2 = vweird.f32 %v744_v42  ;;  %vm385_vm6 = vmor %vm383_vm5, %vm384_vm3 }
 0x12e   : > { %v379_v48 = vmul.f32 %v742_v38, %v378_v43  ;;  %745 = vrsqrt.f32 %v369_v44  ;;  %vm993_vm4 = vmor %vm423_vm1, %vm424_vm2  ;;  %vm463_vm10 = vweird.f32 %v369_v44 }
 0x12f   : > { %v419_v51 = vmul.f32 %v744_v42, %v418_v47  ;;  %747 = vrsqrt.f32 %v988_v46  ;;  %vm503_vm8 = vweird.f32 %v988_v46 }
 0x130   : > { %v380_v52 = vmul.f32 0.5, %v379_v48 }
 0x131   : > { %v420_v53 = vmul.f32 0.5, %v419_v51 }
 0x132   : > { %v381_v54 = vsub.f32 1.5, %v380_v52  ;;  %v321_v56 = vpop.xlane.xlu1 %320 }
 0x133   : > { %v421_v57 = vsub.f32 1.5, %v420_v53  ;;  %v330_v58 = vpop.xlane.xlu2 %329  ;;  %v991_v60 = vmax.f32 %v321_v56, 1e-24 }
 0x134   : > { %v318_v59 = vpop.xlane.xlu0 %317  ;;  %v746_v62 = vpop.eup %745  ;;  %v382_v0 = vmul.f32 %v742_v38, %v381_v54  ;;  %v997_v2 = vmax.f32 %v330_v58, 1e-24 }
 0x135   : > { %v999_v3 = vmax.f32 %v318_v59, 1e-24  ;;  %v748_v4 = vpop.eup %747  ;;  %v422_v5 = vmul.f32 %v744_v42, %v421_v57  ;;  %v458_v7 = vmul.f32 %v746_v62, %v369_v44  ;;  %749 = vrsqrt.f32 %v991_v60 }
 0x136   : > { %v386_v9 = vsel %vm385_vm6, %v742_v38, %v382_v0  ;;  %v498_v10 = vmul.f32 %v748_v4, %v988_v46  ;;  %751 = vrsqrt.f32 %v997_v2  ;;  %vm464_vm7 = vweird.f32 %v746_v62 }
 0x137   : > { %v426_v11 = vsel %vm993_vm4, %v744_v42, %v422_v5  ;;  %v537_v13 = vmul.f32 %v386_v9, %v908_v33  ;;  %v459_v14 = vmul.f32 %v746_v62, %v458_v7  ;;  %753 = vrsqrt.f32 %v999_v3  ;;  %vm465_vm11 = vmor %vm463_vm10, %vm464_vm7 }
 0x138   : > { %v541_v15 = vmul.f32 %v426_v11, %v910_v35  ;;  %v499_v16 = vmul.f32 %v748_v4, %v498_v10  ;;  %vm504_vm9 = vweird.f32 %v748_v4  ;;  %vm433_vm13 = vweird.f32 %v997_v2 }
 0x139   : > { %553 = vst.msk [vmem:[%s1007_s27] sm:$0xff] %vm312_vm0, %v537_v13  ;;  %v460_v18 = vmul.f32 0.5, %v459_v14  ;;  %vm505_vm12 = vmor %vm503_vm8, %vm504_vm9  ;;  %vm403_vm1 = vweird.f32 %v991_v60  ;;  %vm393_vm5 = vweird.f32 %v999_v3 }
 0x13a   : > { %557 = vst.msk [vmem:[%s1007_s27 + $0x20] sm:$0xff] %vm312_vm0, %v541_v15  ;;  %v500_v20 = vmul.f32 0.5, %v499_v16  ;;  %v345_v21 = vpop.xlane.xlu1 %344 }
 0x13b   : > { %v750_v23 = vpop.eup %749  ;;  %v461_v24 = vsub.f32 1.5, %v460_v18  ;;  %v1021_v33 = vmax.f32 %v345_v21, 1e-24 }
 0x13c   : > { %v342_v25 = vpop.xlane.xlu0 %341  ;;  %v752_v26 = vpop.eup %751  ;;  %v501_v35 = vsub.f32 1.5, %v500_v20  ;;  %v398_v27 = vmul.f32 %v750_v23, %v991_v60  ;;  %vm404_vm14 = vweird.f32 %v750_v23 }
 0x13d   : > { %v1024_v28 = vmax.f32 %v342_v25, 1e-24  ;;  %v462_v30 = vmul.f32 %v746_v62, %v461_v24  ;;  %v428_v31 = vmul.f32 %v752_v26, %v997_v2  ;;  %755 = vrsqrt.f32 %v1021_v33  ;;  %v754_v32 = vpop.eup %753  ;;  %vm405_vm3 = vmor %vm403_vm1, %vm404_vm14 }
 0x13e   : > { %v502_v34 = vmul.f32 %v748_v4, %v501_v35  ;;  %v399_v36 = vmul.f32 %v750_v23, %v398_v27  ;;  %v388_v39 = vmul.f32 %v754_v32, %v999_v3  ;;  %vm434_vm15 = vweird.f32 %v752_v26 }
 0x13f   : > { %757 = vrsqrt.f32 %v1024_v28  ;;  %v466_v37 = vsel %vm465_vm11, %v746_v62, %v462_v30  ;;  %v429_v38 = vmul.f32 %v752_v26, %v428_v31  ;;  %vm394_vm2 = vweird.f32 %v754_v32  ;;  %vm435_vm4 = vmor %vm433_vm13, %vm434_vm15 }
 0x140   : > { %v545_v40 = vmul.f32 %v466_v37, %v918_v41  ;;  %v506_v42 = vsel %vm505_vm12, %v748_v4, %v502_v34  ;;  %v400_v43 = vmul.f32 0.5, %v399_v36  ;;  %v389_v48 = vmul.f32 %v754_v32, %v388_v39  ;;  %vm395_vm6 = vmor %vm393_vm5, %vm394_vm2 }
 0x141   : > { %v549_v44 = vmul.f32 %v506_v42, %v920_v45  ;;  %v430_v47 = vmul.f32 0.5, %v429_v38  ;;  %v348_v51 = vpop.xlane.xlu2 %347  ;;  %vm483_vm9 = vweird.f32 %v1021_v33  ;;  %vm473_vm10 = vweird.f32 %v1024_v28 }
 0x142   : > { %561 = vst.msk [vmem:[%s1007_s27 + $0x40] sm:$0xff] %vm312_vm0, %v545_v40  ;;  %v401_v52 = vsub.f32 1.5, %v400_v43  ;;  %v1037_v46 = vmax.f32 %v348_v51, 1e-24  ;;  %v324_v53 = vpop.xlane.xlu1 %323  ;;  %v390_v56 = vmul.f32 0.5, %v389_v48 }
 0x143   : > { %v1039_v54 = vpop.eup %755  ;;  %565 = vst.msk [vmem:[%s1007_s27 + $0x60] sm:$0xff] %vm312_vm0, %v549_v44  ;;  %v431_v41 = vsub.f32 1.5, %v430_v47  ;;  %v1049_v4 = vmax.f32 %v324_v53, 1e-24 }
 0x144   : > { %v333_v45 = vpop.xlane.xlu0 %332  ;;  %v402_v58 = vmul.f32 %v750_v23, %v401_v52  ;;  %v478_v59 = vmul.f32 %v1039_v54, %v1021_v33  ;;  %759 = vrsqrt.f32 %v1037_v46  ;;  %v391_v63 = vsub.f32 1.5, %v390_v56 }
 0x145   : > { %v758_v57 = vpop.eup %757  ;;  %v432_v62 = vmul.f32 %v752_v26, %v431_v41  ;;  %v1055_v7 = vmax.f32 %v333_v45, 1e-24  ;;  %vm484_vm7 = vweird.f32 %v1039_v54  ;;  %vm493_vm13 = vweird.f32 %v1037_v46 }
 0x146   : > { %v468_v0 = vmul.f32 %v758_v57, %v1024_v28  ;;  %v406_v60 = vsel %vm405_vm3, %v750_v23, %v402_v58  ;;  %v479_v5 = vmul.f32 %v1039_v54, %v478_v59  ;;  %v392_v10 = vmul.f32 %v754_v32, %v391_v63  ;;  %vm485_vm11 = vmor %vm483_vm9, %vm484_vm7 }
 0x147   : > { %v436_v9 = vsel %vm435_vm4, %v752_v26, %v432_v62  ;;  %v539_v11 = vmul.f32 %v406_v60, %v934_v55  ;;  %761 = vrsqrt.f32 %v1055_v7  ;;  %vm474_vm8 = vweird.f32 %v758_v57 }
 0x148   : > { %v469_v13 = vmul.f32 %v758_v57, %v468_v0  ;;  %v542_v14 = vmul.f32 %v436_v9, %v927_v49  ;;  %v480_v15 = vmul.f32 0.5, %v479_v5  ;;  %v396_v2 = vsel %vm395_vm6, %v754_v32, %v392_v10  ;;  %vm475_vm12 = vmor %vm473_vm10, %vm474_vm8 }
 0x149   : > { %555 = vst.msk [vmem:[%s1007_s27 + $0x10] sm:$0xff] %vm312_vm0, %v539_v11  ;;  %763 = vrsqrt.f32 %v1049_v4  ;;  %v357_v16 = vpop.xlane.xlu2 %356  ;;  %v538_v55 = vmul.f32 %v396_v2, %v929_v50  ;;  %vm443_vm15 = vweird.f32 %v1055_v7  ;;  %vm413_vm1 = vweird.f32 %v1049_v4 }
 0x14a   : > { %v470_v3 = vmul.f32 0.5, %v469_v13  ;;  %v760_v18 = vpop.eup %759  ;;  %558 = vst.msk [vmem:[%s1007_s27 + $0x28] sm:$0xff] %vm312_vm0, %v542_v14  ;;  %v481_v20 = vsub.f32 1.5, %v480_v15  ;;  %v1068_v49 = vmax.f32 %v357_v16, 1e-24  ;;  %v336_v21 = vpop.xlane.xlu1 %335 }
 0x14b   : > { %v488_v24 = vmul.f32 %v760_v18, %v1037_v46  ;;  %v1071_v26 = vmax.f32 %v336_v21, 1e-24  ;;  %554 = vst.msk [vmem:[%s1007_s27 + $0x8] sm:$0xff] %vm312_vm0, %v538_v55  ;;  %vm494_vm14 = vweird.f32 %v760_v18 }
 0x14c   : > { %v471_v23 = vsub.f32 1.5, %v470_v3  ;;  %v360_v25 = vpop.xlane.xlu0 %359  ;;  %v482_v35 = vmul.f32 %v1039_v54, %v481_v20  ;;  %765 = vrsqrt.f32 %v1068_v49  ;;  %vm495_vm2 = vmor %vm493_vm13, %vm494_vm14  ;;  %vm523_vm6 = vweird.f32 %v1068_v49 }
 0x14d   : > { %v1078_v50 = vmax.f32 %v360_v25, 1e-24  ;;  %v489_v30 = vmul.f32 %v760_v18, %v488_v24  ;;  %767 = vrsqrt.f32 %v1071_v26  ;;  %v762_v31 = vpop.eup %761  ;;  %vm453_vm13 = vweird.f32 %v1071_v26 }
 0x14e   : > { %v472_v27 = vmul.f32 %v758_v57, %v471_v23  ;;  %v486_v33 = vsel %vm485_vm11, %v1039_v54, %v482_v35  ;;  %v438_v28 = vmul.f32 %v762_v31, %v1055_v7  ;;  %vm444_vm3 = vweird.f32 %v762_v31 }
 0x14f   : > { %769 = vrsqrt.f32 %v1078_v50  ;;  %v764_v32 = vpop.eup %763  ;;  %v547_v36 = vmul.f32 %v486_v33, %v945_v1  ;;  %v490_v37 = vmul.f32 0.5, %v489_v30  ;;  %vm445_vm5 = vmor %vm443_vm15, %vm444_vm3  ;;  %vm533_vm7 = vweird.f32 %v1078_v50 }
 0x150   : > { %v476_v34 = vsel %vm475_vm12, %v758_v57, %v472_v27  ;;  %v408_v39 = vmul.f32 %v764_v32, %v1049_v4  ;;  %v439_v42 = vmul.f32 %v762_v31, %v438_v28  ;;  %vm414_vm4 = vweird.f32 %v764_v32 }
 0x151   : > { %v546_v38 = vmul.f32 %v476_v34, %v942_v61  ;;  %563 = vst.msk [vmem:[%s1007_s27 + $0x50] sm:$0xff] %vm312_vm0, %v547_v36  ;;  %v491_v40 = vsub.f32 1.5, %v490_v37  ;;  %vm415_vm8 = vmor %vm413_vm1, %vm414_vm4 }
 0x152   : > { %v766_v43 = vpop.eup %765  ;;  %v409_v1 = vmul.f32 %v764_v32, %v408_v39  ;;  %v354_v44 = vpop.xlane.xlu1 %353  ;;  %v440_v51 = vmul.f32 0.5, %v439_v42 }
 0x153   : > { %562 = vst.msk [vmem:[%s1007_s27 + $0x48] sm:$0xff] %vm312_vm0, %v546_v38  ;;  %v768_v47 = vpop.eup %767  ;;  %v492_v48 = vmul.f32 %v760_v18, %v491_v40  ;;  %v518_v61 = vmul.f32 %v766_v43, %v1068_v49  ;;  %v374_v54 = vmax.f32 %v354_v44, 1e-24  ;;  %vm524_vm9 = vweird.f32 %v766_v43 }
 0x154   : > { %v410_v46 = vmul.f32 0.5, %v409_v1  ;;  %v448_v53 = vmul.f32 %v768_v47, %v1071_v26  ;;  %v441_v56 = vsub.f32 1.5, %v440_v51  ;;  %vm454_vm10 = vweird.f32 %v768_v47  ;;  %vm525_vm12 = vmor %vm523_vm6, %vm524_vm9 }
 0x155   : > { %v770_v52 = vpop.eup %769  ;;  %v496_v41 = vsel %vm495_vm2, %v760_v18, %v492_v48  ;;  %v519_v45 = vmul.f32 %v766_v43, %v518_v61  ;;  %771 = vrsqrt.f32 %v374_v54  ;;  %vm455_vm14 = vmor %vm453_vm13, %vm454_vm10  ;;  %vm513_vm2 = vweird.f32 %v374_v54 }
 0x156   : > { %v528_v57 = vmul.f32 %v770_v52, %v1078_v50  ;;  %v548_v58 = vmul.f32 %v496_v41, %v959_v12  ;;  %v411_v59 = vsub.f32 1.5, %v410_v46  ;;  %v449_v62 = vmul.f32 %v768_v47, %v448_v53 }
 0x157   : > { %v442_v63 = vmul.f32 %v762_v31, %v441_v56  ;;  %v520_v0 = vmul.f32 0.5, %v519_v45  ;;  %vm534_vm11 = vweird.f32 %v770_v52 }
 0x158   : > { %v529_v60 = vmul.f32 %v770_v52, %v528_v57  ;;  %564 = vst.msk [vmem:[%s1007_s27 + $0x58] sm:$0xff] %vm312_vm0, %v548_v58  ;;  %v412_v5 = vmul.f32 %v764_v32, %v411_v59  ;;  %v450_v12 = vmul.f32 0.5, %v449_v62  ;;  %vm535_vm15 = vmor %vm533_vm7, %vm534_vm11 }
 0x159   : > { %v446_v9 = vsel %vm445_vm5, %v762_v31, %v442_v63  ;;  %v521_v10 = vsub.f32 1.5, %v520_v0 }
 0x15a   : > { %v530_v11 = vmul.f32 0.5, %v529_v60  ;;  %v543_v13 = vmul.f32 %v446_v9, %v954_v8  ;;  %v416_v14 = vsel %vm415_vm8, %v764_v32, %v412_v5  ;;  %v451_v7 = vsub.f32 1.5, %v450_v12 }
 0x15b   : > { %v540_v15 = vmul.f32 %v416_v14, %v951_v6  ;;  %v522_v2 = vmul.f32 %v766_v43, %v521_v10  ;;  %v772_v8 = vpop.eup %771 }
 0x15c   : > { %v531_v3 = vsub.f32 1.5, %v530_v11  ;;  %559 = vst.msk [vmem:[%s1007_s27 + $0x30] sm:$0xff] %vm312_vm0, %v543_v13  ;;  %v452_v4 = vmul.f32 %v768_v47, %v451_v7  ;;  %v508_v20 = vmul.f32 %v772_v8, %v374_v54  ;;  %vm514_vm1 = vweird.f32 %v772_v8 }
 0x15d   : > { %556 = vst.msk [vmem:[%s1007_s27 + $0x18] sm:$0xff] %vm312_vm0, %v540_v15  ;;  %v526_v16 = vsel %vm525_vm12, %v766_v43, %v522_v2  ;;  %vm515_vm3 = vmor %vm513_vm2, %vm514_vm1 }
 0x15e   : > { %v532_v18 = vmul.f32 %v770_v52, %v531_v3  ;;  %v551_v6 = vmul.f32 %v526_v16, %v965_v17  ;;  %v456_v55 = vsel %vm455_vm14, %v768_v47, %v452_v4  ;;  %v509_v24 = vmul.f32 %v772_v8, %v508_v20 }
 0x15f   : > { %v544_v21 = vmul.f32 %v456_v55, %v968_v19 }
 0x160   : > { %v536_v49 = vsel %vm535_vm15, %v770_v52, %v532_v18  ;;  %567 = vst.msk [vmem:[%s1007_s27 + $0x70] sm:$0xff] %vm312_vm0, %v551_v6  ;;  %v510_v25 = vmul.f32 0.5, %v509_v24 }
 0x161   : > { %v552_v23 = vmul.f32 %v536_v49, %v972_v22  ;;  %560 = vst.msk [vmem:[%s1007_s27 + $0x38] sm:$0xff] %vm312_vm0, %v544_v21 }
 0x162   : > { %v511_v17 = vsub.f32 1.5, %v510_v25 }
 0x163   : > { %568 = vst.msk [vmem:[%s1007_s27 + $0x78] sm:$0xff] %vm312_vm0, %v552_v23 }
 0x164   : > { %v512_v26 = vmul.f32 %v772_v8, %v511_v17 }
 0x166   : > { %v516_v35 = vsel %vm515_vm3, %v772_v8, %v512_v26 }
 0x167   : > { %v550_v50 = vmul.f32 %v516_v35, %v983_v29 }
 0x169   : > { %566 = vst.msk [vmem:[%s1007_s27 + $0x68] sm:$0xff] %vm312_vm0, %v550_v50 }
 0x16a PF: > { %s12_s11 = sadd.s32 1, %s795_s11   ;;  %s1148_s9 = smov %s791_s10 }
 0x16b   : > { %p9_p5 = scmp.ge.s32.totalorder %s12_s11, 4   ;;  %s1149_s10 = smov %s1151_s12 }
 0x16d   :  { %11 = sbr.rel (!%p9_p5) target bundleno = 2 (0x2), region = 58 }

// kernel: gnn_bet_forward.7
= control target key start
LH: loop header
LB: loop body
LE: loop exit
PB: predicated region body
PF: predicated region fallthrough
CT: control target
= control target key end

     0   :  { %s1000_s12 = smov 0   ;;  %s1002_s13 = smov 0   ;;  %s1255_s0 = inlined_call_operand.vmem [shape: f32[2,128,128], index: 0, kind: input, shape index: {}]   ;;  %s1256_s1 = inlined_call_operand.vmem [shape: f32[2,128,32], index: 1, kind: input, shape index: {}]   ;;  %s1257_s2 = inlined_call_operand.vmem [shape: f32[32,32], index: 2, kind: input, shape index: {}]   ;;  %s1258_s3 = inlined_call_operand.vmem [shape: f32[2,128,32], index: 3, kind: output, shape index: {}]  }
   0x1   :  { %s1004_s14 = smov 0  }
   0x2 LB: > { %s25_s15 = sadd.s32 1, %s974_s13  ;;  %p836_p0 = scmp.ge.s32.totalorder %s978_s14, 1  ;;  %s978_s14 = sphi %s1004_s14, %s13_s14   ;;  %s974_s13 = sphi %s1002_s13, %s1260_s13   ;;  %s970_s12 = sphi %s1000_s12, %s1259_s12  }
   0x3   : > { %p27_p1 = scmp.ge.s32.totalorder %s25_s15, 2  ;;  %p168_p2 = scmp.lt.s32.totalorder %s978_s14, 3 }
   0x5   : > { %s1262_s15 = smov (%p27_p1, %s25_s15), 0  ;;  %p169_p3 = pnand %p836_p0, %p168_p2 }
   0x6   : > { %p206_p4 = scmp.lt.s32.totalorder (!%p169_p3), %s970_s12, 1 }
   0x7   : > { %172 = sbr.rel (%p169_p3) target bundleno = 523 (0x20b), region = 32 }
   0xc   : > { %s1264_s12 = smov (!%p206_p4, %s970_s12), 1  ;;  %v330_v25 = vld [vmem:[%s1257_s2 + $0x18] sm:$0xff]  ;;  %v329_v26 = vld [vmem:[%s1257_s2 + $0x10] sm:$0xff]  ;;  %v328_v27 = vld [vmem:[%s1257_s2 + $0x8] sm:$0xff]  ;;  %vm331_vm0 = vcmask 261120  }
   0xd   : > { %s1018_s16 = sshll.u32 %s1264_s12, 7  ;;  %392 = vmatpush.msra.mxu1 %v330_v25  ;;  %v327_v35 = vld [vmem:[%s1257_s2] sm:$0xff] }
   0xe   : > { %s1024_s19 = scalar_lea.vmem %s1256_s1, %s1018_s16  ;;  %s1045_s22 = scalar_lea.vmem %s1255_s0, %s1018_s16 }
   0xf   : > { %v261_v0 = vld [vmem:[%s1024_s19 + $0x78] sm:$0xff]  ;;  %v260_v1 = vld [vmem:[%s1024_s19 + $0x70] sm:$0xff]  ;;  %v259_v2 = vld [vmem:[%s1024_s19 + $0x68] sm:$0xff]  ;;  %393 = vmatpush.msra.mxu1 %v329_v26  ;;  %s1176_s6 = scalar_lea.vmem %s1258_s3, %s1018_s16 }
  0x10   : > { %262 = vmatpush.msra.mxu0 %v261_v0  ;;  %864 = vmatpush.msra.mxu2 %v261_v0  ;;  %v258_v3 = vld [vmem:[%s1024_s19 + $0x60] sm:$0xff]  ;;  %v257_v4 = vld [vmem:[%s1024_s19 + $0x58] sm:$0xff]  ;;  %v256_v5 = vld [vmem:[%s1024_s19 + $0x50] sm:$0xff] }
  0x11   : > { %865 = vmatpush.msra.mxu3 %v261_v0  ;;  %v255_v6 = vld [vmem:[%s1024_s19 + $0x48] sm:$0xff]  ;;  %v254_v7 = vld [vmem:[%s1024_s19 + $0x40] sm:$0xff]  ;;  %v253_v8 = vld [vmem:[%s1024_s19 + $0x38] sm:$0xff]  ;;  %394 = vmatpush.msra.mxu1 %v328_v27 }
  0x12   : > { %263 = vmatpush.msra.mxu0 %v260_v1  ;;  %866 = vmatpush.msra.mxu2 %v260_v1  ;;  %v252_v9 = vld [vmem:[%s1024_s19 + $0x30] sm:$0xff]  ;;  %v251_v10 = vld [vmem:[%s1024_s19 + $0x28] sm:$0xff]  ;;  %v250_v11 = vld [vmem:[%s1024_s19 + $0x20] sm:$0xff] }
  0x13   : > { %867 = vmatpush.msra.mxu3 %v260_v1  ;;  %v249_v12 = vld [vmem:[%s1024_s19 + $0x18] sm:$0xff]  ;;  %v248_v13 = vld [vmem:[%s1024_s19 + $0x10] sm:$0xff]  ;;  %v247_v14 = vld [vmem:[%s1024_s19 + $0x8] sm:$0xff]  ;;  %395 = vmatpush.msra.mxu1 %v327_v35 }
  0x14   : > { %264 = vmatpush.msra.mxu0 %v259_v2  ;;  %868 = vmatpush.msra.mxu2 %v259_v2  ;;  %v246_v15 = vld [vmem:[%s1024_s19] sm:$0xff]  ;;  %v237_v17 = vld [vmem:[%s1045_s22 + $0x38] sm:$0xff]  ;;  %v231_v18 = vld [vmem:[%s1045_s22 + $0x8] sm:$0xff] }
  0x15   : > { %869 = vmatpush.msra.mxu3 %v259_v2  ;;  %v230_v16 = vld [vmem:[%s1045_s22] sm:$0xff]  ;;  %v232_v20 = vld [vmem:[%s1045_s22 + $0x10] sm:$0xff]  ;;  %v239_v21 = vld [vmem:[%s1045_s22 + $0x48] sm:$0xff] }
  0x16   : > { %265 = vmatpush.msra.mxu0 %v258_v3  ;;  %870 = vmatpush.msra.mxu2 %v258_v3  ;;  %v238_v19 = vld [vmem:[%s1045_s22 + $0x40] sm:$0xff]  ;;  %v233_v22 = vld [vmem:[%s1045_s22 + $0x18] sm:$0xff]  ;;  %v240_v23 = vld [vmem:[%s1045_s22 + $0x50] sm:$0xff] }
  0x17   : > { %871 = vmatpush.msra.mxu3 %v258_v3  ;;  %v245_v24 = vld [vmem:[%s1045_s22 + $0x78] sm:$0xff]  ;;  %v234_v28 = vld [vmem:[%s1045_s22 + $0x20] sm:$0xff]  ;;  %v235_v30 = vld [vmem:[%s1045_s22 + $0x28] sm:$0xff] }
  0x18   : > { %266 = vmatpush.msra.mxu0 %v257_v4  ;;  %872 = vmatpush.msra.mxu2 %v257_v4  ;;  %v241_v29 = vld [vmem:[%s1045_s22 + $0x58] sm:$0xff]  ;;  %v242_v31 = vld [vmem:[%s1045_s22 + $0x60] sm:$0xff]  ;;  %v236_v32 = vld [vmem:[%s1045_s22 + $0x30] sm:$0xff] }
  0x19   : > { %873 = vmatpush.msra.mxu3 %v257_v4  ;;  %v243_v33 = vld [vmem:[%s1045_s22 + $0x68] sm:$0xff]  ;;  %v244_v34 = vld [vmem:[%s1045_s22 + $0x70] sm:$0xff] }
  0x1a   : > { %267 = vmatpush.msra.mxu0 %v256_v5  ;;  %874 = vmatpush.msra.mxu2 %v256_v5 }
  0x1b   : > { %875 = vmatpush.msra.mxu3 %v256_v5 }
  0x1c   : > { %268 = vmatpush.msra.mxu0 %v255_v6  ;;  %876 = vmatpush.msra.mxu2 %v255_v6 }
  0x1d   : > { %877 = vmatpush.msra.mxu3 %v255_v6 }
  0x1e   : > { %269 = vmatpush.msra.mxu0 %v254_v7  ;;  %878 = vmatpush.msra.mxu2 %v254_v7 }
  0x1f   : > { %879 = vmatpush.msra.mxu3 %v254_v7 }
  0x20   : > { %270 = vmatpush.msra.mxu0 %v253_v8  ;;  %880 = vmatpush.msra.mxu2 %v253_v8 }
  0x21   : > { %881 = vmatpush.msra.mxu3 %v253_v8 }
  0x22   : > { %271 = vmatpush.msra.mxu0 %v252_v9  ;;  %882 = vmatpush.msra.mxu2 %v252_v9 }
  0x23   : > { %883 = vmatpush.msra.mxu3 %v252_v9 }
  0x24   : > { %272 = vmatpush.msra.mxu0 %v251_v10  ;;  %884 = vmatpush.msra.mxu2 %v251_v10 }
  0x25   : > { %885 = vmatpush.msra.mxu3 %v251_v10 }
  0x26   : > { %273 = vmatpush.msra.mxu0 %v250_v11  ;;  %886 = vmatpush.msra.mxu2 %v250_v11 }
  0x27   : > { %887 = vmatpush.msra.mxu3 %v250_v11 }
  0x28   : > { %274 = vmatpush.msra.mxu0 %v249_v12  ;;  %888 = vmatpush.msra.mxu2 %v249_v12 }
  0x29   : > { %889 = vmatpush.msra.mxu3 %v249_v12 }
  0x2a   : > { %275 = vmatpush.msra.mxu0 %v248_v13  ;;  %890 = vmatpush.msra.mxu2 %v248_v13 }
  0x2b   : > { %891 = vmatpush.msra.mxu3 %v248_v13 }
  0x2c   : > { %276 = vmatpush.msra.mxu0 %v247_v14  ;;  %892 = vmatpush.msra.mxu2 %v247_v14 }
  0x2d   : > { %893 = vmatpush.msra.mxu3 %v247_v14 }
  0x2e   : > { %277 = vmatpush.msra.mxu0 %v246_v15  ;;  %894 = vmatpush.msra.mxu2 %v246_v15 }
  0x2f   : > { %278 = vmatmul.f32.vlgmr.msra.gmra.mxu0 %v230_v16  ;;  %299 = vmatmul.f32.vlgmr.msra.gmra.mxu2 %v237_v17 }
  0x30   : > { %895 = vmatpush.msra.mxu3 %v246_v15 }
  0x31   : > { %323 = vmatmul.f32.vlgmr.msra.gmra.mxu3 %v245_v24 }
  0x32   : > { %896 = vmatpush.msrb.mxu3 %v330_v25 }
  0x34   : > { %897 = vmatpush.msrb.mxu3 %v329_v26 }
  0x36   : > { %898 = vmatpush.msrb.mxu3 %v328_v27 }
  0x37   : > { %281 = vmatmul.f32.gmra.mxu0 %v231_v18  ;;  %302 = vmatmul.f32.gmra.mxu2 %v238_v19 }
  0x38   : > { %899 = vmatpush.msrb.mxu3 %v327_v35 }
  0x3f   : > { %284 = vmatmul.f32.gmra.mxu0 %v232_v20  ;;  %305 = vmatmul.f32.gmra.mxu2 %v239_v21 }
  0x47   : > { %287 = vmatmul.f32.gmra.mxu0 %v233_v22  ;;  %308 = vmatmul.f32.gmra.mxu2 %v240_v23 }
  0x4f   : > { %290 = vmatmul.f32.gmra.mxu0 %v234_v28  ;;  %311 = vmatmul.f32.gmra.mxu2 %v241_v29 }
  0x57   : > { %293 = vmatmul.f32.gmra.mxu0 %v235_v30  ;;  %314 = vmatmul.f32.gmra.mxu2 %v242_v31 }
  0x5f   : > { %296 = vmatmul.f32.gmra.mxu0 %v236_v32  ;;  %317 = vmatmul.f32.gmra.mxu2 %v243_v33 }
  0x67   : > { %320 = vmatmul.f32.gmra.mxu2 %v244_v34 }
  0xac   : > { %v279_v36 = vpop.f32.mrf.mxu0 }
  0xad   : > { %843 = vmatmul.msk.f32.vlgmr.msra.gmra.mxu1 %vm331_vm0, %v279_v36 }
  0xb2   : > { %v300_v37 = vpop.f32.mrf.mxu2 }
  0xb4   : > { %v282_v38 = vpop.f32.mrf.mxu0  ;;  %v324_v51 = vpop.f32.mrf.mxu3 }
  0xb5   : > { %844 = vmatmul.msk.f32.gmra.mxu1 %vm331_vm0, %v282_v38 }
  0xba   : > { %v303_v39 = vpop.f32.mrf.mxu2 }
  0xbc   : > { %v285_v40 = vpop.f32.mrf.mxu0 }
  0xbd   : > { %845 = vmatmul.msk.f32.gmra.mxu1 %vm331_vm0, %v285_v40 }
  0xc2   : > { %v306_v41 = vpop.f32.mrf.mxu2 }
  0xc4   : > { %v288_v42 = vpop.f32.mrf.mxu0 }
  0xc5   : > { %846 = vmatmul.msk.f32.gmra.mxu1 %vm331_vm0, %v288_v42 }
  0xca   : > { %v309_v43 = vpop.f32.mrf.mxu2 }
  0xcb   : > { %853 = vmatmul.msk.f32.vlgmr.msrb.gmra.mxu3 %vm331_vm0, %v309_v43 }
  0xcc   : > { %v291_v44 = vpop.f32.mrf.mxu0 }
  0xcd   : > { %847 = vmatmul.msk.f32.gmra.mxu1 %vm331_vm0, %v291_v44 }
  0xd2   : > { %v312_v45 = vpop.f32.mrf.mxu2 }
  0xd3   : > { %854 = vmatmul.msk.f32.gmra.mxu3 %vm331_vm0, %v312_v45 }
  0xd4   : > { %v294_v46 = vpop.f32.mrf.mxu0 }
  0xd5   : > { %848 = vmatmul.msk.f32.gmra.mxu1 %vm331_vm0, %v294_v46 }
  0xda   : > { %v315_v47 = vpop.f32.mrf.mxu2 }
  0xdb   : > { %855 = vmatmul.msk.f32.gmra.mxu3 %vm331_vm0, %v315_v47 }
  0xdc   : > { %v297_v48 = vpop.f32.mrf.mxu0 }
  0xdd   : > { %849 = vmatmul.msk.f32.gmra.mxu1 %vm331_vm0, %v297_v48 }
  0xe2   : > { %v318_v49 = vpop.f32.mrf.mxu2 }
  0xe3   : > { %856 = vmatmul.msk.f32.gmra.mxu3 %vm331_vm0, %v318_v49 }
  0xe5   : > { %850 = vmatmul.msk.f32.gmra.mxu1 %vm331_vm0, %v300_v37 }
  0xea   : > { %v321_v50 = vpop.f32.mrf.mxu2 }
  0xeb   : > { %857 = vmatmul.msk.f32.gmra.mxu3 %vm331_vm0, %v321_v50 }
  0xed   : > { %851 = vmatmul.msk.f32.gmra.mxu1 %vm331_vm0, %v303_v39 }
  0xf3   : > { %858 = vmatmul.msk.f32.gmra.mxu3 %vm331_vm0, %v324_v51 }
  0xf5   : > { %852 = vmatmul.msk.f32.gmra.mxu1 %vm331_vm0, %v306_v41 }
 0x12a   : > { %v397_v52 = vpop.f32.mrf.mxu1 }
 0x12b   : > { %v1092_v53 = vmax.f32 %v397_v52, 0.0 }
 0x12d   : > { %v461_v54 = vmul.f32 %v1092_v53, %v1092_v53 }
 0x12f   : > { %v477_v55 = vsel %vm331_vm0, %v461_v54, 0.0 }
 0x130   : > { %478 = vadd.xlane.f32.xlu0 %v477_v55 }
 0x132   : > { %v400_v56 = vpop.f32.mrf.mxu1 }
 0x133   : > { %v1097_v57 = vmax.f32 %v400_v56, 0.0 }
 0x135   : > { %v462_v58 = vmul.f32 %v1097_v57, %v1097_v57 }
 0x137   : > { %v480_v59 = vsel %vm331_vm0, %v462_v58, 0.0 }
 0x138   : > { %481 = vadd.xlane.f32.xlu0 %v480_v59 }
 0x13a   : > { %v403_v60 = vpop.f32.mrf.mxu1 }
 0x13b   : > { %v1102_v61 = vmax.f32 %v403_v60, 0.0 }
 0x13d   : > { %v463_v62 = vmul.f32 %v1102_v61, %v1102_v61 }
 0x13f   : > { %v483_v63 = vsel %vm331_vm0, %v463_v62, 0.0 }
 0x140   : > { %484 = vadd.xlane.f32.xlu1 %v483_v63 }
 0x142   : > { %v406_v0 = vpop.f32.mrf.mxu1 }
 0x143   : > { %v1107_v1 = vmax.f32 %v406_v0, 0.0 }
 0x145   : > { %v464_v2 = vmul.f32 %v1107_v1, %v1107_v1 }
 0x147   : > { %v486_v3 = vsel %vm331_vm0, %v464_v2, 0.0 }
 0x148   : > { %487 = vadd.xlane.f32.xlu1 %v486_v3 }
 0x14a   : > { %v409_v4 = vpop.f32.mrf.mxu1 }
 0x14b   : > { %v1112_v5 = vmax.f32 %v409_v4, 0.0 }
 0x14d   : > { %v465_v6 = vmul.f32 %v1112_v5, %v1112_v5 }
 0x14e   : > { %v427_v7 = vpop.f32.mrf.mxu3 }
 0x14f   : > { %v1116_v8 = vmax.f32 %v427_v7, 0.0  ;;  %v489_v9 = vsel %vm331_vm0, %v465_v6, 0.0 }
 0x150   : > { %490 = vadd.xlane.f32.xlu2 %v489_v9 }
 0x151   : > { %v471_v10 = vmul.f32 %v1116_v8, %v1116_v8 }
 0x152   : > { %v412_v11 = vpop.f32.mrf.mxu1 }
 0x153   : > { %v1121_v12 = vmax.f32 %v412_v11, 0.0  ;;  %v507_v13 = vsel %vm331_vm0, %v471_v10, 0.0 }
 0x154   : > { %508 = vadd.xlane.f32.xlu1 %v507_v13 }
 0x155   : > { %v466_v14 = vmul.f32 %v1121_v12, %v1121_v12 }
 0x156   : > { %v430_v15 = vpop.f32.mrf.mxu3 }
 0x157   : > { %v492_v16 = vsel %vm331_vm0, %v466_v14, 0.0  ;;  %v1127_v17 = vmax.f32 %v430_v15, 0.0 }
 0x158   : > { %493 = vadd.xlane.f32.xlu2 %v492_v16 }
 0x159   : > { %v472_v18 = vmul.f32 %v1127_v17, %v1127_v17 }
 0x15a   : > { %v415_v19 = vpop.f32.mrf.mxu1 }
 0x15b   : > { %v1131_v20 = vmax.f32 %v415_v19, 0.0  ;;  %v510_v21 = vsel %vm331_vm0, %v472_v18, 0.0 }
 0x15d   : > { %v467_v22 = vmul.f32 %v1131_v20, %v1131_v20 }
 0x15e   : > { %v433_v23 = vpop.f32.mrf.mxu3 }
 0x15f   : > { %v495_v24 = vsel %vm331_vm0, %v467_v22, 0.0  ;;  %v1137_v25 = vmax.f32 %v433_v23, 0.0 }
 0x160   : > { %511 = vadd.xlane.f32.xlu2 %v510_v21  ;;  %496 = vadd.xlane.f32.xlu0 %v495_v24 }
 0x161   : > { %v473_v26 = vmul.f32 %v1137_v25, %v1137_v25 }
 0x162   : > { %v418_v27 = vpop.f32.mrf.mxu1 }
 0x163   : > { %v1141_v28 = vmax.f32 %v418_v27, 0.0  ;;  %v513_v29 = vsel %vm331_vm0, %v473_v26, 0.0 }
 0x165   : > { %v468_v30 = vmul.f32 %v1141_v28, %v1141_v28 }
 0x166   : > { %v436_v31 = vpop.f32.mrf.mxu3 }
 0x167   : > { %v498_v32 = vsel %vm331_vm0, %v468_v30, 0.0  ;;  %v1147_v33 = vmax.f32 %v436_v31, 0.0 }
 0x168   : > { %514 = vadd.xlane.f32.xlu0 %v513_v29  ;;  %499 = vadd.xlane.f32.xlu1 %v498_v32 }
 0x169   : > { %v474_v34 = vmul.f32 %v1147_v33, %v1147_v33 }
 0x16a   : > { %v421_v35 = vpop.f32.mrf.mxu1 }
 0x16b   : > { %v1151_v36 = vmax.f32 %v421_v35, 0.0  ;;  %v516_v37 = vsel %vm331_vm0, %v474_v34, 0.0 }
 0x16d   : > { %v469_v38 = vmul.f32 %v1151_v36, %v1151_v36 }
 0x16e   : > { %v439_v39 = vpop.f32.mrf.mxu3 }
 0x16f   : > { %v501_v40 = vsel %vm331_vm0, %v469_v38, 0.0  ;;  %v1157_v41 = vmax.f32 %v439_v39, 0.0 }
 0x170   : > { %517 = vadd.xlane.f32.xlu1 %v516_v37  ;;  %502 = vadd.xlane.f32.xlu2 %v501_v40 }
 0x171   : > { %v475_v42 = vmul.f32 %v1157_v41, %v1157_v41 }
 0x172   : > { %v424_v43 = vpop.f32.mrf.mxu1 }
 0x173   : > { %v1161_v44 = vmax.f32 %v424_v43, 0.0  ;;  %v519_v46 = vsel %vm331_vm0, %v475_v42, 0.0 }
 0x175   : > { %v470_v45 = vmul.f32 %v1161_v44, %v1161_v44 }
 0x176   : > { %v442_v47 = vpop.f32.mrf.mxu3 }
 0x177   : > { %v504_v48 = vsel %vm331_vm0, %v470_v45, 0.0  ;;  %v1167_v49 = vmax.f32 %v442_v47, 0.0 }
 0x178   : > { %520 = vadd.xlane.f32.xlu2 %v519_v46  ;;  %505 = vadd.xlane.f32.xlu0 %v504_v48 }
 0x179   : > { %v476_v50 = vmul.f32 %v1167_v49, %v1167_v49 }
 0x17b   : > { %v522_v51 = vsel %vm331_vm0, %v476_v50, 0.0 }
 0x180   : > { %523 = vadd.xlane.f32.xlu0 %v522_v51 }
 0x1a3   : > { %v479_v52 = vpop.xlane.xlu0 %478 }
 0x1a4   : > { %v525_v54 = vmax.f32 %v479_v52, 1e-24 }
 0x1a6   : > { %924 = vrsqrt.f32 %v525_v54  ;;  %vm547_vm2 = vweird.f32 %v525_v54 }
 0x1ab   : > { %v482_v55 = vpop.xlane.xlu0 %481 }
 0x1ac   : > { %v925_v56 = vpop.eup %924  ;;  %v526_v58 = vmax.f32 %v482_v55, 1e-24 }
 0x1ad   : > { %v542_v59 = vmul.f32 %v925_v56, %v525_v54  ;;  %vm548_vm1 = vweird.f32 %v925_v56 }
 0x1ae   : > { %926 = vrsqrt.f32 %v526_v58  ;;  %vm549_vm3 = vmor %vm547_vm2, %vm548_vm1  ;;  %vm557_vm5 = vweird.f32 %v526_v58 }
 0x1af   : > { %v543_v60 = vmul.f32 %v925_v56, %v542_v59 }
 0x1b1   : > { %v544_v62 = vmul.f32 0.5, %v543_v60 }
 0x1b3   : > { %v545_v63 = vsub.f32 1.5, %v544_v62  ;;  %v485_v0 = vpop.xlane.xlu1 %484 }
 0x1b4   : > { %v927_v2 = vpop.eup %926  ;;  %v527_v3 = vmax.f32 %v485_v0, 1e-24 }
 0x1b5   : > { %v546_v4 = vmul.f32 %v925_v56, %v545_v63  ;;  %v552_v6 = vmul.f32 %v927_v2, %v526_v58  ;;  %vm558_vm4 = vweird.f32 %v927_v2 }
 0x1b6   : > { %928 = vrsqrt.f32 %v527_v3  ;;  %vm559_vm6 = vmor %vm557_vm5, %vm558_vm4  ;;  %vm567_vm8 = vweird.f32 %v527_v3 }
 0x1b7   : > { %v550_v7 = vsel %vm549_vm3, %v925_v56, %v546_v4  ;;  %v553_v9 = vmul.f32 %v927_v2, %v552_v6 }
 0x1b8   : > { %v701_v10 = vmul.f32 %v550_v7, %v1092_v53 }
 0x1b9   : > { %v554_v11 = vmul.f32 0.5, %v553_v9 }
 0x1ba   : > { %717 = vst.msk [vmem:[%s1176_s6] sm:$0xff] %vm331_vm0, %v701_v10 }
 0x1bb   : > { %v555_v13 = vsub.f32 1.5, %v554_v11  ;;  %v488_v14 = vpop.xlane.xlu1 %487 }
 0x1bc   : > { %v929_v15 = vpop.eup %928  ;;  %v528_v16 = vmax.f32 %v488_v14, 1e-24 }
 0x1bd   : > { %v556_v18 = vmul.f32 %v927_v2, %v555_v13  ;;  %v562_v19 = vmul.f32 %v929_v15, %v527_v3  ;;  %vm568_vm7 = vweird.f32 %v929_v15 }
 0x1be   : > { %930 = vrsqrt.f32 %v528_v16  ;;  %vm569_vm9 = vmor %vm567_vm8, %vm568_vm7  ;;  %vm577_vm11 = vweird.f32 %v528_v16 }
 0x1bf   : > { %v560_v21 = vsel %vm559_vm6, %v927_v2, %v556_v18  ;;  %v563_v22 = vmul.f32 %v929_v15, %v562_v19 }
 0x1c0   : > { %v702_v23 = vmul.f32 %v560_v21, %v1097_v57 }
 0x1c1   : > { %v564_v24 = vmul.f32 0.5, %v563_v22 }
 0x1c2   : > { %718 = vst.msk [vmem:[%s1176_s6 + $0x8] sm:$0xff] %vm331_vm0, %v702_v23 }
 0x1c3   : > { %v565_v53 = vsub.f32 1.5, %v564_v24  ;;  %v491_v26 = vpop.xlane.xlu2 %490 }
 0x1c4   : > { %v931_v27 = vpop.eup %930  ;;  %v529_v29 = vmax.f32 %v491_v26, 1e-24 }
 0x1c5   : > { %v566_v30 = vmul.f32 %v929_v15, %v565_v53  ;;  %v572_v31 = vmul.f32 %v931_v27, %v528_v16  ;;  %vm578_vm10 = vweird.f32 %v931_v27 }
 0x1c6   : > { %932 = vrsqrt.f32 %v529_v29  ;;  %vm579_vm12 = vmor %vm577_vm11, %vm578_vm10  ;;  %vm587_vm14 = vweird.f32 %v529_v29 }
 0x1c7   : > { %v570_v32 = vsel %vm569_vm9, %v929_v15, %v566_v30  ;;  %v573_v34 = vmul.f32 %v931_v27, %v572_v31  ;;  %v509_v35 = vpop.xlane.xlu1 %508 }
 0x1c8   : > { %v703_v37 = vmul.f32 %v570_v32, %v1102_v61  ;;  %v535_v57 = vmax.f32 %v509_v35, 1e-24 }
 0x1c9   : > { %v574_v38 = vmul.f32 0.5, %v573_v34 }
 0x1ca   : > { %719 = vst.msk [vmem:[%s1176_s6 + $0x10] sm:$0xff] %vm331_vm0, %v703_v37  ;;  %934 = vrsqrt.f32 %v535_v57  ;;  %vm647_vm2 = vweird.f32 %v535_v57 }
 0x1cb   : > { %v575_v39 = vsub.f32 1.5, %v574_v38  ;;  %v494_v40 = vpop.xlane.xlu2 %493 }
 0x1cc   : > { %v933_v42 = vpop.eup %932  ;;  %v530_v43 = vmax.f32 %v494_v40, 1e-24 }
 0x1cd   : > { %v576_v45 = vmul.f32 %v931_v27, %v575_v39  ;;  %v582_v46 = vmul.f32 %v933_v42, %v529_v29  ;;  %vm588_vm13 = vweird.f32 %v933_v42 }
 0x1ce   : > { %936 = vrsqrt.f32 %v530_v43  ;;  %vm589_vm15 = vmor %vm587_vm14, %vm588_vm13  ;;  %vm597_vm5 = vweird.f32 %v530_v43 }
 0x1cf   : > { %v580_v47 = vsel %vm579_vm12, %v931_v27, %v576_v45  ;;  %v583_v48 = vmul.f32 %v933_v42, %v582_v46 }
 0x1d0   : > { %v935_v50 = vpop.eup %934  ;;  %v704_v61 = vmul.f32 %v580_v47, %v1107_v1 }
 0x1d1   : > { %v584_v51 = vmul.f32 0.5, %v583_v48  ;;  %v642_v52 = vmul.f32 %v935_v50, %v535_v57  ;;  %vm648_vm1 = vweird.f32 %v935_v50 }
 0x1d2   : > { %720 = vst.msk [vmem:[%s1176_s6 + $0x18] sm:$0xff] %vm331_vm0, %v704_v61  ;;  %vm649_vm3 = vmor %vm647_vm2, %vm648_vm1 }
 0x1d3   : > { %v585_v54 = vsub.f32 1.5, %v584_v51  ;;  %v643_v55 = vmul.f32 %v935_v50, %v642_v52  ;;  %v512_v56 = vpop.xlane.xlu2 %511  ;;  %v497_v58 = vpop.xlane.xlu0 %496 }
 0x1d4   : > { %v937_v59 = vpop.eup %936  ;;  %v536_v60 = vmax.f32 %v512_v56, 1e-24  ;;  %v1190_v62 = vmax.f32 %v497_v58, 1e-24 }
 0x1d5   : > { %v586_v63 = vmul.f32 %v933_v42, %v585_v54  ;;  %v644_v0 = vmul.f32 0.5, %v643_v55  ;;  %v592_v2 = vmul.f32 %v937_v59, %v530_v43  ;;  %vm598_vm4 = vweird.f32 %v937_v59 }
 0x1d6   : > { %938 = vrsqrt.f32 %v536_v60  ;;  %vm599_vm6 = vmor %vm597_vm5, %vm598_vm4  ;;  %vm657_vm9 = vweird.f32 %v536_v60  ;;  %vm607_vm11 = vweird.f32 %v1190_v62 }
 0x1d7   : > { %v590_v1 = vsel %vm589_vm15, %v933_v42, %v586_v63  ;;  %v645_v3 = vsub.f32 1.5, %v644_v0  ;;  %v593_v4 = vmul.f32 %v937_v59, %v592_v2  ;;  %940 = vrsqrt.f32 %v1190_v62 }
 0x1d8   : > { %v705_v6 = vmul.f32 %v590_v1, %v1112_v5 }
 0x1d9   : > { %v646_v7 = vmul.f32 %v935_v50, %v645_v3  ;;  %v594_v9 = vmul.f32 0.5, %v593_v4 }
 0x1da   : > { %721 = vst.msk [vmem:[%s1176_s6 + $0x20] sm:$0xff] %vm331_vm0, %v705_v6 }
 0x1db   : > { %v650_v10 = vsel %vm649_vm3, %v935_v50, %v646_v7  ;;  %v595_v11 = vsub.f32 1.5, %v594_v9  ;;  %v515_v13 = vpop.xlane.xlu0 %514  ;;  %v500_v14 = vpop.xlane.xlu1 %499 }
 0x1dc   : > { %v939_v15 = vpop.eup %938  ;;  %v711_v16 = vmul.f32 %v650_v10, %v1116_v8  ;;  %v537_v18 = vmax.f32 %v515_v13, 1e-24  ;;  %v1197_v19 = vmax.f32 %v500_v14, 1e-24 }
 0x1dd   : > { %v941_v5 = vpop.eup %940  ;;  %v596_v21 = vmul.f32 %v937_v59, %v595_v11  ;;  %v652_v22 = vmul.f32 %v939_v15, %v536_v60  ;;  %vm658_vm7 = vweird.f32 %v939_v15 }
 0x1de   : > { %727 = vst.msk [vmem:[%s1176_s6 + $0x50] sm:$0xff] %vm331_vm0, %v711_v16  ;;  %v602_v23 = vmul.f32 %v941_v5, %v1190_v62  ;;  %942 = vrsqrt.f32 %v537_v18  ;;  %vm608_vm8 = vweird.f32 %v941_v5  ;;  %vm659_vm10 = vmor %vm657_vm9, %vm658_vm7  ;;  %vm667_vm15 = vweird.f32 %v537_v18 }
 0x1df   : > { %v600_v24 = vsel %vm599_vm6, %v937_v59, %v596_v21  ;;  %v653_v53 = vmul.f32 %v939_v15, %v652_v22  ;;  %944 = vrsqrt.f32 %v1197_v19  ;;  %vm609_vm12 = vmor %vm607_vm11, %vm608_vm8  ;;  %vm617_vm2 = vweird.f32 %v1197_v19 }
 0x1e0   : > { %v706_v8 = vmul.f32 %v600_v24, %v1121_v12  ;;  %v603_v26 = vmul.f32 %v941_v5, %v602_v23 }
 0x1e1   : > { %v654_v27 = vmul.f32 0.5, %v653_v53 }
 0x1e2   : > { %722 = vst.msk [vmem:[%s1176_s6 + $0x28] sm:$0xff] %vm331_vm0, %v706_v8  ;;  %v604_v29 = vmul.f32 0.5, %v603_v26 }
 0x1e3   : > { %v655_v30 = vsub.f32 1.5, %v654_v27  ;;  %v518_v31 = vpop.xlane.xlu1 %517  ;;  %v503_v32 = vpop.xlane.xlu2 %502 }
 0x1e4   : > { %v943_v34 = vpop.eup %942  ;;  %v605_v35 = vsub.f32 1.5, %v604_v29  ;;  %v1206_v37 = vmax.f32 %v518_v31, 1e-24  ;;  %v1208_v57 = vmax.f32 %v503_v32, 1e-24 }
 0x1e5   : > { %v945_v38 = vpop.eup %944  ;;  %v656_v39 = vmul.f32 %v939_v15, %v655_v30  ;;  %v662_v12 = vmul.f32 %v943_v34, %v537_v18  ;;  %vm668_vm13 = vweird.f32 %v943_v34 }
 0x1e6   : > { %v606_v40 = vmul.f32 %v941_v5, %v605_v35  ;;  %v612_v42 = vmul.f32 %v945_v38, %v1197_v19  ;;  %946 = vrsqrt.f32 %v1206_v37  ;;  %vm618_vm14 = vweird.f32 %v945_v38  ;;  %vm669_vm1 = vmor %vm667_vm15, %vm668_vm13 }
 0x1e7   : > { %v660_v43 = vsel %vm659_vm10, %v939_v15, %v656_v39  ;;  %v663_v45 = vmul.f32 %v943_v34, %v662_v12  ;;  %948 = vrsqrt.f32 %v1208_v57  ;;  %vm619_vm3 = vmor %vm617_vm2, %vm618_vm14  ;;  %vm677_vm6 = vweird.f32 %v1206_v37 }
 0x1e8   : > { %v712_v46 = vmul.f32 %v660_v43, %v1127_v17  ;;  %v610_v47 = vsel %vm609_vm12, %v941_v5, %v606_v40  ;;  %v613_v48 = vmul.f32 %v945_v38, %v612_v42  ;;  %vm627_vm8 = vweird.f32 %v1208_v57 }
 0x1e9   : > { %v707_v50 = vmul.f32 %v610_v47, %v1131_v20  ;;  %v664_v61 = vmul.f32 0.5, %v663_v45 }
 0x1ea   : > { %728 = vst.msk [vmem:[%s1176_s6 + $0x58] sm:$0xff] %vm331_vm0, %v712_v46  ;;  %v614_v51 = vmul.f32 0.5, %v613_v48 }
 0x1eb   : > { %723 = vst.msk [vmem:[%s1176_s6 + $0x30] sm:$0xff] %vm331_vm0, %v707_v50  ;;  %v665_v52 = vsub.f32 1.5, %v664_v61  ;;  %v521_v54 = vpop.xlane.xlu2 %520  ;;  %v506_v55 = vpop.xlane.xlu0 %505 }
 0x1ec   : > { %v947_v56 = vpop.eup %946  ;;  %v615_v58 = vsub.f32 1.5, %v614_v51  ;;  %v539_v59 = vmax.f32 %v521_v54, 1e-24  ;;  %v534_v60 = vmax.f32 %v506_v55, 1e-24 }
 0x1ed   : > { %v949_v17 = vpop.eup %948  ;;  %v666_v62 = vmul.f32 %v943_v34, %v665_v52  ;;  %v672_v20 = vmul.f32 %v947_v56, %v1206_v37  ;;  %vm678_vm4 = vweird.f32 %v947_v56 }
 0x1ee   : > { %v616_v63 = vmul.f32 %v945_v38, %v615_v58  ;;  %v622_v0 = vmul.f32 %v949_v17, %v1208_v57  ;;  %950 = vrsqrt.f32 %v539_v59  ;;  %vm628_vm5 = vweird.f32 %v949_v17  ;;  %vm679_vm7 = vmor %vm677_vm6, %vm678_vm4 }
 0x1ef   : > { %v670_v2 = vsel %vm669_vm1, %v943_v34, %v666_v62  ;;  %v673_v1 = vmul.f32 %v947_v56, %v672_v20  ;;  %952 = vrsqrt.f32 %v534_v60  ;;  %vm629_vm9 = vmor %vm627_vm8, %vm628_vm5  ;;  %vm687_vm12 = vweird.f32 %v539_v59 }
 0x1f0   : > { %v713_v3 = vmul.f32 %v670_v2, %v1137_v25  ;;  %v620_v4 = vsel %vm619_vm3, %v945_v38, %v616_v63  ;;  %v623_v6 = vmul.f32 %v949_v17, %v622_v0  ;;  %vm637_vm14 = vweird.f32 %v534_v60 }
 0x1f1   : > { %v708_v7 = vmul.f32 %v620_v4, %v1141_v28  ;;  %v674_v9 = vmul.f32 0.5, %v673_v1 }
 0x1f2   : > { %729 = vst.msk [vmem:[%s1176_s6 + $0x60] sm:$0xff] %vm331_vm0, %v713_v3  ;;  %v624_v10 = vmul.f32 0.5, %v623_v6 }
 0x1f3   : > { %724 = vst.msk [vmem:[%s1176_s6 + $0x38] sm:$0xff] %vm331_vm0, %v708_v7  ;;  %v675_v11 = vsub.f32 1.5, %v674_v9  ;;  %v524_v13 = vpop.xlane.xlu0 %523 }
 0x1f4   : > { %v951_v14 = vpop.eup %950  ;;  %v625_v15 = vsub.f32 1.5, %v624_v10  ;;  %v540_v16 = vmax.f32 %v524_v13, 1e-24 }
 0x1f5   : > { %v953_v18 = vpop.eup %952  ;;  %v676_v19 = vmul.f32 %v947_v56, %v675_v11  ;;  %v682_v25 = vmul.f32 %v951_v14, %v539_v59  ;;  %vm688_vm10 = vweird.f32 %v951_v14 }
 0x1f6   : > { %v626_v28 = vmul.f32 %v949_v17, %v625_v15  ;;  %v632_v5 = vmul.f32 %v953_v18, %v534_v60  ;;  %954 = vrsqrt.f32 %v540_v16  ;;  %vm638_vm11 = vweird.f32 %v953_v18  ;;  %vm689_vm13 = vmor %vm687_vm12, %vm688_vm10 }
 0x1f7   : > { %v680_v21 = vsel %vm679_vm7, %v947_v56, %v676_v19  ;;  %v683_v22 = vmul.f32 %v951_v14, %v682_v25  ;;  %vm639_vm15 = vmor %vm637_vm14, %vm638_vm11  ;;  %vm697_vm2 = vweird.f32 %v540_v16 }
 0x1f8   : > { %v714_v23 = vmul.f32 %v680_v21, %v1147_v33  ;;  %v630_v24 = vsel %vm629_vm9, %v949_v17, %v626_v28  ;;  %v633_v53 = vmul.f32 %v953_v18, %v632_v5 }
 0x1f9   : > { %v709_v8 = vmul.f32 %v630_v24, %v1151_v36  ;;  %v684_v26 = vmul.f32 0.5, %v683_v22 }
 0x1fa   : > { %730 = vst.msk [vmem:[%s1176_s6 + $0x68] sm:$0xff] %vm331_vm0, %v714_v23  ;;  %v634_v27 = vmul.f32 0.5, %v633_v53 }
 0x1fb   : > { %725 = vst.msk [vmem:[%s1176_s6 + $0x40] sm:$0xff] %vm331_vm0, %v709_v8  ;;  %v685_v29 = vsub.f32 1.5, %v684_v26 }
 0x1fc   : > { %v955_v30 = vpop.eup %954  ;;  %v635_v31 = vsub.f32 1.5, %v634_v27 }
 0x1fd   : > { %v686_v32 = vmul.f32 %v951_v14, %v685_v29  ;;  %v692_v33 = vmul.f32 %v955_v30, %v540_v16  ;;  %vm698_vm1 = vweird.f32 %v955_v30 }
 0x1fe   : > { %v636_v34 = vmul.f32 %v953_v18, %v635_v31  ;;  %vm699_vm3 = vmor %vm697_vm2, %vm698_vm1 }
 0x1ff   : > { %v690_v36 = vsel %vm689_vm13, %v951_v14, %v686_v32  ;;  %v693_v35 = vmul.f32 %v955_v30, %v692_v33 }
 0x200   : > { %v715_v37 = vmul.f32 %v690_v36, %v1157_v41  ;;  %v640_v57 = vsel %vm639_vm15, %v953_v18, %v636_v34 }
 0x201   : > { %v710_v38 = vmul.f32 %v640_v57, %v1161_v44  ;;  %v694_v39 = vmul.f32 0.5, %v693_v35 }
 0x202   : > { %731 = vst.msk [vmem:[%s1176_s6 + $0x70] sm:$0xff] %vm331_vm0, %v715_v37 }
 0x203   : > { %726 = vst.msk [vmem:[%s1176_s6 + $0x48] sm:$0xff] %vm331_vm0, %v710_v38  ;;  %v695_v12 = vsub.f32 1.5, %v694_v39 }
 0x205   : > { %v696_v40 = vmul.f32 %v955_v30, %v695_v12 }
 0x207   : > { %v700_v42 = vsel %vm699_vm3, %v955_v30, %v696_v40 }
 0x208   : > { %v716_v43 = vmul.f32 %v700_v42, %v1167_v49 }
 0x20a   : > { %732 = vst.msk [vmem:[%s1176_s6 + $0x78] sm:$0xff] %vm331_vm0, %v716_v43 }
 0x20b PF: > { %s13_s14 = sadd.s32 1, %s978_s14   ;;  %s1259_s12 = smov %s974_s13 }
 0x20c   : > { %p10_p5 = scmp.ge.s32.totalorder %s13_s14, 4   ;;  %s1260_s13 = smov %s1262_s15 }
 0x20e   :  { %12 = sbr.rel (!%p10_p5) target bundleno = 2 (0x2), region = 65 }

// kernel: gnn_bet_forward.11
= control target key start
LH: loop header
LB: loop body
LE: loop exit
PB: predicated region body
PF: predicated region fallthrough
CT: control target
= control target key end

     0   :  { %s4951_s19 = smov 0   ;;  %s4953_s20 = smov 0   ;;  %s7414_s0 = inlined_call_operand.vmem [shape: f32[2,128,128], index: 0, kind: input, shape index: {}]   ;;  %s7415_s1 = inlined_call_operand.vmem [shape: f32[2,128,32], index: 1, kind: input, shape index: {}, may-alias: {1,2}]   ;;  %s7416_s2 = inlined_call_operand.vmem [shape: f32[2,128,32], index: 2, kind: input, shape index: {}, may-alias: {1,2}]   ;;  %s7417_s3 = inlined_call_operand.vmem [shape: f32[4,32,32], index: 3, kind: input, shape index: {}]   ;;  %s7418_s4 = inlined_call_operand.vmem [shape: f32[32,32], index: 4, kind: input, shape index: {}]   ;;  %s7419_s5 = inlined_call_operand.vmem [shape: f32[32,64], index: 5, kind: input, shape index: {}]   ;;  %s7420_s6 = inlined_call_operand.vmem [shape: f32[1,64], index: 6, kind: input, shape index: {}]   ;;  %s7421_s7 = inlined_call_operand.vmem [shape: f32[64,64], index: 7, kind: input, shape index: {}]   ;;  %s7422_s8 = inlined_call_operand.vmem [shape: f32[1,64], index: 8, kind: input, shape index: {}]   ;;  %s7423_s9 = inlined_call_operand.vmem [shape: f32[1,64], index: 9, kind: input, shape index: {}]   ;;  %s7424_s10 = inlined_call_operand.<no memory space> [shape: f32[1,1], index: 10, kind: input, shape index: {}]   ;;  %s7425_s11 = inlined_call_operand.vmem [shape: f32[2,128,1], index: 11, kind: output, shape index: {}]  }
   0x1   :  { %v16_v0 = vstv %s7424_s10  ;;  %s4955_s21 = smov 0  }
   0x2   :  { %17 = vst [vmem:[#allocation2] sm:$0x1] %v16_v0 }
   0x3 LB: > { %s35_s10 = sadd.s32 1, %s4882_s20  ;;  %p4373_p0 = scmp.ge.s32.totalorder %s4886_s21, 1  ;;  %s4886_s21 = sphi %s4955_s21, %s23_s21   ;;  %s4882_s20 = sphi %s4953_s20, %s7539_s20   ;;  %s4878_s19 = sphi %s4951_s19, %s7538_s19  }
   0x4   : > { %p37_p1 = scmp.ge.s32.totalorder %s35_s10, 2  ;;  %p387_p2 = scmp.lt.s32.totalorder %s4886_s21, 3 }
   0x6   : > { %s7541_s10 = smov (%p37_p1, %s35_s10), 0  ;;  %p388_p3 = pnand %p4373_p0, %p387_p2 }
   0x8   : > { %391 = sbr.rel (%p388_p3) target bundleno = 2052 (0x804), region = 64 }
   0xd   : > { %v4972_v1 = vld [vmem:[%s7419_s5 + $0x18] sm:$0xff]  ;;  %v4977_v2 = vld [vmem:[%s7419_s5 + $0x10] sm:$0xff]  ;;  %p450_p4 = scmp.lt.s32.totalorder %s4878_s19, 1  ;;  %v4984_v3 = vld [vmem:[%s7419_s5 + $0x8] sm:$0xff]  ;;  %vm605_vm0 = vcmask 261120   ;;  %vm747_vm1 = vcmask 523264  }
   0xe   : > { %666 = vmatpush.msra.mxu1 %v4972_v1  ;;  %4672 = vmatpush.msra.mxu2 %v4972_v1  ;;  %v4993_v4 = vld [vmem:[%s7419_s5] sm:$0xff]  ;;  %v5056_v31 = vld [vmem:[%s7421_s7 + $0x38] sm:$0xff]  ;;  %v5067_v34 = vld [vmem:[%s7421_s7 + $0x30] sm:$0xff] }
   0xf   : > { %s7543_s19 = smov (!%p450_p4, %s4878_s19), 1  ;;  %v5079_v38 = vld [vmem:[%s7421_s7 + $0x28] sm:$0xff]  ;;  %v968_v39 = vld [vmem:[%s7417_s3 + $0x18] sm:$0xff]  ;;  %v5094_v43 = vld [vmem:[%s7421_s7 + $0x20] sm:$0xff] }
  0x10   : > { %667 = vmatpush.msra.mxu1 %v4977_v2  ;;  %4673 = vmatpush.msra.mxu2 %v4977_v2  ;;  %s4988_s28 = sshll.u32 %s7543_s19, 7  ;;  %v5105_v46 = vld [vmem:[%s7421_s7 + $0x18] sm:$0xff]  ;;  %v5112_v48 = vld [vmem:[%s7421_s7 + $0x10] sm:$0xff]  ;;  %v5123_v51 = vld [vmem:[%s7421_s7 + $0x8] sm:$0xff] }
  0x11   : > { %s5000_s14 = scalar_lea.vmem %s7415_s1, %s4988_s28  ;;  %s5006_s17 = scalar_lea.vmem %s7416_s2, %s4988_s28  ;;  %4677 = vmatpush.msra.mxu3 %v968_v39  ;;  %v967_v53 = vld [vmem:[%s7417_s3 + $0x10] sm:$0xff]  ;;  %v5135_v54 = vld [vmem:[%s7421_s7] sm:$0xff]  ;;  %v966_v59 = vld [vmem:[%s7417_s3 + $0x8] sm:$0xff] }
  0x12   : > { %668 = vmatpush.msra.mxu1 %v4984_v3  ;;  %4674 = vmatpush.msra.mxu2 %v4984_v3  ;;  %v515_v5 = vld [vmem:[%s5000_s14 + $0x78] sm:$0xff]  ;;  %v581_v6 = vld [vmem:[%s5006_s17] sm:$0xff]  ;;  %v514_v7 = vld [vmem:[%s5000_s14 + $0x70] sm:$0xff]  ;;  %s5042_s22 = scalar_lea.vmem %s7414_s0, %s4988_s28  ;;  %s7304_s23 = scalar_lea.vmem %s7425_s11, %s4988_s28 }
  0x13   : > { %516 = vmatpush.msra.mxu0 %v515_v5  ;;  %v513_v8 = vld [vmem:[%s5000_s14 + $0x68] sm:$0xff]  ;;  %v512_v9 = vld [vmem:[%s5000_s14 + $0x60] sm:$0xff]  ;;  %v511_v10 = vld [vmem:[%s5000_s14 + $0x58] sm:$0xff]  ;;  %4679 = vmatpush.msra.mxu3 %v967_v53 }
  0x14   : > { %669 = vmatpush.msra.mxu1 %v4993_v4  ;;  %4675 = vmatpush.msra.mxu2 %v4993_v4  ;;  %v582_v11 = vld [vmem:[%s5006_s17 + $0x8] sm:$0xff]  ;;  %v510_v12 = vld [vmem:[%s5000_s14 + $0x50] sm:$0xff]  ;;  %v508_v14 = vld [vmem:[%s5000_s14 + $0x40] sm:$0xff] }
  0x15   : > { %4382 = vmatmul.msk.f32.vlgmr.msra.gmra.mxu1 %vm605_vm0, %v581_v6  ;;  %517 = vmatpush.msra.mxu0 %v514_v7  ;;  %v509_v13 = vld [vmem:[%s5000_s14 + $0x48] sm:$0xff]  ;;  %v507_v15 = vld [vmem:[%s5000_s14 + $0x38] sm:$0xff]  ;;  %v583_v16 = vld [vmem:[%s5006_s17 + $0x10] sm:$0xff] }
  0x16   : > { %1414 = vmatpush.msrb.mxu1 %v4972_v1  ;;  %v506_v17 = vld [vmem:[%s5000_s14 + $0x30] sm:$0xff]  ;;  %v505_v18 = vld [vmem:[%s5000_s14 + $0x28] sm:$0xff]  ;;  %v504_v19 = vld [vmem:[%s5000_s14 + $0x20] sm:$0xff]  ;;  %804 = vmatpush.msrb.mxu2 %v5056_v31 }
  0x17   : > { %518 = vmatpush.msra.mxu0 %v513_v8  ;;  %v503_v20 = vld [vmem:[%s5000_s14 + $0x18] sm:$0xff]  ;;  %v502_v22 = vld [vmem:[%s5000_s14 + $0x10] sm:$0xff]  ;;  %v501_v23 = vld [vmem:[%s5000_s14 + $0x8] sm:$0xff]  ;;  %4681 = vmatpush.msra.mxu3 %v966_v59 }
  0x18   : > { %1415 = vmatpush.msrb.mxu1 %v4977_v2  ;;  %v584_v21 = vld [vmem:[%s5006_s17 + $0x18] sm:$0xff]  ;;  %v500_v24 = vld [vmem:[%s5000_s14] sm:$0xff]  ;;  %v590_v27 = vld [vmem:[%s5006_s17 + $0x48] sm:$0xff]  ;;  %805 = vmatpush.msrb.mxu2 %v5067_v34 }
  0x19   : > { %519 = vmatpush.msra.mxu0 %v512_v9  ;;  %v484_v25 = vld [vmem:[%s5042_s22] sm:$0xff]  ;;  %4391 = vmatmul.msk.f32.vlgmr.msra.gmra.mxu2 %vm605_vm0, %v590_v27  ;;  %v485_v28 = vld [vmem:[%s5042_s22 + $0x8] sm:$0xff]  ;;  %v591_v30 = vld [vmem:[%s5006_s17 + $0x50] sm:$0xff] }
  0x1a   : > { %1416 = vmatpush.msrb.mxu1 %v4984_v3  ;;  %v585_v26 = vld [vmem:[%s5006_s17 + $0x20] sm:$0xff]  ;;  %v586_v29 = vld [vmem:[%s5006_s17 + $0x28] sm:$0xff]  ;;  %v486_v32 = vld [vmem:[%s5042_s22 + $0x10] sm:$0xff]  ;;  %806 = vmatpush.msrb.mxu2 %v5079_v38 }
  0x1b   : > { %520 = vmatpush.msra.mxu0 %v511_v10  ;;  %v587_v33 = vld [vmem:[%s5006_s17 + $0x30] sm:$0xff]  ;;  %v592_v35 = vld [vmem:[%s5006_s17 + $0x58] sm:$0xff]  ;;  %v593_v40 = vld [vmem:[%s5006_s17 + $0x60] sm:$0xff] }
  0x1c   : > { %1417 = vmatpush.msrb.mxu1 %v4993_v4  ;;  %v487_v36 = vld [vmem:[%s5042_s22 + $0x18] sm:$0xff]  ;;  %v488_v41 = vld [vmem:[%s5042_s22 + $0x20] sm:$0xff]  ;;  %v594_v44 = vld [vmem:[%s5006_s17 + $0x68] sm:$0xff]  ;;  %807 = vmatpush.msrb.mxu2 %v5094_v43 }
  0x1d   : > { %4383 = vmatmul.msk.f32.gmra.mxu1 %vm605_vm0, %v582_v11  ;;  %521 = vmatpush.msra.mxu0 %v510_v12  ;;  %v588_v37 = vld [vmem:[%s5006_s17 + $0x38] sm:$0xff]  ;;  %v589_v42 = vld [vmem:[%s5006_s17 + $0x40] sm:$0xff]  ;;  %v489_v45 = vld [vmem:[%s5042_s22 + $0x28] sm:$0xff] }
  0x1e   : > { %2235 = vmatpush.msra.mxu1 %v5056_v31  ;;  %v595_v47 = vld [vmem:[%s5006_s17 + $0x70] sm:$0xff]  ;;  %808 = vmatpush.msrb.mxu2 %v5105_v46  ;;  %v596_v50 = vld [vmem:[%s5006_s17 + $0x78] sm:$0xff]  ;;  %v492_v55 = vld [vmem:[%s5042_s22 + $0x40] sm:$0xff] }
  0x1f   : > { %522 = vmatpush.msra.mxu0 %v509_v13  ;;  %v490_v49 = vld [vmem:[%s5042_s22 + $0x30] sm:$0xff]  ;;  %v491_v52 = vld [vmem:[%s5042_s22 + $0x38] sm:$0xff]  ;;  %v493_v56 = vld [vmem:[%s5042_s22 + $0x48] sm:$0xff] }
  0x20   : > { %2236 = vmatpush.msra.mxu1 %v5067_v34  ;;  %809 = vmatpush.msrb.mxu2 %v5112_v48  ;;  %v494_v57 = vld [vmem:[%s5042_s22 + $0x50] sm:$0xff]  ;;  %v495_v58 = vld [vmem:[%s5042_s22 + $0x58] sm:$0xff]  ;;  %v5149_v60 = vld [vmem:[%s7420_s6] ss:$0 sm:$0xff] }
  0x21   : > { %523 = vmatpush.msra.mxu0 %v508_v14  ;;  %4392 = vmatmul.msk.f32.gmra.mxu2 %vm605_vm0, %v591_v30  ;;  %v496_v61 = vld [vmem:[%s5042_s22 + $0x60] sm:$0xff]  ;;  %v497_v6 = vld [vmem:[%s5042_s22 + $0x68] sm:$0xff]  ;;  %v498_v10 = vld [vmem:[%s5042_s22 + $0x70] sm:$0xff] }
  0x22   : > { %2237 = vmatpush.msra.mxu1 %v5079_v38  ;;  %810 = vmatpush.msrb.mxu2 %v5123_v51  ;;  %v965_v62 = vld [vmem:[%s7417_s3] sm:$0xff]  ;;  %v499_v14 = vld [vmem:[%s5042_s22 + $0x78] sm:$0xff] }
  0x23   : > { %524 = vmatpush.msra.mxu0 %v507_v15  ;;  %4683 = vmatpush.msra.mxu3 %v965_v62 }
  0x24   : > { %2238 = vmatpush.msra.mxu1 %v5094_v43  ;;  %811 = vmatpush.msrb.mxu2 %v5135_v54 }
  0x25   : > { %4384 = vmatmul.msk.f32.gmra.mxu1 %vm605_vm0, %v583_v16  ;;  %525 = vmatpush.msra.mxu0 %v506_v17 }
  0x26   : > { %2239 = vmatpush.msra.mxu1 %v5105_v46  ;;  %4676 = vmatpush.msra.mxu2 %v968_v39 }
  0x27   : > { %526 = vmatpush.msra.mxu0 %v505_v18  ;;  %1539 = vmatpush.msrb.mxu3 %v5056_v31 }
  0x28   : > { %2240 = vmatpush.msra.mxu1 %v5112_v48  ;;  %4678 = vmatpush.msra.mxu2 %v967_v53 }
  0x29   : > { %527 = vmatpush.msra.mxu0 %v504_v19  ;;  %4393 = vmatmul.msk.f32.gmra.mxu2 %vm605_vm0, %v592_v35 }
  0x2a   : > { %2241 = vmatpush.msra.mxu1 %v5123_v51  ;;  %4680 = vmatpush.msra.mxu2 %v966_v59 }
  0x2b   : > { %528 = vmatpush.msra.mxu0 %v503_v20  ;;  %1540 = vmatpush.msrb.mxu3 %v5067_v34 }
  0x2c   : > { %2242 = vmatpush.msra.mxu1 %v5135_v54  ;;  %4682 = vmatpush.msra.mxu2 %v965_v62 }
  0x2d   : > { %4385 = vmatmul.msk.f32.gmra.mxu1 %vm605_vm0, %v584_v21  ;;  %529 = vmatpush.msra.mxu0 %v502_v22 }
  0x2e   : > { %1541 = vmatpush.msrb.mxu3 %v5079_v38 }
  0x2f   : > { %530 = vmatpush.msra.mxu0 %v501_v23 }
  0x30   : > { %1542 = vmatpush.msrb.mxu3 %v5094_v43 }
  0x31   : > { %531 = vmatpush.msra.mxu0 %v500_v24  ;;  %4394 = vmatmul.msk.f32.gmra.mxu2 %vm605_vm0, %v593_v40 }
  0x32   : > { %532 = vmatmul.f32.vlgmr.msra.gmra.mxu0 %v484_v25  ;;  %1543 = vmatpush.msrb.mxu3 %v5105_v46 }
  0x33   : > { %1029 = vmatpush.msrb.mxu0 %v968_v39 }
  0x34   : > { %1544 = vmatpush.msrb.mxu3 %v5112_v48 }
  0x35   : > { %4386 = vmatmul.msk.f32.gmra.mxu1 %vm605_vm0, %v585_v26  ;;  %1030 = vmatpush.msrb.mxu0 %v967_v53 }
  0x36   : > { %1545 = vmatpush.msrb.mxu3 %v5123_v51 }
  0x37   : > { %1031 = vmatpush.msrb.mxu0 %v966_v59 }
  0x38   : > { %1546 = vmatpush.msrb.mxu3 %v5135_v54 }
  0x39   : > { %4395 = vmatmul.msk.f32.gmra.mxu2 %vm605_vm0, %v594_v44  ;;  %1032 = vmatpush.msrb.mxu0 %v965_v62 }
  0x3a   : > { %535 = vmatmul.f32.gmra.mxu0 %v485_v28 }
  0x3b   : > { %2110 = vmatpush.msra.mxu0 %v4972_v1 }
  0x3d   : > { %4387 = vmatmul.msk.f32.gmra.mxu1 %vm605_vm0, %v586_v29  ;;  %2111 = vmatpush.msra.mxu0 %v4977_v2 }
  0x3f   : > { %2112 = vmatpush.msra.mxu0 %v4984_v3 }
  0x41   : > { %4396 = vmatmul.msk.f32.gmra.mxu2 %vm605_vm0, %v595_v47  ;;  %2113 = vmatpush.msra.mxu0 %v4993_v4 }
  0x42   : > { %538 = vmatmul.f32.gmra.mxu0 %v486_v32 }
  0x45   : > { %4388 = vmatmul.msk.f32.gmra.mxu1 %vm605_vm0, %v587_v33 }
  0x49   : > { %4397 = vmatmul.msk.f32.gmra.mxu2 %vm605_vm0, %v596_v50 }
  0x4a   : > { %541 = vmatmul.f32.gmra.mxu0 %v487_v36 }
  0x4d   : > { %4389 = vmatmul.msk.f32.gmra.mxu1 %vm605_vm0, %v588_v37 }
  0x52   : > { %544 = vmatmul.f32.gmra.mxu0 %v488_v41 }
  0x55   : > { %4390 = vmatmul.msk.f32.gmra.mxu1 %vm605_vm0, %v589_v42 }
  0x5a   : > { %547 = vmatmul.f32.gmra.mxu0 %v489_v45 }
  0x62   : > { %550 = vmatmul.f32.gmra.mxu0 %v490_v49 }
  0x6a   : > { %553 = vmatmul.f32.gmra.mxu0 %v491_v52 }
  0x72   : > { %556 = vmatmul.f32.gmra.mxu0 %v492_v55 }
  0x7a   : > { %559 = vmatmul.f32.gmra.mxu0 %v493_v56 }
  0x82   : > { %562 = vmatmul.f32.gmra.mxu0 %v494_v57 }
  0x8a   : > { %565 = vmatmul.f32.gmra.mxu0 %v495_v58 }
  0x92   : > { %v671_v63 = vpop.f32.mrf.mxu1  ;;  %568 = vmatmul.f32.gmra.mxu0 %v496_v61 }
  0x93   : > { %v672_v0 = vadd.f32 %v5149_v60, %v671_v63 }
  0x95   : > { %v719_v5 = vmax.f32 %v672_v0, 0.0 }
  0x97   : > { %4398 = vmatmul.msk.f32.vlgmr.msrb.gmra.mxu2 %vm747_vm1, %v719_v5  ;;  %v4465_v5 = vld [vmem:[%s7417_s3 + $0x38] sm:$0xff] }
  0x98   : > { %1725 = vmatpush.msrb.mxu2 %v4465_v5 }
  0x9a   : > { %v674_v7 = vpop.f32.mrf.mxu1  ;;  %571 = vmatmul.f32.gmra.mxu0 %v497_v6 }
  0x9b   : > { %v675_v8 = vadd.f32 %v5149_v60, %v674_v7  ;;  %v4464_v7 = vld [vmem:[%s7417_s3 + $0x30] sm:$0xff] }
  0x9c   : > { %v698_v32 = vpop.f32.mrf.mxu2  ;;  %1726 = vmatpush.msrb.mxu2 %v4464_v7 }
  0x9d   : > { %v720_v9 = vmax.f32 %v675_v8, 0.0  ;;  %v699_v44 = vadd.f32 %v5149_v60, %v698_v32 }
  0x9f   : > { %4399 = vmatmul.msk.f32.gmra.mxu2 %vm747_vm1, %v720_v9  ;;  %v728_v47 = vmax.f32 %v699_v44, 0.0 }
  0xa2   : > { %v677_v11 = vpop.f32.mrf.mxu1  ;;  %574 = vmatmul.f32.gmra.mxu0 %v498_v10  ;;  %v4463_v10 = vld [vmem:[%s7417_s3 + $0x28] sm:$0xff] }
  0xa3   : > { %v678_v12 = vadd.f32 %v5149_v60, %v677_v11  ;;  %1727 = vmatpush.msrb.mxu2 %v4463_v10  ;;  %v4462_v11 = vld [vmem:[%s7417_s3 + $0x20] sm:$0xff] }
  0xa4   : > { %v701_v40 = vpop.f32.mrf.mxu2 }
  0xa5   : > { %v721_v13 = vmax.f32 %v678_v12, 0.0  ;;  %v702_v50 = vadd.f32 %v5149_v60, %v701_v40  ;;  %1728 = vmatpush.msrb.mxu2 %v4462_v11 }
  0xa7   : > { %4400 = vmatmul.msk.f32.gmra.mxu2 %vm747_vm1, %v721_v13  ;;  %v729_v53 = vmax.f32 %v702_v50, 0.0 }
  0xaa   : > { %v680_v15 = vpop.f32.mrf.mxu1  ;;  %577 = vmatmul.f32.gmra.mxu0 %v499_v14 }
  0xab   : > { %v681_v16 = vadd.f32 %v5149_v60, %v680_v15 }
  0xac   : > { %v704_v49 = vpop.f32.mrf.mxu2 }
  0xad   : > { %v722_v17 = vmax.f32 %v681_v16, 0.0  ;;  %v705_v56 = vadd.f32 %v5149_v60, %v704_v49 }
  0xaf   : > { %4401 = vmatmul.msk.f32.gmra.mxu2 %vm747_vm1, %v722_v17  ;;  %v5178_v18 = vpop.f32.mrf.mxu0  ;;  %v730_v58 = vmax.f32 %v705_v56, 0.0 }
  0xb2   : > { %v683_v19 = vpop.f32.mrf.mxu1  ;;  %4414 = vmatmul.msk.f32.vlgmr.msrb.gmra.mxu0 %vm605_vm0, %v5178_v18 }
  0xb3   : > { %v684_v20 = vadd.f32 %v5149_v60, %v683_v19  ;;  %2931 = vmatpush.msrb.mxu0 %v5056_v31 }
  0xb4   : > { %v707_v55 = vpop.f32.mrf.mxu2 }
  0xb5   : > { %v723_v21 = vmax.f32 %v684_v20, 0.0  ;;  %2932 = vmatpush.msrb.mxu0 %v5067_v34  ;;  %v708_v59 = vadd.f32 %v5149_v60, %v707_v55 }
  0xb7   : > { %4402 = vmatmul.msk.f32.gmra.mxu2 %vm747_vm1, %v723_v21  ;;  %v5186_v22 = vpop.f32.mrf.mxu0  ;;  %2933 = vmatpush.msrb.mxu0 %v5079_v38  ;;  %v731_v63 = vmax.f32 %v708_v59, 0.0 }
  0xb9   : > { %2934 = vmatpush.msrb.mxu0 %v5094_v43 }
  0xba   : > { %v686_v23 = vpop.f32.mrf.mxu1  ;;  %4415 = vmatmul.msk.f32.gmra.mxu0 %vm605_vm0, %v5186_v22 }
  0xbb   : > { %v687_v24 = vadd.f32 %v5149_v60, %v686_v23  ;;  %2935 = vmatpush.msrb.mxu0 %v5105_v46 }
  0xbc   : > { %v710_v62 = vpop.f32.mrf.mxu2 }
  0xbd   : > { %v724_v25 = vmax.f32 %v687_v24, 0.0  ;;  %2936 = vmatpush.msrb.mxu0 %v5112_v48  ;;  %v711_v0 = vadd.f32 %v5149_v60, %v710_v62 }
  0xbf   : > { %4403 = vmatmul.msk.f32.gmra.mxu2 %vm747_vm1, %v724_v25  ;;  %v5196_v26 = vpop.f32.mrf.mxu0  ;;  %2937 = vmatpush.msrb.mxu0 %v5123_v51  ;;  %v732_v9 = vmax.f32 %v711_v0, 0.0 }
  0xc1   : > { %2938 = vmatpush.msrb.mxu0 %v5135_v54 }
  0xc2   : > { %v689_v27 = vpop.f32.mrf.mxu1  ;;  %4416 = vmatmul.msk.f32.gmra.mxu0 %vm605_vm0, %v5196_v26 }
  0xc3   : > { %v690_v28 = vadd.f32 %v5149_v60, %v689_v27 }
  0xc4   : > { %v713_v8 = vpop.f32.mrf.mxu2 }
  0xc5   : > { %v725_v29 = vmax.f32 %v690_v28, 0.0  ;;  %v714_v12 = vadd.f32 %v5149_v60, %v713_v8 }
  0xc7   : > { %4404 = vmatmul.msk.f32.gmra.mxu2 %vm747_vm1, %v725_v29  ;;  %v5204_v30 = vpop.f32.mrf.mxu0  ;;  %v733_v14 = vmax.f32 %v714_v12, 0.0 }
  0xca   : > { %v692_v33 = vpop.f32.mrf.mxu1  ;;  %4417 = vmatmul.msk.f32.gmra.mxu0 %vm605_vm0, %v5204_v30 }
  0xcb   : > { %v693_v35 = vadd.f32 %v5149_v60, %v692_v33 }
  0xcc   : > { %v716_v15 = vpop.f32.mrf.mxu2 }
  0xcd   : > { %v726_v36 = vmax.f32 %v693_v35, 0.0  ;;  %v717_v16 = vadd.f32 %v5149_v60, %v716_v15 }
  0xcf   : > { %4405 = vmatmul.msk.f32.gmra.mxu2 %vm747_vm1, %v726_v36  ;;  %v5210_v37 = vpop.f32.mrf.mxu0  ;;  %v734_v19 = vmax.f32 %v717_v16, 0.0 }
  0xd2   : > { %v695_v39 = vpop.f32.mrf.mxu1  ;;  %4418 = vmatmul.msk.f32.gmra.mxu0 %vm605_vm0, %v5210_v37 }
  0xd3   : > { %v696_v41 = vadd.f32 %v5149_v60, %v695_v39 }
  0xd5   : > { %v727_v42 = vmax.f32 %v696_v41, 0.0 }
  0xd7   : > { %4406 = vmatmul.msk.f32.gmra.mxu2 %vm747_vm1, %v727_v42  ;;  %v5217_v45 = vpop.f32.mrf.mxu0 }
  0xda   : > { %4419 = vmatmul.msk.f32.gmra.mxu0 %vm605_vm0, %v5217_v45 }
  0xdf   : > { %4407 = vmatmul.msk.f32.gmra.mxu2 %vm747_vm1, %v728_v47  ;;  %v5223_v52 = vpop.f32.mrf.mxu0 }
  0xe7   : > { %4408 = vmatmul.msk.f32.gmra.mxu2 %vm747_vm1, %v729_v53  ;;  %v5227_v57 = vpop.f32.mrf.mxu0 }
  0xe8   : > { %4421 = vmatmul.msk.f32.vlgmr.msra.gmra.mxu3 %vm605_vm0, %v5227_v57 }
  0xef   : > { %4409 = vmatmul.msk.f32.gmra.mxu2 %vm747_vm1, %v730_v58  ;;  %v5233_v61 = vpop.f32.mrf.mxu0 }
  0xf0   : > { %4422 = vmatmul.msk.f32.gmra.mxu3 %vm605_vm0, %v5233_v61 }
  0xf7   : > { %4410 = vmatmul.msk.f32.gmra.mxu2 %vm747_vm1, %v731_v63  ;;  %v5242_v6 = vpop.f32.mrf.mxu0 }
  0xf8   : > { %4423 = vmatmul.msk.f32.gmra.mxu3 %vm605_vm0, %v5242_v6 }
  0xff   : > { %4411 = vmatmul.msk.f32.gmra.mxu2 %vm747_vm1, %v732_v9  ;;  %v5257_v13 = vpop.f32.mrf.mxu0 }
 0x100   : > { %4424 = vmatmul.msk.f32.gmra.mxu3 %vm605_vm0, %v5257_v13 }
 0x107   : > { %4412 = vmatmul.msk.f32.gmra.mxu2 %vm747_vm1, %v733_v14  ;;  %v5263_v17 = vpop.f32.mrf.mxu0 }
 0x108   : > { %4425 = vmatmul.msk.f32.gmra.mxu3 %vm605_vm0, %v5263_v17 }
 0x10f   : > { %4413 = vmatmul.msk.f32.gmra.mxu2 %vm747_vm1, %v734_v19  ;;  %v5268_v20 = vpop.f32.mrf.mxu0 }
 0x110   : > { %4426 = vmatmul.msk.f32.gmra.mxu3 %vm605_vm0, %v5268_v20 }
 0x117   : > { %4420 = vmatmul.msk.f32.vlgmr.msra.gmra.mxu2 %vm605_vm0, %v5223_v52  ;;  %v5274_v21 = vpop.f32.mrf.mxu0 }
 0x118   : > { %2806 = vmatpush.msra.mxu2 %v4972_v1  ;;  %4427 = vmatmul.msk.f32.gmra.mxu3 %vm605_vm0, %v5274_v21 }
 0x11a   : > { %v5279_v60 = vpop.f32.mrf.mxu2  ;;  %2807 = vmatpush.msra.mxu2 %v4977_v2 }
 0x11b   : > { %7430 = vst [vmem:[#allocation3_spill] sm:$0xff] %v5279_v60 }
 0x11c   : > { %2808 = vmatpush.msra.mxu2 %v4984_v3 }
 0x11e   : > { %2809 = vmatpush.msra.mxu2 %v4993_v4 }
 0x11f   : > { %4466 = vmatmul.msk.f32.vlgmr.msrb.gmra.mxu2 %vm605_vm0, %v5178_v18  ;;  %v5286_v23 = vpop.f32.mrf.mxu0 }
 0x120   : > { %3627 = vmatpush.msrb.mxu2 %v5056_v31  ;;  %4428 = vmatmul.msk.f32.gmra.mxu3 %vm605_vm0, %v5286_v23 }
 0x122   : > { %v5291_v1 = vpop.f32.mrf.mxu2  ;;  %3628 = vmatpush.msrb.mxu2 %v5067_v34 }
 0x123   : > { %7431 = vst [vmem:[#allocation4_spill] sm:$0xff] %v5291_v1 }
 0x124   : > { %3629 = vmatpush.msrb.mxu2 %v5079_v38 }
 0x126   : > { %3630 = vmatpush.msrb.mxu2 %v5094_v43 }
 0x127   : > { %4467 = vmatmul.msk.f32.gmra.mxu2 %vm605_vm0, %v5186_v22  ;;  %v5298_v2 = vpop.f32.mrf.mxu0 }
 0x128   : > { %7432 = vst [vmem:[#allocation5_spill] sm:$0xff] %v5298_v2  ;;  %3631 = vmatpush.msrb.mxu2 %v5105_v46  ;;  %4429 = vmatmul.msk.f32.gmra.mxu3 %vm605_vm0, %v5298_v2 }
 0x12a   : > { %v5303_v3 = vpop.f32.mrf.mxu2  ;;  %3632 = vmatpush.msrb.mxu2 %v5112_v48 }
 0x12b   : > { %7433 = vst [vmem:[#allocation6_spill] sm:$0xff] %v5303_v3 }
 0x12c   : > { %3633 = vmatpush.msrb.mxu2 %v5123_v51 }
 0x12e   : > { %3634 = vmatpush.msrb.mxu2 %v5135_v54 }
 0x12f   : > { %4468 = vmatmul.msk.f32.gmra.mxu2 %vm605_vm0, %v5196_v26  ;;  %v1034_v4 = vpop.f32.mrf.mxu0 }
 0x130   : > { %v5310_v31 = vmax.f32 %v1034_v4, 0.0 }
 0x132   : > { %v5312_v34 = vpop.f32.mrf.mxu2  ;;  %v1098_v38 = vmul.f32 %v5310_v31, %v5310_v31 }
 0x133   : > { %7434 = vst [vmem:[#allocation7_spill] sm:$0xff] %v5312_v34 }
 0x134   : > { %v1114_v43 = vsel %vm605_vm0, %v1098_v38, 0.0 }
 0x135   : > { %1115 = vadd.xlane.f32.xlu0 %v1114_v43 }
 0x137   : > { %4469 = vmatmul.msk.f32.gmra.mxu2 %vm605_vm0, %v5204_v30  ;;  %v1037_v46 = vpop.f32.mrf.mxu0 }
 0x138   : > { %v5319_v48 = vmax.f32 %v1037_v46, 0.0 }
 0x13a   : > { %v5321_v51 = vpop.f32.mrf.mxu2  ;;  %v1099_v54 = vmul.f32 %v5319_v48, %v5319_v48 }
 0x13b   : > { %7435 = vst [vmem:[#allocation8_spill] sm:$0xff] %v5321_v51 }
 0x13c   : > { %v1117_v24 = vsel %vm605_vm0, %v1099_v54, 0.0 }
 0x13d   : > { %1118 = vadd.xlane.f32.xlu0 %v1117_v24 }
 0x13f   : > { %4470 = vmatmul.msk.f32.gmra.mxu2 %vm605_vm0, %v5210_v37  ;;  %v1040_v25 = vpop.f32.mrf.mxu0 }
 0x140   : > { %v5328_v27 = vmax.f32 %v1040_v25, 0.0 }
 0x142   : > { %v5330_v28 = vpop.f32.mrf.mxu2  ;;  %v1100_v29 = vmul.f32 %v5328_v27, %v5328_v27 }
 0x143   : > { %7436 = vst [vmem:[#allocation9_spill] sm:$0xff] %v5330_v28 }
 0x144   : > { %v1120_v32 = vsel %vm605_vm0, %v1100_v29, 0.0 }
 0x145   : > { %1121 = vadd.xlane.f32.xlu1 %v1120_v32 }
 0x147   : > { %4471 = vmatmul.msk.f32.gmra.mxu2 %vm605_vm0, %v5217_v45  ;;  %v1043_v33 = vpop.f32.mrf.mxu0 }
 0x148   : > { %v5337_v35 = vmax.f32 %v1043_v33, 0.0 }
 0x14a   : > { %v5339_v36 = vpop.f32.mrf.mxu2  ;;  %v1101_v39 = vmul.f32 %v5337_v35, %v5337_v35 }
 0x14b   : > { %7437 = vst [vmem:[#allocation10_spill] sm:$0xff] %v5339_v36 }
 0x14c   : > { %v1123_v40 = vsel %vm605_vm0, %v1101_v39, 0.0 }
 0x14d   : > { %1124 = vadd.xlane.f32.xlu1 %v1123_v40 }
 0x14f   : > { %4472 = vmatmul.msk.f32.gmra.mxu2 %vm605_vm0, %v5223_v52  ;;  %v1046_v41 = vpop.f32.mrf.mxu0 }
 0x150   : > { %v5346_v42 = vmax.f32 %v1046_v41, 0.0 }
 0x152   : > { %v5348_v44 = vpop.f32.mrf.mxu2  ;;  %v1102_v47 = vmul.f32 %v5346_v42, %v5346_v42 }
 0x153   : > { %7438 = vst [vmem:[#allocation11_spill] sm:$0xff] %v5348_v44 }
 0x154   : > { %v1126_v49 = vsel %vm605_vm0, %v1102_v47, 0.0 }
 0x155   : > { %1127 = vadd.xlane.f32.xlu2 %v1126_v49 }
 0x157   : > { %4473 = vmatmul.msk.f32.gmra.mxu2 %vm605_vm0, %v5227_v57  ;;  %v1049_v50 = vpop.f32.mrf.mxu0 }
 0x158   : > { %v5355_v53 = vmax.f32 %v1049_v50, 0.0 }
 0x15a   : > { %v5357_v55 = vpop.f32.mrf.mxu2  ;;  %v1103_v56 = vmul.f32 %v5355_v53, %v5355_v53 }
 0x15b   : > { %7439 = vst [vmem:[#allocation12_spill] sm:$0xff] %v5357_v55 }
 0x15c   : > { %v1129_v58 = vsel %vm605_vm0, %v1103_v56, 0.0 }
 0x15d   : > { %1130 = vadd.xlane.f32.xlu2 %v1129_v58 }
 0x15f   : > { %4474 = vmatmul.msk.f32.gmra.mxu2 %vm605_vm0, %v5233_v61 }
 0x162   : > { %v5364_v59 = vpop.f32.mrf.mxu2 }
 0x163   : > { %7440 = vst [vmem:[#allocation13_spill] sm:$0xff] %v5364_v59 }
 0x167   : > { %4475 = vmatmul.msk.f32.gmra.mxu2 %vm605_vm0, %v5242_v6 }
 0x16a   : > { %v5368_v62 = vpop.f32.mrf.mxu2 }
 0x16b   : > { %7441 = vst [vmem:[#allocation14_spill] sm:$0xff] %v5368_v62  ;;  %v1055_v63 = vpop.f32.mrf.mxu3 }
 0x16c   : > { %v5370_v0 = vmax.f32 %v1055_v63, 0.0 }
 0x16e   : > { %v1105_v5 = vmul.f32 %v5370_v0, %v5370_v0 }
 0x16f   : > { %4476 = vmatmul.msk.f32.gmra.mxu2 %vm605_vm0, %v5257_v13 }
 0x170   : > { %v1135_v7 = vsel %vm605_vm0, %v1105_v5, 0.0 }
 0x171   : > { %1136 = vadd.xlane.f32.xlu1 %v1135_v7 }
 0x172   : > { %v5377_v8 = vpop.f32.mrf.mxu2 }
 0x173   : > { %7442 = vst [vmem:[#allocation15_spill] sm:$0xff] %v5377_v8  ;;  %v1058_v9 = vpop.f32.mrf.mxu3 }
 0x174   : > { %v5379_v10 = vmax.f32 %v1058_v9, 0.0 }
 0x176   : > { %v1106_v11 = vmul.f32 %v5379_v10, %v5379_v10 }
 0x177   : > { %4477 = vmatmul.msk.f32.gmra.mxu2 %vm605_vm0, %v5263_v17 }
 0x178   : > { %v1138_v12 = vsel %vm605_vm0, %v1106_v11, 0.0 }
 0x179   : > { %1139 = vadd.xlane.f32.xlu2 %v1138_v12 }
 0x17a   : > { %v5386_v14 = vpop.f32.mrf.mxu2 }
 0x17b   : > { %7443 = vst [vmem:[#allocation16_spill] sm:$0xff] %v5386_v14  ;;  %v1061_v15 = vpop.f32.mrf.mxu3 }
 0x17c   : > { %v5414_v47 = vmax.f32 %v1061_v15, 0.0 }
 0x17e   : > { %v1107_v5 = vmul.f32 %v5414_v47, %v5414_v47 }
 0x17f   : > { %4478 = vmatmul.msk.f32.gmra.mxu2 %vm605_vm0, %v5268_v20 }
 0x182   : > { %v5390_v16 = vpop.f32.mrf.mxu2 }
 0x183   : > { %7444 = vst [vmem:[#allocation17_spill] sm:$0xff] %v5390_v16  ;;  %v1064_v19 = vpop.f32.mrf.mxu3 }
 0x184   : > { %v5392_v4 = vmax.f32 %v1064_v19, 0.0  ;;  %v1141_v19 = vsel %vm605_vm0, %v1107_v5, 0.0 }
 0x186   : > { %v1108_v38 = vmul.f32 %v5392_v4, %v5392_v4 }
 0x187   : > { %4479 = vmatmul.msk.f32.gmra.mxu2 %vm605_vm0, %v5274_v21 }
 0x188   : > { %v1144_v43 = vsel %vm605_vm0, %v1108_v38, 0.0 }
 0x189   : > { %1145 = vadd.xlane.f32.xlu1 %v1144_v43 }
 0x18a   : > { %v5399_v46 = vpop.f32.mrf.mxu2 }
 0x18b   : > { %7445 = vst [vmem:[#allocation18_spill] sm:$0xff] %v5399_v46  ;;  %v1067_v54 = vpop.f32.mrf.mxu3 }
 0x18c   : > { %v5401_v24 = vmax.f32 %v1067_v54, 0.0 }
 0x18e   : > { %v1109_v25 = vmul.f32 %v5401_v24, %v5401_v24 }
 0x18f   : > { %4480 = vmatmul.msk.f32.gmra.mxu2 %vm605_vm0, %v5286_v23 }
 0x190   : > { %v1147_v29 = vsel %vm605_vm0, %v1109_v25, 0.0 }
 0x191   : > { %1148 = vadd.xlane.f32.xlu2 %v1147_v29 }
 0x192   : > { %v5408_v32 = vpop.f32.mrf.mxu2 }
 0x193   : > { %7446 = vst [vmem:[#allocation19_spill] sm:$0xff] %v5408_v32  ;;  %v1070_v33 = vpop.f32.mrf.mxu3 }
 0x194   : > { %v5428_v12 = vmax.f32 %v1070_v33, 0.0 }
 0x196   : > { %v1110_v33 = vmul.f32 %v5428_v12, %v5428_v12 }
 0x197   : > { %4481 = vmatmul.msk.f32.gmra.mxu2 %vm605_vm0, %v5298_v2 }
 0x19a   : > { %v1052_v39 = vpop.f32.mrf.mxu2 }
 0x19b   : > { %v5412_v40 = vmax.f32 %v1052_v39, 0.0  ;;  %v1073_v41 = vpop.f32.mrf.mxu3 }
 0x19c   : > { %v5416_v49 = vmax.f32 %v1073_v41, 0.0 }
 0x19d   : > { %v1104_v50 = vmul.f32 %v5412_v40, %v5412_v40 }
 0x19e   : > { %v1111_v58 = vmul.f32 %v5416_v49, %v5416_v49 }
 0x19f   : > { %v1132_v56 = vsel %vm605_vm0, %v1104_v50, 0.0 }
 0x1a0   : > { %1133 = vadd.xlane.f32.xlu0 %v1132_v56  ;;  %v1153_v63 = vsel %vm605_vm0, %v1111_v58, 0.0  ;;  %v1150_v58 = vsel %vm605_vm0, %v1110_v33, 0.0 }
 0x1a1   : > { %1154 = vadd.xlane.f32.xlu1 %v1153_v63 }
 0x1a2   : > { %v1730_v7 = vpop.f32.mrf.mxu2 }
 0x1a3   : > { %v5426_v9 = vmax.f32 %v1730_v7, 0.0  ;;  %v1076_v11 = vpop.f32.mrf.mxu3 }
 0x1a4   : > { %v5430_v15 = vmax.f32 %v1076_v11, 0.0 }
 0x1a5   : > { %v1794_v38 = vmul.f32 %v5426_v9, %v5426_v9 }
 0x1a6   : > { %v1112_v43 = vmul.f32 %v5430_v15, %v5430_v15 }
 0x1a7   : > { %v1810_v25 = vsel %vm605_vm0, %v1794_v38, 0.0 }
 0x1a8   : > { %1142 = vadd.xlane.f32.xlu0 %v1141_v19  ;;  %v1116_v54 = vpop.xlane.xlu0 %1115  ;;  %v1156_v29 = vsel %vm605_vm0, %v1112_v43, 0.0 }
 0x1a9   : > { %v1162_v39 = vmax.f32 %v1116_v54, 1e-24  ;;  %1811 = vadd.xlane.f32.xlu1 %v1810_v25  ;;  %1157 = vadd.xlane.f32.xlu2 %v1156_v29 }
 0x1aa   : > { %v1733_v41 = vpop.f32.mrf.mxu2 }
 0x1ab   : > { %v5441_v50 = vmax.f32 %v1733_v41, 0.0  ;;  %4712 = vrsqrt.f32 %v1162_v39  ;;  %v1079_v56 = vpop.f32.mrf.mxu3  ;;  %vm1184_vm2 = vweird.f32 %v1162_v39 }
 0x1ac   : > { %v5444_v63 = vmax.f32 %v1079_v56, 0.0 }
 0x1ad   : > { %v1795_v5 = vmul.f32 %v5441_v50, %v5441_v50 }
 0x1ae   : > { %v1113_v19 = vmul.f32 %v5444_v63, %v5444_v63 }
 0x1af   : > { %v1813_v11 = vsel %vm605_vm0, %v1795_v5, 0.0 }
 0x1b0   : > { %1151 = vadd.xlane.f32.xlu0 %v1150_v58  ;;  %v1119_v7 = vpop.xlane.xlu0 %1118  ;;  %v1159_v33 = vsel %vm605_vm0, %v1113_v19, 0.0 }
 0x1b1   : > { %v4713_v38 = vpop.eup %4712  ;;  %v1163_v43 = vmax.f32 %v1119_v7, 1e-24  ;;  %1814 = vadd.xlane.f32.xlu2 %v1813_v11 }
 0x1b2   : > { %v1736_v54 = vpop.f32.mrf.mxu2  ;;  %v1179_v25 = vmul.f32 %v4713_v38, %v1162_v39  ;;  %vm1185_vm3 = vweird.f32 %v4713_v38 }
 0x1b3   : > { %4714 = vrsqrt.f32 %v1163_v43  ;;  %v5452_v56 = vmax.f32 %v1736_v54, 0.0  ;;  %vm1186_vm4 = vmor %vm1184_vm2, %vm1185_vm3  ;;  %vm1194_vm5 = vweird.f32 %v1163_v43 }
 0x1b4   : > { %v1180_v29 = vmul.f32 %v4713_v38, %v1179_v25 }
 0x1b5   : > { %v1796_v25 = vmul.f32 %v5452_v56, %v5452_v56 }
 0x1b6   : > { %v1181_v41 = vmul.f32 0.5, %v1180_v29 }
 0x1b8   : > { %1160 = vadd.xlane.f32.xlu0 %v1159_v33  ;;  %v1182_v58 = vsub.f32 1.5, %v1181_v41  ;;  %v1122_v5 = vpop.xlane.xlu1 %1121  ;;  %v1816_v41 = vsel %vm605_vm0, %v1796_v25, 0.0 }
 0x1b9   : > { %v4715_v46 = vpop.eup %4714  ;;  %v1164_v8 = vmax.f32 %v1122_v5, 1e-24 }
 0x1ba   : > { %v1739_v32 = vpop.f32.mrf.mxu2  ;;  %v1183_v7 = vmul.f32 %v4713_v38, %v1182_v58  ;;  %v1189_v16 = vmul.f32 %v4715_v46, %v1163_v43  ;;  %vm1195_vm6 = vweird.f32 %v4715_v46 }
 0x1bb   : > { %v5454_v11 = vmax.f32 %v1739_v32, 0.0  ;;  %4716 = vrsqrt.f32 %v1164_v8  ;;  %vm1196_vm7 = vmor %vm1194_vm5, %vm1195_vm6  ;;  %vm1204_vm8 = vweird.f32 %v1164_v8 }
 0x1bc   : > { %v1190_v19 = vmul.f32 %v4715_v46, %v1189_v16  ;;  %v1187_v39 = vsel %vm1186_vm4, %v4713_v38, %v1183_v7 }
 0x1bd   : > { %v1797_v54 = vmul.f32 %v5454_v11, %v5454_v11  ;;  %v1338_v29 = vmul.f32 %v1187_v39, %v5310_v31 }
 0x1be   : > { %v1191_v33 = vmul.f32 0.5, %v1190_v19 }
 0x1bf   : > { %v1819_v58 = vsel %vm605_vm0, %v1797_v54, 0.0  ;;  %4430 = vmatmul.msk.f32.vlgmr.msrb.gmra.mxu1 %vm605_vm0, %v1338_v29 }
 0x1c0   : > { %1817 = vadd.xlane.f32.xlu0 %v1816_v41  ;;  %v1192_v32 = vsub.f32 1.5, %v1191_v33  ;;  %1820 = vadd.xlane.f32.xlu1 %v1819_v58  ;;  %v1125_v5 = vpop.xlane.xlu1 %1124 }
 0x1c1   : > { %v4717_v16 = vpop.eup %4716  ;;  %v1165_v38 = vmax.f32 %v1125_v5, 1e-24 }
 0x1c2   : > { %v1742_v7 = vpop.f32.mrf.mxu2  ;;  %v1199_v55 = vmul.f32 %v4717_v16, %v1164_v8  ;;  %v1193_v31 = vmul.f32 %v4715_v46, %v1192_v32  ;;  %vm1205_vm9 = vweird.f32 %v4717_v16 }
 0x1c3   : > { %v5464_v43 = vmax.f32 %v1742_v7, 0.0  ;;  %4718 = vrsqrt.f32 %v1165_v38  ;;  %vm1206_vm10 = vmor %vm1204_vm8, %vm1205_vm9  ;;  %vm1214_vm11 = vweird.f32 %v1165_v38 }
 0x1c4   : > { %v1200_v19 = vmul.f32 %v4717_v16, %v1199_v55  ;;  %v1197_v25 = vsel %vm1196_vm7, %v4715_v46, %v1193_v31 }
 0x1c5   : > { %v1798_v39 = vmul.f32 %v5464_v43, %v5464_v43  ;;  %v1339_v54 = vmul.f32 %v1197_v25, %v5319_v48 }
 0x1c6   : > { %v1201_v29 = vmul.f32 0.5, %v1200_v19 }
 0x1c7   : > { %v1822_v33 = vsel %vm605_vm0, %v1798_v39, 0.0  ;;  %4431 = vmatmul.msk.f32.gmra.mxu1 %vm605_vm0, %v1339_v54 }
 0x1c8   : > { %1823 = vadd.xlane.f32.xlu2 %v1822_v33  ;;  %v1202_v41 = vsub.f32 1.5, %v1201_v29  ;;  %v1128_v58 = vpop.xlane.xlu2 %1127 }
 0x1c9   : > { %v4719_v5 = vpop.eup %4718  ;;  %v1166_v32 = vmax.f32 %v1128_v58, 1e-24 }
 0x1ca   : > { %v1745_v7 = vpop.f32.mrf.mxu2  ;;  %v1209_v55 = vmul.f32 %v4719_v5, %v1165_v38  ;;  %v1203_v31 = vmul.f32 %v4717_v16, %v1202_v41  ;;  %vm1215_vm12 = vweird.f32 %v4719_v5 }
 0x1cb   : > { %v5471_v46 = vmax.f32 %v1745_v7, 0.0  ;;  %4720 = vrsqrt.f32 %v1166_v32  ;;  %vm1216_vm13 = vmor %vm1214_vm11, %vm1215_vm12  ;;  %vm1224_vm14 = vweird.f32 %v1166_v32 }
 0x1cc   : > { %v1210_v48 = vmul.f32 %v4719_v5, %v1209_v55  ;;  %v1207_v19 = vsel %vm1206_vm10, %v4717_v16, %v1203_v31 }
 0x1cd   : > { %v1799_v8 = vmul.f32 %v5471_v46, %v5471_v46  ;;  %v1340_v25 = vmul.f32 %v1207_v19, %v5328_v27 }
 0x1ce   : > { %v1211_v39 = vmul.f32 0.5, %v1210_v48 }
 0x1cf   : > { %v1825_v54 = vsel %vm605_vm0, %v1799_v8, 0.0  ;;  %4432 = vmatmul.msk.f32.gmra.mxu1 %vm605_vm0, %v1340_v25 }
 0x1d0   : > { %1826 = vadd.xlane.f32.xlu0 %v1825_v54  ;;  %v1212_v29 = vsub.f32 1.5, %v1211_v39  ;;  %v1131_v33 = vpop.xlane.xlu2 %1130 }
 0x1d1   : > { %v4721_v58 = vpop.eup %4720  ;;  %v1167_v41 = vmax.f32 %v1131_v33, 1e-24 }
 0x1d2   : > { %v1748_v7 = vpop.f32.mrf.mxu2  ;;  %v1219_v55 = vmul.f32 %v4721_v58, %v1166_v32  ;;  %v1213_v16 = vmul.f32 %v4719_v5, %v1212_v29  ;;  %vm1225_vm15 = vweird.f32 %v4721_v58 }
 0x1d3   : > { %v5478_v14 = vmax.f32 %v1748_v7, 0.0  ;;  %4722 = vrsqrt.f32 %v1167_v41  ;;  %vm1226_vm2 = vmor %vm1224_vm14, %vm1225_vm15  ;;  %vm1234_vm3 = vweird.f32 %v1167_v41 }
 0x1d4   : > { %v1220_v27 = vmul.f32 %v4721_v58, %v1219_v55  ;;  %v1217_v31 = vsel %vm1216_vm13, %v4719_v5, %v1213_v16 }
 0x1d5   : > { %v1800_v38 = vmul.f32 %v5478_v14, %v5478_v14  ;;  %v1341_v48 = vmul.f32 %v1217_v31, %v5337_v35 }
 0x1d6   : > { %v1221_v8 = vmul.f32 0.5, %v1220_v27 }
 0x1d7   : > { %v1828_v19 = vsel %vm605_vm0, %v1800_v38, 0.0  ;;  %4433 = vmatmul.msk.f32.gmra.mxu1 %vm605_vm0, %v1341_v48 }
 0x1d8   : > { %1829 = vadd.xlane.f32.xlu1 %v1828_v19  ;;  %v1222_v25 = vsub.f32 1.5, %v1221_v8 }
 0x1d9   : > { %v4723_v39 = vpop.eup %4722 }
 0x1da   : > { %v1751_v54 = vpop.f32.mrf.mxu2  ;;  %v1229_v29 = vmul.f32 %v4723_v39, %v1167_v41  ;;  %v1223_v7 = vmul.f32 %v4721_v58, %v1222_v25  ;;  %vm1235_vm4 = vweird.f32 %v4723_v39 }
 0x1db   : > { %v5485_v33 = vmax.f32 %v1751_v54, 0.0  ;;  %vm1236_vm5 = vmor %vm1234_vm3, %vm1235_vm4 }
 0x1dc   : > { %v1230_v55 = vmul.f32 %v4723_v39, %v1229_v29  ;;  %v1227_v5 = vsel %vm1226_vm2, %v4721_v58, %v1223_v7 }
 0x1dd   : > { %v1801_v35 = vmul.f32 %v5485_v33, %v5485_v33  ;;  %v1342_v32 = vmul.f32 %v1227_v5, %v5346_v42 }
 0x1de   : > { %v1231_v16 = vmul.f32 0.5, %v1230_v55 }
 0x1df   : > { %v1831_v27 = vsel %vm605_vm0, %v1801_v35, 0.0  ;;  %4434 = vmatmul.msk.f32.gmra.mxu1 %vm605_vm0, %v1342_v32 }
 0x1e0   : > { %1832 = vadd.xlane.f32.xlu2 %v1831_v27  ;;  %v1232_v38 = vsub.f32 1.5, %v1231_v16 }
 0x1e2   : > { %v1754_v31 = vpop.f32.mrf.mxu2  ;;  %v1233_v8 = vmul.f32 %v4723_v39, %v1232_v38 }
 0x1e3   : > { %v5492_v48 = vmax.f32 %v1754_v31, 0.0 }
 0x1e4   : > { %v1237_v19 = vsel %vm1236_vm5, %v4723_v39, %v1233_v8  ;;  %v1137_v55 = vpop.xlane.xlu1 %1136 }
 0x1e5   : > { %v1802_v58 = vmul.f32 %v5492_v48, %v5492_v48  ;;  %v1343_v42 = vmul.f32 %v1237_v19, %v5355_v53  ;;  %v1169_v5 = vmax.f32 %v1137_v55, 1e-24 }
 0x1e7   : > { %v1834_v41 = vsel %vm605_vm0, %v1802_v58, 0.0  ;;  %4435 = vmatmul.msk.f32.gmra.mxu1 %vm605_vm0, %v1343_v42  ;;  %4724 = vrsqrt.f32 %v1169_v5  ;;  %vm1254_vm9 = vweird.f32 %v1169_v5 }
 0x1e8   : > { %1835 = vadd.xlane.f32.xlu0 %v1834_v41 }
 0x1ea   : > { %v1757_v25 = vpop.f32.mrf.mxu2 }
 0x1eb   : > { %v5499_v54 = vmax.f32 %v1757_v25, 0.0 }
 0x1ec   : > { %v1140_v35 = vpop.xlane.xlu2 %1139 }
 0x1ed   : > { %v1803_v29 = vmul.f32 %v5499_v54, %v5499_v54  ;;  %v5504_v16 = vmax.f32 %v1140_v35, 1e-24  ;;  %v5508_v31 = vpop.eup %4724 }
 0x1ee   : > { %v1249_v8 = vmul.f32 %v5508_v31, %v1169_v5  ;;  %vm1255_vm10 = vweird.f32 %v5508_v31 }
 0x1ef   : > { %v1837_v7 = vsel %vm605_vm0, %v1803_v29, 0.0  ;;  %vm5538_vm11 = vmor %vm1254_vm9, %vm1255_vm10  ;;  %vm1264_vm14 = vweird.f32 %v5504_v16 }
 0x1f0   : > { %1838 = vadd.xlane.f32.xlu2 %v1837_v7  ;;  %v1250_v7 = vmul.f32 %v5508_v31, %v1249_v8 }
 0x1f2   : > { %v1251_v28 = vmul.f32 0.5, %v1250_v7 }
 0x1f4   : > { %v1252_v51 = vsub.f32 1.5, %v1251_v28 }
 0x1fc   : > { %v1146_v39 = vpop.xlane.xlu1 %1145 }
 0x1fd   : > { %v5522_v44 = vmax.f32 %v1146_v39, 1e-24 }
 0x1ff   : > { %vm1284_vm10 = vweird.f32 %v5522_v44 }
 0x204   : > { %v1149_v27 = vpop.xlane.xlu2 %1148 }
 0x213   : > { %v1134_v53 = vpop.xlane.xlu0 %1133 }
 0x214   : > { %v1168_v32 = vmax.f32 %v1134_v53, 1e-24  ;;  %v5506_v38 = vpop.xlane.xlu1 %1154 }
 0x216   : > { %4726 = vrsqrt.f32 %v1168_v32  ;;  %vm1244_vm7 = vweird.f32 %v1168_v32 }
 0x217   : > { %4728 = vrsqrt.f32 %v5504_v16 }
 0x21b   : > { %v1143_v58 = vpop.xlane.xlu0 %1142 }
 0x21c   : > { %v4727_v19 = vpop.eup %4726  ;;  %v5512_v41 = vmax.f32 %v1143_v58, 1e-24  ;;  %v1812_v25 = vpop.xlane.xlu1 %1811 }
 0x21d   : > { %v1239_v42 = vmul.f32 %v4727_v19, %v1168_v32  ;;  %v5514_v29 = vpop.xlane.xlu2 %1157  ;;  %v1858_v55 = vmax.f32 %v1812_v25, 1e-24  ;;  %v5517_v35 = vpop.eup %4728  ;;  %vm1245_vm6 = vweird.f32 %v4727_v19 }
 0x21e   : > { %v1259_v59 = vmul.f32 %v5517_v35, %v5504_v16  ;;  %vm1246_vm8 = vmor %vm1244_vm7, %vm1245_vm6  ;;  %vm1265_vm2 = vweird.f32 %v5517_v35  ;;  %vm1274_vm6 = vweird.f32 %v5512_v41 }
 0x21f   : > { %v1240_v53 = vmul.f32 %v4727_v19, %v1239_v42  ;;  %4730 = vrsqrt.f32 %v1858_v55  ;;  %vm1880_vm13 = vweird.f32 %v1858_v55  ;;  %vm5557_vm3 = vmor %vm1264_vm14, %vm1265_vm2 }
 0x220   : > { %4732 = vrsqrt.f32 %v5512_v41  ;;  %v1260_v42 = vmul.f32 %v5517_v35, %v1259_v59  ;;  %v5533_v59 = vmax.f32 %v1149_v27, 1e-24 }
 0x221   : > { %v1241_v62 = vmul.f32 0.5, %v1240_v53  ;;  %4734 = vrsqrt.f32 %v5522_v44 }
 0x222   : > { %v1261_v32 = vmul.f32 0.5, %v1260_v42 }
 0x223   : > { %v1242_v58 = vsub.f32 1.5, %v1241_v62  ;;  %v1152_v3 = vpop.xlane.xlu0 %1151 }
 0x225   : > { %v1815_v36 = vpop.xlane.xlu2 %1814  ;;  %v1243_v8 = vmul.f32 %v4727_v19, %v1242_v58  ;;  %v4731_v25 = vpop.eup %4730 }
 0x226   : > { %v1859_v34 = vmax.f32 %v1815_v36, 1e-24  ;;  %v5525_v53 = vpop.eup %4732  ;;  %v1875_v7 = vmul.f32 %v4731_v25, %v1858_v55  ;;  %v1253_v36 = vmul.f32 %v5508_v31, %v1252_v51  ;;  %vm1881_vm12 = vweird.f32 %v4731_v25 }
 0x227   : > { %v1247_v1 = vsel %vm1246_vm8, %v4727_v19, %v1243_v8  ;;  %v1269_v28 = vmul.f32 %v5525_v53, %v5512_v41  ;;  %v5542_v19 = vpop.eup %4734  ;;  %v1262_v8 = vsub.f32 1.5, %v1261_v32  ;;  %vm1882_vm15 = vmor %vm1880_vm13, %vm1881_vm12  ;;  %vm1275_vm8 = vweird.f32 %v5525_v53 }
 0x228   : > { %4736 = vrsqrt.f32 %v1859_v34  ;;  %v1876_v62 = vmul.f32 %v4731_v25, %v1875_v7  ;;  %v1344_v39 = vmul.f32 %v1247_v1, %v5412_v40  ;;  %v1257_v51 = vsel %vm5538_vm11, %v5508_v31, %v1253_v36  ;;  %vm5588_vm9 = vmor %vm1274_vm6, %vm1275_vm8 }
 0x229   : > { %v1270_v42 = vmul.f32 %v5525_v53, %v1269_v28  ;;  %4738 = vrsqrt.f32 %v5533_v59  ;;  %v1345_v28 = vmul.f32 %v1257_v51, %v5370_v0  ;;  %v1263_v36 = vmul.f32 %v5517_v35, %v1262_v8 }
 0x22a   : > { %v1877_v58 = vmul.f32 0.5, %v1876_v62  ;;  %4436 = vmatmul.msk.f32.gmra.mxu1 %vm605_vm0, %v1344_v39  ;;  %v1279_v62 = vmul.f32 %v5542_v19, %v5522_v44  ;;  %vm1890_vm5 = vweird.f32 %v1859_v34  ;;  %vm1285_vm11 = vweird.f32 %v5542_v19 }
 0x22b   : > { %v5536_v60 = vpop.xlane.xlu0 %1160  ;;  %vm5621_vm12 = vmor %vm1284_vm10, %vm1285_vm11  ;;  %vm1294_vm13 = vweird.f32 %v5533_v59 }
 0x22c   : > { %v1878_v1 = vsub.f32 1.5, %v1877_v58  ;;  %v1271_v58 = vmul.f32 0.5, %v1270_v42 }
 0x22e   : > { %v4737_v40 = vpop.eup %4736  ;;  %v1879_v27 = vmul.f32 %v4731_v25, %v1878_v1  ;;  %v1280_v1 = vmul.f32 %v5542_v19, %v1279_v62  ;;  %v1272_v51 = vsub.f32 1.5, %v1271_v58 }
 0x22f   : > { %v1885_v7 = vmul.f32 %v4737_v40, %v1859_v34  ;;  %v5565_v0 = vpop.eup %4738  ;;  %vm1891_vm4 = vweird.f32 %v4737_v40 }
 0x230   : > { %v1883_v39 = vsel %vm1882_vm15, %v4731_v25, %v1879_v27  ;;  %v1267_v27 = vsel %vm5557_vm3, %v5517_v35, %v1263_v36  ;;  %v1281_v62 = vmul.f32 0.5, %v1280_v1  ;;  %vm1892_vm7 = vmor %vm1890_vm5, %vm1891_vm4  ;;  %vm1295_vm3 = vweird.f32 %v5565_v0 }
 0x231   : > { %v1886_v32 = vmul.f32 %v4737_v40, %v1885_v7  ;;  %v2034_v31 = vmul.f32 %v1883_v39, %v5426_v9  ;;  %v5567_v9 = vmax.f32 %v1152_v3, 1e-24  ;;  %v1289_v3 = vmul.f32 %v5565_v0, %v5533_v59  ;;  %vm5661_vm5 = vmor %vm1294_vm13, %vm1295_vm3 }
 0x232   : > { %4437 = vmatmul.msk.f32.gmra.mxu1 %vm605_vm0, %v1345_v28  ;;  %v5581_v39 = vmax.f32 %v5506_v38, 1e-24  ;;  %v1346_v35 = vmul.f32 %v1267_v27, %v5379_v10  ;;  %v1273_v28 = vmul.f32 %v5525_v53, %v1272_v51  ;;  %v1282_v36 = vsub.f32 1.5, %v1281_v62 }
 0x233   : > { %v1887_v5 = vmul.f32 0.5, %v1886_v32  ;;  %v1818_v55 = vpop.xlane.xlu0 %1817  ;;  %v1821_v25 = vpop.xlane.xlu1 %1820  ;;  %4482 = vmatmul.msk.f32.vlgmr.msra.gmra.mxu0 %vm605_vm0, %v2034_v31  ;;  %v1290_v38 = vmul.f32 %v5565_v0, %v1289_v3  ;;  %vm1304_vm8 = vweird.f32 %v5567_v9 }
 0x234   : > { %v5562_v2 = vmax.f32 %v1818_v55, 1e-24  ;;  %v5569_v42 = vmax.f32 %v1821_v25, 1e-24  ;;  %v1277_v16 = vsel %vm5588_vm9, %v5525_v53, %v1273_v28  ;;  %v1283_v62 = vmul.f32 %v5542_v19, %v1282_v36 }
 0x235   : > { %v1888_v8 = vsub.f32 1.5, %v1887_v5  ;;  %v1291_v27 = vmul.f32 0.5, %v1290_v38  ;;  %v1347_v53 = vmul.f32 %v1277_v16, %v5414_v47  ;;  %v5635_v38 = vmax.f32 %v5514_v29, 1e-24 }
 0x236   : > { %4740 = vrsqrt.f32 %v5562_v2  ;;  %vm1900_vm15 = vweird.f32 %v5562_v2  ;;  %vm1910_vm6 = vweird.f32 %v5569_v42 }
 0x237   : > { %4742 = vrsqrt.f32 %v5569_v42  ;;  %v1889_v7 = vmul.f32 %v4737_v40, %v1888_v8  ;;  %v5613_v8 = vld [vmem:[%s7420_s6] ss:$0 sm:$0xff]  ;;  %v1292_v36 = vsub.f32 1.5, %v1291_v27 }
 0x238   : > { %4744 = vrsqrt.f32 %v5567_v9 }
 0x239   : > { %v1893_v34 = vsel %vm1892_vm7, %v4737_v40, %v1889_v7  ;;  %4746 = vrsqrt.f32 %v5581_v39 }
 0x23a   : > { %v2035_v32 = vmul.f32 %v1893_v34, %v5441_v50  ;;  %4438 = vmatmul.msk.f32.gmra.mxu1 %vm605_vm0, %v1346_v35 }
 0x23b   : > { %v1824_v58 = vpop.xlane.xlu2 %1823 }
 0x23c   : > { %v4741_v31 = vpop.eup %4740  ;;  %v5593_v5 = vmax.f32 %v1824_v58, 1e-24  ;;  %4483 = vmatmul.msk.f32.gmra.mxu0 %vm605_vm0, %v2035_v32  ;;  %v1419_v40 = vpop.f32.mrf.mxu1 }
 0x23d   : > { %v5596_v10 = vpop.eup %4742  ;;  %v1895_v50 = vmul.f32 %v4741_v31, %v5562_v2  ;;  %v1420_v51 = vadd.f32 %v5613_v8, %v1419_v40  ;;  %vm1901_vm14 = vweird.f32 %v4741_v31  ;;  %v1287_v40 = vsel %vm5621_vm12, %v5542_v19, %v1283_v62 }
 0x23e   : > { %v1905_v55 = vmul.f32 %v5596_v10, %v5569_v42  ;;  %4748 = vrsqrt.f32 %v5593_v5  ;;  %v5608_v1 = vpop.eup %4744  ;;  %vm1902_vm2 = vmor %vm1900_vm15, %vm1901_vm14  ;;  %vm1911_vm4 = vweird.f32 %v5596_v10  ;;  %vm1920_vm11 = vweird.f32 %v5593_v5 }
 0x23f   : > { %v1896_v25 = vmul.f32 %v4741_v31, %v1895_v50  ;;  %v1467_v35 = vmax.f32 %v1420_v51, 0.0  ;;  %v1299_v32 = vmul.f32 %v5608_v1, %v5567_v9  ;;  %v5627_v58 = vpop.eup %4746  ;;  %vm5672_vm7 = vmor %vm1910_vm6, %vm1911_vm4  ;;  %vm1305_vm9 = vweird.f32 %v5608_v1 }
 0x240   : > { %v1906_v7 = vmul.f32 %v5596_v10, %v1905_v55  ;;  %v1309_v19 = vmul.f32 %v5627_v58, %v5581_v39  ;;  %vm5710_vm12 = vmor %vm1304_vm8, %vm1305_vm9  ;;  %vm1314_vm14 = vweird.f32 %v5581_v39  ;;  %vm1315_vm15 = vweird.f32 %v5627_v58 }
 0x241   : > { %v1897_v3 = vmul.f32 0.5, %v1896_v25  ;;  %4446 = vmatmul.msk.f32.vlgmr.msrb.gmra.mxu3 %vm747_vm1, %v1467_v35  ;;  %vm5737_vm3 = vmor %vm1314_vm14, %vm1315_vm15  ;;  %vm1324_vm6 = vweird.f32 %v5635_v38 }
 0x242   : > { %v1907_v28 = vmul.f32 0.5, %v1906_v7  ;;  %4439 = vmatmul.msk.f32.gmra.mxu1 %vm605_vm0, %v1347_v53  ;;  %v1300_v7 = vmul.f32 %v5608_v1, %v1299_v32  ;;  %v1293_v53 = vmul.f32 %v5565_v0, %v1292_v36 }
 0x243   : > { %v1898_v41 = vsub.f32 1.5, %v1897_v3  ;;  %v1827_v47 = vpop.xlane.xlu0 %1826  ;;  %v1348_v3 = vmul.f32 %v1287_v40, %v5392_v4  ;;  %v1310_v4 = vmul.f32 %v5627_v58, %v1309_v19  ;;  %v5682_v40 = vmax.f32 %v5536_v60, 1e-24 }
 0x244   : > { %v5632_v44 = vpop.eup %4748  ;;  %v5637_v50 = vmax.f32 %v1827_v47, 1e-24  ;;  %v1908_v16 = vsub.f32 1.5, %v1907_v28  ;;  %v1422_v51 = vpop.f32.mrf.mxu1  ;;  %v1301_v28 = vmul.f32 0.5, %v1300_v7  ;;  %v1297_v36 = vsel %vm5661_vm5, %v5565_v0, %v1293_v53 }
 0x245   : > { %v1899_v55 = vmul.f32 %v4741_v31, %v1898_v41  ;;  %v1915_v25 = vmul.f32 %v5632_v44, %v5593_v5  ;;  %v1423_v29 = vadd.f32 %v5613_v8, %v1422_v51  ;;  %v1311_v0 = vmul.f32 0.5, %v1310_v4 }
 0x246   : > { %4750 = vrsqrt.f32 %v5637_v50  ;;  %v1909_v34 = vmul.f32 %v5596_v10, %v1908_v16  ;;  %v1302_v51 = vsub.f32 1.5, %v1301_v28  ;;  %v1349_v19 = vmul.f32 %v1297_v36, %v5401_v24 }
 0x247   : > { %v1903_v27 = vsel %vm1902_vm2, %v4741_v31, %v1899_v55  ;;  %v1916_v2 = vmul.f32 %v5632_v44, %v1915_v25  ;;  %v1468_v62 = vmax.f32 %v1423_v29, 0.0  ;;  %4752 = vrsqrt.f32 %v5635_v38 }
 0x248   : > { %v2036_v35 = vmul.f32 %v1903_v27, %v5452_v56  ;;  %v1913_v42 = vsel %vm5672_vm7, %v5596_v10, %v1909_v34  ;;  %vm1921_vm10 = vweird.f32 %v5632_v44  ;;  %v1303_v24 = vmul.f32 %v5608_v1, %v1302_v51 }
 0x249   : > { %v1917_v32 = vmul.f32 0.5, %v1916_v2  ;;  %4447 = vmatmul.msk.f32.gmra.mxu3 %vm747_vm1, %v1468_v62  ;;  %v2037_v27 = vmul.f32 %v1913_v42, %v5454_v11  ;;  %v1312_v34 = vsub.f32 1.5, %v1311_v0  ;;  %vm1922_vm13 = vmor %vm1920_vm11, %vm1921_vm10  ;;  %vm1930_vm4 = vweird.f32 %v5637_v50 }
 0x24a   : > { %4484 = vmatmul.msk.f32.gmra.mxu0 %vm605_vm0, %v2036_v35  ;;  %4440 = vmatmul.msk.f32.gmra.mxu1 %vm605_vm0, %v1348_v3  ;;  %v1307_v59 = vsel %vm5710_vm12, %v5608_v1, %v1303_v24  ;;  %vm1334_vm12 = vweird.f32 %v5682_v40 }
 0x24b   : > { %v1830_v56 = vpop.xlane.xlu1 %1829  ;;  %v1918_v55 = vsub.f32 1.5, %v1917_v32  ;;  %v1350_v1 = vmul.f32 %v1307_v59, %v5428_v12 }
 0x24c   : > { %v5670_v41 = vpop.eup %4750  ;;  %v5676_v47 = vmax.f32 %v1830_v56, 1e-24  ;;  %v1425_v25 = vpop.f32.mrf.mxu1 }
 0x24d   : > { %v1925_v16 = vmul.f32 %v5670_v41, %v5637_v50  ;;  %v1426_v7 = vadd.f32 %v5613_v8, %v1425_v25  ;;  %v5691_v29 = vpop.eup %4752  ;;  %v1919_v2 = vmul.f32 %v5632_v44, %v1918_v55  ;;  %vm1931_vm2 = vweird.f32 %v5670_v41 }
 0x24e   : > { %4754 = vrsqrt.f32 %v5676_v47  ;;  %v1319_v3 = vmul.f32 %v5691_v29, %v5635_v38  ;;  %vm5752_vm5 = vmor %vm1930_vm4, %vm1931_vm2  ;;  %vm1325_vm7 = vweird.f32 %v5691_v29  ;;  %v4516_v38 = vld [vmem:[%s7417_s3 + $0x50] sm:$0xff]  ;;  %vm1940_vm10 = vweird.f32 %v5676_v47 }
 0x24f   : > { %v1926_v60 = vmul.f32 %v5670_v41, %v1925_v16  ;;  %v1469_v10 = vmax.f32 %v1426_v7, 0.0  ;;  %4756 = vrsqrt.f32 %v5682_v40  ;;  %v1923_v31 = vsel %vm1922_vm13, %v5632_v44, %v1919_v2  ;;  %vm5781_vm9 = vmor %vm1324_vm6, %vm1325_vm7 }
 0x250   : > { %v1320_v56 = vmul.f32 %v5691_v29, %v1319_v3  ;;  %v2038_v55 = vmul.f32 %v1923_v31, %v5464_v43  ;;  %v1313_v16 = vmul.f32 %v5627_v58, %v1312_v34  ;;  %v4517_v43 = vld [vmem:[%s7417_s3 + $0x58] sm:$0xff] }
 0x251   : > { %v1927_v62 = vmul.f32 0.5, %v1926_v60  ;;  %4448 = vmatmul.msk.f32.gmra.mxu3 %vm747_vm1, %v1469_v10 }
 0x252   : > { %4485 = vmatmul.msk.f32.gmra.mxu0 %vm605_vm0, %v2037_v27  ;;  %4441 = vmatmul.msk.f32.gmra.mxu1 %vm605_vm0, %v1349_v19  ;;  %v1321_v39 = vmul.f32 0.5, %v1320_v56  ;;  %v1317_v3 = vsel %vm5737_vm3, %v5627_v58, %v1313_v16 }
 0x253   : > { %v1833_v11 = vpop.xlane.xlu2 %1832  ;;  %v1928_v5 = vsub.f32 1.5, %v1927_v62  ;;  %2421 = vmatpush.msra.mxu3 %v4517_v43 }
 0x254   : > { %v5714_v53 = vpop.eup %4754  ;;  %v5716_v32 = vmax.f32 %v1833_v11, 1e-24  ;;  %v1428_v4 = vpop.f32.mrf.mxu1  ;;  %v1322_v24 = vsub.f32 1.5, %v1321_v39 }
 0x255   : > { %v1935_v28 = vmul.f32 %v5714_v53, %v5676_v47  ;;  %v1429_v9 = vadd.f32 %v5613_v8, %v1428_v4  ;;  %v5727_v36 = vpop.eup %4756  ;;  %v1929_v25 = vmul.f32 %v5670_v41, %v1928_v5  ;;  %vm1941_vm8 = vweird.f32 %v5714_v53  ;;  %2422 = vmatpush.msra.mxu3 %v4516_v38 }
 0x256   : > { %4758 = vrsqrt.f32 %v5716_v32  ;;  %v1329_v0 = vmul.f32 %v5727_v36, %v5682_v40  ;;  %v1323_v56 = vmul.f32 %v5691_v29, %v1322_v24  ;;  %vm1942_vm11 = vmor %vm1940_vm10, %vm1941_vm8  ;;  %vm1335_vm13 = vweird.f32 %v5727_v36 }
 0x257   : > { %v1936_v44 = vmul.f32 %v5714_v53, %v1935_v28  ;;  %v1470_v42 = vmax.f32 %v1429_v9, 0.0  ;;  %v1933_v27 = vsel %vm5752_vm5, %v5670_v41, %v1929_v25  ;;  %v1351_v28 = vmul.f32 %v1317_v3, %v5416_v49  ;;  %vm1336_vm15 = vmor %vm1334_vm12, %vm1335_vm13 }
 0x258   : > { %v1330_v11 = vmul.f32 %v5727_v36, %v1329_v0  ;;  %v2039_v31 = vmul.f32 %v1933_v27, %v5471_v46  ;;  %v1327_v47 = vsel %vm5781_vm9, %v5691_v29, %v1323_v56  ;;  %vm1950_vm2 = vweird.f32 %v5716_v32 }
 0x259   : > { %v1937_v51 = vmul.f32 0.5, %v1936_v44  ;;  %4449 = vmatmul.msk.f32.gmra.mxu3 %vm747_vm1, %v1470_v42  ;;  %v1352_v43 = vmul.f32 %v1327_v47, %v5430_v15 }
 0x25a   : > { %4486 = vmatmul.msk.f32.gmra.mxu0 %vm605_vm0, %v2038_v55  ;;  %4442 = vmatmul.msk.f32.gmra.mxu1 %vm605_vm0, %v1350_v1  ;;  %v1331_v4 = vmul.f32 0.5, %v1330_v11 }
 0x25b   : > { %v1836_v12 = vpop.xlane.xlu0 %1835  ;;  %v1938_v2 = vsub.f32 1.5, %v1937_v51 }
 0x25c   : > { %v5750_v60 = vpop.eup %4758  ;;  %v5756_v10 = vmax.f32 %v1836_v12, 1e-24  ;;  %v1431_v62 = vpop.f32.mrf.mxu1  ;;  %v1332_v25 = vsub.f32 1.5, %v1331_v4 }
 0x25d   : > { %v1945_v50 = vmul.f32 %v5750_v60, %v5716_v32  ;;  %v1432_v35 = vadd.f32 %v5613_v8, %v1431_v62  ;;  %v1939_v5 = vmul.f32 %v5714_v53, %v1938_v2  ;;  %vm1951_vm14 = vweird.f32 %v5750_v60 }
 0x25e   : > { %4760 = vrsqrt.f32 %v5756_v10  ;;  %v1333_v12 = vmul.f32 %v5727_v36, %v1332_v25  ;;  %vm1952_vm3 = vmor %vm1950_vm2, %vm1951_vm14  ;;  %vm1960_vm5 = vweird.f32 %v5756_v10  ;;  %v4843_v25 = vld [vmem:[%s7419_s5 + $0x8] sm:$0xff] }
 0x25f   : > { %v1946_v34 = vmul.f32 %v5750_v60, %v1945_v50  ;;  %v1471_v41 = vmax.f32 %v1432_v35, 0.0  ;;  %v1943_v44 = vsel %vm1942_vm11, %v5714_v53, %v1939_v5 }
 0x260   : > { %v2040_v53 = vmul.f32 %v1943_v44, %v5478_v14  ;;  %v1337_v27 = vsel %vm1336_vm15, %v5727_v36, %v1333_v12 }
 0x261   : > { %v1947_v58 = vmul.f32 0.5, %v1946_v34  ;;  %4450 = vmatmul.msk.f32.gmra.mxu3 %vm747_vm1, %v1471_v41  ;;  %v1353_v32 = vmul.f32 %v1337_v27, %v5444_v63 }
 0x262   : > { %4487 = vmatmul.msk.f32.gmra.mxu0 %vm605_vm0, %v2039_v31  ;;  %4443 = vmatmul.msk.f32.gmra.mxu1 %vm605_vm0, %v1351_v28 }
 0x263   : > { %v1839_v49 = vpop.xlane.xlu2 %1838  ;;  %v1948_v42 = vsub.f32 1.5, %v1947_v58 }
 0x264   : > { %v4761_v46 = vpop.eup %4760  ;;  %v1867_v59 = vmax.f32 %v1839_v49, 1e-24  ;;  %v1434_v16 = vpop.f32.mrf.mxu1 }
 0x265   : > { %v1955_v55 = vmul.f32 %v4761_v46, %v5756_v10  ;;  %v1435_v51 = vadd.f32 %v5613_v8, %v1434_v16  ;;  %v1949_v39 = vmul.f32 %v5750_v60, %v1948_v42  ;;  %vm1961_vm4 = vweird.f32 %v4761_v46  ;;  %v4515_v10 = vld [vmem:[%s7417_s3 + $0x48] sm:$0xff] }
 0x266   : > { %4762 = vrsqrt.f32 %v1867_v59  ;;  %vm1962_vm6 = vmor %vm1960_vm5, %vm1961_vm4  ;;  %vm1970_vm8 = vweird.f32 %v1867_v59  ;;  %2423 = vmatpush.msra.mxu3 %v4515_v10 }
 0x267   : > { %v1956_v1 = vmul.f32 %v4761_v46, %v1955_v55  ;;  %v1472_v7 = vmax.f32 %v1435_v51, 0.0  ;;  %v1953_v14 = vsel %vm1952_vm3, %v5750_v60, %v1949_v39  ;;  %v4842_v55 = vld [vmem:[%s7419_s5 + $0x10] sm:$0xff]  ;;  %v4844_v51 = vld [vmem:[%s7419_s5] sm:$0xff] }
 0x268   : > { %v2041_v2 = vmul.f32 %v1953_v14, %v5485_v33 }
 0x269   : > { %v1957_v0 = vmul.f32 0.5, %v1956_v1  ;;  %4451 = vmatmul.msk.f32.gmra.mxu3 %vm747_vm1, %v1472_v7 }
 0x26a   : > { %4488 = vmatmul.msk.f32.gmra.mxu0 %vm605_vm0, %v2040_v53  ;;  %4444 = vmatmul.msk.f32.gmra.mxu1 %vm605_vm0, %v1352_v43 }
 0x26b   : > { %v1958_v29 = vsub.f32 1.5, %v1957_v0 }
 0x26c   : > { %v4763_v40 = vpop.eup %4762 }
 0x26d   : > { %v1965_v19 = vmul.f32 %v4763_v40, %v1867_v59  ;;  %v1959_v50 = vmul.f32 %v4761_v46, %v1958_v29  ;;  %vm1971_vm7 = vweird.f32 %v4763_v40  ;;  %v4841_v59 = vld [vmem:[%s7419_s5 + $0x18] sm:$0xff] }
 0x26e   : > { %vm1972_vm9 = vmor %vm1970_vm8, %vm1971_vm7 }
 0x26f   : > { %v1966_v15 = vmul.f32 %v4763_v40, %v1965_v19  ;;  %v1963_v60 = vsel %vm1962_vm6, %v4761_v46, %v1959_v50  ;;  %v4514_v46 = vld [vmem:[%s7417_s3 + $0x40] sm:$0xff] }
 0x270   : > { %v2042_v24 = vmul.f32 %v1963_v60, %v5492_v48  ;;  %2424 = vmatpush.msra.mxu3 %v4514_v46  ;;  %v4845_v46 = vld [vmem:[%s7421_s7 + $0x38] sm:$0xff] }
 0x271   : > { %v1967_v62 = vmul.f32 0.5, %v1966_v15 }
 0x272   : > { %4489 = vmatmul.msk.f32.gmra.mxu0 %vm605_vm0, %v2041_v2  ;;  %4445 = vmatmul.msk.f32.gmra.mxu1 %vm605_vm0, %v1353_v32 }
 0x273   : > { %v1968_v3 = vsub.f32 1.5, %v1967_v62  ;;  %3502 = vmatpush.msrb.mxu3 %v4841_v59 }
 0x275   : > { %v1969_v36 = vmul.f32 %v4763_v40, %v1968_v3  ;;  %3503 = vmatpush.msrb.mxu3 %v4842_v55  ;;  %v4846_v55 = vld [vmem:[%s7421_s7 + $0x30] sm:$0xff] }
 0x277   : > { %v1973_v33 = vsel %vm1972_vm9, %v4763_v40, %v1969_v36  ;;  %3504 = vmatpush.msrb.mxu3 %v4843_v25  ;;  %v4847_v25 = vld [vmem:[%s7421_s7 + $0x28] sm:$0xff] }
 0x278   : > { %v2043_v63 = vmul.f32 %v1973_v33, %v5499_v54 }
 0x279   : > { %3505 = vmatpush.msrb.mxu3 %v4844_v51  ;;  %v4848_v51 = vld [vmem:[%s7421_s7 + $0x20] sm:$0xff] }
 0x27a   : > { %4490 = vmatmul.msk.f32.gmra.mxu0 %vm605_vm0, %v2042_v24 }
 0x282   : > { %4491 = vmatmul.msk.f32.gmra.mxu0 %vm605_vm0, %v2043_v63 }
 0x2a7   : > { %v1437_v11 = vpop.f32.mrf.mxu1 }
 0x2a8   : > { %v1438_v35 = vadd.f32 %v5613_v8, %v1437_v11 }
 0x2aa   : > { %v1473_v48 = vmax.f32 %v1438_v35, 0.0 }
 0x2ac   : > { %4452 = vmatmul.msk.f32.gmra.mxu3 %vm747_vm1, %v1473_v48 }
 0x2af   : > { %v1440_v34 = vpop.f32.mrf.mxu1 }
 0x2b0   : > { %v1441_v41 = vadd.f32 %v5613_v8, %v1440_v34  ;;  %v2115_v31 = vpop.f32.mrf.mxu0 }
 0x2b1   : > { %v2116_v5 = vadd.f32 %v5613_v8, %v2115_v31 }
 0x2b2   : > { %v1474_v54 = vmax.f32 %v1441_v41, 0.0 }
 0x2b3   : > { %v2163_v58 = vmax.f32 %v2116_v5, 0.0 }
 0x2b4   : > { %4453 = vmatmul.msk.f32.gmra.mxu3 %vm747_vm1, %v1474_v54 }
 0x2b5   : > { %4498 = vmatmul.msk.f32.vlgmr.msra.gmra.mxu1 %vm747_vm1, %v2163_v58 }
 0x2b7   : > { %v1443_v28 = vpop.f32.mrf.mxu1 }
 0x2b8   : > { %v1444_v4 = vadd.f32 %v5613_v8, %v1443_v28 }
 0x2b9   : > { %v2118_v56 = vpop.f32.mrf.mxu0 }
 0x2ba   : > { %v2119_v38 = vadd.f32 %v5613_v8, %v2118_v56  ;;  %v1475_v9 = vmax.f32 %v1444_v4, 0.0 }
 0x2bc   : > { %v2164_v49 = vmax.f32 %v2119_v38, 0.0  ;;  %4454 = vmatmul.msk.f32.gmra.mxu3 %vm747_vm1, %v1475_v9 }
 0x2be   : > { %4499 = vmatmul.msk.f32.gmra.mxu1 %vm747_vm1, %v2164_v49 }
 0x2bf   : > { %v1446_v44 = vpop.f32.mrf.mxu1 }
 0x2c0   : > { %v1447_v42 = vadd.f32 %v5613_v8, %v1446_v44 }
 0x2c2   : > { %v1476_v16 = vmax.f32 %v1447_v42, 0.0 }
 0x2c4   : > { %4455 = vmatmul.msk.f32.gmra.mxu3 %vm747_vm1, %v1476_v16  ;;  %v5870_v56 = vpop.f32.mrf.mxu3 }
 0x2c7   : > { %v2121_v47 = vpop.f32.mrf.mxu0  ;;  %v1449_v1 = vpop.f32.mrf.mxu1 }
 0x2c8   : > { %v2122_v7 = vadd.f32 %v5613_v8, %v2121_v47  ;;  %v1450_v53 = vadd.f32 %v5613_v8, %v1449_v1  ;;  %v4850_v47 = vld [vmem:[%s7421_s7 + $0x10] sm:$0xff] }
 0x2ca   : > { %v2165_v39 = vmax.f32 %v2122_v7, 0.0  ;;  %v1477_v0 = vmax.f32 %v1450_v53, 0.0  ;;  %v4851_v7 = vld [vmem:[%s7421_s7 + $0x8] sm:$0xff]  ;;  %v4852_v53 = vld [vmem:[%s7421_s7] sm:$0xff] }
 0x2cc   : > { %4500 = vmatmul.msk.f32.gmra.mxu1 %vm747_vm1, %v2165_v39  ;;  %4456 = vmatmul.msk.f32.gmra.mxu3 %vm747_vm1, %v1477_v0  ;;  %v5879_v44 = vpop.f32.mrf.mxu3 }
 0x2cd   : > { %7467 = vst [vmem:[#allocation20_spill] sm:$0xff] %v5879_v44 }
 0x2cf   : > { %v2124_v43 = vpop.f32.mrf.mxu0  ;;  %v1452_v12 = vpop.f32.mrf.mxu1 }
 0x2d0   : > { %v2125_v40 = vadd.f32 %v5613_v8, %v2124_v43  ;;  %v1453_v14 = vadd.f32 %v5613_v8, %v1452_v12 }
 0x2d2   : > { %v2166_v29 = vmax.f32 %v2125_v40, 0.0  ;;  %v1478_v19 = vmax.f32 %v1453_v14, 0.0 }
 0x2d4   : > { %4501 = vmatmul.msk.f32.gmra.mxu1 %vm747_vm1, %v2166_v29  ;;  %4457 = vmatmul.msk.f32.gmra.mxu3 %vm747_vm1, %v1478_v19  ;;  %v5900_v1 = vpop.f32.mrf.mxu3 }
 0x2d7   : > { %v2127_v27 = vpop.f32.mrf.mxu0  ;;  %v1455_v15 = vpop.f32.mrf.mxu1 }
 0x2d8   : > { %v2128_v2 = vadd.f32 %v5613_v8, %v2127_v27  ;;  %v1456_v50 = vadd.f32 %v5613_v8, %v1455_v15 }
 0x2da   : > { %v2167_v62 = vmax.f32 %v2128_v2, 0.0  ;;  %v1479_v32 = vmax.f32 %v1456_v50, 0.0 }
 0x2dc   : > { %4502 = vmatmul.msk.f32.gmra.mxu1 %vm747_vm1, %v2167_v62  ;;  %4458 = vmatmul.msk.f32.gmra.mxu3 %vm747_vm1, %v1479_v32  ;;  %v5910_v39 = vpop.f32.mrf.mxu3  ;;  %v7478_v62 = vld [vmem:[#allocation5_spill] sm:$0xff]  ;;  %v1760_v32 = vpop.f32.mrf.mxu2 }
 0x2df   : > { %v2130_v60 = vpop.f32.mrf.mxu0  ;;  %v1458_v3 = vpop.f32.mrf.mxu1 }
 0x2e0   : > { %v2131_v24 = vadd.f32 %v5613_v8, %v2130_v60  ;;  %v1459_v36 = vadd.f32 %v5613_v8, %v1458_v3 }
 0x2e2   : > { %v2168_v33 = vmax.f32 %v2131_v24, 0.0  ;;  %v1480_v63 = vmax.f32 %v1459_v36, 0.0 }
 0x2e4   : > { %4503 = vmatmul.msk.f32.gmra.mxu1 %vm747_vm1, %v2168_v33  ;;  %4459 = vmatmul.msk.f32.gmra.mxu3 %vm747_vm1, %v1480_v63  ;;  %v5916_v0 = vpop.f32.mrf.mxu3  ;;  %v1763_v36 = vpop.f32.mrf.mxu2  ;;  %v5966_v63 = vmax.f32 %v1760_v32, 0.0 }
 0x2e5   : > { %7468 = vst [vmem:[#allocation21_spill] sm:$0xff] %v5916_v0 }
 0x2e7   : > { %v2133_v10 = vpop.f32.mrf.mxu0  ;;  %v1461_v11 = vpop.f32.mrf.mxu1 }
 0x2e8   : > { %v2134_v35 = vadd.f32 %v5613_v8, %v2133_v10  ;;  %v1462_v48 = vadd.f32 %v5613_v8, %v1461_v11 }
 0x2ea   : > { %v2169_v34 = vmax.f32 %v2134_v35, 0.0  ;;  %v1481_v41 = vmax.f32 %v1462_v48, 0.0  ;;  %v1804_v48 = vmul.f32 %v5966_v63, %v5966_v63 }
 0x2ec   : > { %4504 = vmatmul.msk.f32.gmra.mxu1 %vm747_vm1, %v2169_v34  ;;  %4460 = vmatmul.msk.f32.gmra.mxu3 %vm747_vm1, %v1481_v41  ;;  %v5920_v43 = vpop.f32.mrf.mxu3  ;;  %v1766_v41 = vpop.f32.mrf.mxu2 }
 0x2ef   : > { %v2136_v31 = vpop.f32.mrf.mxu0  ;;  %v1464_v5 = vpop.f32.mrf.mxu1 }
 0x2f0   : > { %v2137_v54 = vadd.f32 %v5613_v8, %v2136_v31  ;;  %v1465_v58 = vadd.f32 %v5613_v8, %v1464_v5  ;;  %v5975_v31 = vmax.f32 %v1763_v36, 0.0  ;;  %v1840_v5 = vsel %vm605_vm0, %v1804_v48, 0.0 }
 0x2f2   : > { %v2170_v28 = vmax.f32 %v2137_v54, 0.0  ;;  %v1482_v4 = vmax.f32 %v1465_v58, 0.0 }
 0x2f4   : > { %4505 = vmatmul.msk.f32.gmra.mxu1 %vm747_vm1, %v2170_v28  ;;  %4461 = vmatmul.msk.f32.gmra.mxu3 %vm747_vm1, %v1482_v4  ;;  %v1805_v4 = vmul.f32 %v5975_v31, %v5975_v31 }
 0x2f7   : > { %v2139_v38 = vpop.f32.mrf.mxu0 }
 0x2f8   : > { %v2140_v9 = vadd.f32 %v5613_v8, %v2139_v38 }
 0x2fa   : > { %v2171_v49 = vmax.f32 %v2140_v9, 0.0  ;;  %v5985_v9 = vmax.f32 %v1766_v41, 0.0 }
 0x2fc   : > { %4506 = vmatmul.msk.f32.gmra.mxu1 %vm747_vm1, %v2171_v49  ;;  %4518 = vmatmul.msk.f32.vlgmr.msra.gmra.mxu3 %vm605_vm0, %v5178_v18  ;;  %v1843_v49 = vsel %vm605_vm0, %v1805_v4, 0.0 }
 0x2fd   : > { %4066 = vmatpush.msra.mxu3 %v4845_v46 }
 0x2ff   : > { %v2142_v59 = vpop.f32.mrf.mxu0  ;;  %4067 = vmatpush.msra.mxu3 %v4846_v55 }
 0x300   : > { %v2143_v42 = vadd.f32 %v5613_v8, %v2142_v59  ;;  %v4849_v8 = vld [vmem:[%s7421_s7 + $0x18] sm:$0xff]  ;;  %v1769_v59 = vpop.f32.mrf.mxu2 }
 0x301   : > { %4068 = vmatpush.msra.mxu3 %v4847_v25 }
 0x302   : > { %v2172_v16 = vmax.f32 %v2143_v42, 0.0 }
 0x303   : > { %4069 = vmatpush.msra.mxu3 %v4848_v51  ;;  %v5995_v51 = vmax.f32 %v1769_v59, 0.0 }
 0x304   : > { %4507 = vmatmul.msk.f32.gmra.mxu1 %vm747_vm1, %v2172_v16  ;;  %4519 = vmatmul.msk.f32.gmra.mxu3 %vm605_vm0, %v5186_v22  ;;  %v1806_v16 = vmul.f32 %v5985_v9, %v5985_v9 }
 0x305   : > { %4070 = vmatpush.msra.mxu3 %v4849_v8 }
 0x306   : > { %v1846_v8 = vsel %vm605_vm0, %v1806_v16, 0.0 }
 0x307   : > { %4071 = vmatpush.msra.mxu3 %v4850_v47 }
 0x309   : > { %4072 = vmatpush.msra.mxu3 %v4851_v7  ;;  %v1772_v7 = vpop.f32.mrf.mxu2 }
 0x30b   : > { %4073 = vmatpush.msra.mxu3 %v4852_v53 }
 0x30c   : > { %4520 = vmatmul.msk.f32.gmra.mxu3 %vm605_vm0, %v5196_v26 }
 0x314   : > { %4521 = vmatmul.msk.f32.gmra.mxu3 %vm605_vm0, %v5204_v30 }
 0x31c   : > { %4522 = vmatmul.msk.f32.gmra.mxu3 %vm605_vm0, %v5210_v37 }
 0x324   : > { %4523 = vmatmul.msk.f32.gmra.mxu3 %vm605_vm0, %v5217_v45 }
 0x32c   : > { %4524 = vmatmul.msk.f32.gmra.mxu3 %vm605_vm0, %v5223_v52 }
 0x32f   : > { %v5924_v12 = vpop.f32.mrf.mxu3 }
 0x330   : > { %7469 = vst [vmem:[#allocation22_spill] sm:$0xff] %v5924_v12 }
 0x334   : > { %4525 = vmatmul.msk.f32.gmra.mxu3 %vm605_vm0, %v5227_v57 }
 0x337   : > { %v5928_v40 = vpop.f32.mrf.mxu3 }
 0x338   : > { %7470 = vst [vmem:[#allocation23_spill] sm:$0xff] %v5928_v40 }
 0x33c   : > { %4526 = vmatmul.msk.f32.gmra.mxu3 %vm605_vm0, %v5233_v61 }
 0x33f   : > { %v5932_v14 = vpop.f32.mrf.mxu3 }
 0x340   : > { %7471 = vst [vmem:[#allocation24_spill] sm:$0xff] %v5932_v14 }
 0x344   : > { %4527 = vmatmul.msk.f32.gmra.mxu3 %vm605_vm0, %v5242_v6 }
 0x347   : > { %v5936_v29 = vpop.f32.mrf.mxu3 }
 0x348   : > { %7472 = vst [vmem:[#allocation25_spill] sm:$0xff] %v5936_v29 }
 0x34c   : > { %4528 = vmatmul.msk.f32.gmra.mxu3 %vm605_vm0, %v5257_v13 }
 0x34f   : > { %v5940_v19 = vpop.f32.mrf.mxu3 }
 0x350   : > { %7473 = vst [vmem:[#allocation26_spill] sm:$0xff] %v5940_v19 }
 0x354   : > { %4529 = vmatmul.msk.f32.gmra.mxu3 %vm605_vm0, %v5263_v17 }
 0x357   : > { %v5944_v27 = vpop.f32.mrf.mxu3 }
 0x358   : > { %7474 = vst [vmem:[#allocation27_spill] sm:$0xff] %v5944_v27 }
 0x35c   : > { %4530 = vmatmul.msk.f32.gmra.mxu3 %vm605_vm0, %v5268_v20 }
 0x35f   : > { %v5948_v15 = vpop.f32.mrf.mxu3 }
 0x360   : > { %7475 = vst [vmem:[#allocation28_spill] sm:$0xff] %v5948_v15 }
 0x364   : > { %4531 = vmatmul.msk.f32.gmra.mxu3 %vm605_vm0, %v5274_v21 }
 0x367   : > { %v5952_v2 = vpop.f32.mrf.mxu3 }
 0x368   : > { %7476 = vst [vmem:[#allocation29_spill] sm:$0xff] %v5952_v2 }
 0x36c   : > { %4532 = vmatmul.msk.f32.gmra.mxu3 %vm605_vm0, %v5286_v23 }
 0x36f   : > { %v5956_v50 = vpop.f32.mrf.mxu3 }
 0x370   : > { %7477 = vst [vmem:[#allocation30_spill] sm:$0xff] %v5956_v50 }
 0x374   : > { %4533 = vmatmul.msk.f32.gmra.mxu3 %vm605_vm0, %v7478_v62 }
 0x377   : > { %v5960_v60 = vpop.f32.mrf.mxu3 }
 0x378   : > { %7479 = vst [vmem:[#allocation5_spill] sm:$0xff] %v5960_v60 }
 0x37f   : > { %v2426_v3 = vpop.f32.mrf.mxu3 }
 0x380   : > { %v5962_v24 = vmax.f32 %v2426_v3, 0.0  ;;  %v1807_v3 = vmul.f32 %v5995_v51, %v5995_v51 }
 0x382   : > { %v2490_v33 = vmul.f32 %v5962_v24, %v5962_v24 }
 0x384   : > { %v2506_v10 = vsel %vm605_vm0, %v2490_v33, 0.0  ;;  %v6005_v33 = vmax.f32 %v1772_v7, 0.0 }
 0x385   : > { %2507 = vadd.xlane.f32.xlu1 %v2506_v10  ;;  %v1849_v10 = vsel %vm605_vm0, %v1807_v3, 0.0 }
 0x386   : > { %v1808_v41 = vmul.f32 %v6005_v33, %v6005_v33 }
 0x387   : > { %v2429_v11 = vpop.f32.mrf.mxu3 }
 0x388   : > { %v5969_v35 = vmax.f32 %v2429_v11, 0.0  ;;  %v1852_v4 = vsel %vm605_vm0, %v1808_v41, 0.0 }
 0x38a   : > { %v2491_v34 = vmul.f32 %v5969_v35, %v5969_v35 }
 0x38c   : > { %v2509_v54 = vsel %vm605_vm0, %v2491_v34, 0.0 }
 0x38d   : > { %1841 = vadd.xlane.f32.xlu1 %v1840_v5  ;;  %2510 = vadd.xlane.f32.xlu0 %v2509_v54  ;;  %v1775_v5 = vpop.f32.mrf.mxu2 }
 0x38f   : > { %v2432_v58 = vpop.f32.mrf.mxu3 }
 0x390   : > { %v5979_v28 = vmax.f32 %v2432_v58, 0.0  ;;  %v6015_v58 = vmax.f32 %v1775_v5, 0.0 }
 0x392   : > { %v2492_v38 = vmul.f32 %v5979_v28, %v5979_v28  ;;  %v1809_v59 = vmul.f32 %v6015_v58, %v6015_v58 }
 0x394   : > { %v2512_v46 = vsel %vm605_vm0, %v2492_v38, 0.0  ;;  %v1855_v16 = vsel %vm605_vm0, %v1809_v59, 0.0 }
 0x395   : > { %1844 = vadd.xlane.f32.xlu0 %v1843_v49  ;;  %2513 = vadd.xlane.f32.xlu2 %v2512_v46 }
 0x397   : > { %v2435_v42 = vpop.f32.mrf.mxu3 }
 0x398   : > { %v5989_v55 = vmax.f32 %v2435_v42, 0.0 }
 0x39a   : > { %v2493_v25 = vmul.f32 %v5989_v55, %v5989_v55 }
 0x39c   : > { %v2515_v47 = vsel %vm605_vm0, %v2493_v25, 0.0 }
 0x39d   : > { %1847 = vadd.xlane.f32.xlu2 %v1846_v8  ;;  %2516 = vadd.xlane.f32.xlu1 %v2515_v47 }
 0x39f   : > { %v2438_v53 = vpop.f32.mrf.mxu3 }
 0x3a0   : > { %v5999_v32 = vmax.f32 %v2438_v53, 0.0 }
 0x3a2   : > { %v2494_v36 = vmul.f32 %v5999_v32, %v5999_v32 }
 0x3a4   : > { %v2518_v11 = vsel %vm605_vm0, %v2494_v36, 0.0 }
 0x3a5   : > { %1850 = vadd.xlane.f32.xlu1 %v1849_v10  ;;  %2519 = vadd.xlane.f32.xlu0 %v2518_v11 }
 0x3a7   : > { %v2441_v48 = vpop.f32.mrf.mxu3 }
 0x3a8   : > { %v6009_v34 = vmax.f32 %v2441_v48, 0.0 }
 0x3aa   : > { %v2495_v54 = vmul.f32 %v6009_v34, %v6009_v34 }
 0x3ac   : > { %v2521_v38 = vsel %vm605_vm0, %v2495_v54, 0.0 }
 0x3ad   : > { %1853 = vadd.xlane.f32.xlu0 %v1852_v4  ;;  %2522 = vadd.xlane.f32.xlu2 %v2521_v38 }
 0x3af   : > { %v2444_v49 = vpop.f32.mrf.mxu3 }
 0x3b0   : > { %v6019_v46 = vmax.f32 %v2444_v49, 0.0 }
 0x3b2   : > { %v2496_v42 = vmul.f32 %v6019_v46, %v6019_v46 }
 0x3b4   : > { %v2524_v25 = vsel %vm605_vm0, %v2496_v42, 0.0 }
 0x3b5   : > { %1856 = vadd.xlane.f32.xlu2 %v1855_v16  ;;  %2525 = vadd.xlane.f32.xlu1 %v2524_v25 }
 0x3b7   : > { %v2447_v8 = vpop.f32.mrf.mxu3 }
 0x3b8   : > { %v6027_v47 = vmax.f32 %v2447_v8, 0.0 }
 0x3ba   : > { %v2497_v7 = vmul.f32 %v6027_v47, %v6027_v47 }
 0x3bc   : > { %v2527_v53 = vsel %vm605_vm0, %v2497_v7, 0.0 }
 0x3bd   : > { %2528 = vadd.xlane.f32.xlu0 %v2527_v53 }
 0x3bf   : > { %v2450_v3 = vpop.f32.mrf.mxu3 }
 0x3c0   : > { %v6032_v36 = vmax.f32 %v2450_v3, 0.0 }
 0x3c2   : > { %v2498_v10 = vmul.f32 %v6032_v36, %v6032_v36 }
 0x3c4   : > { %v2530_v11 = vsel %vm605_vm0, %v2498_v10, 0.0 }
 0x3c5   : > { %2531 = vadd.xlane.f32.xlu1 %v2530_v11 }
 0x3c7   : > { %v2453_v48 = vpop.f32.mrf.mxu3 }
 0x3c8   : > { %v6037_v41 = vmax.f32 %v2453_v48, 0.0 }
 0x3ca   : > { %v2499_v5 = vmul.f32 %v6037_v41, %v6037_v41 }
 0x3cc   : > { %v2533_v54 = vsel %vm605_vm0, %v2499_v5, 0.0 }
 0x3cd   : > { %2534 = vadd.xlane.f32.xlu2 %v2533_v54 }
 0x3cf   : > { %v2456_v4 = vpop.f32.mrf.mxu3 }
 0x3d0   : > { %v6042_v38 = vmax.f32 %v2456_v4, 0.0 }
 0x3d2   : > { %v2500_v49 = vmul.f32 %v6042_v38, %v6042_v38 }
 0x3d4   : > { %v2536_v59 = vsel %vm605_vm0, %v2500_v49, 0.0 }
 0x3d5   : > { %2537 = vadd.xlane.f32.xlu0 %v2536_v59 }
 0x3d7   : > { %v2459_v42 = vpop.f32.mrf.mxu3 }
 0x3d8   : > { %v6047_v16 = vmax.f32 %v2459_v42, 0.0 }
 0x3da   : > { %v2501_v25 = vmul.f32 %v6047_v16, %v6047_v16 }
 0x3dc   : > { %v2539_v8 = vsel %vm605_vm0, %v2501_v25, 0.0 }
 0x3dd   : > { %2540 = vadd.xlane.f32.xlu1 %v2539_v8 }
 0x3df   : > { %v2462_v7 = vpop.f32.mrf.mxu3 }
 0x3e0   : > { %v6052_v53 = vmax.f32 %v2462_v7, 0.0 }
 0x3e2   : > { %v2502_v3 = vmul.f32 %v6052_v53, %v6052_v53 }
 0x3e4   : > { %v2542_v10 = vsel %vm605_vm0, %v2502_v3, 0.0 }
 0x3e5   : > { %2543 = vadd.xlane.f32.xlu2 %v2542_v10 }
 0x3e7   : > { %v2465_v11 = vpop.f32.mrf.mxu3 }
 0x3e8   : > { %v6057_v48 = vmax.f32 %v2465_v11, 0.0 }
 0x3ea   : > { %v2503_v5 = vmul.f32 %v6057_v48, %v6057_v48 }
 0x3ec   : > { %v2545_v54 = vsel %vm605_vm0, %v2503_v5, 0.0 }
 0x3ed   : > { %2546 = vadd.xlane.f32.xlu0 %v2545_v54 }
 0x3ef   : > { %v2468_v4 = vpop.f32.mrf.mxu3 }
 0x3f0   : > { %v6062_v49 = vmax.f32 %v2468_v4, 0.0 }
 0x3f2   : > { %v2504_v59 = vmul.f32 %v6062_v49, %v6062_v49 }
 0x3f4   : > { %v2548_v42 = vsel %vm605_vm0, %v2504_v59, 0.0 }
 0x3f5   : > { %2549 = vadd.xlane.f32.xlu1 %v2548_v42 }
 0x3f7   : > { %v2471_v25 = vpop.f32.mrf.mxu3 }
 0x3f8   : > { %v6067_v8 = vmax.f32 %v2471_v25, 0.0  ;;  %v2508_v7 = vpop.xlane.xlu1 %2507 }
 0x3f9   : > { %v2554_v3 = vmax.f32 %v2508_v7, 1e-24 }
 0x3fa   : > { %v2505_v10 = vmul.f32 %v6067_v8, %v6067_v8 }
 0x3fb   : > { %4764 = vrsqrt.f32 %v2554_v3  ;;  %vm2576_vm11 = vweird.f32 %v2554_v3 }
 0x3fc   : > { %v2551_v11 = vsel %vm605_vm0, %v2505_v10, 0.0 }
 0x3fd   : > { %2552 = vadd.xlane.f32.xlu2 %v2551_v11 }
 0x400   : > { %v1842_v5 = vpop.xlane.xlu1 %1841  ;;  %v2511_v54 = vpop.xlane.xlu0 %2510 }
 0x401   : > { %v4765_v4 = vpop.eup %4764  ;;  %v1868_v2 = vmax.f32 %v1842_v5, 1e-24  ;;  %v2555_v60 = vmax.f32 %v2511_v54, 1e-24 }
 0x402   : > { %v2571_v19 = vmul.f32 %v4765_v4, %v2554_v3  ;;  %vm2577_vm10 = vweird.f32 %v4765_v4 }
 0x403   : > { %4766 = vrsqrt.f32 %v1868_v2  ;;  %vm2578_vm12 = vmor %vm2576_vm11, %vm2577_vm10  ;;  %vm1980_vm15 = vweird.f32 %v1868_v2  ;;  %vm2586_vm3 = vweird.f32 %v2555_v60 }
 0x404   : > { %v2572_v59 = vmul.f32 %v4765_v4, %v2571_v19  ;;  %4768 = vrsqrt.f32 %v2555_v60 }
 0x406   : > { %v2573_v42 = vmul.f32 0.5, %v2572_v59 }
 0x408   : > { %v2574_v25 = vsub.f32 1.5, %v2573_v42  ;;  %v1845_v7 = vpop.xlane.xlu0 %1844  ;;  %v2514_v50 = vpop.xlane.xlu2 %2513 }
 0x409   : > { %v4767_v15 = vpop.eup %4766  ;;  %v1869_v40 = vmax.f32 %v1845_v7, 1e-24  ;;  %v6072_v27 = vmax.f32 %v2514_v50, 1e-24 }
 0x40a   : > { %v4769_v10 = vpop.eup %4768  ;;  %v2575_v11 = vmul.f32 %v4765_v4, %v2574_v25  ;;  %v1975_v29 = vmul.f32 %v4767_v15, %v1868_v2  ;;  %vm1981_vm13 = vweird.f32 %v4767_v15 }
 0x40b   : > { %v2581_v5 = vmul.f32 %v4769_v10, %v2555_v60  ;;  %4770 = vrsqrt.f32 %v1869_v40  ;;  %vm2587_vm14 = vweird.f32 %v4769_v10  ;;  %vm1982_vm2 = vmor %vm1980_vm15, %vm1981_vm13  ;;  %vm1990_vm7 = vweird.f32 %v1869_v40 }
 0x40c   : > { %v2579_v54 = vsel %vm2578_vm12, %v4765_v4, %v2575_v11  ;;  %v1976_v0 = vmul.f32 %v4767_v15, %v1975_v29  ;;  %4772 = vrsqrt.f32 %v6072_v27  ;;  %vm2588_vm4 = vmor %vm2586_vm3, %vm2587_vm14  ;;  %vm2596_vm9 = vweird.f32 %v6072_v27 }
 0x40d   : > { %v2730_v19 = vmul.f32 %v2579_v54, %v5962_v24  ;;  %v2582_v59 = vmul.f32 %v4769_v10, %v2581_v5 }
 0x40e   : > { %v1977_v42 = vmul.f32 0.5, %v1976_v0 }
 0x40f   : > { %v2583_v14 = vmul.f32 0.5, %v2582_v59  ;;  %4534 = vmatmul.msk.f32.vlgmr.msra.gmra.mxu2 %vm605_vm0, %v2730_v19 }
 0x410   : > { %v1978_v50 = vsub.f32 1.5, %v1977_v42  ;;  %v2517_v7 = vpop.xlane.xlu1 %2516  ;;  %v1848_v25 = vpop.xlane.xlu2 %1847 }
 0x411   : > { %v4771_v3 = vpop.eup %4770  ;;  %v2584_v12 = vsub.f32 1.5, %v2583_v14  ;;  %v6077_v44 = vmax.f32 %v2517_v7, 1e-24  ;;  %v6079_v4 = vmax.f32 %v1848_v25, 1e-24 }
 0x412   : > { %v4773_v29 = vpop.eup %4772  ;;  %v1979_v11 = vmul.f32 %v4767_v15, %v1978_v50  ;;  %v1985_v24 = vmul.f32 %v4771_v3, %v1869_v40  ;;  %vm1991_vm5 = vweird.f32 %v4771_v3 }
 0x413   : > { %v2585_v0 = vmul.f32 %v4769_v10, %v2584_v12  ;;  %v2591_v5 = vmul.f32 %v4773_v29, %v6072_v27  ;;  %4774 = vrsqrt.f32 %v6077_v44  ;;  %vm2597_vm6 = vweird.f32 %v4773_v29  ;;  %vm1992_vm8 = vmor %vm1990_vm7, %vm1991_vm5 }
 0x414   : > { %v1983_v54 = vsel %vm1982_vm2, %v4767_v15, %v1979_v11  ;;  %v1986_v19 = vmul.f32 %v4771_v3, %v1985_v24  ;;  %4776 = vrsqrt.f32 %v6079_v4  ;;  %vm2598_vm10 = vmor %vm2596_vm9, %vm2597_vm6  ;;  %vm2606_vm13 = vweird.f32 %v6077_v44 }
 0x415   : > { %v2589_v14 = vsel %vm2588_vm4, %v4769_v10, %v2585_v0  ;;  %v2592_v59 = vmul.f32 %v4773_v29, %v2591_v5  ;;  %v2044_v42 = vmul.f32 %v1983_v54, %v5966_v63  ;;  %vm2000_vm15 = vweird.f32 %v6079_v4 }
 0x416   : > { %v1987_v7 = vmul.f32 0.5, %v1986_v19  ;;  %v2731_v2 = vmul.f32 %v2589_v14, %v5969_v35 }
 0x417   : > { %v2593_v50 = vmul.f32 0.5, %v2592_v59  ;;  %4492 = vmatmul.msk.f32.gmra.mxu0 %vm605_vm0, %v2044_v42 }
 0x418   : > { %v1988_v12 = vsub.f32 1.5, %v1987_v7  ;;  %4535 = vmatmul.msk.f32.gmra.mxu2 %vm605_vm0, %v2731_v2  ;;  %v1851_v60 = vpop.xlane.xlu1 %1850  ;;  %v2520_v15 = vpop.xlane.xlu0 %2519 }
 0x419   : > { %v4775_v25 = vpop.eup %4774  ;;  %v2594_v11 = vsub.f32 1.5, %v2593_v50  ;;  %v6088_v24 = vmax.f32 %v1851_v60, 1e-24  ;;  %v6090_v10 = vmax.f32 %v2520_v15, 1e-24 }
 0x41a   : > { %v4777_v63 = vpop.eup %4776  ;;  %v1989_v0 = vmul.f32 %v4771_v3, %v1988_v12  ;;  %v2601_v35 = vmul.f32 %v4775_v25, %v6077_v44  ;;  %vm2607_vm11 = vweird.f32 %v4775_v25 }
 0x41b   : > { %v2595_v5 = vmul.f32 %v4773_v29, %v2594_v11  ;;  %v1995_v54 = vmul.f32 %v4777_v63, %v6079_v4  ;;  %4778 = vrsqrt.f32 %v6088_v24  ;;  %vm2001_vm12 = vweird.f32 %v4777_v63  ;;  %vm2608_vm14 = vmor %vm2606_vm13, %vm2607_vm11 }
 0x41c   : > { %v1993_v19 = vsel %vm1992_vm8, %v4771_v3, %v1989_v0  ;;  %v2602_v14 = vmul.f32 %v4775_v25, %v2601_v35  ;;  %4780 = vrsqrt.f32 %v6090_v10  ;;  %vm2002_vm2 = vmor %vm2000_vm15, %vm2001_vm12  ;;  %vm2010_vm5 = vweird.f32 %v6088_v24 }
 0x41d   : > { %v2599_v59 = vsel %vm2598_vm10, %v4773_v29, %v2595_v5  ;;  %v1996_v42 = vmul.f32 %v4777_v63, %v1995_v54  ;;  %v2045_v7 = vmul.f32 %v1993_v19, %v5975_v31  ;;  %vm2616_vm7 = vweird.f32 %v6090_v10 }
 0x41e   : > { %v2603_v40 = vmul.f32 0.5, %v2602_v14  ;;  %v2732_v2 = vmul.f32 %v2599_v59, %v5979_v28 }
 0x41f   : > { %v1997_v50 = vmul.f32 0.5, %v1996_v42  ;;  %4493 = vmatmul.msk.f32.gmra.mxu0 %vm605_vm0, %v2045_v7 }
 0x420   : > { %v2604_v27 = vsub.f32 1.5, %v2603_v40  ;;  %4536 = vmatmul.msk.f32.gmra.mxu2 %vm605_vm0, %v2732_v2  ;;  %v1854_v12 = vpop.xlane.xlu0 %1853  ;;  %v2523_v3 = vpop.xlane.xlu2 %2522 }
 0x421   : > { %v4779_v60 = vpop.eup %4778  ;;  %v1998_v15 = vsub.f32 1.5, %v1997_v50  ;;  %v6101_v11 = vmax.f32 %v1854_v12, 1e-24  ;;  %v6103_v29 = vmax.f32 %v2523_v3, 1e-24 }
 0x422   : > { %v4781_v31 = vpop.eup %4780  ;;  %v2605_v0 = vmul.f32 %v4775_v25, %v2604_v27  ;;  %v2005_v28 = vmul.f32 %v4779_v60, %v6088_v24  ;;  %vm2011_vm3 = vweird.f32 %v4779_v60 }
 0x423   : > { %v1999_v35 = vmul.f32 %v4777_v63, %v1998_v15  ;;  %v2611_v5 = vmul.f32 %v4781_v31, %v6090_v10  ;;  %4782 = vrsqrt.f32 %v6101_v11  ;;  %vm2617_vm4 = vweird.f32 %v4781_v31  ;;  %vm2012_vm6 = vmor %vm2010_vm5, %vm2011_vm3 }
 0x424   : > { %v2609_v54 = vsel %vm2608_vm14, %v4775_v25, %v2605_v0  ;;  %v2006_v19 = vmul.f32 %v4779_v60, %v2005_v28  ;;  %4784 = vrsqrt.f32 %v6103_v29  ;;  %vm2618_vm8 = vmor %vm2616_vm7, %vm2617_vm4  ;;  %vm2020_vm11 = vweird.f32 %v6101_v11 }
 0x425   : > { %v2003_v14 = vsel %vm2002_vm2, %v4777_v63, %v1999_v35  ;;  %v2612_v59 = vmul.f32 %v4781_v31, %v2611_v5  ;;  %v2733_v42 = vmul.f32 %v2609_v54, %v5989_v55  ;;  %vm2626_vm13 = vweird.f32 %v6103_v29 }
 0x426   : > { %v2007_v44 = vmul.f32 0.5, %v2006_v19  ;;  %v2046_v7 = vmul.f32 %v2003_v14, %v5985_v9 }
 0x427   : > { %v2613_v40 = vmul.f32 0.5, %v2612_v59 }
 0x428   : > { %v2008_v2 = vsub.f32 1.5, %v2007_v44  ;;  %4494 = vmatmul.msk.f32.gmra.mxu0 %vm605_vm0, %v2046_v7  ;;  %4537 = vmatmul.msk.f32.gmra.mxu2 %vm605_vm0, %v2733_v42  ;;  %v2526_v4 = vpop.xlane.xlu1 %2525  ;;  %v1857_v25 = vpop.xlane.xlu2 %1856 }
 0x429   : > { %v4783_v50 = vpop.eup %4782  ;;  %v2614_v27 = vsub.f32 1.5, %v2613_v40  ;;  %v2560_v12 = vmax.f32 %v2526_v4, 1e-24  ;;  %v6115_v63 = vmax.f32 %v1857_v25, 1e-24 }
 0x42a   : > { %v4785_v3 = vpop.eup %4784  ;;  %v2009_v55 = vmul.f32 %v4779_v60, %v2008_v2  ;;  %v2015_v9 = vmul.f32 %v4783_v50, %v6101_v11  ;;  %vm2021_vm9 = vweird.f32 %v4783_v50 }
 0x42b   : > { %v2615_v15 = vmul.f32 %v4781_v31, %v2614_v27  ;;  %v2621_v0 = vmul.f32 %v4785_v3, %v6103_v29  ;;  %4786 = vrsqrt.f32 %v2560_v12  ;;  %vm2627_vm10 = vweird.f32 %v4785_v3  ;;  %vm2022_vm12 = vmor %vm2020_vm11, %vm2021_vm9 }
 0x42c   : > { %v2013_v28 = vsel %vm2012_vm6, %v4779_v60, %v2009_v55  ;;  %v2016_v35 = vmul.f32 %v4783_v50, %v2015_v9  ;;  %4788 = vrsqrt.f32 %v6115_v63  ;;  %vm2628_vm14 = vmor %vm2626_vm13, %vm2627_vm10  ;;  %vm2636_vm3 = vweird.f32 %v2560_v12 }
 0x42d   : > { %v2619_v5 = vsel %vm2618_vm8, %v4781_v31, %v2615_v15  ;;  %v2622_v54 = vmul.f32 %v4785_v3, %v2621_v0  ;;  %v2047_v19 = vmul.f32 %v2013_v28, %v5995_v51  ;;  %vm2030_vm5 = vweird.f32 %v6115_v63 }
 0x42e   : > { %v2017_v14 = vmul.f32 0.5, %v2016_v35  ;;  %v2734_v24 = vmul.f32 %v2619_v5, %v5999_v32 }
 0x42f   : > { %v2623_v59 = vmul.f32 0.5, %v2622_v54 }
 0x430   : > { %v2018_v42 = vsub.f32 1.5, %v2017_v14  ;;  %4495 = vmatmul.msk.f32.gmra.mxu0 %vm605_vm0, %v2047_v19  ;;  %4538 = vmatmul.msk.f32.gmra.mxu2 %vm605_vm0, %v2734_v24  ;;  %v2529_v10 = vpop.xlane.xlu0 %2528  ;;  %v4569_v14 = vld [vmem:[%s7417_s3 + $0x78] sm:$0xff] }
 0x431   : > { %v4787_v60 = vpop.eup %4786  ;;  %v2624_v44 = vsub.f32 1.5, %v2623_v59  ;;  %v2561_v7 = vmax.f32 %v2529_v10, 1e-24  ;;  %3117 = vmatpush.msrb.mxu1 %v4569_v14 }
 0x432   : > { %v4789_v40 = vpop.eup %4788  ;;  %v2019_v31 = vmul.f32 %v4783_v50, %v2018_v42  ;;  %v2631_v51 = vmul.f32 %v4787_v60, %v2560_v12  ;;  %vm2637_vm15 = vweird.f32 %v4787_v60 }
 0x433   : > { %v2625_v2 = vmul.f32 %v4785_v3, %v2624_v44  ;;  %v2025_v32 = vmul.f32 %v4789_v40, %v6115_v63  ;;  %4790 = vrsqrt.f32 %v2561_v7  ;;  %vm2031_vm2 = vweird.f32 %v4789_v40  ;;  %vm2638_vm4 = vmor %vm2636_vm3, %vm2637_vm15 }
 0x434   : > { %v2023_v4 = vsel %vm2022_vm12, %v4783_v50, %v2019_v31  ;;  %v2632_v25 = vmul.f32 %v4787_v60, %v2631_v51  ;;  %vm2032_vm6 = vmor %vm2030_vm5, %vm2031_vm2  ;;  %vm2646_vm8 = vweird.f32 %v2561_v7 }
 0x435   : > { %v2629_v27 = vsel %vm2628_vm14, %v4785_v3, %v2625_v2  ;;  %v2026_v55 = vmul.f32 %v4789_v40, %v2025_v32  ;;  %v2048_v9 = vmul.f32 %v2023_v4, %v6005_v33 }
 0x436   : > { %v2633_v15 = vmul.f32 0.5, %v2632_v25  ;;  %v2735_v0 = vmul.f32 %v2629_v27, %v6009_v34 }
 0x437   : > { %v2027_v28 = vmul.f32 0.5, %v2026_v55 }
 0x438   : > { %v2634_v11 = vsub.f32 1.5, %v2633_v15  ;;  %4496 = vmatmul.msk.f32.gmra.mxu0 %vm605_vm0, %v2048_v9  ;;  %4539 = vmatmul.msk.f32.gmra.mxu2 %vm605_vm0, %v2735_v0  ;;  %v2532_v29 = vpop.xlane.xlu1 %2531 }
 0x439   : > { %v4791_v35 = vpop.eup %4790  ;;  %v2028_v5 = vsub.f32 1.5, %v2027_v28  ;;  %v2562_v50 = vmax.f32 %v2532_v29, 1e-24 }
 0x43a   : > { %v2635_v54 = vmul.f32 %v4787_v60, %v2634_v11  ;;  %v2641_v3 = vmul.f32 %v4791_v35, %v2561_v7  ;;  %vm2647_vm7 = vweird.f32 %v4791_v35 }
 0x43b   : > { %v2029_v33 = vmul.f32 %v4789_v40, %v2028_v5  ;;  %4792 = vrsqrt.f32 %v2562_v50  ;;  %vm2648_vm9 = vmor %vm2646_vm8, %vm2647_vm7  ;;  %vm2656_vm11 = vweird.f32 %v2562_v50 }
 0x43c   : > { %v2639_v34 = vsel %vm2638_vm4, %v4787_v60, %v2635_v54  ;;  %v2642_v19 = vmul.f32 %v4791_v35, %v2641_v3 }
 0x43d   : > { %v2033_v24 = vsel %vm2032_vm6, %v4789_v40, %v2029_v33  ;;  %v2736_v59 = vmul.f32 %v2639_v34, %v6019_v46 }
 0x43e   : > { %v2643_v42 = vmul.f32 0.5, %v2642_v19  ;;  %v2049_v12 = vmul.f32 %v2033_v24, %v6015_v58 }
 0x440   : > { %v2644_v10 = vsub.f32 1.5, %v2643_v42  ;;  %4497 = vmatmul.msk.f32.gmra.mxu0 %vm605_vm0, %v2049_v12  ;;  %4540 = vmatmul.msk.f32.gmra.mxu2 %vm605_vm0, %v2736_v59  ;;  %v2535_v63 = vpop.xlane.xlu2 %2534 }
 0x441   : > { %v4793_v60 = vpop.eup %4792  ;;  %v2563_v44 = vmax.f32 %v2535_v63, 1e-24  ;;  %v4568_v63 = vld [vmem:[%s7417_s3 + $0x70] sm:$0xff] }
 0x442   : > { %v2645_v31 = vmul.f32 %v4791_v35, %v2644_v10  ;;  %v2651_v51 = vmul.f32 %v4793_v60, %v2562_v50  ;;  %vm2657_vm10 = vweird.f32 %v4793_v60  ;;  %3118 = vmatpush.msrb.mxu1 %v4568_v63 }
 0x443   : > { %4794 = vrsqrt.f32 %v2563_v44  ;;  %vm2658_vm12 = vmor %vm2656_vm11, %vm2657_vm10  ;;  %vm2666_vm14 = vweird.f32 %v2563_v44 }
 0x444   : > { %v2649_v40 = vsel %vm2648_vm9, %v4791_v35, %v2645_v31  ;;  %v2652_v46 = vmul.f32 %v4793_v60, %v2651_v51 }
 0x445   : > { %v2737_v2 = vmul.f32 %v2649_v40, %v6027_v47 }
 0x446   : > { %v2653_v32 = vmul.f32 0.5, %v2652_v46 }
 0x448   : > { %v2654_v58 = vsub.f32 1.5, %v2653_v32  ;;  %4541 = vmatmul.msk.f32.gmra.mxu2 %vm605_vm0, %v2737_v2  ;;  %v2538_v4 = vpop.xlane.xlu0 %2537 }
 0x449   : > { %v4795_v25 = vpop.eup %4794  ;;  %v2564_v27 = vmax.f32 %v2538_v4, 1e-24 }
 0x44a   : > { %v2655_v55 = vmul.f32 %v4793_v60, %v2654_v58  ;;  %v2661_v9 = vmul.f32 %v4795_v25, %v2563_v44  ;;  %vm2667_vm13 = vweird.f32 %v4795_v25 }
 0x44b   : > { %4796 = vrsqrt.f32 %v2564_v27  ;;  %vm2668_vm15 = vmor %vm2666_vm14, %vm2667_vm13  ;;  %vm2676_vm3 = vweird.f32 %v2564_v27 }
 0x44c   : > { %v2659_v7 = vsel %vm2658_vm12, %v4793_v60, %v2655_v55  ;;  %v2662_v15 = vmul.f32 %v4795_v25, %v2661_v9  ;;  %v4567_v55 = vld [vmem:[%s7417_s3 + $0x68] sm:$0xff] }
 0x44d   : > { %v2738_v0 = vmul.f32 %v2659_v7, %v6032_v36  ;;  %3119 = vmatpush.msrb.mxu1 %v4567_v55 }
 0x44e   : > { %v2663_v28 = vmul.f32 0.5, %v2662_v15 }
 0x450   : > { %v2664_v11 = vsub.f32 1.5, %v2663_v28  ;;  %4542 = vmatmul.msk.f32.gmra.mxu2 %vm605_vm0, %v2738_v0  ;;  %v2541_v47 = vpop.xlane.xlu1 %2540 }
 0x451   : > { %v4797_v29 = vpop.eup %4796  ;;  %v2565_v35 = vmax.f32 %v2541_v47, 1e-24 }
 0x452   : > { %v2665_v5 = vmul.f32 %v4795_v25, %v2664_v11  ;;  %v2671_v54 = vmul.f32 %v4797_v29, %v2564_v27  ;;  %vm2677_vm2 = vweird.f32 %v4797_v29 }
 0x453   : > { %4798 = vrsqrt.f32 %v2565_v35  ;;  %vm2678_vm4 = vmor %vm2676_vm3, %vm2677_vm2  ;;  %vm2686_vm6 = vweird.f32 %v2565_v35 }
 0x454   : > { %v2669_v50 = vsel %vm2668_vm15, %v4795_v25, %v2665_v5  ;;  %v2672_v3 = vmul.f32 %v4797_v29, %v2671_v54 }
 0x455   : > { %v2739_v33 = vmul.f32 %v2669_v50, %v6037_v41 }
 0x456   : > { %v2673_v34 = vmul.f32 0.5, %v2672_v3 }
 0x458   : > { %v2674_v19 = vsub.f32 1.5, %v2673_v34  ;;  %4543 = vmatmul.msk.f32.gmra.mxu2 %vm605_vm0, %v2739_v33  ;;  %v2544_v36 = vpop.xlane.xlu2 %2543 }
 0x459   : > { %v4799_v14 = vpop.eup %4798  ;;  %v2566_v24 = vmax.f32 %v2544_v36, 1e-24 }
 0x45a   : > { %v2675_v59 = vmul.f32 %v4797_v29, %v2674_v19  ;;  %v2681_v42 = vmul.f32 %v4799_v14, %v2565_v35  ;;  %vm2687_vm5 = vweird.f32 %v4799_v14 }
 0x45b   : > { %4800 = vrsqrt.f32 %v2566_v24  ;;  %vm2688_vm7 = vmor %vm2686_vm6, %vm2687_vm5  ;;  %vm2696_vm9 = vweird.f32 %v2566_v24 }
 0x45c   : > { %v2679_v12 = vsel %vm2678_vm4, %v4797_v29, %v2675_v59  ;;  %v2682_v10 = vmul.f32 %v4799_v14, %v2681_v42 }
 0x45d   : > { %v2740_v41 = vmul.f32 %v2679_v12, %v6042_v38 }
 0x45e   : > { %v2683_v60 = vmul.f32 0.5, %v2682_v10 }
 0x460   : > { %v2684_v44 = vsub.f32 1.5, %v2683_v60  ;;  %4544 = vmatmul.msk.f32.gmra.mxu2 %vm605_vm0, %v2740_v41  ;;  %v2547_v31 = vpop.xlane.xlu0 %2546 }
 0x461   : > { %v4801_v51 = vpop.eup %4800  ;;  %v2567_v40 = vmax.f32 %v2547_v31, 1e-24  ;;  %v4566_v31 = vld [vmem:[%s7417_s3 + $0x60] sm:$0xff] }
 0x462   : > { %v2685_v46 = vmul.f32 %v4799_v14, %v2684_v44  ;;  %v2691_v2 = vmul.f32 %v4801_v51, %v2566_v24  ;;  %vm2697_vm8 = vweird.f32 %v4801_v51  ;;  %3120 = vmatpush.msrb.mxu1 %v4566_v31 }
 0x463   : > { %4802 = vrsqrt.f32 %v2567_v40  ;;  %vm2698_vm10 = vmor %vm2696_vm9, %vm2697_vm8  ;;  %vm2706_vm12 = vweird.f32 %v2567_v40 }
 0x464   : > { %v2689_v32 = vsel %vm2688_vm7, %v4799_v14, %v2685_v46  ;;  %v2692_v58 = vmul.f32 %v4801_v51, %v2691_v2  ;;  %v4856_v46 = vld [vmem:[%s7419_s5] sm:$0xff] }
 0x465   : > { %v2741_v4 = vmul.f32 %v2689_v32, %v6047_v16  ;;  %v6183_v2 = vld [vmem:[%s7420_s6] ss:$0 sm:$0xff] }
 0x466   : > { %v2693_v25 = vmul.f32 0.5, %v2692_v58 }
 0x468   : > { %v2694_v38 = vsub.f32 1.5, %v2693_v25  ;;  %4545 = vmatmul.msk.f32.gmra.mxu2 %vm605_vm0, %v2741_v4  ;;  %v2550_v27 = vpop.xlane.xlu1 %2549 }
 0x469   : > { %v4803_v9 = vpop.eup %4802  ;;  %v2568_v7 = vmax.f32 %v2550_v27, 1e-24 }
 0x46a   : > { %v2695_v15 = vmul.f32 %v4801_v51, %v2694_v38  ;;  %v2701_v0 = vmul.f32 %v4803_v9, %v2567_v40  ;;  %vm2707_vm11 = vweird.f32 %v4803_v9 }
 0x46b   : > { %4804 = vrsqrt.f32 %v2568_v7  ;;  %vm2708_vm13 = vmor %vm2706_vm12, %vm2707_vm11  ;;  %vm2716_vm15 = vweird.f32 %v2568_v7 }
 0x46c   : > { %v2699_v28 = vsel %vm2698_vm10, %v4801_v51, %v2695_v15  ;;  %v2702_v16 = vmul.f32 %v4803_v9, %v2701_v0  ;;  %v4854_v51 = vld [vmem:[%s7419_s5 + $0x10] sm:$0xff] }
 0x46d   : > { %v2742_v11 = vmul.f32 %v2699_v28, %v6052_v53 }
 0x46e   : > { %v2703_v47 = vmul.f32 0.5, %v2702_v16 }
 0x470   : > { %v2704_v29 = vsub.f32 1.5, %v2703_v47  ;;  %4546 = vmatmul.msk.f32.gmra.mxu2 %vm605_vm0, %v2742_v11  ;;  %v2553_v35 = vpop.xlane.xlu2 %2552 }
 0x471   : > { %v4805_v5 = vpop.eup %4804  ;;  %v2569_v54 = vmax.f32 %v2553_v35, 1e-24 }
 0x472   : > { %v2705_v50 = vmul.f32 %v4803_v9, %v2704_v29  ;;  %v2711_v3 = vmul.f32 %v4805_v5, %v2568_v7  ;;  %vm2717_vm14 = vweird.f32 %v4805_v5 }
 0x473   : > { %4806 = vrsqrt.f32 %v2569_v54  ;;  %vm2718_vm2 = vmor %vm2716_vm15, %vm2717_vm14  ;;  %vm2726_vm4 = vweird.f32 %v2569_v54 }
 0x474   : > { %v2709_v33 = vsel %vm2708_vm13, %v4803_v9, %v2705_v50  ;;  %v2712_v34 = vmul.f32 %v4805_v5, %v2711_v3 }
 0x475   : > { %v2743_v19 = vmul.f32 %v2709_v33, %v6057_v48 }
 0x476   : > { %v2713_v36 = vmul.f32 0.5, %v2712_v34 }
 0x478   : > { %v2714_v14 = vsub.f32 1.5, %v2713_v36  ;;  %4547 = vmatmul.msk.f32.gmra.mxu2 %vm605_vm0, %v2743_v19 }
 0x479   : > { %v4807_v53 = vpop.eup %4806 }
 0x47a   : > { %v2715_v24 = vmul.f32 %v4805_v5, %v2714_v14  ;;  %v2721_v59 = vmul.f32 %v4807_v53, %v2569_v54  ;;  %vm2727_vm3 = vweird.f32 %v4807_v53 }
 0x47b   : > { %vm2728_vm5 = vmor %vm2726_vm4, %vm2727_vm3 }
 0x47c   : > { %v2719_v42 = vsel %vm2718_vm2, %v4805_v5, %v2715_v24  ;;  %v2722_v12 = vmul.f32 %v4807_v53, %v2721_v59 }
 0x47d   : > { %v2744_v10 = vmul.f32 %v2719_v42, %v6062_v49  ;;  %v4853_v49 = vld [vmem:[%s7419_s5 + $0x18] sm:$0xff] }
 0x47e   : > { %v2723_v63 = vmul.f32 0.5, %v2722_v12  ;;  %3941 = vmatpush.msra.mxu1 %v4853_v49 }
 0x480   : > { %v2724_v41 = vsub.f32 1.5, %v2723_v63  ;;  %4548 = vmatmul.msk.f32.gmra.mxu2 %vm605_vm0, %v2744_v10  ;;  %3942 = vmatpush.msra.mxu1 %v4854_v51 }
 0x482   : > { %v2725_v48 = vmul.f32 %v4807_v53, %v2724_v41 }
 0x484   : > { %v2729_v60 = vsel %vm2728_vm5, %v4807_v53, %v2725_v48  ;;  %v6202_v53 = vpop.f32.mrf.mxu1 }
 0x485   : > { %v2745_v44 = vmul.f32 %v2729_v60, %v6067_v8  ;;  %v4855_v8 = vld [vmem:[%s7419_s5 + $0x8] sm:$0xff] }
 0x486   : > { %3943 = vmatpush.msra.mxu1 %v4855_v8 }
 0x488   : > { %4549 = vmatmul.msk.f32.gmra.mxu2 %vm605_vm0, %v2745_v44  ;;  %3944 = vmatpush.msra.mxu1 %v4856_v46 }
 0x48c   : > { %v6209_v60 = vpop.f32.mrf.mxu1 }
 0x492   : > { %v2811_v40 = vpop.f32.mrf.mxu2 }
 0x493   : > { %v2812_v32 = vadd.f32 %v6183_v2, %v2811_v40 }
 0x494   : > { %v2145_v58 = vpop.f32.mrf.mxu0  ;;  %v6214_v8 = vpop.f32.mrf.mxu1 }
 0x495   : > { %v2859_v4 = vmax.f32 %v2812_v32, 0.0  ;;  %v2146_v25 = vadd.f32 %v6183_v2, %v2145_v58 }
 0x497   : > { %v2173_v38 = vmax.f32 %v2146_v25, 0.0  ;;  %4550 = vmatmul.msk.f32.vlgmr.msrb.gmra.mxu0 %vm747_vm1, %v2859_v4 }
 0x499   : > { %4508 = vmatmul.msk.f32.gmra.mxu1 %vm747_vm1, %v2173_v38 }
 0x49b   : > { %v2814_v27 = vpop.f32.mrf.mxu2 }
 0x49c   : > { %v2815_v55 = vadd.f32 %v6183_v2, %v2814_v27  ;;  %v2148_v9 = vpop.f32.mrf.mxu0  ;;  %v6221_v58 = vpop.f32.mrf.mxu1 }
 0x49d   : > { %v2149_v7 = vadd.f32 %v6183_v2, %v2148_v9 }
 0x49e   : > { %v2860_v15 = vmax.f32 %v2815_v55, 0.0 }
 0x49f   : > { %v2174_v0 = vmax.f32 %v2149_v7, 0.0 }
 0x4a0   : > { %4551 = vmatmul.msk.f32.gmra.mxu0 %vm747_vm1, %v2860_v15 }
 0x4a1   : > { %4509 = vmatmul.msk.f32.gmra.mxu1 %vm747_vm1, %v2174_v0 }
 0x4a3   : > { %v2817_v28 = vpop.f32.mrf.mxu2 }
 0x4a4   : > { %v2818_v16 = vadd.f32 %v6183_v2, %v2817_v28  ;;  %v6229_v55 = vpop.f32.mrf.mxu1 }
 0x4a5   : > { %v2151_v11 = vpop.f32.mrf.mxu0 }
 0x4a6   : > { %v2861_v47 = vmax.f32 %v2818_v16, 0.0  ;;  %v2152_v29 = vadd.f32 %v6183_v2, %v2151_v11  ;;  %v3799_v11 = vld [vmem:[%s7418_s4 + $0x18] sm:$0xff] }
 0x4a7   : > { %3812 = vmatpush.msra.mxu0 %v3799_v11 }
 0x4a8   : > { %v2175_v35 = vmax.f32 %v2152_v29, 0.0  ;;  %4552 = vmatmul.msk.f32.gmra.mxu0 %vm747_vm1, %v2861_v47 }
 0x4aa   : > { %4510 = vmatmul.msk.f32.gmra.mxu1 %vm747_vm1, %v2175_v35 }
 0x4ab   : > { %v2820_v5 = vpop.f32.mrf.mxu2 }
 0x4ac   : > { %v2821_v54 = vadd.f32 %v6183_v2, %v2820_v5  ;;  %v6236_v28 = vpop.f32.mrf.mxu1 }
 0x4ad   : > { %v2154_v50 = vpop.f32.mrf.mxu0 }
 0x4ae   : > { %v2862_v3 = vmax.f32 %v2821_v54, 0.0  ;;  %v2155_v33 = vadd.f32 %v6183_v2, %v2154_v50  ;;  %v3798_v54 = vld [vmem:[%s7418_s4 + $0x10] sm:$0xff] }
 0x4af   : > { %3813 = vmatpush.msra.mxu0 %v3798_v54 }
 0x4b0   : > { %v2176_v34 = vmax.f32 %v2155_v33, 0.0  ;;  %4553 = vmatmul.msk.f32.gmra.mxu0 %vm747_vm1, %v2862_v3  ;;  %v3797_v33 = vld [vmem:[%s7418_s4 + $0x8] sm:$0xff] }
 0x4b1   : > { %3814 = vmatpush.msra.mxu0 %v3797_v33 }
 0x4b2   : > { %4511 = vmatmul.msk.f32.gmra.mxu1 %vm747_vm1, %v2176_v34 }
 0x4b3   : > { %v2823_v19 = vpop.f32.mrf.mxu2 }
 0x4b4   : > { %v2824_v36 = vadd.f32 %v6183_v2, %v2823_v19  ;;  %v6245_v5 = vpop.f32.mrf.mxu1  ;;  %v3796_v19 = vld [vmem:[%s7418_s4] sm:$0xff] }
 0x4b5   : > { %v2157_v14 = vpop.f32.mrf.mxu0  ;;  %3815 = vmatpush.msra.mxu0 %v3796_v19 }
 0x4b6   : > { %v2863_v24 = vmax.f32 %v2824_v36, 0.0  ;;  %v2158_v59 = vadd.f32 %v6183_v2, %v2157_v14 }
 0x4b8   : > { %v2177_v42 = vmax.f32 %v2158_v59, 0.0  ;;  %4554 = vmatmul.msk.f32.gmra.mxu0 %vm747_vm1, %v2863_v24 }
 0x4ba   : > { %4512 = vmatmul.msk.f32.gmra.mxu1 %vm747_vm1, %v2177_v42 }
 0x4bb   : > { %v2826_v12 = vpop.f32.mrf.mxu2 }
 0x4bc   : > { %v2827_v10 = vadd.f32 %v6183_v2, %v2826_v12  ;;  %v6261_v36 = vpop.f32.mrf.mxu1 }
 0x4bd   : > { %v2160_v63 = vpop.f32.mrf.mxu0 }
 0x4be   : > { %v2864_v41 = vmax.f32 %v2827_v10, 0.0  ;;  %v2161_v48 = vadd.f32 %v6183_v2, %v2160_v63 }
 0x4c0   : > { %v2178_v44 = vmax.f32 %v2161_v48, 0.0  ;;  %4555 = vmatmul.msk.f32.gmra.mxu0 %vm747_vm1, %v2864_v41 }
 0x4c2   : > { %4513 = vmatmul.msk.f32.gmra.mxu1 %vm747_vm1, %v2178_v44 }
 0x4c3   : > { %v2829_v31 = vpop.f32.mrf.mxu2 }
 0x4c4   : > { %v2830_v49 = vadd.f32 %v6183_v2, %v2829_v31  ;;  %v6269_v12 = vpop.f32.mrf.mxu1 }
 0x4c6   : > { %v2865_v51 = vmax.f32 %v2830_v49, 0.0 }
 0x4c8   : > { %4556 = vmatmul.msk.f32.gmra.mxu0 %vm747_vm1, %v2865_v51 }
 0x4ca   : > { %4570 = vmatmul.msk.f32.vlgmr.msrb.gmra.mxu1 %vm605_vm0, %v5178_v18 }
 0x4cb   : > { %v2832_v40 = vpop.f32.mrf.mxu2 }
 0x4cc   : > { %v2833_v46 = vadd.f32 %v6183_v2, %v2832_v40  ;;  %v6276_v44 = vpop.f32.mrf.mxu1 }
 0x4ce   : > { %v2866_v32 = vmax.f32 %v2833_v46, 0.0 }
 0x4d0   : > { %4557 = vmatmul.msk.f32.gmra.mxu0 %vm747_vm1, %v2866_v32 }
 0x4d2   : > { %4571 = vmatmul.msk.f32.gmra.mxu1 %vm605_vm0, %v5186_v22 }
 0x4d3   : > { %v2835_v4 = vpop.f32.mrf.mxu2 }
 0x4d4   : > { %v2836_v25 = vadd.f32 %v6183_v2, %v2835_v4 }
 0x4d6   : > { %v2867_v38 = vmax.f32 %v2836_v25, 0.0 }
 0x4d8   : > { %4558 = vmatmul.msk.f32.gmra.mxu0 %vm747_vm1, %v2867_v38 }
 0x4da   : > { %4572 = vmatmul.msk.f32.gmra.mxu1 %vm605_vm0, %v5196_v26 }
 0x4db   : > { %v2838_v27 = vpop.f32.mrf.mxu2 }
 0x4dc   : > { %v2839_v9 = vadd.f32 %v6183_v2, %v2838_v27 }
 0x4de   : > { %v2868_v7 = vmax.f32 %v2839_v9, 0.0 }
 0x4e0   : > { %4559 = vmatmul.msk.f32.gmra.mxu0 %vm747_vm1, %v2868_v7 }
 0x4e2   : > { %4573 = vmatmul.msk.f32.gmra.mxu1 %vm605_vm0, %v5204_v30 }
 0x4e3   : > { %v2841_v15 = vpop.f32.mrf.mxu2 }
 0x4e4   : > { %v2842_v0 = vadd.f32 %v6183_v2, %v2841_v15 }
 0x4e6   : > { %v2869_v16 = vmax.f32 %v2842_v0, 0.0 }
 0x4e8   : > { %4560 = vmatmul.msk.f32.gmra.mxu0 %vm747_vm1, %v2869_v16 }
 0x4ea   : > { %4574 = vmatmul.msk.f32.gmra.mxu1 %vm605_vm0, %v5210_v37 }
 0x4eb   : > { %v2844_v47 = vpop.f32.mrf.mxu2 }
 0x4ec   : > { %v2845_v29 = vadd.f32 %v6183_v2, %v2844_v47 }
 0x4ee   : > { %v2870_v35 = vmax.f32 %v2845_v29, 0.0 }
 0x4f0   : > { %4561 = vmatmul.msk.f32.gmra.mxu0 %vm747_vm1, %v2870_v35 }
 0x4f2   : > { %4575 = vmatmul.msk.f32.gmra.mxu1 %vm605_vm0, %v5217_v45 }
 0x4f3   : > { %v2847_v50 = vpop.f32.mrf.mxu2 }
 0x4f4   : > { %v2848_v3 = vadd.f32 %v6183_v2, %v2847_v50 }
 0x4f6   : > { %v2871_v34 = vmax.f32 %v2848_v3, 0.0 }
 0x4f8   : > { %4562 = vmatmul.msk.f32.gmra.mxu0 %vm747_vm1, %v2871_v34 }
 0x4fa   : > { %4576 = vmatmul.msk.f32.gmra.mxu1 %vm605_vm0, %v5223_v52 }
 0x4fb   : > { %v2850_v14 = vpop.f32.mrf.mxu2 }
 0x4fc   : > { %v2851_v24 = vadd.f32 %v6183_v2, %v2850_v14 }
 0x4fe   : > { %v2872_v59 = vmax.f32 %v2851_v24, 0.0 }
 0x500   : > { %4563 = vmatmul.msk.f32.gmra.mxu0 %vm747_vm1, %v2872_v59 }
 0x502   : > { %4577 = vmatmul.msk.f32.gmra.mxu1 %vm605_vm0, %v5227_v57 }
 0x503   : > { %v2853_v42 = vpop.f32.mrf.mxu2 }
 0x504   : > { %v2854_v10 = vadd.f32 %v6183_v2, %v2853_v42 }
 0x506   : > { %v2873_v63 = vmax.f32 %v2854_v10, 0.0 }
 0x508   : > { %4564 = vmatmul.msk.f32.gmra.mxu0 %vm747_vm1, %v2873_v63 }
 0x50a   : > { %4578 = vmatmul.msk.f32.gmra.mxu1 %vm605_vm0, %v5233_v61 }
 0x50b   : > { %v2856_v41 = vpop.f32.mrf.mxu2 }
 0x50c   : > { %v2857_v48 = vadd.f32 %v6183_v2, %v2856_v41 }
 0x50e   : > { %v2874_v31 = vmax.f32 %v2857_v48, 0.0 }
 0x510   : > { %4565 = vmatmul.msk.f32.gmra.mxu0 %vm747_vm1, %v2874_v31 }
 0x512   : > { %4579 = vmatmul.msk.f32.gmra.mxu1 %vm605_vm0, %v5242_v6 }
 0x514   : > { %v6281_v49 = vpop.f32.mrf.mxu0 }
 0x516   : > { %v6283_v51 = vpop.f32.mrf.mxu1 }
 0x518   : > { %4618 = vmatmul.msk.f32.vlgmr.msra.gmra.mxu0 %vm605_vm0, %v5178_v18 }
 0x51a   : > { %4580 = vmatmul.msk.f32.gmra.mxu1 %vm605_vm0, %v5257_v13 }
 0x51d   : > { %v6289_v40 = vpop.f32.mrf.mxu0 }
 0x51e   : > { %v6291_v2 = vpop.f32.mrf.mxu1 }
 0x520   : > { %4619 = vmatmul.msk.f32.gmra.mxu0 %vm605_vm0, %v5186_v22 }
 0x522   : > { %4581 = vmatmul.msk.f32.gmra.mxu1 %vm605_vm0, %v5263_v17 }
 0x525   : > { %v6297_v46 = vpop.f32.mrf.mxu0 }
 0x526   : > { %7480 = vst [vmem:[#allocation31_spill] sm:$0xff] %v6297_v46 }
 0x527   : > { %v6299_v32 = vpop.f32.mrf.mxu1 }
 0x528   : > { %4620 = vmatmul.msk.f32.gmra.mxu0 %vm605_vm0, %v5196_v26 }
 0x52a   : > { %4582 = vmatmul.msk.f32.gmra.mxu1 %vm605_vm0, %v5268_v20 }
 0x52d   : > { %v6305_v18 = vpop.f32.mrf.mxu0 }
 0x52f   : > { %v6307_v4 = vpop.f32.mrf.mxu1 }
 0x530   : > { %4621 = vmatmul.msk.f32.gmra.mxu0 %vm605_vm0, %v5204_v30 }
 0x532   : > { %4583 = vmatmul.msk.f32.gmra.mxu1 %vm605_vm0, %v5274_v21 }
 0x535   : > { %v6313_v22 = vpop.f32.mrf.mxu0 }
 0x536   : > { %7481 = vst [vmem:[#allocation32_spill] sm:$0xff] %v6313_v22 }
 0x537   : > { %v6315_v25 = vpop.f32.mrf.mxu1 }
 0x538   : > { %4622 = vmatmul.msk.f32.gmra.mxu0 %vm605_vm0, %v5210_v37 }
 0x53a   : > { %4584 = vmatmul.msk.f32.gmra.mxu1 %vm605_vm0, %v5286_v23 }
 0x53d   : > { %v6321_v26 = vpop.f32.mrf.mxu0 }
 0x53e   : > { %7482 = vst [vmem:[#allocation33_spill] sm:$0xff] %v6321_v26  ;;  %v7502_v26 = vld [vmem:[#allocation13_spill] sm:$0xff] }
 0x53f   : > { %v6323_v38 = vpop.f32.mrf.mxu1 }
 0x540   : > { %4623 = vmatmul.msk.f32.gmra.mxu0 %vm605_vm0, %v5217_v45 }
 0x542   : > { %4585 = vmatmul.msk.f32.gmra.mxu1 %vm605_vm0, %v7478_v62 }
 0x545   : > { %v6329_v30 = vpop.f32.mrf.mxu0 }
 0x546   : > { %7483 = vst [vmem:[#allocation34_spill] sm:$0xff] %v6329_v30  ;;  %v7507_v30 = vld [vmem:[#allocation17_spill] sm:$0xff] }
 0x547   : > { %v3122_v27 = vpop.f32.mrf.mxu1 }
 0x548   : > { %v6331_v9 = vmax.f32 %v3122_v27, 0.0  ;;  %4624 = vmatmul.msk.f32.gmra.mxu0 %vm605_vm0, %v5223_v52 }
 0x54a   : > { %v3186_v37 = vmul.f32 %v6331_v9, %v6331_v9 }
 0x54c   : > { %v3202_v7 = vsel %vm605_vm0, %v3186_v37, 0.0 }
 0x54d   : > { %v6338_v15 = vpop.f32.mrf.mxu0  ;;  %3203 = vadd.xlane.f32.xlu0 %v3202_v7 }
 0x54e   : > { %7484 = vst [vmem:[#allocation35_spill] sm:$0xff] %v6338_v15 }
 0x54f   : > { %v3125_v45 = vpop.f32.mrf.mxu1 }
 0x550   : > { %v6340_v0 = vmax.f32 %v3125_v45, 0.0  ;;  %4625 = vmatmul.msk.f32.gmra.mxu0 %vm605_vm0, %v5227_v57 }
 0x552   : > { %v3187_v16 = vmul.f32 %v6340_v0, %v6340_v0 }
 0x554   : > { %v3205_v11 = vsel %vm605_vm0, %v3187_v16, 0.0 }
 0x555   : > { %v6347_v52 = vpop.f32.mrf.mxu0  ;;  %3206 = vadd.xlane.f32.xlu1 %v3205_v11 }
 0x556   : > { %7485 = vst [vmem:[#allocation36_spill] sm:$0xff] %v6347_v52 }
 0x557   : > { %v3128_v47 = vpop.f32.mrf.mxu1 }
 0x558   : > { %v6349_v29 = vmax.f32 %v3128_v47, 0.0  ;;  %4626 = vmatmul.msk.f32.gmra.mxu0 %vm605_vm0, %v5233_v61 }
 0x55a   : > { %v3188_v35 = vmul.f32 %v6349_v29, %v6349_v29 }
 0x55c   : > { %v3208_v54 = vsel %vm605_vm0, %v3188_v35, 0.0 }
 0x55d   : > { %3209 = vadd.xlane.f32.xlu2 %v3208_v54  ;;  %v6356_v57 = vpop.f32.mrf.mxu0 }
 0x55e   : > { %7486 = vst [vmem:[#allocation37_spill] sm:$0xff] %v6356_v57 }
 0x55f   : > { %v3131_v50 = vpop.f32.mrf.mxu1 }
 0x560   : > { %v6358_v3 = vmax.f32 %v3131_v50, 0.0  ;;  %4627 = vmatmul.msk.f32.gmra.mxu0 %vm605_vm0, %v5242_v6 }
 0x562   : > { %v3189_v33 = vmul.f32 %v6358_v3, %v6358_v3 }
 0x564   : > { %v3211_v34 = vsel %vm605_vm0, %v3189_v33, 0.0 }
 0x565   : > { %3212 = vadd.xlane.f32.xlu0 %v3211_v34  ;;  %v6365_v61 = vpop.f32.mrf.mxu0 }
 0x566   : > { %7487 = vst [vmem:[#allocation38_spill] sm:$0xff] %v6365_v61 }
 0x567   : > { %v3134_v19 = vpop.f32.mrf.mxu1 }
 0x568   : > { %v6367_v14 = vmax.f32 %v3134_v19, 0.0  ;;  %4628 = vmatmul.msk.f32.gmra.mxu0 %vm605_vm0, %v5257_v13 }
 0x56a   : > { %v3190_v24 = vmul.f32 %v6367_v14, %v6367_v14 }
 0x56c   : > { %v3214_v59 = vsel %vm605_vm0, %v3190_v24, 0.0 }
 0x56d   : > { %3215 = vadd.xlane.f32.xlu1 %v3214_v59  ;;  %v6374_v6 = vpop.f32.mrf.mxu0 }
 0x56e   : > { %7488 = vst [vmem:[#allocation39_spill] sm:$0xff] %v6374_v6 }
 0x56f   : > { %v3137_v42 = vpop.f32.mrf.mxu1 }
 0x570   : > { %v6376_v10 = vmax.f32 %v3137_v42, 0.0  ;;  %4629 = vmatmul.msk.f32.gmra.mxu0 %vm605_vm0, %v5263_v17 }
 0x572   : > { %v3191_v63 = vmul.f32 %v6376_v10, %v6376_v10 }
 0x574   : > { %v3217_v41 = vsel %vm605_vm0, %v3191_v63, 0.0 }
 0x575   : > { %3218 = vadd.xlane.f32.xlu2 %v3217_v41  ;;  %v6383_v13 = vpop.f32.mrf.mxu0 }
 0x576   : > { %7489 = vst [vmem:[#allocation40_spill] sm:$0xff] %v6383_v13  ;;  %v7497_v13 = vld [vmem:[#allocation8_spill] sm:$0xff] }
 0x577   : > { %v3140_v48 = vpop.f32.mrf.mxu1 }
 0x578   : > { %v6385_v31 = vmax.f32 %v3140_v48, 0.0  ;;  %4630 = vmatmul.msk.f32.gmra.mxu0 %vm605_vm0, %v5268_v20 }
 0x57a   : > { %v3192_v27 = vmul.f32 %v6385_v31, %v6385_v31 }
 0x57c   : > { %v3220_v37 = vsel %vm605_vm0, %v3192_v27, 0.0 }
 0x57d   : > { %3221 = vadd.xlane.f32.xlu0 %v3220_v37  ;;  %v6392_v17 = vpop.f32.mrf.mxu0 }
 0x57e   : > { %7490 = vst [vmem:[#allocation41_spill] sm:$0xff] %v6392_v17 }
 0x57f   : > { %v3143_v7 = vpop.f32.mrf.mxu1 }
 0x580   : > { %v6394_v45 = vmax.f32 %v3143_v7, 0.0  ;;  %4631 = vmatmul.msk.f32.gmra.mxu0 %vm605_vm0, %v5274_v21 }
 0x582   : > { %v3193_v16 = vmul.f32 %v6394_v45, %v6394_v45 }
 0x584   : > { %v3223_v11 = vsel %vm605_vm0, %v3193_v16, 0.0 }
 0x585   : > { %3224 = vadd.xlane.f32.xlu1 %v3223_v11  ;;  %v6401_v20 = vpop.f32.mrf.mxu0 }
 0x586   : > { %7491 = vst [vmem:[#allocation42_spill] sm:$0xff] %v6401_v20 }
 0x587   : > { %v3146_v47 = vpop.f32.mrf.mxu1 }
 0x588   : > { %v6403_v35 = vmax.f32 %v3146_v47, 0.0  ;;  %4632 = vmatmul.msk.f32.gmra.mxu0 %vm605_vm0, %v5286_v23 }
 0x58a   : > { %v3194_v54 = vmul.f32 %v6403_v35, %v6403_v35 }
 0x58c   : > { %v3226_v50 = vsel %vm605_vm0, %v3194_v54, 0.0 }
 0x58d   : > { %3227 = vadd.xlane.f32.xlu2 %v3226_v50  ;;  %v6410_v21 = vpop.f32.mrf.mxu0 }
 0x58e   : > { %7492 = vst [vmem:[#allocation43_spill] sm:$0xff] %v6410_v21 }
 0x58f   : > { %v3149_v33 = vpop.f32.mrf.mxu1 }
 0x590   : > { %v6412_v34 = vmax.f32 %v3149_v33, 0.0  ;;  %4633 = vmatmul.msk.f32.gmra.mxu0 %vm605_vm0, %v7478_v62 }
 0x592   : > { %v3195_v19 = vmul.f32 %v6412_v34, %v6412_v34 }
 0x594   : > { %v3229_v24 = vsel %vm605_vm0, %v3195_v19, 0.0 }
 0x595   : > { %3230 = vadd.xlane.f32.xlu0 %v3229_v24  ;;  %v3817_v23 = vpop.f32.mrf.mxu0  ;;  %v6439_v24 = vld [vmem:[%s7422_s8] ss:$0 sm:$0xff] }
 0x596   : > { %v3865_v59 = vmax.f32 %v3817_v23, 0.0  ;;  %v853_v22 = vadd.f32 %v6439_v24, %v7507_v30 }
 0x597   : > { %v3152_v42 = vpop.f32.mrf.mxu1 }
 0x598   : > { %v6419_v63 = vmax.f32 %v3152_v42, 0.0  ;;  %4634 = vmatmul.msk.f32.vlgmr.msra.gmra.mxu1 %vm605_vm0, %v3865_v59 }
 0x59a   : > { %v3196_v41 = vmul.f32 %v6419_v63, %v6419_v63 }
 0x59c   : > { %v3232_v48 = vsel %vm605_vm0, %v3196_v41, 0.0 }
 0x59d   : > { %3233 = vadd.xlane.f32.xlu1 %v3232_v48  ;;  %v3820_v62 = vpop.f32.mrf.mxu0  ;;  %v7493_v48 = vld [vmem:[#allocation3_spill] sm:$0xff] }
 0x59e   : > { %v3866_v27 = vmax.f32 %v3820_v62, 0.0  ;;  %v814_v62 = vadd.f32 %v6439_v24, %v7493_v48 }
 0x59f   : > { %v3155_v37 = vpop.f32.mrf.mxu1 }
 0x5a0   : > { %v6425_v7 = vmax.f32 %v3155_v37, 0.0  ;;  %4635 = vmatmul.msk.f32.gmra.mxu1 %vm605_vm0, %v3866_v27 }
 0x5a2   : > { %v3197_v16 = vmul.f32 %v6425_v7, %v6425_v7 }
 0x5a4   : > { %v3235_v11 = vsel %vm605_vm0, %v3197_v16, 0.0  ;;  %v861_v16 = vmax.f32 %v814_v62, 0.0 }
 0x5a5   : > { %3236 = vadd.xlane.f32.xlu2 %v3235_v11  ;;  %v3823_v47 = vpop.f32.mrf.mxu0 }
 0x5a6   : > { %v3867_v54 = vmax.f32 %v3823_v47, 0.0  ;;  %v6453_v47 = vld [vmem:[%s7423_s9] ss:$0 sm:$0xff] }
 0x5a7   : > { %v3158_v50 = vpop.f32.mrf.mxu1  ;;  %v881_v62 = vmul.f32 %v6453_v47, %v861_v16  ;;  %v7498_v16 = vld [vmem:[#allocation10_spill] sm:$0xff] }
 0x5a8   : > { %v6431_v33 = vmax.f32 %v3158_v50, 0.0  ;;  %4636 = vmatmul.msk.f32.gmra.mxu1 %vm605_vm0, %v3867_v54  ;;  %v832_v6 = vadd.f32 %v6439_v24, %v7498_v16 }
 0x5aa   : > { %v3198_v19 = vmul.f32 %v6431_v33, %v6431_v33 }
 0x5ac   : > { %v3238_v23 = vsel %vm605_vm0, %v3198_v19, 0.0  ;;  %v7494_v19 = vld [vmem:[#allocation4_spill] sm:$0xff] }
 0x5ad   : > { %3239 = vadd.xlane.f32.xlu0 %v3238_v23  ;;  %v3826_v59 = vpop.f32.mrf.mxu0  ;;  %v817_v23 = vadd.f32 %v6439_v24, %v7494_v19 }
 0x5ae   : > { %v3868_v42 = vmax.f32 %v3826_v59, 0.0 }
 0x5af   : > { %v3161_v41 = vpop.f32.mrf.mxu1  ;;  %v862_v21 = vmax.f32 %v817_v23, 0.0 }
 0x5b0   : > { %v6444_v27 = vmax.f32 %v3161_v41, 0.0  ;;  %4637 = vmatmul.msk.f32.gmra.mxu1 %vm605_vm0, %v3868_v42  ;;  %v7495_v41 = vld [vmem:[#allocation7_spill] sm:$0xff] }
 0x5b1   : > { %v823_v42 = vadd.f32 %v6439_v24, %v7495_v41 }
 0x5b2   : > { %v3199_v37 = vmul.f32 %v6444_v27, %v6444_v27 }
 0x5b4   : > { %v3241_v11 = vsel %vm605_vm0, %v3199_v37, 0.0 }
 0x5b5   : > { %3242 = vadd.xlane.f32.xlu1 %v3241_v11  ;;  %v3829_v54 = vpop.f32.mrf.mxu0  ;;  %v864_v11 = vmax.f32 %v823_v42, 0.0 }
 0x5b6   : > { %v3869_v50 = vmax.f32 %v3829_v54, 0.0  ;;  %v897_v54 = vsel %vm747_vm1, %v881_v62, 0.0  ;;  %v7500_v62 = vld [vmem:[#allocation6_spill] sm:$0xff] }
 0x5b7   : > { %v3164_v59 = vpop.f32.mrf.mxu1  ;;  %v884_v42 = vmul.f32 %v6453_v47, %v864_v11 }
 0x5b8   : > { %v6459_v48 = vmax.f32 %v3164_v59, 0.0  ;;  %4638 = vmatmul.msk.f32.gmra.mxu1 %vm605_vm0, %v3869_v50  ;;  %v882_v59 = vmul.f32 %v6453_v47, %v862_v21  ;;  %v826_v50 = vadd.f32 %v6439_v24, %v7497_v13 }
 0x5ba   : > { %7496 = vst [vmem:[#allocation3_spill] sm:$0xff] %v6459_v48  ;;  %v3200_v37 = vmul.f32 %v6459_v48, %v6459_v48  ;;  %v900_v13 = vsel %vm747_vm1, %v882_v59, 0.0 }
 0x5bc   : > { %v3244_v20 = vsel %vm605_vm0, %v3200_v37, 0.0 }
 0x5bd   : > { %898 = vadd.xlane.f32.xlu1 %v897_v54  ;;  %3245 = vadd.xlane.f32.xlu2 %v3244_v20  ;;  %v3832_v19 = vpop.f32.mrf.mxu0  ;;  %v820_v20 = vadd.f32 %v6439_v24, %v7500_v62  ;;  %v865_v54 = vmax.f32 %v826_v50, 0.0  ;;  %v7501_v62 = vld [vmem:[#allocation11_spill] sm:$0xff] }
 0x5be   : > { %v3870_v17 = vmax.f32 %v3832_v19, 0.0  ;;  %v867_v19 = vmax.f32 %v832_v6, 0.0 }
 0x5bf   : > { %v3167_v41 = vpop.f32.mrf.mxu1  ;;  %v863_v52 = vmax.f32 %v820_v20, 0.0  ;;  %v885_v59 = vmul.f32 %v6453_v47, %v865_v54 }
 0x5c0   : > { %v6472_v61 = vmax.f32 %v3167_v41, 0.0  ;;  %v3204_v23 = vpop.xlane.xlu0 %3203  ;;  %4639 = vmatmul.msk.f32.gmra.mxu1 %vm605_vm0, %v3870_v17  ;;  %v906_v41 = vsel %vm747_vm1, %v884_v42, 0.0  ;;  %v887_v6 = vmul.f32 %v6453_v47, %v867_v19  ;;  %v7503_v42 = vld [vmem:[#allocation9_spill] sm:$0xff] }
 0x5c1   : > { %v3250_v37 = vmax.f32 %v3204_v23, 1e-24  ;;  %v835_v23 = vadd.f32 %v6439_v24, %v7501_v62  ;;  %v829_v20 = vadd.f32 %v6439_v24, %v7503_v42  ;;  %v909_v19 = vsel %vm747_vm1, %v885_v59, 0.0 }
 0x5c2   : > { %7499 = vst [vmem:[#allocation4_spill] sm:$0xff] %v6472_v61  ;;  %v3201_v21 = vmul.f32 %v6472_v61, %v6472_v61  ;;  %v841_v61 = vadd.f32 %v6439_v24, %v7502_v26 }
 0x5c3   : > { %4808 = vrsqrt.f32 %v3250_v37  ;;  %v866_v62 = vmax.f32 %v829_v20, 0.0  ;;  %vm3272_vm7 = vweird.f32 %v3250_v37 }
 0x5c4   : > { %v3247_v16 = vsel %vm605_vm0, %v3201_v21, 0.0  ;;  %v870_v26 = vmax.f32 %v841_v61, 0.0  ;;  %v7505_v61 = vld [vmem:[#allocation16_spill] sm:$0xff] }
 0x5c5   : > { %907 = vadd.xlane.f32.xlu1 %v906_v41  ;;  %901 = vadd.xlane.f32.xlu2 %v900_v13  ;;  %v3835_v17 = vpop.f32.mrf.mxu0  ;;  %v883_v13 = vmul.f32 %v6453_v47, %v863_v52  ;;  %v7504_v52 = vld [vmem:[#allocation14_spill] sm:$0xff] }
 0x5c6   : > { %3248 = vadd.xlane.f32.xlu0 %v3247_v16  ;;  %v3871_v11 = vmax.f32 %v3835_v17, 0.0  ;;  %v868_v16 = vmax.f32 %v835_v23, 0.0  ;;  %v844_v23 = vadd.f32 %v6439_v24, %v7504_v52  ;;  %v890_v20 = vmul.f32 %v6453_v47, %v870_v26 }
 0x5c7   : > { %v903_v54 = vsel %vm747_vm1, %v883_v13, 0.0 }
 0x5c8   : > { %v3207_v57 = vpop.xlane.xlu1 %3206  ;;  %4640 = vmatmul.msk.f32.gmra.mxu1 %vm605_vm0, %v3871_v11  ;;  %v915_v11 = vsel %vm747_vm1, %v887_v6, 0.0  ;;  %v888_v48 = vmul.f32 %v6453_v47, %v868_v16  ;;  %v871_v52 = vmax.f32 %v844_v23, 0.0  ;;  %v924_v46 = vsel %vm747_vm1, %v890_v20, 0.0 }
 0x5c9   : > { %v4809_v50 = vpop.eup %4808  ;;  %v6492_v21 = vmax.f32 %v3207_v57, 1e-24 }
 0x5ca   : > { %v3267_v41 = vmul.f32 %v4809_v50, %v3250_v37  ;;  %vm3273_vm6 = vweird.f32 %v4809_v50 }
 0x5cb   : > { %4810 = vrsqrt.f32 %v6492_v21  ;;  %vm3274_vm8 = vmor %vm3272_vm7, %vm3273_vm6  ;;  %vm3282_vm10 = vweird.f32 %v6492_v21 }
 0x5cc   : > { %v3268_v17 = vmul.f32 %v4809_v50, %v3267_v41  ;;  %v850_v41 = vadd.f32 %v6439_v24, %v7505_v61 }
 0x5cd   : > { %916 = vadd.xlane.f32.xlu1 %v915_v11  ;;  %910 = vadd.xlane.f32.xlu2 %v909_v19  ;;  %v3838_v42 = vpop.f32.mrf.mxu0  ;;  %v7506_v11 = vld [vmem:[#allocation12_spill] sm:$0xff] }
 0x5ce   : > { %v3269_v57 = vmul.f32 0.5, %v3268_v17  ;;  %904 = vadd.xlane.f32.xlu0 %v903_v54  ;;  %v3872_v15 = vmax.f32 %v3838_v42, 0.0  ;;  %v838_v17 = vadd.f32 %v6439_v24, %v7506_v11  ;;  %v886_v54 = vmul.f32 %v6453_v47, %v866_v62 }
 0x5d0   : > { %v3270_v6 = vsub.f32 1.5, %v3269_v57  ;;  %4641 = vmatmul.msk.f32.gmra.mxu1 %vm605_vm0, %v3872_v15  ;;  %v3210_v59 = vpop.xlane.xlu2 %3209  ;;  %v918_v15 = vsel %vm747_vm1, %v888_v48, 0.0  ;;  %v873_v57 = vmax.f32 %v850_v41, 0.0  ;;  %v869_v11 = vmax.f32 %v838_v17, 0.0 }
 0x5d1   : > { %v4811_v13 = vpop.eup %4810  ;;  %v6508_v19 = vmax.f32 %v3210_v59, 1e-24  ;;  %v912_v37 = vsel %vm747_vm1, %v886_v54, 0.0  ;;  %v891_v48 = vmul.f32 %v6453_v47, %v871_v52  ;;  %v7509_v54 = vld [vmem:[#allocation15_spill] sm:$0xff] }
 0x5d2   : > { %v3271_v42 = vmul.f32 %v4809_v50, %v3270_v6  ;;  %v3277_v16 = vmul.f32 %v4811_v13, %v6492_v21  ;;  %vm3283_vm9 = vweird.f32 %v4811_v13  ;;  %v889_v30 = vmul.f32 %v6453_v47, %v869_v11 }
 0x5d3   : > { %4812 = vrsqrt.f32 %v6508_v19  ;;  %vm3284_vm11 = vmor %vm3282_vm10, %vm3283_vm9  ;;  %vm3292_vm13 = vweird.f32 %v6508_v19 }
 0x5d4   : > { %v3275_v26 = vsel %vm3274_vm8, %v4809_v50, %v3271_v42  ;;  %v3278_v61 = vmul.f32 %v4811_v13, %v3277_v16  ;;  %v7508_v50 = vld [vmem:[#allocation19_spill] sm:$0xff]  ;;  %v847_v42 = vadd.f32 %v6439_v24, %v7509_v54  ;;  %v921_v11 = vsel %vm747_vm1, %v889_v30, 0.0  ;;  %v7510_v54 = vld [vmem:[#allocation18_spill] sm:$0xff] }
 0x5d5   : > { %v3426_v59 = vmul.f32 %v3275_v26, %v6331_v9  ;;  %925 = vadd.xlane.f32.xlu1 %v924_v46  ;;  %919 = vadd.xlane.f32.xlu2 %v918_v15  ;;  %v3841_v62 = vpop.f32.mrf.mxu0  ;;  %v859_v41 = vadd.f32 %v6439_v24, %v7508_v50  ;;  %v893_v9 = vmul.f32 %v6453_v47, %v873_v57  ;;  %v874_v26 = vmax.f32 %v853_v22, 0.0 }
 0x5d6   : > { %v3279_v6 = vmul.f32 0.5, %v3278_v61  ;;  %913 = vadd.xlane.f32.xlu0 %v912_v37  ;;  %v3873_v23 = vmax.f32 %v3841_v62, 0.0  ;;  %v927_v61 = vsel %vm747_vm1, %v891_v48, 0.0  ;;  %v1555_v48 = vadd.f32 %v6439_v24, %v5900_v1 }
 0x5d7   : > { %4586 = vmatmul.msk.f32.vlgmr.msrb.gmra.mxu3 %vm605_vm0, %v3426_v59  ;;  %v876_v57 = vmax.f32 %v859_v41, 0.0  ;;  %v933_v62 = vsel %vm747_vm1, %v893_v9, 0.0 }
 0x5d8   : > { %v3280_v20 = vsub.f32 1.5, %v3279_v6  ;;  %v3213_v46 = vpop.xlane.xlu0 %3212  ;;  %4642 = vmatmul.msk.f32.gmra.mxu1 %vm605_vm0, %v3873_v23  ;;  %v872_v6 = vmax.f32 %v847_v42, 0.0  ;;  %v856_v42 = vadd.f32 %v6439_v24, %v7510_v54 }
 0x5d9   : > { %v4813_v17 = vpop.eup %4812  ;;  %v6527_v16 = vmax.f32 %v3213_v46, 1e-24 }
 0x5da   : > { %v3281_v15 = vmul.f32 %v4811_v13, %v3280_v20  ;;  %v3287_v52 = vmul.f32 %v4813_v17, %v6508_v19  ;;  %v1549_v20 = vadd.f32 %v6439_v24, %v5870_v56  ;;  %vm3293_vm12 = vweird.f32 %v4813_v17 }
 0x5db   : > { %4814 = vrsqrt.f32 %v6527_v16  ;;  %v892_v56 = vmul.f32 %v6453_v47, %v872_v6  ;;  %vm3294_vm14 = vmor %vm3292_vm13, %vm3293_vm12  ;;  %vm3302_vm2 = vweird.f32 %v6527_v16 }
 0x5dc   : > { %v3285_v59 = vsel %vm3284_vm11, %v4811_v13, %v3281_v15  ;;  %v3288_v37 = vmul.f32 %v4813_v17, %v3287_v52  ;;  %v894_v13 = vmul.f32 %v6453_v47, %v874_v26  ;;  %v1596_v52 = vmax.f32 %v1549_v20, 0.0 }
 0x5dd   : > { %934 = vadd.xlane.f32.xlu1 %v933_v62  ;;  %928 = vadd.xlane.f32.xlu2 %v927_v61  ;;  %v3844_v23 = vpop.f32.mrf.mxu0  ;;  %v3427_v21 = vmul.f32 %v3285_v59, %v6340_v0  ;;  %v896_v0 = vmul.f32 %v6453_v47, %v876_v57  ;;  %v1598_v61 = vmax.f32 %v1555_v48, 0.0  ;;  %v875_v62 = vmax.f32 %v856_v42, 0.0 }
 0x5de   : > { %v3289_v50 = vmul.f32 0.5, %v3288_v37  ;;  %922 = vadd.xlane.f32.xlu0 %v921_v11  ;;  %v3874_v22 = vmax.f32 %v3844_v23, 0.0  ;;  %v936_v26 = vsel %vm747_vm1, %v894_v13, 0.0  ;;  %v930_v6 = vsel %vm747_vm1, %v892_v56, 0.0 }
 0x5df   : > { %4587 = vmatmul.msk.f32.gmra.mxu3 %vm605_vm0, %v3427_v21  ;;  %v942_v37 = vsel %vm747_vm1, %v896_v0, 0.0 }
 0x5e0   : > { %v3290_v41 = vsub.f32 1.5, %v3289_v50  ;;  %v3216_v46 = vpop.xlane.xlu1 %3215  ;;  %4643 = vmatmul.msk.f32.gmra.mxu1 %vm605_vm0, %v3874_v22  ;;  %v1558_v50 = vadd.f32 %v6439_v24, %v5910_v39  ;;  %v1564_v22 = vadd.f32 %v6439_v24, %v5920_v43  ;;  %v895_v39 = vmul.f32 %v6453_v47, %v875_v62 }
 0x5e1   : > { %v4815_v9 = vpop.eup %4814  ;;  %v6547_v30 = vmax.f32 %v3216_v46, 1e-24 }
 0x5e2   : > { %v3291_v15 = vmul.f32 %v4813_v17, %v3290_v41  ;;  %v3297_v1 = vmul.f32 %v4815_v9, %v6527_v16  ;;  %vm3303_vm15 = vweird.f32 %v4815_v9  ;;  %v7511_v41 = vld [vmem:[#allocation20_spill] sm:$0xff]  ;;  %v1599_v42 = vmax.f32 %v1558_v50, 0.0 }
 0x5e3   : > { %4816 = vrsqrt.f32 %v6547_v30  ;;  %v1552_v46 = vadd.f32 %v6439_v24, %v7511_v41  ;;  %vm3304_vm3 = vmor %vm3302_vm2, %vm3303_vm15  ;;  %vm3312_vm5 = vweird.f32 %v6547_v30 }
 0x5e4   : > { %v3295_v57 = vsel %vm3294_vm14, %v4813_v17, %v3291_v15  ;;  %v3298_v59 = vmul.f32 %v4815_v9, %v3297_v1  ;;  %v1612_v17 = vmul.f32 %v6453_v47, %v1596_v52  ;;  %v1601_v15 = vmax.f32 %v1564_v22, 0.0  ;;  %v7514_v22 = vld [vmem:[#allocation21_spill] sm:$0xff] }
 0x5e5   : > { %943 = vadd.xlane.f32.xlu1 %v942_v37  ;;  %937 = vadd.xlane.f32.xlu2 %v936_v26  ;;  %v3847_v11 = vpop.f32.mrf.mxu0  ;;  %v3428_v19 = vmul.f32 %v3295_v57, %v6349_v29  ;;  %v1614_v29 = vmul.f32 %v6453_v47, %v1598_v61  ;;  %v1597_v61 = vmax.f32 %v1552_v46, 0.0  ;;  %v939_v57 = vsel %vm747_vm1, %v895_v39, 0.0 }
 0x5e6   : > { %v3299_v23 = vmul.f32 0.5, %v3298_v59  ;;  %931 = vadd.xlane.f32.xlu0 %v930_v6  ;;  %v3875_v21 = vmax.f32 %v3847_v11, 0.0  ;;  %v1628_v56 = vsel %vm747_vm1, %v1612_v17, 0.0  ;;  %v7512_v6 = vld [vmem:[#allocation22_spill] sm:$0xff] }
 0x5e7   : > { %4588 = vmatmul.msk.f32.gmra.mxu3 %vm605_vm0, %v3428_v19  ;;  %v1634_v26 = vsel %vm747_vm1, %v1614_v29, 0.0  ;;  %v1567_v11 = vadd.f32 %v6439_v24, %v7512_v6  ;;  %v7513_v19 = vld [vmem:[#allocation24_spill] sm:$0xff]  ;;  %v1613_v29 = vmul.f32 %v6453_v47, %v1597_v61 }
 0x5e8   : > { %v3300_v20 = vsub.f32 1.5, %v3299_v23  ;;  %4644 = vmatmul.msk.f32.gmra.mxu1 %vm605_vm0, %v3875_v21  ;;  %v3219_v13 = vpop.xlane.xlu2 %3218  ;;  %v1573_v23 = vadd.f32 %v6439_v24, %v7513_v19  ;;  %v7517_v19 = vld [vmem:[#allocation23_spill] sm:$0xff] }
 0x5e9   : > { %v4817_v48 = vpop.eup %4816  ;;  %v6567_v0 = vmax.f32 %v3219_v13, 1e-24  ;;  %v1602_v39 = vmax.f32 %v1567_v11, 0.0 }
 0x5ea   : > { %v3301_v54 = vmul.f32 %v4815_v9, %v3300_v20  ;;  %v3307_v43 = vmul.f32 %v4817_v48, %v6547_v30  ;;  %vm3313_vm4 = vweird.f32 %v4817_v48  ;;  %v1561_v20 = vadd.f32 %v6439_v24, %v7514_v22 }
 0x5eb   : > { %4818 = vrsqrt.f32 %v6567_v0  ;;  %vm3314_vm6 = vmor %vm3312_vm5, %vm3313_vm4  ;;  %vm3322_vm8 = vweird.f32 %v6567_v0 }
 0x5ec   : > { %v3305_v1 = vsel %vm3304_vm3, %v4815_v9, %v3301_v54  ;;  %v3308_v52 = vmul.f32 %v4817_v48, %v3307_v43  ;;  %v1615_v9 = vmul.f32 %v6453_v47, %v1599_v42  ;;  %v1604_v43 = vmax.f32 %v1573_v23, 0.0 }
 0x5ed   : > { %1635 = vadd.xlane.f32.xlu1 %v1634_v26  ;;  %1629 = vadd.xlane.f32.xlu2 %v1628_v56  ;;  %v3850_v59 = vpop.f32.mrf.mxu0  ;;  %v3429_v16 = vmul.f32 %v3305_v1, %v6358_v3  ;;  %v1617_v3 = vmul.f32 %v6453_v47, %v1601_v15  ;;  %v1600_v1 = vmax.f32 %v1561_v20, 0.0  ;;  %v1570_v23 = vadd.f32 %v6439_v24, %v7517_v19 }
 0x5ee   : > { %v3309_v37 = vmul.f32 0.5, %v3308_v52  ;;  %940 = vadd.xlane.f32.xlu0 %v939_v57  ;;  %v3876_v62 = vmax.f32 %v3850_v59, 0.0  ;;  %v1637_v54 = vsel %vm747_vm1, %v1615_v9, 0.0  ;;  %v1631_v52 = vsel %vm747_vm1, %v1613_v29, 0.0  ;;  %v7515_v59 = vld [vmem:[#allocation25_spill] sm:$0xff] }
 0x5ef   : > { %4589 = vmatmul.msk.f32.gmra.mxu3 %vm605_vm0, %v3429_v16  ;;  %v1643_v15 = vsel %vm747_vm1, %v1617_v3, 0.0  ;;  %v1576_v16 = vadd.f32 %v6439_v24, %v7515_v59 }
 0x5f0   : > { %v3310_v21 = vsub.f32 1.5, %v3309_v37  ;;  %v3222_v50 = vpop.xlane.xlu0 %3221  ;;  %4645 = vmatmul.msk.f32.gmra.mxu1 %vm605_vm0, %v3876_v62  ;;  %v7516_v37 = vld [vmem:[#allocation27_spill] sm:$0xff] }
 0x5f1   : > { %v4819_v17 = vpop.eup %4818  ;;  %v6587_v13 = vmax.f32 %v3222_v50, 1e-24  ;;  %v1582_v62 = vadd.f32 %v6439_v24, %v7516_v37  ;;  %v1616_v50 = vmul.f32 %v6453_v47, %v1600_v1  ;;  %v1605_v20 = vmax.f32 %v1576_v16, 0.0 }
 0x5f2   : > { %v3311_v41 = vmul.f32 %v4817_v48, %v3310_v21  ;;  %v3317_v46 = vmul.f32 %v4819_v17, %v6567_v0  ;;  %vm3323_vm7 = vweird.f32 %v4819_v17 }
 0x5f3   : > { %4820 = vrsqrt.f32 %v6587_v13  ;;  %vm3324_vm9 = vmor %vm3322_vm8, %vm3323_vm7  ;;  %vm3332_vm11 = vweird.f32 %v6587_v13 }
 0x5f4   : > { %v3315_v42 = vsel %vm3314_vm6, %v4817_v48, %v3311_v41  ;;  %v3318_v56 = vmul.f32 %v4819_v17, %v3317_v46  ;;  %v1618_v48 = vmul.f32 %v6453_v47, %v1602_v39  ;;  %v1607_v41 = vmax.f32 %v1582_v62, 0.0 }
 0x5f5   : > { %1644 = vadd.xlane.f32.xlu1 %v1643_v15  ;;  %1638 = vadd.xlane.f32.xlu2 %v1637_v54  ;;  %v3853_v26 = vpop.f32.mrf.mxu0  ;;  %v3430_v30 = vmul.f32 %v3315_v42, %v6367_v14  ;;  %v1620_v14 = vmul.f32 %v6453_v47, %v1604_v43  ;;  %v1603_v43 = vmax.f32 %v1570_v23, 0.0  ;;  %v1640_v42 = vsel %vm747_vm1, %v1616_v50, 0.0 }
 0x5f6   : > { %v3319_v61 = vmul.f32 0.5, %v3318_v56  ;;  %1632 = vadd.xlane.f32.xlu0 %v1631_v52  ;;  %v3877_v57 = vmax.f32 %v3853_v26, 0.0  ;;  %v1646_v29 = vsel %vm747_vm1, %v1618_v48, 0.0  ;;  %v7518_v52 = vld [vmem:[#allocation28_spill] sm:$0xff]  ;;  %v7520_v48 = vld [vmem:[#allocation26_spill] sm:$0xff] }
 0x5f7   : > { %4590 = vmatmul.msk.f32.gmra.mxu3 %vm605_vm0, %v3430_v30  ;;  %v1652_v54 = vsel %vm747_vm1, %v1620_v14, 0.0  ;;  %v1585_v26 = vadd.f32 %v6439_v24, %v7518_v52  ;;  %v7519_v30 = vld [vmem:[#allocation30_spill] sm:$0xff]  ;;  %v1579_v37 = vadd.f32 %v6439_v24, %v7520_v48  ;;  %v7522_v52 = vld [vmem:[#allocation29_spill] sm:$0xff] }
 0x5f8   : > { %v3320_v6 = vsub.f32 1.5, %v3319_v61  ;;  %v3225_v11 = vpop.xlane.xlu1 %3224  ;;  %4646 = vmatmul.msk.f32.gmra.mxu1 %vm605_vm0, %v3877_v57  ;;  %v1591_v61 = vadd.f32 %v6439_v24, %v7519_v30 }
 0x5f9   : > { %v4821_v9 = vpop.eup %4820  ;;  %v6607_v21 = vmax.f32 %v3225_v11, 1e-24  ;;  %v1608_v19 = vmax.f32 %v1585_v26, 0.0  ;;  %v1588_v26 = vadd.f32 %v6439_v24, %v7522_v52  ;;  %v2260_v52 = vadd.f32 %v6439_v24, %v6236_v28 }
 0x5fa   : > { %v3321_v3 = vmul.f32 %v4819_v17, %v3320_v6  ;;  %v3327_v22 = vmul.f32 %v4821_v9, %v6587_v13  ;;  %vm3333_vm10 = vweird.f32 %v4821_v9  ;;  %v1619_v6 = vmul.f32 %v6453_v47, %v1603_v43 }
 0x5fb   : > { %4822 = vrsqrt.f32 %v6607_v21  ;;  %vm3334_vm12 = vmor %vm3332_vm11, %vm3333_vm10  ;;  %v1610_v50 = vmax.f32 %v1591_v61, 0.0  ;;  %v2248_v43 = vadd.f32 %v6439_v24, %v6209_v60  ;;  %vm3342_vm14 = vweird.f32 %v6607_v21 }
 0x5fc   : > { %v3325_v46 = vsel %vm3324_vm9, %v4819_v17, %v3321_v3  ;;  %v3328_v39 = vmul.f32 %v4821_v9, %v3327_v22  ;;  %v1621_v17 = vmul.f32 %v6453_v47, %v1605_v20 }
 0x5fd   : > { %1653 = vadd.xlane.f32.xlu1 %v1652_v54  ;;  %1647 = vadd.xlane.f32.xlu2 %v1646_v29  ;;  %v3856_v56 = vpop.f32.mrf.mxu0  ;;  %v3431_v0 = vmul.f32 %v3325_v46, %v6376_v10  ;;  %v1623_v10 = vmul.f32 %v6453_v47, %v1607_v41  ;;  %v1606_v29 = vmax.f32 %v1579_v37, 0.0  ;;  %v1649_v41 = vsel %vm747_vm1, %v1619_v6, 0.0 }
 0x5fe   : > { %v3329_v15 = vmul.f32 0.5, %v3328_v39  ;;  %1641 = vadd.xlane.f32.xlu0 %v1640_v42  ;;  %v3878_v1 = vmax.f32 %v3856_v56, 0.0  ;;  %v1655_v23 = vsel %vm747_vm1, %v1621_v17, 0.0  ;;  %v7521_v42 = vld [vmem:[#allocation5_spill] sm:$0xff] }
 0x5ff   : > { %4591 = vmatmul.msk.f32.gmra.mxu3 %vm605_vm0, %v3431_v0  ;;  %v1661_v20 = vsel %vm747_vm1, %v1623_v10, 0.0  ;;  %v1594_v56 = vadd.f32 %v6439_v24, %v7521_v42  ;;  %v1622_v60 = vmul.f32 %v6453_v47, %v1606_v29 }
 0x600   : > { %v3330_v57 = vsub.f32 1.5, %v3329_v15  ;;  %4647 = vmatmul.msk.f32.gmra.mxu1 %vm605_vm0, %v3878_v1  ;;  %v3228_v59 = vpop.xlane.xlu2 %3227 }
 0x601   : > { %v4823_v16 = vpop.eup %4822  ;;  %v6627_v62 = vmax.f32 %v3228_v59, 1e-24  ;;  %v1611_v10 = vmax.f32 %v1594_v56, 0.0 }
 0x602   : > { %v3331_v11 = vmul.f32 %v4821_v9, %v3330_v57  ;;  %v3337_v14 = vmul.f32 %v4823_v16, %v6607_v21  ;;  %vm3343_vm13 = vweird.f32 %v4823_v16  ;;  %v2293_v57 = vmax.f32 %v2248_v43, 0.0 }
 0x603   : > { %4824 = vrsqrt.f32 %v6627_v62  ;;  %vm3344_vm15 = vmor %vm3342_vm14, %vm3343_vm13  ;;  %vm3352_vm3 = vweird.f32 %v6627_v62 }
 0x604   : > { %v3335_v3 = vsel %vm3334_vm12, %v4821_v9, %v3331_v11  ;;  %v3338_v22 = vmul.f32 %v4823_v16, %v3337_v14  ;;  %v1624_v9 = vmul.f32 %v6453_v47, %v1608_v19  ;;  %v1609_v11 = vmax.f32 %v1588_v26, 0.0 }
 0x605   : > { %1662 = vadd.xlane.f32.xlu1 %v1661_v20  ;;  %1656 = vadd.xlane.f32.xlu2 %v1655_v23  ;;  %v3859_v46 = vpop.f32.mrf.mxu0  ;;  %v3432_v13 = vmul.f32 %v3335_v3, %v6385_v31  ;;  %v1626_v31 = vmul.f32 %v6453_v47, %v1610_v50  ;;  %v1658_v14 = vsel %vm747_vm1, %v1622_v60, 0.0  ;;  %v2251_v3 = vadd.f32 %v6439_v24, %v6214_v8 }
 0x606   : > { %v3339_v39 = vmul.f32 0.5, %v3338_v22  ;;  %1650 = vadd.xlane.f32.xlu0 %v1649_v41  ;;  %v3879_v54 = vmax.f32 %v3859_v46, 0.0  ;;  %v1664_v59 = vsel %vm747_vm1, %v1624_v9, 0.0  ;;  %v2257_v22 = vadd.f32 %v6439_v24, %v6229_v55 }
 0x607   : > { %4592 = vmatmul.msk.f32.gmra.mxu3 %vm605_vm0, %v3432_v13  ;;  %v1670_v6 = vsel %vm747_vm1, %v1626_v31, 0.0  ;;  %v2245_v46 = vadd.f32 %v6439_v24, %v6202_v53  ;;  %v1625_v8 = vmul.f32 %v6453_v47, %v1609_v11 }
 0x608   : > { %v3340_v0 = vsub.f32 1.5, %v3339_v39  ;;  %v3231_v15 = vpop.xlane.xlu0 %3230  ;;  %4648 = vmatmul.msk.f32.gmra.mxu1 %vm605_vm0, %v3879_v54  ;;  %v2294_v54 = vmax.f32 %v2251_v3, 0.0  ;;  %v2296_v9 = vmax.f32 %v2257_v22, 0.0 }
 0x609   : > { %v4825_v1 = vpop.eup %4824  ;;  %v6647_v17 = vmax.f32 %v3231_v15, 1e-24  ;;  %v1667_v15 = vsel %vm747_vm1, %v1625_v8, 0.0 }
 0x60a   : > { %v3341_v30 = vmul.f32 %v4823_v16, %v3340_v0  ;;  %v3347_v61 = vmul.f32 %v4825_v1, %v6627_v62  ;;  %vm3353_vm2 = vweird.f32 %v4825_v1  ;;  %v2292_v0 = vmax.f32 %v2245_v46, 0.0 }
 0x60b   : > { %4826 = vrsqrt.f32 %v6647_v17  ;;  %vm3354_vm4 = vmor %vm3352_vm3, %vm3353_vm2  ;;  %v2310_v26 = vmul.f32 %v6453_v47, %v2294_v54  ;;  %vm3362_vm6 = vweird.f32 %v6647_v17 }
 0x60c   : > { %v3345_v48 = vsel %vm3344_vm15, %v4823_v16, %v3341_v30  ;;  %v3348_v37 = vmul.f32 %v4825_v1, %v3347_v61  ;;  %v2309_v16 = vmul.f32 %v6453_v47, %v2293_v57  ;;  %v2312_v61 = vmul.f32 %v6453_v47, %v2296_v9 }
 0x60d   : > { %1671 = vadd.xlane.f32.xlu1 %v1670_v6  ;;  %1665 = vadd.xlane.f32.xlu2 %v1664_v59  ;;  %v3862_v19 = vpop.f32.mrf.mxu0  ;;  %v3433_v21 = vmul.f32 %v3345_v48, %v6394_v45  ;;  %v1627_v45 = vmul.f32 %v6453_v47, %v1611_v10  ;;  %v2308_v28 = vmul.f32 %v6453_v47, %v2292_v0 }
 0x60e   : > { %v3349_v23 = vmul.f32 0.5, %v3348_v37  ;;  %1659 = vadd.xlane.f32.xlu0 %v1658_v14  ;;  %v3880_v50 = vmax.f32 %v3862_v19, 0.0  ;;  %v2327_v43 = vsel %vm747_vm1, %v2309_v16, 0.0  ;;  %v2297_v37 = vmax.f32 %v2260_v52, 0.0 }
 0x60f   : > { %4593 = vmatmul.msk.f32.gmra.mxu3 %vm605_vm0, %v3433_v21  ;;  %v1673_v53 = vsel %vm747_vm1, %v1627_v45, 0.0  ;;  %v2324_v21 = vsel %vm747_vm1, %v2308_v28, 0.0  ;;  %v2275_v16 = vadd.f32 %v6439_v24, %v6283_v51 }
 0x610   : > { %v3350_v20 = vsub.f32 1.5, %v3349_v23  ;;  %v3234_v29 = vpop.xlane.xlu1 %3233  ;;  %4649 = vmatmul.msk.f32.gmra.mxu1 %vm605_vm0, %v3880_v50  ;;  %v2269_v50 = vadd.f32 %v6439_v24, %v6269_v12  ;;  %v2313_v3 = vmul.f32 %v6453_v47, %v2297_v37 }
 0x611   : > { %v4827_v41 = vpop.eup %4826  ;;  %v6667_v13 = vmax.f32 %v3234_v29, 1e-24 }
 0x612   : > { %v3351_v39 = vmul.f32 %v4825_v1, %v3350_v20  ;;  %v3357_v55 = vmul.f32 %v4827_v41, %v6647_v17  ;;  %vm3363_vm5 = vweird.f32 %v4827_v41  ;;  %v2339_v51 = vsel %vm747_vm1, %v2313_v3, 0.0 }
 0x613   : > { %4828 = vrsqrt.f32 %v6667_v13  ;;  %vm3364_vm7 = vmor %vm3362_vm6, %vm3363_vm5  ;;  %vm3372_vm9 = vweird.f32 %v6667_v13 }
 0x614   : > { %v3355_v42 = vsel %vm3354_vm4, %v4825_v1, %v3351_v39  ;;  %v3358_v56 = vmul.f32 %v4827_v41, %v3357_v55  ;;  %v2266_v1 = vadd.f32 %v6439_v24, %v6261_v36  ;;  %v2330_v36 = vsel %vm747_vm1, %v2310_v26, 0.0 }
 0x615   : > { %2328 = vadd.xlane.f32.xlu1 %v2327_v43  ;;  %1674 = vadd.xlane.f32.xlu2 %v1673_v53  ;;  %v3434_v62 = vmul.f32 %v3355_v42, %v6403_v35  ;;  %v2254_v35 = vadd.f32 %v6439_v24, %v6221_v58  ;;  %v2336_v58 = vsel %vm747_vm1, %v2312_v61, 0.0  ;;  %v2300_v39 = vmax.f32 %v2269_v50, 0.0 }
 0x616   : > { %v3359_v31 = vmul.f32 0.5, %v3358_v56  ;;  %1668 = vadd.xlane.f32.xlu0 %v1667_v15  ;;  %v2299_v6 = vmax.f32 %v2266_v1, 0.0  ;;  %v2302_v55 = vmax.f32 %v2275_v16, 0.0  ;;  %v2278_v53 = vadd.f32 %v6439_v24, %v6291_v2 }
 0x617   : > { %4594 = vmatmul.msk.f32.gmra.mxu3 %vm605_vm0, %v3434_v62  ;;  %v2295_v19 = vmax.f32 %v2254_v35, 0.0  ;;  %v2316_v0 = vmul.f32 %v6453_v47, %v2300_v39  ;;  %v2284_v15 = vadd.f32 %v6439_v24, %v6307_v4  ;;  %v2950_v39 = vadd.f32 %v6439_v24, %v6305_v18 }
 0x618   : > { %v3360_v60 = vsub.f32 1.5, %v3359_v31  ;;  %v3237_v30 = vpop.xlane.xlu2 %3236  ;;  %v2315_v29 = vmul.f32 %v6453_v47, %v2299_v6  ;;  %v2318_v52 = vmul.f32 %v6453_v47, %v2302_v55  ;;  %v2303_v61 = vmax.f32 %v2278_v53, 0.0 }
 0x619   : > { %v4829_v57 = vpop.eup %4828  ;;  %v6686_v59 = vmax.f32 %v3237_v30, 1e-24  ;;  %v2311_v12 = vmul.f32 %v6453_v47, %v2295_v19  ;;  %v2348_v4 = vsel %vm747_vm1, %v2316_v0, 0.0  ;;  %v2991_v0 = vmax.f32 %v2950_v39, 0.0  ;;  %v7529_v39 = vld [vmem:[#allocation33_spill] sm:$0xff] }
 0x61a   : > { %v3361_v10 = vmul.f32 %v4827_v41, %v3360_v60  ;;  %v3367_v48 = vmul.f32 %v4829_v57, %v6667_v13  ;;  %vm3373_vm8 = vweird.f32 %v4829_v57  ;;  %v2319_v6 = vmul.f32 %v6453_v47, %v2303_v61  ;;  %v7523_v61 = vld [vmem:[#allocation32_spill] sm:$0xff] }
 0x61b   : > { %4830 = vrsqrt.f32 %v6686_v59  ;;  %vm3374_vm10 = vmor %vm3372_vm9, %vm3373_vm8  ;;  %v2333_v42 = vsel %vm747_vm1, %v2311_v12, 0.0  ;;  %vm3382_vm12 = vweird.f32 %v6686_v59 }
 0x61c   : > { %v3365_v11 = vsel %vm3364_vm7, %v4827_v41, %v3361_v10  ;;  %v3368_v14 = vmul.f32 %v4829_v57, %v3367_v48 }
 0x61d   : > { %2337 = vadd.xlane.f32.xlu1 %v2336_v58  ;;  %2331 = vadd.xlane.f32.xlu2 %v2330_v36  ;;  %v3435_v17 = vmul.f32 %v3365_v11, %v6412_v34  ;;  %v2263_v34 = vadd.f32 %v6439_v24, %v6245_v5  ;;  %v2345_v5 = vsel %vm747_vm1, %v2315_v29, 0.0  ;;  %v2941_v36 = vadd.f32 %v6439_v24, %v6281_v49 }
 0x61e   : > { %v3369_v23 = vmul.f32 0.5, %v3368_v14  ;;  %2325 = vadd.xlane.f32.xlu0 %v2324_v21  ;;  %v2287_v11 = vadd.f32 %v6439_v24, %v6315_v25 }
 0x61f   : > { %4595 = vmatmul.msk.f32.gmra.mxu3 %vm605_vm0, %v3435_v17  ;;  %v2298_v9 = vmax.f32 %v2263_v34, 0.0  ;;  %v2281_v17 = vadd.f32 %v6439_v24, %v6299_v32  ;;  %v2988_v16 = vmax.f32 %v2941_v36, 0.0 }
 0x620   : > { %v3370_v22 = vsub.f32 1.5, %v3369_v23  ;;  %v3240_v20 = vpop.xlane.xlu0 %3239  ;;  %v6745_v23 = vpop.f32.mrf.mxu1 }
 0x621   : > { %v4831_v45 = vpop.eup %4830  ;;  %v6705_v41 = vmax.f32 %v3240_v20, 1e-24  ;;  %v2314_v2 = vmul.f32 %v6453_v47, %v2298_v9  ;;  %v2306_v20 = vmax.f32 %v2287_v11, 0.0  ;;  %v2304_v34 = vmax.f32 %v2281_v17, 0.0 }
 0x622   : > { %v3371_v46 = vmul.f32 %v4829_v57, %v3370_v22  ;;  %v3377_v8 = vmul.f32 %v4831_v45, %v6686_v59  ;;  %vm3383_vm11 = vweird.f32 %v4831_v45  ;;  %v2357_v22 = vsel %vm747_vm1, %v2319_v6, 0.0 }
 0x623   : > { %4832 = vrsqrt.f32 %v6705_v41  ;;  %vm3384_vm13 = vmor %vm3382_vm12, %vm3383_vm11  ;;  %v2342_v48 = vsel %vm747_vm1, %v2314_v2, 0.0  ;;  %vm3392_vm15 = vweird.f32 %v6705_v41  ;;  %v2290_v9 = vadd.f32 %v6439_v24, %v6323_v38 }
 0x624   : > { %v3375_v54 = vsel %vm3374_vm10, %v4829_v57, %v3371_v46  ;;  %v3378_v43 = vmul.f32 %v4831_v45, %v3377_v8  ;;  %v2305_v57 = vmax.f32 %v2284_v15, 0.0  ;;  %v2944_v8 = vadd.f32 %v6439_v24, %v6289_v40 }
 0x625   : > { %2346 = vadd.xlane.f32.xlu1 %v2345_v5  ;;  %2340 = vadd.xlane.f32.xlu2 %v2339_v51  ;;  %v3436_v13 = vmul.f32 %v3375_v54, %v6419_v63  ;;  %v2272_v63 = vadd.f32 %v6439_v24, %v6276_v44  ;;  %v2354_v44 = vsel %vm747_vm1, %v2318_v52, 0.0  ;;  %v3004_v51 = vmul.f32 %v6453_v47, %v2988_v16 }
 0x626   : > { %v3379_v56 = vmul.f32 0.5, %v3378_v43  ;;  %2334 = vadd.xlane.f32.xlu0 %v2333_v42  ;;  %v2321_v21 = vmul.f32 %v6453_v47, %v2305_v57  ;;  %v2320_v42 = vmul.f32 %v6453_v47, %v2304_v34  ;;  %v2989_v53 = vmax.f32 %v2944_v8, 0.0 }
 0x627   : > { %4596 = vmatmul.msk.f32.gmra.mxu3 %vm605_vm0, %v3436_v13  ;;  %v2301_v10 = vmax.f32 %v2272_v63, 0.0 }
 0x628   : > { %v3380_v62 = vsub.f32 1.5, %v3379_v56  ;;  %v3243_v31 = vpop.xlane.xlu1 %3242  ;;  %v6775_v15 = vpop.f32.mrf.mxu1  ;;  %v2360_v52 = vsel %vm747_vm1, %v2320_v42, 0.0 }
 0x629   : > { %v4833_v26 = vpop.eup %4832  ;;  %v6724_v1 = vmax.f32 %v3243_v31, 1e-24  ;;  %v2317_v50 = vmul.f32 %v6453_v47, %v2301_v10  ;;  %v7525_v10 = vld [vmem:[#allocation31_spill] sm:$0xff] }
 0x62a   : > { %v3381_v60 = vmul.f32 %v4831_v45, %v3380_v62  ;;  %v3387_v30 = vmul.f32 %v4833_v26, %v6705_v41  ;;  %vm3393_vm14 = vweird.f32 %v4833_v26  ;;  %v3020_v62 = vsel %vm747_vm1, %v3004_v51, 0.0 }
 0x62b   : > { %4834 = vrsqrt.f32 %v6724_v1  ;;  %vm3394_vm2 = vmor %vm3392_vm15, %vm3393_vm14  ;;  %v2351_v12 = vsel %vm747_vm1, %v2317_v50, 0.0  ;;  %vm3402_vm4 = vweird.f32 %v6724_v1 }
 0x62c   : > { %v3385_v35 = vsel %vm3384_vm13, %v4831_v45, %v3381_v60  ;;  %v3388_v28 = vmul.f32 %v4833_v26, %v3387_v30  ;;  %v2363_v45 = vsel %vm747_vm1, %v2321_v21, 0.0  ;;  %v6794_v30 = vld [vmem:[%s7422_s8] ss:$0 sm:$0xff] }
 0x62d   : > { %2355 = vadd.xlane.f32.xlu1 %v2354_v44  ;;  %2349 = vadd.xlane.f32.xlu2 %v2348_v4  ;;  %v3437_v59 = vmul.f32 %v3385_v35, %v6425_v7  ;;  %v7524_v4 = vld [vmem:[#allocation34_spill] sm:$0xff]  ;;  %v2956_v51 = vadd.f32 %v6794_v30, %v7529_v39 }
 0x62e   : > { %v3389_v37 = vmul.f32 0.5, %v3388_v28  ;;  %2343 = vadd.xlane.f32.xlu0 %v2342_v48  ;;  %v2959_v57 = vadd.f32 %v6794_v30, %v7524_v4  ;;  %v2947_v48 = vadd.f32 %v6794_v30, %v7525_v10 }
 0x62f   : > { %4597 = vmatmul.msk.f32.gmra.mxu3 %vm605_vm0, %v3437_v59 }
 0x630   : > { %v3390_v14 = vsub.f32 1.5, %v3389_v37  ;;  %v6740_v58 = vpop.xlane.xlu1 %898  ;;  %v3246_v19 = vpop.xlane.xlu2 %3245  ;;  %v2994_v21 = vmax.f32 %v2959_v57, 0.0  ;;  %v2990_v50 = vmax.f32 %v2947_v48, 0.0 }
 0x631   : > { %v4835_v7 = vpop.eup %4834  ;;  %v6747_v49 = vmax.f32 %v3246_v19, 1e-24 }
 0x632   : > { %v3391_v3 = vmul.f32 %v4833_v26, %v3390_v14  ;;  %v3397_v25 = vmul.f32 %v4835_v7, %v6724_v1  ;;  %vm3403_vm3 = vweird.f32 %v4835_v7  ;;  %v6787_v1 = vld [vmem:[%s7423_s9] ss:$0 sm:$0xff] }
 0x633   : > { %4836 = vrsqrt.f32 %v6747_v49  ;;  %vm3404_vm5 = vmor %vm3402_vm4, %vm3403_vm3  ;;  %v3007_v2 = vmul.f32 %v6787_v1, %v2991_v0  ;;  %v3005_v60 = vmul.f32 %v6787_v1, %v2989_v53  ;;  %vm3412_vm7 = vweird.f32 %v6747_v49 }
 0x634   : > { %v3395_v29 = vsel %vm3394_vm2, %v4833_v26, %v3391_v3  ;;  %v3398_v32 = vmul.f32 %v4835_v7, %v3397_v25  ;;  %v6813_v3 = vpop.f32.mrf.mxu1  ;;  %v2993_v53 = vmax.f32 %v2956_v51, 0.0 }
 0x635   : > { %2364 = vadd.xlane.f32.xlu1 %v2363_v45  ;;  %2358 = vadd.xlane.f32.xlu2 %v2357_v22  ;;  %v3438_v41 = vmul.f32 %v3395_v29, %v6431_v33  ;;  %v2322_v33 = vmul.f32 %v6453_v47, %v2306_v20  ;;  %v2307_v47 = vmax.f32 %v2290_v9, 0.0  ;;  %v3023_v14 = vsel %vm747_vm1, %v3005_v60, 0.0  ;;  %v7526_v22 = vld [vmem:[#allocation3_spill] sm:$0xff]  ;;  %v7528_v45 = vld [vmem:[#allocation37_spill] sm:$0xff] }
 0x636   : > { %v3399_v46 = vmul.f32 0.5, %v3398_v32  ;;  %2352 = vadd.xlane.f32.xlu0 %v2351_v12  ;;  %v3029_v17 = vsel %vm747_vm1, %v3007_v2, 0.0  ;;  %v7527_v29 = vld [vmem:[#allocation35_spill] sm:$0xff]  ;;  %v2968_v34 = vadd.f32 %v6794_v30, %v7528_v45 }
 0x637   : > { %4598 = vmatmul.msk.f32.gmra.mxu3 %vm605_vm0, %v3438_v41  ;;  %v2366_v24 = vsel %vm747_vm1, %v2322_v33, 0.0  ;;  %v2323_v37 = vmul.f32 %v6787_v1, %v2307_v47  ;;  %v2962_v32 = vadd.f32 %v6794_v30, %v7527_v29 }
 0x638   : > { %v3400_v55 = vsub.f32 1.5, %v3399_v46  ;;  %v6763_v54 = vpop.xlane.xlu1 %907  ;;  %v6765_v43 = vpop.xlane.xlu2 %901  ;;  %v3010_v46 = vmul.f32 %v6787_v1, %v2994_v21  ;;  %v2997_v42 = vmax.f32 %v2968_v34, 0.0 }
 0x639   : > { %v4837_v5 = vpop.eup %4836  ;;  %v3249_v40 = vpop.xlane.xlu0 %3248  ;;  %v2369_v16 = vsel %vm747_vm1, %v2323_v37, 0.0 }
 0x63a   : > { %v3401_v18 = vmul.f32 %v4835_v7, %v3400_v55  ;;  %v3407_v13 = vmul.f32 %v4837_v5, %v6747_v49  ;;  %v6773_v56 = vmax.f32 %v3249_v40, 1e-24  ;;  %vm3413_vm6 = vweird.f32 %v4837_v5 }
 0x63b   : > { %vm3414_vm8 = vmor %vm3412_vm7, %vm3413_vm6  ;;  %v2995_v40 = vmax.f32 %v2962_v32, 0.0 }
 0x63c   : > { %v3405_v31 = vsel %vm3404_vm5, %v4835_v7, %v3401_v18  ;;  %v3408_v38 = vmul.f32 %v4837_v5, %v3407_v13  ;;  %4838 = vrsqrt.f32 %v6773_v56  ;;  %vm3422_vm10 = vweird.f32 %v6773_v56 }
 0x63d   : > { %3021 = vadd.xlane.f32.xlu1 %v3020_v62  ;;  %2367 = vadd.xlane.f32.xlu2 %v2366_v24  ;;  %v3439_v26 = vmul.f32 %v3405_v31, %v6444_v27  ;;  %v2953_v27 = vadd.f32 %v6794_v30, %v7523_v61  ;;  %v3038_v18 = vsel %vm747_vm1, %v3010_v46, 0.0  ;;  %v7530_v31 = vld [vmem:[#allocation4_spill] sm:$0xff]  ;;  %v3955_v24 = vpop.f32.mrf.mxu1  ;;  %v3009_v61 = vmul.f32 %v6787_v1, %v2993_v53 }
 0x63e   : > { %v3409_v63 = vmul.f32 0.5, %v3408_v38  ;;  %2361 = vadd.xlane.f32.xlu0 %v2360_v52  ;;  %v3011_v52 = vmul.f32 %v6787_v1, %v2995_v40 }
 0x63f   : > { %4599 = vmatmul.msk.f32.gmra.mxu3 %vm605_vm0, %v3439_v26  ;;  %v2992_v19 = vmax.f32 %v2953_v27, 0.0  ;;  %v3013_v26 = vmul.f32 %v6787_v1, %v2997_v42  ;;  %v6853_v27 = vld [vmem:[%s7420_s6] ss:$0 sm:$0xff]  ;;  %v3035_v48 = vsel %vm747_vm1, %v3009_v61, 0.0 }
 0x640   : > { %v3410_v35 = vsub.f32 1.5, %v3409_v63  ;;  %v6800_v28 = vpop.xlane.xlu1 %916  ;;  %v6802_v44 = vpop.xlane.xlu2 %910  ;;  %v7531_v63 = vld [vmem:[#allocation36_spill] sm:$0xff]  ;;  %v3947_v4 = vadd.f32 %v6853_v27, %v6745_v23  ;;  %v3041_v57 = vsel %vm747_vm1, %v3011_v52, 0.0  ;;  %v3953_v34 = vadd.f32 %v6853_v27, %v6813_v3 }
 0x641   : > { %v6806_v59 = vpop.xlane.xlu0 %904  ;;  %v3008_v8 = vmul.f32 %v6787_v1, %v2992_v19  ;;  %v2965_v2 = vadd.f32 %v6794_v30, %v7531_v63  ;;  %v3950_v19 = vadd.f32 %v6853_v27, %v6775_v15  ;;  %v3956_v53 = vadd.f32 %v6853_v27, %v3955_v24 }
 0x642   : > { %v4839_v36 = vpop.eup %4838  ;;  %v3411_v6 = vmul.f32 %v4837_v5, %v3410_v35  ;;  %v3047_v35 = vsel %vm747_vm1, %v3013_v26, 0.0  ;;  %v3994_v37 = vmax.f32 %v3947_v4, 0.0 }
 0x643   : > { %v3417_v11 = vmul.f32 %v4839_v36, %v6773_v56  ;;  %vm3423_vm9 = vweird.f32 %v4839_v36  ;;  %v3032_v13 = vsel %vm747_vm1, %v3008_v8, 0.0  ;;  %v2996_v10 = vmax.f32 %v2965_v2, 0.0 }
 0x644   : > { %v3415_v7 = vsel %vm3414_vm8, %v4837_v5, %v3411_v6  ;;  %v3006_v5 = vmul.f32 %v6787_v1, %v2990_v50  ;;  %vm3424_vm11 = vmor %vm3422_vm10, %vm3423_vm9  ;;  %v3997_v2 = vmax.f32 %v3956_v53, 0.0 }
 0x645   : > { %v3418_v25 = vmul.f32 %v4839_v36, %v3417_v11  ;;  %3030 = vadd.xlane.f32.xlu1 %v3029_v17  ;;  %3024 = vadd.xlane.f32.xlu2 %v3023_v14  ;;  %v3440_v49 = vmul.f32 %v3415_v7, %v7526_v22  ;;  %v3958_v11 = vpop.f32.mrf.mxu1  ;;  %v3012_v23 = vmul.f32 %v6787_v1, %v2996_v10  ;;  %v6871_v17 = vld [vmem:[#allocation2] ss:$0 sm:$0xff] }
 0x646   : > { %2370 = vadd.xlane.f32.xlu0 %v2369_v16  ;;  %v3026_v62 = vsel %vm747_vm1, %v3006_v5, 0.0  ;;  %v3995_v16 = vmax.f32 %v3950_v19, 0.0  ;;  %v951_v15 = vadd.f32 %v6871_v17, %v6806_v59  ;;  %v3996_v5 = vmax.f32 %v3953_v34, 0.0 }
 0x647   : > { %v3419_v20 = vmul.f32 0.5, %v3418_v25  ;;  %4600 = vmatmul.msk.f32.gmra.mxu3 %vm605_vm0, %v3440_v49  ;;  %v3044_v25 = vsel %vm747_vm1, %v3012_v23, 0.0  ;;  %v952_v40 = vadd.f32 %v6871_v17, %v6763_v54  ;;  %v955_v61 = vadd.f32 %v6871_v17, %v6800_v28 }
 0x648   : > { %v6822_v12 = vpop.xlane.xlu1 %925  ;;  %v6824_v41 = vpop.xlane.xlu2 %919 }
 0x649   : > { %v3420_v55 = vsub.f32 1.5, %v3419_v20  ;;  %v6830_v33 = vpop.xlane.xlu0 %913  ;;  %v949_v20 = vadd.f32 %v6871_v17, %v6740_v58  ;;  %v956_v34 = vadd.f32 %v6871_v17, %v6824_v41 }
 0x64a   : > { %v954_v3 = vadd.f32 %v6871_v17, %v6830_v33 }
 0x64b   : > { %v3421_v9 = vmul.f32 %v4839_v36, %v3420_v55 }
 0x64d   : > { %v3425_v0 = vsel %vm3424_vm11, %v4839_v36, %v3421_v9  ;;  %3039 = vadd.xlane.f32.xlu1 %v3038_v18  ;;  %3033 = vadd.xlane.f32.xlu2 %v3032_v13  ;;  %v3961_v8 = vpop.f32.mrf.mxu1 }
 0x64e   : > { %3027 = vadd.xlane.f32.xlu0 %v3026_v62  ;;  %v3441_v38 = vmul.f32 %v3425_v0, %v7530_v31  ;;  %v950_v0 = vadd.f32 %v6871_v17, %v6765_v43 }
 0x650   : > { %4601 = vmatmul.msk.f32.gmra.mxu3 %vm605_vm0, %v3441_v38  ;;  %v6839_v56 = vpop.xlane.xlu1 %934  ;;  %v6841_v47 = vpop.xlane.xlu2 %928  ;;  %vm4235_vm0 = vcmask 7168  }
 0x651   : > { %v6847_v60 = vpop.xlane.xlu0 %922  ;;  %v961_v41 = vadd.f32 %v6871_v17, %v6839_v56 }
 0x652   : > { %v957_v4 = vadd.f32 %v6871_v17, %v6847_v60 }
 0x655   : > { %3042 = vadd.xlane.f32.xlu2 %v3041_v57  ;;  %3048 = vadd.xlane.f32.xlu1 %v3047_v35  ;;  %v3964_v26 = vpop.f32.mrf.mxu1 }
 0x656   : > { %3036 = vadd.xlane.f32.xlu0 %v3035_v48  ;;  %v3959_v48 = vadd.f32 %v6853_v27, %v3958_v11 }
 0x658   : > { %4650 = vmatmul.msk.f32.vlgmr.msra.gmra.mxu3 %vm747_vm1, %v3994_v37  ;;  %v6861_v36 = vpop.xlane.xlu1 %943  ;;  %v6863_v6 = vpop.xlane.xlu2 %937  ;;  %v953_v37 = vadd.f32 %v6871_v17, %v6802_v44 }
 0x659   : > { %v6865_v14 = vpop.xlane.xlu0 %931 }
 0x65a   : > { %v3507_v21 = vpop.f32.mrf.mxu3 }
 0x65b   : > { %v3508_v7 = vadd.f32 %v6853_v27, %v3507_v21 }
 0x65d   : > { %v3555_v50 = vmax.f32 %v3508_v7, 0.0 }
 0x65e   : > { %3045 = vadd.xlane.f32.xlu0 %v3044_v25  ;;  %v3998_v25 = vmax.f32 %v3959_v48, 0.0  ;;  %v962_v48 = vadd.f32 %v6871_v17, %v6863_v6 }
 0x65f   : > { %4602 = vmatmul.msk.f32.vlgmr.msrb.gmra.mxu2 %vm747_vm1, %v3555_v50 }
 0x660   : > { %4651 = vmatmul.msk.f32.gmra.mxu3 %vm747_vm1, %v3995_v16  ;;  %v1636_v22 = vpop.xlane.xlu1 %1635  ;;  %v1630_v49 = vpop.xlane.xlu2 %1629 }
 0x661   : > { %v1678_v29 = vadd.f32 %v6871_v17, %v1636_v22  ;;  %v6881_v32 = vpop.xlane.xlu0 %940  ;;  %v1676_v45 = vadd.f32 %v6871_v17, %v1630_v49  ;;  %v3967_v16 = vpop.f32.mrf.mxu1  ;;  %v958_v22 = vadd.f32 %v6871_v17, %v6822_v12  ;;  %v960_v49 = vadd.f32 %v6871_v17, %v6865_v14 }
 0x662   : > { %v3510_v46 = vpop.f32.mrf.mxu3 }
 0x663   : > { %v6886_v39 = vadd.f32 %v1678_v29, %v951_v15  ;;  %v6888_v51 = vadd.f32 %v1676_v45, %v949_v20  ;;  %v3511_v58 = vadd.f32 %v6853_v27, %v3510_v46  ;;  %v3962_v45 = vadd.f32 %v6853_v27, %v3961_v8 }
 0x665   : > { %v3556_v55 = vmax.f32 %v3511_v58, 0.0 }
 0x667   : > { %4603 = vmatmul.msk.f32.gmra.mxu2 %vm747_vm1, %v3556_v55 }
 0x668   : > { %4652 = vmatmul.msk.f32.gmra.mxu3 %vm747_vm1, %v3996_v5  ;;  %v1645_v59 = vpop.xlane.xlu1 %1644  ;;  %v1639_v9 = vpop.xlane.xlu2 %1638 }
 0x669   : > { %v1681_v42 = vadd.f32 %v6871_v17, %v1645_v59  ;;  %v1633_v18 = vpop.xlane.xlu0 %1632  ;;  %v1679_v13 = vadd.f32 %v6871_v17, %v1639_v9  ;;  %v3999_v9 = vmax.f32 %v3962_v45, 0.0 }
 0x66a   : > { %v1677_v62 = vadd.f32 %v6871_v17, %v1633_v18  ;;  %v3513_v31 = vpop.f32.mrf.mxu3 }
 0x66b   : > { %v6903_v38 = vadd.f32 %v1681_v42, %v954_v3  ;;  %v6905_v52 = vadd.f32 %v1679_v13, %v952_v40  ;;  %v3514_v54 = vadd.f32 %v6853_v27, %v3513_v31  ;;  %v3970_v3 = vpop.f32.mrf.mxu1  ;;  %v963_v42 = vadd.f32 %v6871_v17, %v6881_v32 }
 0x66c   : > { %v6908_v33 = vadd.f32 %v1677_v62, %v950_v0  ;;  %v3965_v0 = vadd.f32 %v6853_v27, %v3964_v26  ;;  %v959_v62 = vadd.f32 %v6871_v17, %v6841_v47  ;;  %v964_v47 = vadd.f32 %v6871_v17, %v6861_v36 }
 0x66d   : > { %v3557_v63 = vmax.f32 %v3514_v54, 0.0 }
 0x66f   : > { %4604 = vmatmul.msk.f32.gmra.mxu2 %vm747_vm1, %v3557_v63 }
 0x670   : > { %4653 = vmatmul.msk.f32.gmra.mxu3 %vm747_vm1, %v3997_v2  ;;  %v1654_v24 = vpop.xlane.xlu1 %1653  ;;  %v1648_v43 = vpop.xlane.xlu2 %1647 }
 0x671   : > { %v1684_v57 = vadd.f32 %v6871_v17, %v1654_v24  ;;  %v1642_v35 = vpop.xlane.xlu0 %1641  ;;  %v1682_v10 = vadd.f32 %v6871_v17, %v1648_v43  ;;  %v4000_v43 = vmax.f32 %v3965_v0, 0.0 }
 0x672   : > { %v1680_v23 = vadd.f32 %v6871_v17, %v1642_v35  ;;  %v3516_v19 = vpop.f32.mrf.mxu3 }
 0x673   : > { %v6922_v21 = vadd.f32 %v1684_v57, %v957_v4  ;;  %v6924_v7 = vadd.f32 %v1682_v10, %v955_v61  ;;  %v3517_v28 = vadd.f32 %v6853_v27, %v3516_v19  ;;  %v3968_v10 = vadd.f32 %v6853_v27, %v3967_v16  ;;  %v3973_v19 = vpop.f32.mrf.mxu1 }
 0x674   : > { %v6927_v60 = vadd.f32 %v1680_v23, %v953_v37 }
 0x675   : > { %v3558_v50 = vmax.f32 %v3517_v28, 0.0 }
 0x677   : > { %4605 = vmatmul.msk.f32.gmra.mxu2 %vm747_vm1, %v3558_v50 }
 0x678   : > { %4654 = vmatmul.msk.f32.gmra.mxu3 %vm747_vm1, %v3998_v25  ;;  %v1663_v11 = vpop.xlane.xlu1 %1662  ;;  %v1657_v44 = vpop.xlane.xlu2 %1656 }
 0x679   : > { %v1687_v20 = vadd.f32 %v6871_v17, %v1663_v11  ;;  %v1651_v15 = vpop.xlane.xlu0 %1650  ;;  %v1685_v29 = vadd.f32 %v6871_v17, %v1657_v44  ;;  %v4001_v44 = vmax.f32 %v3968_v10, 0.0 }
 0x67a   : > { %v1683_v46 = vadd.f32 %v6871_v17, %v1651_v15  ;;  %v3519_v58 = vpop.f32.mrf.mxu3 }
 0x67b   : > { %v6941_v55 = vadd.f32 %v1687_v20, %v960_v49  ;;  %v6943_v5 = vadd.f32 %v1685_v29, %v958_v22  ;;  %v3520_v12 = vadd.f32 %v6853_v27, %v3519_v58  ;;  %v3971_v20 = vadd.f32 %v6853_v27, %v3970_v3 }
 0x67c   : > { %v6946_v14 = vadd.f32 %v1683_v46, %v956_v34  ;;  %v3974_v3 = vadd.f32 %v6853_v27, %v3973_v19 }
 0x67d   : > { %v3559_v59 = vmax.f32 %v3520_v12, 0.0  ;;  %v3976_v12 = vpop.f32.mrf.mxu1 }
 0x67f   : > { %4606 = vmatmul.msk.f32.gmra.mxu2 %vm747_vm1, %v3559_v59 }
 0x680   : > { %4655 = vmatmul.msk.f32.gmra.mxu3 %vm747_vm1, %v3999_v9  ;;  %v1672_v8 = vpop.xlane.xlu1 %1671  ;;  %v1666_v40 = vpop.xlane.xlu2 %1665  ;;  %v4002_v9 = vmax.f32 %v3971_v20, 0.0 }
 0x681   : > { %v1690_v18 = vadd.f32 %v6871_v17, %v1672_v8  ;;  %v1660_v13 = vpop.xlane.xlu0 %1659  ;;  %v1688_v53 = vadd.f32 %v6871_v17, %v1666_v40 }
 0x682   : > { %v1686_v31 = vadd.f32 %v6871_v17, %v1660_v13  ;;  %v3522_v54 = vpop.f32.mrf.mxu3 }
 0x683   : > { %v6960_v63 = vadd.f32 %v1690_v18, %v963_v42  ;;  %v6962_v56 = vadd.f32 %v1688_v53, %v961_v41  ;;  %v3523_v2 = vadd.f32 %v6853_v27, %v3522_v54 }
 0x684   : > { %v6965_v32 = vadd.f32 %v1686_v31, %v959_v62  ;;  %v4003_v31 = vmax.f32 %v3974_v3, 0.0 }
 0x685   : > { %v3560_v24 = vmax.f32 %v3523_v2, 0.0  ;;  %v3979_v54 = vpop.f32.mrf.mxu1 }
 0x687   : > { %4607 = vmatmul.msk.f32.gmra.mxu2 %vm747_vm1, %v3560_v24 }
 0x688   : > { %4656 = vmatmul.msk.f32.gmra.mxu3 %vm747_vm1, %v4000_v43  ;;  %v2329_v26 = vpop.xlane.xlu1 %2328  ;;  %v1675_v61 = vpop.xlane.xlu2 %1674 }
 0x689   : > { %v2373_v4 = vadd.f32 %v6871_v17, %v2329_v26  ;;  %v1669_v57 = vpop.xlane.xlu0 %1668  ;;  %v1691_v35 = vadd.f32 %v6871_v17, %v1675_v61  ;;  %v3977_v26 = vadd.f32 %v6853_v27, %v3976_v12 }
 0x68a   : > { %v1689_v37 = vadd.f32 %v6871_v17, %v1669_v57  ;;  %v3525_v23 = vpop.f32.mrf.mxu3 }
 0x68b   : > { %v6978_v28 = vadd.f32 %v2373_v4, %v6908_v33  ;;  %v6980_v50 = vadd.f32 %v1691_v35, %v964_v47  ;;  %v3526_v36 = vadd.f32 %v6853_v27, %v3525_v23 }
 0x68c   : > { %v6983_v25 = vadd.f32 %v1689_v37, %v962_v48  ;;  %v4004_v48 = vmax.f32 %v3977_v26, 0.0 }
 0x68d   : > { %v3561_v11 = vmax.f32 %v3526_v36, 0.0  ;;  %v3982_v19 = vpop.f32.mrf.mxu1 }
 0x68f   : > { %4608 = vmatmul.msk.f32.gmra.mxu2 %vm747_vm1, %v3561_v11  ;;  %v3980_v11 = vadd.f32 %v6853_v27, %v3979_v54 }
 0x690   : > { %4657 = vmatmul.msk.f32.gmra.mxu3 %vm747_vm1, %v4001_v44  ;;  %v2338_v6 = vpop.xlane.xlu1 %2337  ;;  %v2332_v16 = vpop.xlane.xlu2 %2331 }
 0x691   : > { %v2376_v22 = vadd.f32 %v6871_v17, %v2338_v6  ;;  %v2326_v49 = vpop.xlane.xlu0 %2325  ;;  %v2374_v33 = vadd.f32 %v6871_v17, %v2332_v16  ;;  %v4005_v20 = vmax.f32 %v3980_v11, 0.0 }
 0x692   : > { %v2372_v15 = vadd.f32 %v6871_v17, %v2326_v49  ;;  %v3528_v29 = vpop.f32.mrf.mxu3 }
 0x693   : > { %v6992_v45 = vadd.f32 %v2376_v22, %v6927_v60  ;;  %v6995_v34 = vadd.f32 %v2374_v33, %v6886_v39  ;;  %v3529_v46 = vadd.f32 %v6853_v27, %v3528_v29 }
 0x694   : > { %v6999_v58 = vadd.f32 %v2372_v15, %v6888_v51 }
 0x695   : > { %v3562_v59 = vmax.f32 %v3529_v46, 0.0 }
 0x697   : > { %4609 = vmatmul.msk.f32.gmra.mxu2 %vm747_vm1, %v3562_v59 }
 0x698   : > { %4658 = vmatmul.msk.f32.gmra.mxu3 %vm747_vm1, %v4002_v9  ;;  %v2347_v8 = vpop.xlane.xlu1 %2346  ;;  %v2341_v40 = vpop.xlane.xlu2 %2340 }
 0x699   : > { %v2379_v60 = vadd.f32 %v6871_v17, %v2347_v8  ;;  %v2335_v41 = vpop.xlane.xlu0 %2334  ;;  %v2377_v39 = vadd.f32 %v6871_v17, %v2341_v40 }
 0x69a   : > { %v2375_v42 = vadd.f32 %v6871_v17, %v2335_v41  ;;  %v3531_v51 = vpop.f32.mrf.mxu3 }
 0x69b   : > { %v7008_v18 = vadd.f32 %v2379_v60, %v6946_v14  ;;  %v7011_v13 = vadd.f32 %v2377_v39, %v6903_v38  ;;  %v3532_v53 = vadd.f32 %v6853_v27, %v3531_v51 }
 0x69c   : > { %v7015_v0 = vadd.f32 %v2375_v42, %v6905_v52 }
 0x69d   : > { %v3563_v62 = vmax.f32 %v3532_v53, 0.0 }
 0x69f   : > { %4610 = vmatmul.msk.f32.gmra.mxu2 %vm747_vm1, %v3563_v62 }
 0x6a0   : > { %4659 = vmatmul.msk.f32.gmra.mxu3 %vm747_vm1, %v4003_v31  ;;  %v2356_v2 = vpop.xlane.xlu1 %2355  ;;  %v2350_v24 = vpop.xlane.xlu2 %2349 }
 0x6a1   : > { %v2382_v14 = vadd.f32 %v6871_v17, %v2356_v2  ;;  %v2344_v43 = vpop.xlane.xlu0 %2343  ;;  %v2380_v38 = vadd.f32 %v6871_v17, %v2350_v24 }
 0x6a2   : > { %v2378_v61 = vadd.f32 %v6871_v17, %v2344_v43  ;;  %v3534_v52 = vpop.f32.mrf.mxu3 }
 0x6a3   : > { %v7024_v47 = vadd.f32 %v2382_v14, %v6965_v32  ;;  %v7027_v4 = vadd.f32 %v2380_v38, %v6922_v21  ;;  %v3535_v57 = vadd.f32 %v6853_v27, %v3534_v52 }
 0x6a4   : > { %v7031_v35 = vadd.f32 %v2378_v61, %v6924_v7 }
 0x6a5   : > { %v3564_v10 = vmax.f32 %v3535_v57, 0.0 }
 0x6a7   : > { %4611 = vmatmul.msk.f32.gmra.mxu2 %vm747_vm1, %v3564_v10 }
 0x6a8   : > { %4660 = vmatmul.msk.f32.gmra.mxu3 %vm747_vm1, %v4004_v48  ;;  %v2365_v37 = vpop.xlane.xlu1 %2364  ;;  %v2359_v23 = vpop.xlane.xlu2 %2358 }
 0x6a9   : > { %v2385_v32 = vadd.f32 %v6871_v17, %v2365_v37  ;;  %v2353_v36 = vpop.xlane.xlu0 %2352  ;;  %v2383_v21 = vadd.f32 %v6871_v17, %v2359_v23 }
 0x6aa   : > { %v2381_v44 = vadd.f32 %v6871_v17, %v2353_v36  ;;  %v3537_v7 = vpop.f32.mrf.mxu3 }
 0x6ab   : > { %v7040_v6 = vadd.f32 %v2385_v32, %v6983_v25  ;;  %v7043_v16 = vadd.f32 %v2383_v21, %v6941_v55  ;;  %v3538_v22 = vadd.f32 %v6853_v27, %v3537_v7  ;;  %v3983_v55 = vadd.f32 %v6853_v27, %v3982_v19 }
 0x6ac   : > { %v7047_v49 = vadd.f32 %v2381_v44, %v6943_v5  ;;  %v3985_v5 = vpop.f32.mrf.mxu1 }
 0x6ad   : > { %v3565_v33 = vmax.f32 %v3538_v22, 0.0  ;;  %v4006_v3 = vmax.f32 %v3983_v55, 0.0 }
 0x6af   : > { %4612 = vmatmul.msk.f32.gmra.mxu2 %vm747_vm1, %v3565_v33 }
 0x6b0   : > { %4661 = vmatmul.msk.f32.gmra.mxu3 %vm747_vm1, %v4005_v20  ;;  %v3022_v15 = vpop.xlane.xlu1 %3021  ;;  %v2368_v29 = vpop.xlane.xlu2 %2367 }
 0x6b1   : > { %v3068_v46 = vadd.f32 %v6871_v17, %v3022_v15  ;;  %v2362_v25 = vpop.xlane.xlu0 %2361  ;;  %v2386_v12 = vadd.f32 %v6871_v17, %v2368_v29 }
 0x6b2   : > { %v2384_v59 = vadd.f32 %v6871_v17, %v2362_v25  ;;  %v3540_v9 = vpop.f32.mrf.mxu3 }
 0x6b3   : > { %v7056_v8 = vadd.f32 %v3068_v46, %v6999_v58  ;;  %v7059_v40 = vadd.f32 %v2386_v12, %v6960_v63  ;;  %v3541_v60 = vadd.f32 %v6853_v27, %v3540_v9  ;;  %v3986_v63 = vadd.f32 %v6853_v27, %v3985_v5 }
 0x6b4   : > { %v7063_v41 = vadd.f32 %v2384_v59, %v6962_v56  ;;  %v3988_v43 = vpop.f32.mrf.mxu1  ;;  %v7532_v59 = vld [vmem:[#allocation38_spill] sm:$0xff] }
 0x6b5   : > { %v3566_v39 = vmax.f32 %v3541_v60, 0.0  ;;  %v4007_v26 = vmax.f32 %v3986_v63, 0.0  ;;  %v3989_v10 = vadd.f32 %v6853_v27, %v3988_v43 }
 0x6b7   : > { %4613 = vmatmul.msk.f32.gmra.mxu2 %vm747_vm1, %v3566_v39  ;;  %v4008_v21 = vmax.f32 %v3989_v10, 0.0 }
 0x6b8   : > { %4662 = vmatmul.msk.f32.gmra.mxu3 %vm747_vm1, %v4006_v3  ;;  %v3031_v42 = vpop.xlane.xlu1 %3030  ;;  %v3025_v51 = vpop.xlane.xlu2 %3024 }
 0x6b9   : > { %v3071_v53 = vadd.f32 %v6871_v17, %v3031_v42  ;;  %v2371_v58 = vpop.xlane.xlu0 %2370  ;;  %v3069_v62 = vadd.f32 %v6871_v17, %v3025_v51  ;;  %v7533_v51 = vld [vmem:[#allocation39_spill] sm:$0xff] }
 0x6ba   : > { %v2387_v31 = vadd.f32 %v6871_v17, %v2371_v58  ;;  %v3543_v54 = vpop.f32.mrf.mxu3 }
 0x6bb   : > { %v7072_v56 = vadd.f32 %v3071_v53, %v7015_v0  ;;  %v7075_v2 = vadd.f32 %v3069_v62, %v6978_v28  ;;  %v3544_v24 = vadd.f32 %v6853_v27, %v3543_v54  ;;  %v2974_v53 = vadd.f32 %v6794_v30, %v7533_v51  ;;  %v7537_v51 = vld [vmem:[#allocation43_spill] sm:$0xff] }
 0x6bc   : > { %v7079_v14 = vadd.f32 %v2387_v31, %v6980_v50  ;;  %v3991_v11 = vpop.f32.mrf.mxu1 }
 0x6bd   : > { %v3567_v38 = vmax.f32 %v3544_v24, 0.0  ;;  %v3992_v7 = vadd.f32 %v6853_v27, %v3991_v11  ;;  %v2999_v54 = vmax.f32 %v2974_v53, 0.0  ;;  %v7535_v11 = vld [vmem:[#allocation41_spill] sm:$0xff]  ;;  %v2986_v53 = vadd.f32 %v6794_v30, %v7537_v51 }
 0x6bf   : > { %4614 = vmatmul.msk.f32.gmra.mxu2 %vm747_vm1, %v3567_v38  ;;  %v4009_v20 = vmax.f32 %v3992_v7, 0.0 }
 0x6c0   : > { %4663 = vmatmul.msk.f32.gmra.mxu3 %vm747_vm1, %v4007_v26  ;;  %v3040_v61 = vpop.xlane.xlu1 %3039  ;;  %v3034_v52 = vpop.xlane.xlu2 %3033 }
 0x6c1   : > { %v3074_v0 = vadd.f32 %v6871_v17, %v3040_v61  ;;  %v3028_v57 = vpop.xlane.xlu0 %3027  ;;  %v3072_v28 = vadd.f32 %v6871_v17, %v3034_v52  ;;  %v7534_v61 = vld [vmem:[#allocation40_spill] sm:$0xff] }
 0x6c2   : > { %v3070_v48 = vadd.f32 %v6871_v17, %v3028_v57  ;;  %v3546_v50 = vpop.f32.mrf.mxu3  ;;  %v2977_v52 = vadd.f32 %v6794_v30, %v7534_v61  ;;  %v3015_v57 = vmul.f32 %v6787_v1, %v2999_v54 }
 0x6c3   : > { %v7088_v37 = vadd.f32 %v3074_v0, %v7031_v35  ;;  %v7091_v23 = vadd.f32 %v3072_v28, %v6992_v45  ;;  %v3547_v19 = vadd.f32 %v6853_v27, %v3546_v50 }
 0x6c4   : > { %v7095_v32 = vadd.f32 %v3070_v48, %v6995_v34  ;;  %v3000_v10 = vmax.f32 %v2977_v52, 0.0  ;;  %v3053_v48 = vsel %vm747_vm1, %v3015_v57, 0.0 }
 0x6c5   : > { %v3568_v36 = vmax.f32 %v3547_v19, 0.0 }
 0x6c7   : > { %4615 = vmatmul.msk.f32.gmra.mxu2 %vm747_vm1, %v3568_v36 }
 0x6c8   : > { %4664 = vmatmul.msk.f32.gmra.mxu3 %vm747_vm1, %v4008_v21 }
 0x6c9   : > { %v3037_v44 = vpop.xlane.xlu0 %3036 }
 0x6ca   : > { %v3073_v35 = vadd.f32 %v6871_v17, %v3037_v44  ;;  %v3549_v22 = vpop.f32.mrf.mxu3  ;;  %v2980_v44 = vadd.f32 %v6794_v30, %v7535_v11 }
 0x6cb   : > { %v3550_v45 = vadd.f32 %v6853_v27, %v3549_v22 }
 0x6cc   : > { %v7103_v33 = vadd.f32 %v3073_v35, %v7011_v13  ;;  %v2971_v13 = vadd.f32 %v6794_v30, %v7532_v59  ;;  %v3016_v35 = vmul.f32 %v6787_v1, %v3000_v10 }
 0x6cd   : > { %v3569_v34 = vmax.f32 %v3550_v45, 0.0  ;;  %v3001_v45 = vmax.f32 %v2980_v44, 0.0 }
 0x6ce   : > { %v2998_v39 = vmax.f32 %v2971_v13, 0.0 }
 0x6cf   : > { %4616 = vmatmul.msk.f32.gmra.mxu2 %vm747_vm1, %v3569_v34  ;;  %v3017_v13 = vmul.f32 %v6787_v1, %v3001_v45 }
 0x6d0   : > { %4665 = vmatmul.msk.f32.gmra.mxu3 %vm747_vm1, %v4009_v20  ;;  %v3014_v62 = vmul.f32 %v6787_v1, %v2998_v39  ;;  %v3056_v20 = vsel %vm747_vm1, %v3016_v35, 0.0 }
 0x6d2   : > { %v3050_v43 = vsel %vm747_vm1, %v3014_v62, 0.0 }
 0x6d3   : > { %v3552_v15 = vpop.f32.mrf.mxu3 }
 0x6d4   : > { %v3553_v29 = vadd.f32 %v6853_v27, %v3552_v15 }
 0x6d6   : > { %v3570_v46 = vmax.f32 %v3553_v29, 0.0 }
 0x6d8   : > { %4617 = vmatmul.msk.f32.gmra.mxu2 %vm747_vm1, %v3570_v46 }
 0x6db   : > { %v7109_v25 = vpop.f32.mrf.mxu3 }
 0x6e2   : > { %v3636_v12 = vpop.f32.mrf.mxu2 }
 0x6e3   : > { %v3637_v55 = vadd.f32 %v6794_v30, %v3636_v12  ;;  %v7114_v5 = vpop.f32.mrf.mxu3  ;;  %v7536_v12 = vld [vmem:[#allocation42_spill] sm:$0xff] }
 0x6e5   : > { %v3684_v9 = vmax.f32 %v3637_v55, 0.0  ;;  %v2983_v55 = vadd.f32 %v6794_v30, %v7536_v12 }
 0x6e7   : > { %v3700_v60 = vmul.f32 %v6787_v1, %v3684_v9 }
 0x6e9   : > { %v3716_v3 = vsel %vm747_vm1, %v3700_v60, 0.0  ;;  %v3002_v60 = vmax.f32 %v2983_v55, 0.0 }
 0x6ea   : > { %v3639_v27 = vpop.f32.mrf.mxu2  ;;  %3717 = vadd.xlane.f32.xlu2 %v3716_v3  ;;  %v3059_v3 = vsel %vm747_vm1, %v3017_v13, 0.0 }
 0x6eb   : > { %v3640_v42 = vadd.f32 %v6794_v30, %v3639_v27  ;;  %v7123_v31 = vpop.f32.mrf.mxu3  ;;  %v3018_v62 = vmul.f32 %v6787_v1, %v3002_v60 }
 0x6ed   : > { %v3685_v58 = vmax.f32 %v3640_v42, 0.0 }
 0x6ef   : > { %v3701_v63 = vmul.f32 %v6787_v1, %v3685_v58 }
 0x6f1   : > { %v3719_v24 = vsel %vm747_vm1, %v3701_v63, 0.0 }
 0x6f2   : > { %3720 = vadd.xlane.f32.xlu0 %v3719_v24  ;;  %3051 = vadd.xlane.f32.xlu2 %v3050_v43  ;;  %v3642_v38 = vpop.f32.mrf.mxu2  ;;  %v3003_v24 = vmax.f32 %v2986_v53, 0.0  ;;  %v3062_v43 = vsel %vm747_vm1, %v3018_v62, 0.0 }
 0x6f3   : > { %v3643_v26 = vadd.f32 %v6794_v30, %v3642_v38  ;;  %v7134_v19 = vpop.f32.mrf.mxu3 }
 0x6f5   : > { %v3686_v0 = vmax.f32 %v3643_v26, 0.0 }
 0x6f7   : > { %v3702_v28 = vmul.f32 %v6787_v1, %v3686_v0  ;;  %v3019_v0 = vmul.f32 %v6787_v1, %v3003_v24 }
 0x6f9   : > { %v3722_v50 = vsel %vm747_vm1, %v3702_v28, 0.0 }
 0x6fa   : > { %3054 = vadd.xlane.f32.xlu0 %v3053_v48  ;;  %v3645_v36 = vpop.f32.mrf.mxu2  ;;  %3723 = vadd.xlane.f32.xlu1 %v3722_v50  ;;  %v3065_v48 = vsel %vm747_vm1, %v3019_v0, 0.0 }
 0x6fb   : > { %v3646_v21 = vadd.f32 %v6794_v30, %v3645_v36  ;;  %v7144_v46 = vpop.f32.mrf.mxu3 }
 0x6fd   : > { %v3687_v7 = vmax.f32 %v3646_v21, 0.0 }
 0x6ff   : > { %v3703_v22 = vmul.f32 %v6787_v1, %v3687_v7 }
 0x701   : > { %v3725_v34 = vsel %vm747_vm1, %v3703_v22, 0.0 }
 0x702   : > { %v3648_v15 = vpop.f32.mrf.mxu2  ;;  %3726 = vadd.xlane.f32.xlu2 %v3725_v34  ;;  %3057 = vadd.xlane.f32.xlu1 %v3056_v20 }
 0x703   : > { %v3649_v29 = vadd.f32 %v6794_v30, %v3648_v15  ;;  %v7156_v63 = vpop.f32.mrf.mxu3 }
 0x705   : > { %v3688_v59 = vmax.f32 %v3649_v29, 0.0 }
 0x707   : > { %v3704_v9 = vmul.f32 %v6787_v1, %v3688_v59 }
 0x709   : > { %v3728_v39 = vsel %vm747_vm1, %v3704_v9, 0.0 }
 0x70a   : > { %3729 = vadd.xlane.f32.xlu0 %v3728_v39  ;;  %3060 = vadd.xlane.f32.xlu2 %v3059_v3  ;;  %v3651_v27 = vpop.f32.mrf.mxu2 }
 0x70b   : > { %v3652_v42 = vadd.f32 %v6794_v30, %v3651_v27  ;;  %v7164_v28 = vpop.f32.mrf.mxu3 }
 0x70d   : > { %v3689_v58 = vmax.f32 %v3652_v42, 0.0 }
 0x70f   : > { %v3705_v54 = vmul.f32 %v6787_v1, %v3689_v58 }
 0x711   : > { %v3731_v38 = vsel %vm747_vm1, %v3705_v54, 0.0 }
 0x712   : > { %3063 = vadd.xlane.f32.xlu0 %v3062_v43  ;;  %v3654_v26 = vpop.f32.mrf.mxu2  ;;  %3732 = vadd.xlane.f32.xlu1 %v3731_v38 }
 0x713   : > { %v3655_v61 = vadd.f32 %v6794_v30, %v3654_v26  ;;  %v7171_v7 = vpop.f32.mrf.mxu3 }
 0x715   : > { %v3690_v52 = vmax.f32 %v3655_v61, 0.0 }
 0x717   : > { %v3706_v57 = vmul.f32 %v6787_v1, %v3690_v52 }
 0x719   : > { %v3734_v10 = vsel %vm747_vm1, %v3706_v57, 0.0 }
 0x71a   : > { %v3657_v50 = vpop.f32.mrf.mxu2  ;;  %3735 = vadd.xlane.f32.xlu2 %v3734_v10  ;;  %3066 = vadd.xlane.f32.xlu1 %v3065_v48  ;;  %v4076_v48 = vadd.f32 %v6794_v30, %v7109_v25 }
 0x71b   : > { %v3658_v36 = vadd.f32 %v6794_v30, %v3657_v50  ;;  %v7177_v12 = vpop.f32.mrf.mxu3 }
 0x71d   : > { %v3691_v21 = vmax.f32 %v3658_v36, 0.0 }
 0x71f   : > { %v3707_v11 = vmul.f32 %v6787_v1, %v3691_v21  ;;  %v4123_v21 = vmax.f32 %v4076_v48, 0.0  ;;  %v4097_v48 = vadd.f32 %v6794_v30, %v7171_v7 }
 0x721   : > { %v3737_v44 = vsel %vm747_vm1, %v3707_v11, 0.0 }
 0x722   : > { %3738 = vadd.xlane.f32.xlu0 %v3737_v44  ;;  %v3660_v35 = vpop.f32.mrf.mxu2 }
 0x723   : > { %v3661_v22 = vadd.f32 %v6794_v30, %v3660_v35  ;;  %v7182_v3 = vpop.f32.mrf.mxu3 }
 0x725   : > { %v3692_v45 = vmax.f32 %v3661_v22, 0.0 }
 0x727   : > { %v3708_v34 = vmul.f32 %v6787_v1, %v3692_v45  ;;  %v7202_v45 = vpop.xlane.xlu2 %3042 }
 0x729   : > { %v3740_v20 = vsel %vm747_vm1, %v3708_v34, 0.0  ;;  %v4079_v34 = vadd.f32 %v6794_v30, %v7114_v5  ;;  %v7213_v5 = vpop.xlane.xlu0 %3045 }
 0x72a   : > { %v3663_v15 = vpop.f32.mrf.mxu2  ;;  %3741 = vadd.xlane.f32.xlu1 %v3740_v20  ;;  %v4085_v20 = vadd.f32 %v6794_v30, %v7134_v19 }
 0x72b   : > { %v3664_v29 = vadd.f32 %v6794_v30, %v3663_v15  ;;  %v7188_v54 = vpop.f32.mrf.mxu3  ;;  %v4139_v15 = vmul.f32 %v6787_v1, %v4123_v21 }
 0x72d   : > { %v3693_v55 = vmax.f32 %v3664_v29, 0.0 }
 0x72f   : > { %v3709_v59 = vmul.f32 %v6787_v1, %v3693_v55  ;;  %v4124_v55 = vmax.f32 %v4079_v34, 0.0 }
 0x731   : > { %v3743_v13 = vsel %vm747_vm1, %v3709_v59, 0.0  ;;  %v4126_v59 = vmax.f32 %v4085_v20, 0.0 }
 0x732   : > { %v3666_v9 = vpop.f32.mrf.mxu2  ;;  %3744 = vadd.xlane.f32.xlu2 %v3743_v13  ;;  %v4155_v13 = vsel %vm747_vm1, %v4139_v15, 0.0 }
 0x733   : > { %v3667_v60 = vadd.f32 %v6794_v30, %v3666_v9  ;;  %v7194_v0 = vpop.f32.mrf.mxu3  ;;  %v4142_v19 = vmul.f32 %v6787_v1, %v4126_v59 }
 0x735   : > { %v3694_v39 = vmax.f32 %v3667_v60, 0.0 }
 0x737   : > { %v3710_v27 = vmul.f32 %v6787_v1, %v3694_v39 }
 0x739   : > { %v3746_v42 = vsel %vm747_vm1, %v3710_v27, 0.0  ;;  %v4088_v27 = vadd.f32 %v6794_v30, %v7144_v46 }
 0x73a   : > { %3747 = vadd.xlane.f32.xlu0 %v3746_v42  ;;  %v3669_v51 = vpop.f32.mrf.mxu2  ;;  %v4094_v42 = vadd.f32 %v6794_v30, %v7164_v28 }
 0x73b   : > { %v3670_v53 = vadd.f32 %v6794_v30, %v3669_v51  ;;  %v4111_v22 = vpop.f32.mrf.mxu3 }
 0x73d   : > { %v3695_v58 = vmax.f32 %v3670_v53, 0.0  ;;  %v4140_v53 = vmul.f32 %v6787_v1, %v4124_v55 }
 0x73f   : > { %v3711_v62 = vmul.f32 %v6787_v1, %v3695_v58  ;;  %v4082_v58 = vadd.f32 %v6794_v30, %v7123_v31  ;;  %v4158_v46 = vsel %vm747_vm1, %v4140_v53, 0.0 }
 0x741   : > { %v3749_v24 = vsel %vm747_vm1, %v3711_v62, 0.0 }
 0x742   : > { %v3672_v43 = vpop.f32.mrf.mxu2  ;;  %3750 = vadd.xlane.f32.xlu1 %v3749_v24 }
 0x743   : > { %v3673_v38 = vadd.f32 %v6794_v30, %v3672_v43  ;;  %v4114_v62 = vpop.f32.mrf.mxu3 }
 0x745   : > { %v3696_v26 = vmax.f32 %v3673_v38, 0.0  ;;  %v4127_v38 = vmax.f32 %v4088_v27, 0.0 }
 0x747   : > { %v3712_v61 = vmul.f32 %v6787_v1, %v3696_v26  ;;  %v4129_v26 = vmax.f32 %v4094_v42, 0.0  ;;  %v4143_v31 = vmul.f32 %v6787_v1, %v4127_v38 }
 0x749   : > { %v3752_v52 = vsel %vm747_vm1, %v3712_v61, 0.0  ;;  %v4164_v61 = vsel %vm747_vm1, %v4142_v19, 0.0 }
 0x74a   : > { %v3675_v57 = vpop.f32.mrf.mxu2  ;;  %3753 = vadd.xlane.f32.xlu2 %v3752_v52  ;;  %v4125_v52 = vmax.f32 %v4082_v58, 0.0 }
 0x74b   : > { %v3676_v10 = vadd.f32 %v6794_v30, %v3675_v57  ;;  %v7229_v57 = vpop.xlane.xlu1 %3048  ;;  %v4117_v34 = vpop.f32.mrf.mxu3 }
 0x74d   : > { %v3697_v50 = vmax.f32 %v3676_v10, 0.0  ;;  %v4145_v10 = vmul.f32 %v6787_v1, %v4129_v26 }
 0x74f   : > { %v3713_v36 = vmul.f32 %v6787_v1, %v3697_v50  ;;  %v4103_v50 = vadd.f32 %v6794_v30, %v7182_v3  ;;  %v4173_v7 = vsel %vm747_vm1, %v4145_v10, 0.0  ;;  %v4167_v3 = vsel %vm747_vm1, %v4143_v31, 0.0 }
 0x751   : > { %v3755_v11 = vsel %vm747_vm1, %v3713_v36, 0.0  ;;  %v4132_v15 = vmax.f32 %v4103_v50, 0.0 }
 0x752   : > { %3756 = vadd.xlane.f32.xlu0 %v3755_v11  ;;  %v3678_v44 = vpop.f32.mrf.mxu2  ;;  %v4091_v11 = vadd.f32 %v6794_v30, %v7156_v63 }
 0x753   : > { %v3679_v35 = vadd.f32 %v6794_v30, %v3678_v44 }
 0x755   : > { %v3698_v25 = vmax.f32 %v3679_v35, 0.0  ;;  %v4141_v35 = vmul.f32 %v6787_v1, %v4125_v52 }
 0x757   : > { %v3714_v29 = vmul.f32 %v6787_v1, %v3698_v25  ;;  %v4130_v25 = vmax.f32 %v4097_v48, 0.0  ;;  %v4161_v55 = vsel %vm747_vm1, %v4141_v35, 0.0 }
 0x759   : > { %v3758_v9 = vsel %vm747_vm1, %v3714_v29, 0.0  ;;  %v4128_v29 = vmax.f32 %v4091_v11, 0.0 }
 0x75a   : > { %4156 = vadd.xlane.f32.xlu0 %v4155_v13  ;;  %3759 = vadd.xlane.f32.xlu1 %v3758_v9 }
 0x75b   : > { %v3681_v60 = vpop.f32.mrf.mxu2 }
 0x75c   : > { %v3682_v39 = vadd.f32 %v6794_v30, %v3681_v60 }
 0x75d   : > { %v7220_v51 = vpop.xlane.xlu2 %3717 }
 0x75e   : > { %v3699_v24 = vmax.f32 %v3682_v39, 0.0 }
 0x760   : > { %v3715_v43 = vmul.f32 %v6787_v1, %v3699_v24  ;;  %v4861_v1 = vld [vmem:[%s7423_s9] ss:$0 sm:$0xff] }
 0x761   : > { %v4146_v30 = vmul.f32 %v4861_v1, %v4130_v25  ;;  %v4148_v63 = vmul.f32 %v4861_v1, %v4132_v15  ;;  %v4144_v39 = vmul.f32 %v4861_v1, %v4128_v29 }
 0x762   : > { %4165 = vadd.xlane.f32.xlu0 %v4164_v61  ;;  %v3761_v28 = vsel %vm747_vm1, %v3715_v43, 0.0  ;;  %4159 = vadd.xlane.f32.xlu1 %v4158_v46 }
 0x763   : > { %3762 = vadd.xlane.f32.xlu2 %v3761_v28  ;;  %v4182_v24 = vsel %vm747_vm1, %v4148_v63, 0.0  ;;  %v4176_v43 = vsel %vm747_vm1, %v4146_v30, 0.0 }
 0x765   : > { %v7237_v36 = vpop.xlane.xlu0 %3720  ;;  %v3052_v21 = vpop.xlane.xlu2 %3051 }
 0x766   : > { %v3078_v44 = vadd.f32 %v6871_v17, %v3052_v21 }
 0x768   : > { %v7244_v20 = vadd.f32 %v3078_v44, %v7024_v47  ;;  %v4862_v47 = vld [vmem:[%s7422_s8] ss:$0 sm:$0xff] }
 0x769   : > { %v4106_v59 = vadd.f32 %v4862_v47, %v7188_v54  ;;  %v4112_v13 = vadd.f32 %v4862_v47, %v4111_v22  ;;  %v4100_v19 = vadd.f32 %v4862_v47, %v7177_v12  ;;  %v4120_v54 = vpop.f32.mrf.mxu3  ;;  %v4170_v22 = vsel %vm747_vm1, %v4144_v39, 0.0 }
 0x76a   : > { %4174 = vadd.xlane.f32.xlu0 %v4173_v7  ;;  %4168 = vadd.xlane.f32.xlu1 %v4167_v3  ;;  %v4115_v61 = vadd.f32 %v4862_v47, %v4114_v62  ;;  %v4121_v46 = vadd.f32 %v4862_v47, %v4120_v54  ;;  %v4109_v28 = vadd.f32 %v4862_v47, %v7194_v0 }
 0x76b   : > { %4162 = vadd.xlane.f32.xlu2 %v4161_v55  ;;  %v4133_v53 = vmax.f32 %v4106_v59, 0.0  ;;  %v4135_v58 = vmax.f32 %v4112_v13, 0.0  ;;  %v4131_v38 = vmax.f32 %v4100_v19, 0.0  ;;  %v4118_v7 = vadd.f32 %v4862_v47, %v4117_v34 }
 0x76c   : > { %v4136_v48 = vmax.f32 %v4115_v61, 0.0  ;;  %v4138_v50 = vmax.f32 %v4121_v46, 0.0  ;;  %v4134_v44 = vmax.f32 %v4109_v28, 0.0 }
 0x76d   : > { %v3055_v9 = vpop.xlane.xlu0 %3054  ;;  %v7256_v60 = vpop.xlane.xlu1 %3723  ;;  %v4149_v26 = vmul.f32 %v4861_v1, %v4133_v53  ;;  %v4151_v12 = vmul.f32 %v4861_v1, %v4135_v58  ;;  %v4137_v29 = vmax.f32 %v4118_v7, 0.0 }
 0x76e   : > { %v3079_v27 = vadd.f32 %v6871_v17, %v3055_v9  ;;  %v4152_v35 = vmul.f32 %v4861_v1, %v4136_v48  ;;  %v4154_v25 = vmul.f32 %v4861_v1, %v4138_v50  ;;  %v4150_v15 = vmul.f32 %v4861_v1, %v4134_v44 }
 0x76f   : > { %v4191_v21 = vsel %vm747_vm1, %v4151_v12, 0.0  ;;  %v4185_v11 = vsel %vm747_vm1, %v4149_v26, 0.0  ;;  %v4153_v63 = vmul.f32 %v4861_v1, %v4137_v29 }
 0x770   : > { %v7261_v42 = vadd.f32 %v3079_v27, %v7043_v16  ;;  %v4147_v16 = vmul.f32 %v4861_v1, %v4131_v38  ;;  %v4194_v3 = vsel %vm747_vm1, %v4152_v35, 0.0  ;;  %v4188_v55 = vsel %vm747_vm1, %v4150_v15, 0.0 }
 0x771   : > { %v4197_v9 = vsel %vm747_vm1, %v4153_v63, 0.0  ;;  %v3764_v38 = vadd.f32 %v6871_v17, %v7220_v51 }
 0x772   : > { %4183 = vadd.xlane.f32.xlu0 %v4182_v24  ;;  %4177 = vadd.xlane.f32.xlu1 %v4176_v43  ;;  %v4179_v62 = vsel %vm747_vm1, %v4147_v16, 0.0 }
 0x773   : > { %4171 = vadd.xlane.f32.xlu2 %v4170_v22  ;;  %v3780_v26 = vadd.f32 %v3764_v38, %v7056_v8 }
 0x775   : > { %v3058_v52 = vpop.xlane.xlu1 %3057  ;;  %v3727_v47 = vpop.xlane.xlu2 %3726 }
 0x776   : > { %v3080_v31 = vadd.f32 %v6871_v17, %v3058_v52  ;;  %v7306_v52 = vld [vmem:[#allocation2] ss:$0 sm:$0xff] }
 0x777   : > { %v3765_v51 = vadd.f32 %v7306_v52, %v7237_v36  ;;  %v3767_v8 = vadd.f32 %v7306_v52, %v3727_v47  ;;  %v3766_v35 = vadd.f32 %v7306_v52, %v7256_v60  ;;  %v3077_v29 = vadd.f32 %v7306_v52, %v7229_v57 }
 0x778   : > { %v7269_v10 = vadd.f32 %v3080_v31, %v7063_v41  ;;  %v4200_v41 = vsel %vm747_vm1, %v4154_v25, 0.0 }
 0x779   : > { %v3781_v28 = vadd.f32 %v3765_v51, %v7075_v2  ;;  %v3783_v31 = vadd.f32 %v3767_v8, %v7072_v56 }
 0x77a   : > { %4192 = vadd.xlane.f32.xlu0 %v4191_v21  ;;  %4186 = vadd.xlane.f32.xlu1 %v4185_v11 }
 0x77b   : > { %4180 = vadd.xlane.f32.xlu2 %v4179_v62 }
 0x77d   : > { %v3730_v0 = vpop.xlane.xlu0 %3729  ;;  %v7284_v27 = vpop.xlane.xlu2 %3060 }
 0x77e   : > { %v3768_v36 = vadd.f32 %v7306_v52, %v3730_v0 }
 0x780   : > { %v3784_v25 = vadd.f32 %v3768_v36, %v7091_v23 }
 0x782   : > { %4201 = vadd.xlane.f32.xlu0 %v4200_v41  ;;  %4195 = vadd.xlane.f32.xlu1 %v4194_v3  ;;  %v3782_v3 = vadd.f32 %v3766_v35, %v7095_v32  ;;  %v3093_v32 = vadd.f32 %v3077_v29, %v7047_v49 }
 0x783   : > { %4189 = vadd.xlane.f32.xlu2 %v4188_v55  ;;  %v3075_v55 = vadd.f32 %v7306_v52, %v7202_v45 }
 0x785   : > { %v3064_v30 = vpop.xlane.xlu0 %3063  ;;  %v3733_v34 = vpop.xlane.xlu1 %3732  ;;  %v3091_v57 = vadd.f32 %v3075_v55, %v7008_v18 }
 0x786   : > { %v3082_v59 = vadd.f32 %v6871_v17, %v3064_v30 }
 0x788   : > { %v7279_v13 = vadd.f32 %v3082_v59, %v7059_v40 }
 0x78b   : > { %4198 = vadd.xlane.f32.xlu2 %v4197_v9  ;;  %v3769_v9 = vadd.f32 %v7306_v52, %v3733_v34 }
 0x78d   : > { %v7282_v39 = vpop.xlane.xlu1 %3066  ;;  %v3736_v1 = vpop.xlane.xlu2 %3735 }
 0x78e   : > { %v3770_v62 = vadd.f32 %v7306_v52, %v3736_v1 }
 0x790   : > { %v3786_v15 = vadd.f32 %v3770_v62, %v7088_v37 }
 0x795   : > { %v3739_v19 = vpop.xlane.xlu0 %3738 }
 0x796   : > { %v3771_v37 = vadd.f32 %v7306_v52, %v3739_v19 }
 0x798   : > { %v3787_v1 = vadd.f32 %v3771_v37, %v3091_v57 }
 0x79d   : > { %v7286_v53 = vpop.xlane.xlu1 %3741 }
 0x7a5   : > { %v3745_v43 = vpop.xlane.xlu2 %3744 }
 0x7a6   : > { %v3773_v59 = vadd.f32 %v7306_v52, %v3745_v43 }
 0x7a8   : > { %v3789_v19 = vadd.f32 %v3773_v59, %v3093_v32 }
 0x7ad   : > { %v7288_v58 = vpop.xlane.xlu0 %3747 }
 0x7ae   : > { %v3774_v51 = vadd.f32 %v7306_v52, %v7288_v58 }
 0x7b5   : > { %v7290_v24 = vpop.xlane.xlu1 %3750 }
 0x7b6   : > { %v3775_v35 = vadd.f32 %v7306_v52, %v7290_v24 }
 0x7bd   : > { %v3754_v12 = vpop.xlane.xlu2 %3753 }
 0x7be   : > { %v3776_v8 = vadd.f32 %v7306_v52, %v3754_v12 }
 0x7c0   : > { %v3792_v58 = vadd.f32 %v3776_v8, %v7269_v10 }
 0x7c5   : > { %v7292_v40 = vpop.xlane.xlu0 %3756 }
 0x7c6   : > { %v3777_v10 = vadd.f32 %v7306_v52, %v7292_v40 }
 0x7cd   : > { %v4157_v54 = vpop.xlane.xlu0 %4156  ;;  %v7296_v22 = vpop.xlane.xlu1 %3759 }
 0x7ce   : > { %v4203_v61 = vadd.f32 %v6871_v17, %v4157_v54  ;;  %v3785_v54 = vadd.f32 %v3769_v9, %v7103_v33 }
 0x7d0   : > { %v4219_v46 = vadd.f32 %v4203_v61, %v3780_v26  ;;  %v3076_v61 = vadd.f32 %v7306_v52, %v7213_v5 }
 0x7d2   : > { %4236 = vst.msk [vmem:[%s7304_s23] sm:$0xff] %vm4235_vm0, %v4219_v46  ;;  %v3092_v33 = vadd.f32 %v3076_v61, %v7027_v4  ;;  %v3081_v4 = vadd.f32 %v7306_v52, %v7284_v27 }
 0x7d4   : > { %v3097_v27 = vadd.f32 %v3081_v4, %v7040_v6 }
 0x7d5   : > { %v4166_v17 = vpop.xlane.xlu0 %4165  ;;  %v4160_v16 = vpop.xlane.xlu1 %4159 }
 0x7d6   : > { %v4206_v48 = vadd.f32 %v7306_v52, %v4166_v17  ;;  %v4204_v50 = vadd.f32 %v7306_v52, %v4160_v16  ;;  %v7317_v21 = vpop.xlane.xlu2 %3762  ;;  %v3772_v17 = vadd.f32 %v7306_v52, %v7286_v53 }
 0x7d7   : > { %v3779_v62 = vadd.f32 %v7306_v52, %v7317_v21 }
 0x7d8   : > { %v4222_v11 = vadd.f32 %v4206_v48, %v3783_v31  ;;  %v4220_v44 = vadd.f32 %v4204_v50, %v3781_v28  ;;  %v3790_v28 = vadd.f32 %v3774_v51, %v7244_v20  ;;  %v3788_v48 = vadd.f32 %v3772_v17, %v3092_v33 }
 0x7da   : > { %4239 = vst.msk [vmem:[%s7304_s23 + $0x18] sm:$0xff] %vm4235_vm0, %v4222_v11  ;;  %v3083_v11 = vadd.f32 %v7306_v52, %v7282_v39 }
 0x7db   : > { %4237 = vst.msk [vmem:[%s7304_s23 + $0x8] sm:$0xff] %vm4235_vm0, %v4220_v44 }
 0x7dc   : > { %v3099_v39 = vadd.f32 %v3083_v11, %v7079_v14 }
 0x7dd   : > { %v4175_v56 = vpop.xlane.xlu0 %4174  ;;  %v4169_v2 = vpop.xlane.xlu1 %4168 }
 0x7de   : > { %v4209_v7 = vadd.f32 %v7306_v52, %v4175_v56  ;;  %v4207_v0 = vadd.f32 %v7306_v52, %v4169_v2  ;;  %v4163_v41 = vpop.xlane.xlu2 %4162  ;;  %v3793_v2 = vadd.f32 %v3777_v10, %v3097_v27  ;;  %v3795_v21 = vadd.f32 %v3779_v62, %v3099_v39 }
 0x7df   : > { %v4205_v60 = vadd.f32 %v7306_v52, %v4163_v41 }
 0x7e0   : > { %v4225_v23 = vadd.f32 %v4209_v7, %v3786_v15  ;;  %v4223_v30 = vadd.f32 %v4207_v0, %v3784_v25  ;;  %v3791_v7 = vadd.f32 %v3775_v35, %v7261_v42 }
 0x7e1   : > { %v4221_v63 = vadd.f32 %v4205_v60, %v3782_v3  ;;  %v3778_v3 = vadd.f32 %v7306_v52, %v7296_v22 }
 0x7e2   : > { %4242 = vst.msk [vmem:[%s7304_s23 + $0x30] sm:$0xff] %vm4235_vm0, %v4225_v23 }
 0x7e3   : > { %4240 = vst.msk [vmem:[%s7304_s23 + $0x20] sm:$0xff] %vm4235_vm0, %v4223_v30  ;;  %v3794_v29 = vadd.f32 %v3778_v3, %v7279_v13 }
 0x7e4   : > { %4238 = vst.msk [vmem:[%s7304_s23 + $0x10] sm:$0xff] %vm4235_vm0, %v4221_v63 }
 0x7e5   : > { %v4184_v45 = vpop.xlane.xlu0 %4183  ;;  %v4178_v47 = vpop.xlane.xlu1 %4177 }
 0x7e6   : > { %v4212_v43 = vadd.f32 %v7306_v52, %v4184_v45  ;;  %v4210_v38 = vadd.f32 %v7306_v52, %v4178_v47  ;;  %v4172_v34 = vpop.xlane.xlu2 %4171 }
 0x7e7   : > { %v4208_v49 = vadd.f32 %v7306_v52, %v4172_v34 }
 0x7e8   : > { %v4228_v26 = vadd.f32 %v4212_v43, %v3789_v19  ;;  %v4226_v18 = vadd.f32 %v4210_v38, %v3787_v1 }
 0x7e9   : > { %v4224_v46 = vadd.f32 %v4208_v49, %v3785_v54 }
 0x7ea   : > { %4245 = vst.msk [vmem:[%s7304_s23 + $0x48] sm:$0xff] %vm4235_vm0, %v4228_v26 }
 0x7eb   : > { %4243 = vst.msk [vmem:[%s7304_s23 + $0x38] sm:$0xff] %vm4235_vm0, %v4226_v18 }
 0x7ec   : > { %4241 = vst.msk [vmem:[%s7304_s23 + $0x28] sm:$0xff] %vm4235_vm0, %v4224_v46 }
 0x7ed   : > { %v4193_v16 = vpop.xlane.xlu0 %4192  ;;  %v4187_v5 = vpop.xlane.xlu1 %4186 }
 0x7ee   : > { %v4215_v12 = vadd.f32 %v7306_v52, %v4193_v16  ;;  %v4213_v31 = vadd.f32 %v7306_v52, %v4187_v5  ;;  %v4181_v53 = vpop.xlane.xlu2 %4180 }
 0x7ef   : > { %v4211_v50 = vadd.f32 %v7306_v52, %v4181_v53 }
 0x7f0   : > { %v4231_v44 = vadd.f32 %v4215_v12, %v3792_v58  ;;  %v4229_v20 = vadd.f32 %v4213_v31, %v3790_v28 }
 0x7f1   : > { %v4227_v36 = vadd.f32 %v4211_v50, %v3788_v48 }
 0x7f2   : > { %4248 = vst.msk [vmem:[%s7304_s23 + $0x60] sm:$0xff] %vm4235_vm0, %v4231_v44 }
 0x7f3   : > { %4246 = vst.msk [vmem:[%s7304_s23 + $0x50] sm:$0xff] %vm4235_vm0, %v4229_v20 }
 0x7f4   : > { %4244 = vst.msk [vmem:[%s7304_s23 + $0x40] sm:$0xff] %vm4235_vm0, %v4227_v36 }
 0x7f5   : > { %v4202_v40 = vpop.xlane.xlu0 %4201  ;;  %v4196_v56 = vpop.xlane.xlu1 %4195 }
 0x7f6   : > { %v4218_v25 = vadd.f32 %v7306_v52, %v4202_v40  ;;  %v4216_v24 = vadd.f32 %v7306_v52, %v4196_v56  ;;  %v4190_v15 = vpop.xlane.xlu2 %4189 }
 0x7f7   : > { %v4214_v6 = vadd.f32 %v7306_v52, %v4190_v15 }
 0x7f8   : > { %v4234_v0 = vadd.f32 %v4218_v25, %v3795_v21  ;;  %v4232_v14 = vadd.f32 %v4216_v24, %v3793_v2 }
 0x7f9   : > { %v4230_v41 = vadd.f32 %v4214_v6, %v3791_v7 }
 0x7fa   : > { %4251 = vst.msk [vmem:[%s7304_s23 + $0x78] sm:$0xff] %vm4235_vm0, %v4234_v0 }
 0x7fb   : > { %4249 = vst.msk [vmem:[%s7304_s23 + $0x68] sm:$0xff] %vm4235_vm0, %v4232_v14 }
 0x7fc   : > { %4247 = vst.msk [vmem:[%s7304_s23 + $0x58] sm:$0xff] %vm4235_vm0, %v4230_v41 }
 0x7fe   : > { %v4199_v60 = vpop.xlane.xlu2 %4198 }
 0x7ff   : > { %v4217_v55 = vadd.f32 %v7306_v52, %v4199_v60 }
 0x801   : > { %v4233_v42 = vadd.f32 %v4217_v55, %v3794_v29 }
 0x803   : > { %4250 = vst.msk [vmem:[%s7304_s23 + $0x70] sm:$0xff] %vm4235_vm0, %v4233_v42 }
 0x804 PF: > { %s23_s21 = sadd.s32 1, %s4886_s21   ;;  %s7538_s19 = smov %s4882_s20 }
 0x805   : > { %p20_p5 = scmp.ge.s32.totalorder %s23_s21, 4   ;;  %s7539_s20 = smov %s7541_s10 }
 0x807   :  { %22 = sbr.rel (!%p20_p5) target bundleno = 3 (0x3), region = 103 }

</bundles_post_ra>
